<compile_context>
chip_gen: v5e
topology: v5e:2x2
jax: 0.10.0
libtpu: 0.0.40
codegen_flags: <defaults>
</compile_context>

<pallas_src>
import jax
import jax.numpy as jnp
from jax.experimental import pallas as pl
from jax.experimental.pallas import tpu as pltpu


# ----------------------------------------------------------------------------
# UniRect activation with precomputed scalars:
#   lam = relu(lambda)+1e-8 ;  p = exp(inv_lam * softplus(kappa*x - log(lam),
#                                                         beta=-1, thr=20))
#   out = p * x
# ----------------------------------------------------------------------------
def _unirect(x, inv_lam, log_lam, kappa):
    nz = log_lam - kappa * x                               # = -(kappa*x - log lam)
    # torch softplus(z, beta=-1, threshold=20): -log(1+exp(-z)); linear when -z > 20
    sp = jnp.where(nz > 20.0, -nz, -jnp.log(1.0 + jnp.exp(nz)))   # keep select form
    return jnp.exp(sp * inv_lam) * x


# ----------------------------------------------------------------------------
# Fused per-image kernel
# ----------------------------------------------------------------------------
def bottleneck_kernel(scal_ref, wsp_ref,                   # SMEM scalars / 7x7 weights
                      x_ref, w1_ref, s1_ref, b1_ref,
                      w2_ref, s2_ref, b2_ref,
                      w3_ref, s3_ref, b3_ref,
                      out_ref,
                      pad2_ref, slab_ref, pad7_ref):
    _, Cin, HW = x_ref.shape
    width = w1_ref.shape[1]
    Cout = w3_ref.shape[1]
    Hp2, Wp2, _ = pad2_ref.shape
    H, W = Hp2 - 2, Wp2 - 2

    inv_l1, log_l1, kap1 = scal_ref[0], scal_ref[1], scal_ref[2]
    inv_l2, log_l2, kap2 = scal_ref[3], scal_ref[4], scal_ref[5]
    inv_l3, log_l3, kap3 = scal_ref[6], scal_ref[7], scal_ref[8]
    sp_scale, sp_bias = scal_ref[9], scal_ref[10]

    # --- conv1 (1x1) + bn1 + UniRect1 ---------------------------------------
    xf = x_ref[0].T.astype(jnp.bfloat16)                   # (H*W, Cin) bf16
    h1 = jnp.dot(xf, w1_ref[...], preferred_element_type=jnp.float32)
    h1 = h1 * s1_ref[...] + b1_ref[...]
    h1 = _unirect(h1, inv_l1, log_l1, kap1)                # (H*W, width) f32

    # --- conv2 (3x3, pad=1, stride=1) via one im2col matmul + bn2 + UniRect2
    # zero only the 1-wide halo ring; the interior is fully overwritten below
    z_row = jnp.zeros((1, Wp2, width), jnp.float32)
    pad2_ref[0:1, :, :] = z_row
    pad2_ref[H + 1:H + 2, :, :] = z_row
    z_col = jnp.zeros((H, 1, width), jnp.float32)
    pad2_ref[1:H + 1, 0:1, :] = z_col
    pad2_ref[1:H + 1, W + 1:W + 2, :] = z_col
    pad2_ref[1:H + 1, 1:W + 1, :] = h1.reshape(H, W, width)

    for dy in range(3):
        for dx in range(3):
            j = dy * 3 + dx
            patch = pad2_ref[dy:dy + H, dx:dx + W, :].reshape(H * W, width)
            slab_ref[:, j * width:(j + 1) * width] = patch.astype(jnp.bfloat16)

    h2 = jnp.dot(slab_ref[...], w2_ref[...], preferred_element_type=jnp.float32)
    h2 = h2 * s2_ref[...] + b2_ref[...]
    h2 = _unirect(h2, inv_l2, log_l2, kap2)                # (H*W, width) f32

    # --- conv3 (1x1) + bn3 ---------------------------------------------------
    h3 = jnp.dot(h2.astype(jnp.bfloat16), w3_ref[...],
                 preferred_element_type=jnp.float32)
    h3 = h3 * s3_ref[...] + b3_ref[...]
    h3_img = h3.reshape(H, W, Cout)

    # --- CBAM spatial gate: channel max/mean -> 7x7 conv -> BN -> sigmoid ----
    # TODO(synk): cbam.CBAM source is not provided; the gumbel-softmax variant
    # (use_gumbel=True) is approximated by the standard SpatialGate sigmoid.
    max_c = jnp.max(h3_img, axis=-1)                       # (H, W)
    mean_c = jnp.mean(h3_img, axis=-1)                     # (H, W)

    # zero only the 3-wide halo ring of the channel-major pooled buffer
    z_row7 = jnp.zeros((2, 3, W + 6), jnp.float32)
    pad7_ref[:, 0:3, :] = z_row7
    pad7_ref[:, H + 3:H + 6, :] = z_row7
    z_col7 = jnp.zeros((2, H, 3), jnp.float32)
    pad7_ref[:, 3:H + 3, 0:3] = z_col7
    pad7_ref[:, 3:H + 3, W + 3:W + 6] = z_col7
    pad7_ref[0:1, 3:H + 3, 3:W + 3] = max_c[None]
    pad7_ref[1:2, 3:H + 3, 3:W + 3] = mean_c[None]

    p_max = pad7_ref[0]                                    # (H+6, W+6)
    p_mean = pad7_ref[1]
    g = jnp.zeros((H, W), jnp.float32)
    for dy in range(7):
        for dx in range(7):
            j = dy * 7 + dx
            g = (g + wsp_ref[j] * p_max[dy:dy + H, dx:dx + W]
                   + wsp_ref[49 + j] * p_mean[dy:dy + H, dx:dx + W])
    gate = jax.nn.sigmoid(g * sp_scale + sp_bias)          # (H, W)

    # --- residual (identity, downsample=None) + UniRect3 ---------------------
    x_img = x_ref[0].T.reshape(H, W, Cin)                  # re-read to bound live range
    out = h3_img * gate[..., None] + x_img
    out = _unirect(out, inv_l3, log_l3, kap3)
    # lane-dense channel-major store: (Cout, H*W) with H*W in the 128-lane axis
    out_ref[0] = out.reshape(H * W, Cout).T.astype(out_ref.dtype)


# ----------------------------------------------------------------------------
# Wrapper: NCHW in / NCHW out (like the PyTorch module).  No HBM transposes:
# the kernel consumes/produces channel-major flat (N, C, H*W).
# ----------------------------------------------------------------------------
def spatial_bottleneck_gumbel(x_nchw, p):
    x = x_nchw.astype(jnp.float32)
    N, Cin, H, W = x.shape
    HW = H * W
    x_cm = x.reshape(N, Cin, HW)
    width = p['w1'].shape[1]
    Cout = p['w3'].shape[1]

    def full(shape):
        return pl.BlockSpec(shape, lambda n, s=len(shape): (0,) * s)

    grid_spec = pltpu.PrefetchScalarGridSpec(
        num_scalar_prefetch=0,
        grid=(N,),
        in_specs=[
            pl.BlockSpec(memory_space=pltpu.MemorySpace.SMEM),   # scal (11,)
            pl.BlockSpec(memory_space=pltpu.MemorySpace.SMEM),   # wsp  (98,)
            pl.BlockSpec((1, Cin, HW), lambda n: (n, 0, 0)),     # x, channel-major
            full((Cin, width)),                                  # w1 (bf16)
            full((1, width)), full((1, width)),                  # bn1 scale/bias
            full((9 * width, width)),                            # w2 im2col (bf16)
            full((1, width)), full((1, width)),                  # bn2
            full((width, Cout)),                                 # w3 (bf16)
            full((1, Cout)), full((1, Cout)),                    # bn3
        ],
        out_specs=pl.BlockSpec((1, Cout, HW), lambda n: (n, 0, 0)),
        scratch_shapes=[
            pltpu.VMEM((H + 2, W + 2, width), jnp.float32),      # 3x3 halo pad
            pltpu.VMEM((HW, 9 * width), jnp.bfloat16),           # im2col slab
            pltpu.VMEM((2, H + 6, W + 6), jnp.float32),          # 7x7 pooled pad (CM)
        ],
    )
    out = pl.pallas_call(
        bottleneck_kernel,
        out_shape=jax.ShapeDtypeStruct((N, Cout, HW), jnp.float32),
        grid_spec=grid_spec,
        compiler_params=pltpu.CompilerParams(
            dimension_semantics=("parallel",)),
    )(p['scal'], p['wsp'], x_cm, p['w1'], p['s1'], p['b1'],
      p['w2'], p['s2'], p['b2'], p['w3'], p['s3'], p['b3'])
    return out.reshape(N, Cout, H, W)


# ----------------------------------------------------------------------------
# Deterministic parameter init (shapes per the module's __init__)
# ----------------------------------------------------------------------------
def init_params(key, inplanes, planes, base_width=64, groups=1):
    width = int(planes * (base_width / 64.0)) * groups
    cout = planes * 4
    ks = jax.random.split(key, 20)

    def conv_w(k, shape, fan_in):
        return jax.random.normal(k, shape, jnp.float32) * (2.0 / fan_in) ** 0.5

    def bn(kg, kb, km, kv, c):
        gamma = jax.random.uniform(kg, (c,), minval=0.5, maxval=1.5)
        beta = 0.1 * jax.random.normal(kb, (c,))
        mean = 0.1 * jax.random.normal(km, (c,))
        var = jax.random.uniform(kv, (c,), minval=0.5, maxval=1.5)
        scale = gamma / jnp.sqrt(var + 1e-5)
        bias = beta - mean * scale
        return (scale.reshape(1, c).astype(jnp.float32),
                bias.reshape(1, c).astype(jnp.float32))

    w1 = conv_w(ks[0], (inplanes, width), inplanes).astype(jnp.bfloat16)
    w2 = conv_w(ks[1], (3, 3, width, width), 9 * width)          # [dy,dx,cin,cout]
    w2 = w2.reshape(9 * width, width).astype(jnp.bfloat16)       # im2col layout
    w3 = conv_w(ks[2], (width, cout), width).astype(jnp.bfloat16)
    wsp = conv_w(ks[3], (2, 7, 7), 2 * 49).reshape(98).astype(jnp.float32)
    s1, b1 = bn(ks[4], ks[5], ks[6], ks[7], width)
    s2, b2 = bn(ks[8], ks[9], ks[10], ks[11], width)
    s3, b3 = bn(ks[12], ks[13], ks[14], ks[15], cout)

    # UniRect (num_parameters=1): lambda ~ U(0,1), kappa ~ U(0.8,1.2)
    lam_raw = jax.random.uniform(ks[16], (3,), minval=0.0, maxval=1.0)
    kap = jax.random.uniform(ks[17], (3,), minval=0.8, maxval=1.2)
    lam = jnp.maximum(lam_raw, 0.0) + 1e-8                       # relu(lambda)+eps
    inv_lam = 1.0 / lam
    log_lam = jnp.log(lam)
    # CBAM spatial-conv BN (1 channel), folded (running mean=0, var=1)
    sp_gamma = jax.random.uniform(ks[18], (), minval=0.5, maxval=1.5)
    sp_beta = 0.1 * jax.random.normal(ks[19], ())
    sp_scale = sp_gamma / jnp.sqrt(1.0 + 1e-5)
    sp_bias = sp_beta
    scal = jnp.stack([inv_lam[0], log_lam[0], kap[0],
                      inv_lam[1], log_lam[1], kap[1],
                      inv_lam[2], log_lam[2], kap[2],
                      sp_scale, sp_bias]).astype(jnp.float32)

    return dict(w1=w1, s1=s1, b1=b1, w2=w2, s2=s2, b2=b2,
                w3=w3, s3=s3, b3=b3, wsp=wsp, scal=scal)


# ----------------------------------------------------------------------------
# Pure-JAX reference mirroring the kernel math (bf16 matmul operands, f32 accum)
# ----------------------------------------------------------------------------
def reference(x_nchw, p):
    x = jnp.transpose(x_nchw, (0, 2, 3, 1)).astype(jnp.float32)  # NHWC
    N, H, W, _ = x.shape
    s = p['scal']
    width = p['w1'].shape[1]

    def ur(v, i):
        return _unirect(v, s[3 * i + 0], s[3 * i + 1], s[3 * i + 2])

    def mm(a, w):
        return jnp.einsum('nhwc,cd->nhwd', a.astype(jnp.bfloat16), w,
                          preferred_element_type=jnp.float32)

    h1 = ur(mm(x, p['w1']) * p['s1'][0] + p['b1'][0], 0)
    w2t = p['w2'].reshape(3, 3, width, width)
    hp = jnp.pad(h1, ((0, 0), (1, 1), (1, 1), (0, 0)))
    h2 = jnp.zeros_like(h1)
    for dy in range(3):
        for dx in range(3):
            h2 = h2 + mm(hp[:, dy:dy + H, dx:dx + W, :], w2t[dy, dx])
    h2 = ur(h2 * p['s2'][0] + p['b2'][0], 1)
    h3 = mm(h2, p['w3']) * p['s3'][0] + p['b3'][0]
    wsp = p['wsp'].reshape(2, 7, 7)
    pool = jnp.stack([jnp.max(h3, -1), jnp.mean(h3, -1)], axis=-1)
    pp = jnp.pad(pool, ((0, 0), (3, 3), (3, 3), (0, 0)))
    g = jnp.zeros(h3.shape[:3], jnp.float32)
    for dy in range(7):
        for dx in range(7):
            g = g + (wsp[0, dy, dx] * pp[:, dy:dy + H, dx:dx + W, 0]
                     + wsp[1, dy, dx] * pp[:, dy:dy + H, dx:dx + W, 1])
    gate = jax.nn.sigmoid(g * s[9] + s[10])
    out = ur(h3 * gate[..., None] + x, 2)
    return jnp.transpose(out, (0, 3, 1, 2))


if __name__ == "__main__":
    key = jax.random.PRNGKey(0)
    k_x, k_p = jax.random.split(key)

    N, inplanes, planes, S = 2, 64, 16, 16        # width=16, out channels = 64
    x = jax.random.normal(k_x, (N, inplanes, S, S), jnp.float32)
    params = init_params(k_p, inplanes, planes)

    out = jax.jit(lambda v: spatial_bottleneck_gumbel(v, params))(x)
    out = jax.block_until_ready(out)

    assert out.shape == (N, planes * 4, S, S)
    assert bool(jnp.all(jnp.isfinite(out)))
    ref = reference(x, params)
    err = float(jnp.max(jnp.abs(out - ref)))
    assert bool(jnp.allclose(out, ref, atol=1e-2, rtol=1e-2)), f"max abs err {err}"
    print("KERNEL_OK")
</pallas_src>

<mosaic_0001>
module attributes {stable_mosaic.version = 11 : i64} {
  func.func @bottleneck_kernel(%arg0: i32, %arg1: memref<11xf32, #tpu.memory_space<smem>>, %arg2: memref<98xf32, #tpu.memory_space<smem>>, %arg3: memref<1x64x256xf32, #tpu.memory_space<vmem>>, %arg4: memref<64x16xbf16, #tpu.memory_space<vmem>>, %arg5: memref<1x16xf32, #tpu.memory_space<vmem>>, %arg6: memref<1x16xf32, #tpu.memory_space<vmem>>, %arg7: memref<144x16xbf16, #tpu.memory_space<vmem>>, %arg8: memref<1x16xf32, #tpu.memory_space<vmem>>, %arg9: memref<1x16xf32, #tpu.memory_space<vmem>>, %arg10: memref<16x64xbf16, #tpu.memory_space<vmem>>, %arg11: memref<1x64xf32, #tpu.memory_space<vmem>>, %arg12: memref<1x64xf32, #tpu.memory_space<vmem>>, %arg13: memref<1x64x256xf32, #tpu.memory_space<vmem>>, %arg14: memref<18x18x16xf32, #tpu.memory_space<vmem>>, %arg15: memref<256x144xbf16, #tpu.memory_space<vmem>>, %arg16: memref<2x22x22xf32, #tpu.memory_space<vmem>>) attributes {dimension_semantics = [#tpu.dimension_semantics<parallel>], iteration_bounds = array<i64: 2>, scalar_prefetch = 0 : i64, scratch_operands = 3 : i64, tpu.core_type = #tpu.core_type<tc>, window_params = [{transform_indices = @transform_0, window_bounds = array<i64: 11>}, {transform_indices = @transform_1, window_bounds = array<i64: 98>}, {transform_indices = @transform_2, window_bounds = array<i64: 1, 64, 256>}, {pipeline_mode = #tpu.pipeline_mode<synchronous>, transform_indices = @transform_3, window_bounds = array<i64: 64, 16>}, {pipeline_mode = #tpu.pipeline_mode<synchronous>, transform_indices = @transform_4, window_bounds = array<i64: 1, 16>}, {pipeline_mode = #tpu.pipeline_mode<synchronous>, transform_indices = @transform_5, window_bounds = array<i64: 1, 16>}, {pipeline_mode = #tpu.pipeline_mode<synchronous>, transform_indices = @transform_6, window_bounds = array<i64: 144, 16>}, {pipeline_mode = #tpu.pipeline_mode<synchronous>, transform_indices = @transform_7, window_bounds = array<i64: 1, 16>}, {pipeline_mode = #tpu.pipeline_mode<synchronous>, transform_indices = @transform_8, window_bounds = array<i64: 1, 16>}, {pipeline_mode = #tpu.pipeline_mode<synchronous>, transform_indices = @transform_9, window_bounds = array<i64: 16, 64>}, {pipeline_mode = #tpu.pipeline_mode<synchronous>, transform_indices = @transform_10, window_bounds = array<i64: 1, 64>}, {pipeline_mode = #tpu.pipeline_mode<synchronous>, transform_indices = @transform_11, window_bounds = array<i64: 1, 64>}, {transform_indices = @transform_12, window_bounds = array<i64: 1, 64, 256>}]} {
    %c0 = arith.constant 0 : index
    %0 = memref.load %arg1[%c0] : memref<11xf32, #tpu.memory_space<smem>>
    %c1 = arith.constant 1 : index
    %1 = memref.load %arg1[%c1] : memref<11xf32, #tpu.memory_space<smem>>
    %c2 = arith.constant 2 : index
    %2 = memref.load %arg1[%c2] : memref<11xf32, #tpu.memory_space<smem>>
    %c3 = arith.constant 3 : index
    %3 = memref.load %arg1[%c3] : memref<11xf32, #tpu.memory_space<smem>>
    %c4 = arith.constant 4 : index
    %4 = memref.load %arg1[%c4] : memref<11xf32, #tpu.memory_space<smem>>
    %c5 = arith.constant 5 : index
    %5 = memref.load %arg1[%c5] : memref<11xf32, #tpu.memory_space<smem>>
    %c6 = arith.constant 6 : index
    %6 = memref.load %arg1[%c6] : memref<11xf32, #tpu.memory_space<smem>>
    %c7 = arith.constant 7 : index
    %7 = memref.load %arg1[%c7] : memref<11xf32, #tpu.memory_space<smem>>
    %c8 = arith.constant 8 : index
    %8 = memref.load %arg1[%c8] : memref<11xf32, #tpu.memory_space<smem>>
    %c9 = arith.constant 9 : index
    %9 = memref.load %arg1[%c9] : memref<11xf32, #tpu.memory_space<smem>>
    %c10 = arith.constant 10 : index
    %10 = memref.load %arg1[%c10] : memref<11xf32, #tpu.memory_space<smem>>
    %c0_0 = arith.constant 0 : index
    %c0_1 = arith.constant 0 : index
    %c0_2 = arith.constant 0 : index
    %11 = vector.load %arg3[%c0_0, %c0_1, %c0_2] : memref<1x64x256xf32, #tpu.memory_space<vmem>>, vector<1x64x256xf32>
    %12 = vector.shape_cast %11 : vector<1x64x256xf32> to vector<64x256xf32>
    %13 = tpu.transpose %12, [1, 0] : vector<64x256xf32> -> vector<256x64xf32>
    %14 = arith.truncf %13 : vector<256x64xf32> to vector<256x64xbf16>
    %c0_3 = arith.constant 0 : index
    %c0_4 = arith.constant 0 : index
    %15 = vector.load %arg4[%c0_3, %c0_4] : memref<64x16xbf16, #tpu.memory_space<vmem>>, vector<64x16xbf16>
    %cst = arith.constant dense<0.000000e+00> : vector<256x16xf32>
    %16 = tpu.matmul %14, %15, %cst {dimension_numbers = #tpu.dot_dimension_numbers<[1], [0], [0], [1], [0, 0, 1, 1], [], []>} : vector<256x64xbf16>, vector<64x16xbf16>, vector<256x16xf32> -> vector<256x16xf32>
    %c0_5 = arith.constant 0 : index
    %c0_6 = arith.constant 0 : index
    %17 = vector.load %arg5[%c0_5, %c0_6] : memref<1x16xf32, #tpu.memory_space<vmem>>, vector<1x16xf32>
    %18 = vector.broadcast %17 : vector<1x16xf32> to vector<256x16xf32>
    %19 = arith.mulf %16, %18 : vector<256x16xf32>
    %c0_7 = arith.constant 0 : index
    %c0_8 = arith.constant 0 : index
    %20 = vector.load %arg6[%c0_7, %c0_8] : memref<1x16xf32, #tpu.memory_space<vmem>>, vector<1x16xf32>
    %21 = vector.broadcast %20 : vector<1x16xf32> to vector<256x16xf32>
    %22 = arith.addf %19, %21 : vector<256x16xf32>
    %23 = vector.broadcast %2 : f32 to vector<256x16xf32>
    %24 = arith.mulf %23, %22 : vector<256x16xf32>
    %25 = vector.broadcast %1 : f32 to vector<256x16xf32>
    %26 = arith.subf %25, %24 : vector<256x16xf32>
    %cst_9 = arith.constant 2.000000e+01 : f32
    %27 = vector.broadcast %cst_9 : f32 to vector<256x16xf32>
    %28 = arith.cmpf ogt, %26, %27 : vector<256x16xf32>
    %cst_10 = arith.constant 0.000000e+00 : f32
    %29 = vector.broadcast %cst_10 : f32 to vector<256x16xf32>
    %30 = arith.subf %29, %26 : vector<256x16xf32>
    %31 = math.exp %26 : vector<256x16xf32>
    %cst_11 = arith.constant 1.000000e+00 : f32
    %32 = vector.broadcast %cst_11 : f32 to vector<256x16xf32>
    %33 = arith.addf %32, %31 : vector<256x16xf32>
    %34 = math.log %33 : vector<256x16xf32>
    %cst_12 = arith.constant 0.000000e+00 : f32
    %35 = vector.broadcast %cst_12 : f32 to vector<256x16xf32>
    %36 = arith.subf %35, %34 : vector<256x16xf32>
    %37 = arith.select %28, %30, %36 : vector<256x16xi1>, vector<256x16xf32>
    %38 = vector.broadcast %0 : f32 to vector<256x16xf32>
    %39 = arith.mulf %37, %38 : vector<256x16xf32>
    %40 = math.exp %39 : vector<256x16xf32>
    %41 = arith.mulf %40, %22 : vector<256x16xf32>
    %cst_13 = arith.constant 0.000000e+00 : f32
    %42 = vector.broadcast %cst_13 : f32 to vector<1x18x16xf32>
    %c0_14 = arith.constant 0 : index
    %c0_15 = arith.constant 0 : index
    %c0_16 = arith.constant 0 : index
    %43 = vector.load %arg14[%c0_14, %c0_15, %c0_16] : memref<18x18x16xf32, #tpu.memory_space<vmem>>, vector<1x18x16xf32>
    tpu.vector_store %arg14[%c0_14, %c0_15, %c0_16], %42 {strides = array<i32>} : memref<18x18x16xf32, #tpu.memory_space<vmem>>, vector<1x18x16xf32>,
    %c17 = arith.constant 17 : index
    %c0_17 = arith.constant 0 : index
    %c0_18 = arith.constant 0 : index
    %44 = vector.load %arg14[%c17, %c0_17, %c0_18] : memref<18x18x16xf32, #tpu.memory_space<vmem>>, vector<1x18x16xf32>
    tpu.vector_store %arg14[%c17, %c0_17, %c0_18], %42 {strides = array<i32>} : memref<18x18x16xf32, #tpu.memory_space<vmem>>, vector<1x18x16xf32>,
    %cst_19 = arith.constant 0.000000e+00 : f32
    %45 = vector.broadcast %cst_19 : f32 to vector<16x1x16xf32>
    %c1_20 = arith.constant 1 : index
    %c0_21 = arith.constant 0 : index
    %c0_22 = arith.constant 0 : index
    %46 = vector.load %arg14[%c1_20, %c0_21, %c0_22] : memref<18x18x16xf32, #tpu.memory_space<vmem>>, vector<16x1x16xf32>
    tpu.vector_store %arg14[%c1_20, %c0_21, %c0_22], %45 {strides = array<i32>} : memref<18x18x16xf32, #tpu.memory_space<vmem>>, vector<16x1x16xf32>,
    %c1_23 = arith.constant 1 : index
    %c17_24 = arith.constant 17 : index
    %c0_25 = arith.constant 0 : index
    %47 = vector.load %arg14[%c1_23, %c17_24, %c0_25] : memref<18x18x16xf32, #tpu.memory_space<vmem>>, vector<16x1x16xf32>
    tpu.vector_store %arg14[%c1_23, %c17_24, %c0_25], %45 {strides = array<i32>} : memref<18x18x16xf32, #tpu.memory_space<vmem>>, vector<16x1x16xf32>,
    %48 = vector.shape_cast %41 : vector<256x16xf32> to vector<16x16x16xf32>
    %c1_26 = arith.constant 1 : index
    %c1_27 = arith.constant 1 : index
    %c0_28 = arith.constant 0 : index
    %49 = vector.load %arg14[%c1_26, %c1_27, %c0_28] : memref<18x18x16xf32, #tpu.memory_space<vmem>>, vector<16x16x16xf32>
    tpu.vector_store %arg14[%c1_26, %c1_27, %c0_28], %48 {strides = array<i32>} : memref<18x18x16xf32, #tpu.memory_space<vmem>>, vector<16x16x16xf32>,
    %c0_29 = arith.constant 0 : index
    %c0_30 = arith.constant 0 : index
    %c0_31 = arith.constant 0 : index
    %50 = vector.load %arg14[%c0_29, %c0_30, %c0_31] : memref<18x18x16xf32, #tpu.memory_space<vmem>>, vector<16x16x16xf32>
    %51 = vector.shape_cast %50 : vector<16x16x16xf32> to vector<256x16xf32>
    %52 = arith.truncf %51 : vector<256x16xf32> to vector<256x16xbf16>
    %c0_32 = arith.constant 0 : index
    %c0_33 = arith.constant 0 : index
    %53 = vector.load %arg15[%c0_32, %c0_33] : memref<256x144xbf16, #tpu.memory_space<vmem>>, vector<256x16xbf16>
    tpu.vector_store %arg15[%c0_32, %c0_33], %52 {strides = array<i32>} : memref<256x144xbf16, #tpu.memory_space<vmem>>, vector<256x16xbf16>,
    %c0_34 = arith.constant 0 : index
    %c1_35 = arith.constant 1 : index
    %c0_36 = arith.constant 0 : index
    %54 = vector.load %arg14[%c0_34, %c1_35, %c0_36] : memref<18x18x16xf32, #tpu.memory_space<vmem>>, vector<16x16x16xf32>
    %55 = vector.shape_cast %54 : vector<16x16x16xf32> to vector<256x16xf32>
    %56 = arith.truncf %55 : vector<256x16xf32> to vector<256x16xbf16>
    %c0_37 = arith.constant 0 : index
    %c16 = arith.constant 16 : index
    %57 = vector.load %arg15[%c0_37, %c16] : memref<256x144xbf16, #tpu.memory_space<vmem>>, vector<256x16xbf16>
    tpu.vector_store %arg15[%c0_37, %c16], %56 {strides = array<i32>} : memref<256x144xbf16, #tpu.memory_space<vmem>>, vector<256x16xbf16>,
    %c0_38 = arith.constant 0 : index
    %c2_39 = arith.constant 2 : index
    %c0_40 = arith.constant 0 : index
    %58 = vector.load %arg14[%c0_38, %c2_39, %c0_40] : memref<18x18x16xf32, #tpu.memory_space<vmem>>, vector<16x16x16xf32>
    %59 = vector.shape_cast %58 : vector<16x16x16xf32> to vector<256x16xf32>
    %60 = arith.truncf %59 : vector<256x16xf32> to vector<256x16xbf16>
    %c0_41 = arith.constant 0 : index
    %c32 = arith.constant 32 : index
    %61 = vector.load %arg15[%c0_41, %c32] : memref<256x144xbf16, #tpu.memory_space<vmem>>, vector<256x16xbf16>
    tpu.vector_store %arg15[%c0_41, %c32], %60 {strides = array<i32>} : memref<256x144xbf16, #tpu.memory_space<vmem>>, vector<256x16xbf16>,
    %c1_42 = arith.constant 1 : index
    %c0_43 = arith.constant 0 : index
    %c0_44 = arith.constant 0 : index
    %62 = vector.load %arg14[%c1_42, %c0_43, %c0_44] : memref<18x18x16xf32, #tpu.memory_space<vmem>>, vector<16x16x16xf32>
    %63 = vector.shape_cast %62 : vector<16x16x16xf32> to vector<256x16xf32>
    %64 = arith.truncf %63 : vector<256x16xf32> to vector<256x16xbf16>
    %c0_45 = arith.constant 0 : index
    %c48 = arith.constant 48 : index
    %65 = vector.load %arg15[%c0_45, %c48] : memref<256x144xbf16, #tpu.memory_space<vmem>>, vector<256x16xbf16>
    tpu.vector_store %arg15[%c0_45, %c48], %64 {strides = array<i32>} : memref<256x144xbf16, #tpu.memory_space<vmem>>, vector<256x16xbf16>,
    %c1_46 = arith.constant 1 : index
    %c1_47 = arith.constant 1 : index
    %c0_48 = arith.constant 0 : index
    %66 = vector.load %arg14[%c1_46, %c1_47, %c0_48] : memref<18x18x16xf32, #tpu.memory_space<vmem>>, vector<16x16x16xf32>
    %67 = vector.shape_cast %66 : vector<16x16x16xf32> to vector<256x16xf32>
    %68 = arith.truncf %67 : vector<256x16xf32> to vector<256x16xbf16>
    %c0_49 = arith.constant 0 : index
    %c64 = arith.constant 64 : index
    %69 = vector.load %arg15[%c0_49, %c64] : memref<256x144xbf16, #tpu.memory_space<vmem>>, vector<256x16xbf16>
    tpu.vector_store %arg15[%c0_49, %c64], %68 {strides = array<i32>} : memref<256x144xbf16, #tpu.memory_space<vmem>>, vector<256x16xbf16>,
    %c1_50 = arith.constant 1 : index
    %c2_51 = arith.constant 2 : index
    %c0_52 = arith.constant 0 : index
    %70 = vector.load %arg14[%c1_50, %c2_51, %c0_52] : memref<18x18x16xf32, #tpu.memory_space<vmem>>, vector<16x16x16xf32>
    %71 = vector.shape_cast %70 : vector<16x16x16xf32> to vector<256x16xf32>
    %72 = arith.truncf %71 : vector<256x16xf32> to vector<256x16xbf16>
    %c0_53 = arith.constant 0 : index
    %c80 = arith.constant 80 : index
    %73 = vector.load %arg15[%c0_53, %c80] : memref<256x144xbf16, #tpu.memory_space<vmem>>, vector<256x16xbf16>
    tpu.vector_store %arg15[%c0_53, %c80], %72 {strides = array<i32>} : memref<256x144xbf16, #tpu.memory_space<vmem>>, vector<256x16xbf16>,
    %c2_54 = arith.constant 2 : index
    %c0_55 = arith.constant 0 : index
    %c0_56 = arith.constant 0 : index
    %74 = vector.load %arg14[%c2_54, %c0_55, %c0_56] : memref<18x18x16xf32, #tpu.memory_space<vmem>>, vector<16x16x16xf32>
    %75 = vector.shape_cast %74 : vector<16x16x16xf32> to vector<256x16xf32>
    %76 = arith.truncf %75 : vector<256x16xf32> to vector<256x16xbf16>
    %c0_57 = arith.constant 0 : index
    %c96 = arith.constant 96 : index
    %77 = vector.load %arg15[%c0_57, %c96] : memref<256x144xbf16, #tpu.memory_space<vmem>>, vector<256x16xbf16>
    tpu.vector_store %arg15[%c0_57, %c96], %76 {strides = array<i32>} : memref<256x144xbf16, #tpu.memory_space<vmem>>, vector<256x16xbf16>,
    %c2_58 = arith.constant 2 : index
    %c1_59 = arith.constant 1 : index
    %c0_60 = arith.constant 0 : index
    %78 = vector.load %arg14[%c2_58, %c1_59, %c0_60] : memref<18x18x16xf32, #tpu.memory_space<vmem>>, vector<16x16x16xf32>
    %79 = vector.shape_cast %78 : vector<16x16x16xf32> to vector<256x16xf32>
    %80 = arith.truncf %79 : vector<256x16xf32> to vector<256x16xbf16>
    %c0_61 = arith.constant 0 : index
    %c112 = arith.constant 112 : index
    %81 = vector.load %arg15[%c0_61, %c112] : memref<256x144xbf16, #tpu.memory_space<vmem>>, vector<256x16xbf16>
    tpu.vector_store %arg15[%c0_61, %c112], %80 {strides = array<i32>} : memref<256x144xbf16, #tpu.memory_space<vmem>>, vector<256x16xbf16>,
    %c2_62 = arith.constant 2 : index
    %c2_63 = arith.constant 2 : index
    %c0_64 = arith.constant 0 : index
    %82 = vector.load %arg14[%c2_62, %c2_63, %c0_64] : memref<18x18x16xf32, #tpu.memory_space<vmem>>, vector<16x16x16xf32>
    %83 = vector.shape_cast %82 : vector<16x16x16xf32> to vector<256x16xf32>
    %84 = arith.truncf %83 : vector<256x16xf32> to vector<256x16xbf16>
    %c0_65 = arith.constant 0 : index
    %c128 = arith.constant 128 : index
    %85 = vector.load %arg15[%c0_65, %c128] : memref<256x144xbf16, #tpu.memory_space<vmem>>, vector<256x16xbf16>
    tpu.vector_store %arg15[%c0_65, %c128], %84 {strides = array<i32>} : memref<256x144xbf16, #tpu.memory_space<vmem>>, vector<256x16xbf16>,
    %c0_66 = arith.constant 0 : index
    %c0_67 = arith.constant 0 : index
    %86 = vector.load %arg15[%c0_66, %c0_67] : memref<256x144xbf16, #tpu.memory_space<vmem>>, vector<256x144xbf16>
    %c0_68 = arith.constant 0 : index
    %c0_69 = arith.constant 0 : index
    %87 = vector.load %arg7[%c0_68, %c0_69] : memref<144x16xbf16, #tpu.memory_space<vmem>>, vector<144x16xbf16>
    %cst_70 = arith.constant dense<0.000000e+00> : vector<256x16xf32>
    %88 = tpu.matmul %86, %87, %cst_70 {dimension_numbers = #tpu.dot_dimension_numbers<[1], [0], [0], [1], [0, 0, 1, 1], [], []>} : vector<256x144xbf16>, vector<144x16xbf16>, vector<256x16xf32> -> vector<256x16xf32>
    %c0_71 = arith.constant 0 : index
    %c0_72 = arith.constant 0 : index
    %89 = vector.load %arg8[%c0_71, %c0_72] : memref<1x16xf32, #tpu.memory_space<vmem>>, vector<1x16xf32>
    %90 = vector.broadcast %89 : vector<1x16xf32> to vector<256x16xf32>
    %91 = arith.mulf %88, %90 : vector<256x16xf32>
    %c0_73 = arith.constant 0 : index
    %c0_74 = arith.constant 0 : index
    %92 = vector.load %arg9[%c0_73, %c0_74] : memref<1x16xf32, #tpu.memory_space<vmem>>, vector<1x16xf32>
    %93 = vector.broadcast %92 : vector<1x16xf32> to vector<256x16xf32>
    %94 = arith.addf %91, %93 : vector<256x16xf32>
    %95 = vector.broadcast %5 : f32 to vector<256x16xf32>
    %96 = arith.mulf %95, %94 : vector<256x16xf32>
    %97 = vector.broadcast %4 : f32 to vector<256x16xf32>
    %98 = arith.subf %97, %96 : vector<256x16xf32>
    %cst_75 = arith.constant 2.000000e+01 : f32
    %99 = vector.broadcast %cst_75 : f32 to vector<256x16xf32>
    %100 = arith.cmpf ogt, %98, %99 : vector<256x16xf32>
    %cst_76 = arith.constant 0.000000e+00 : f32
    %101 = vector.broadcast %cst_76 : f32 to vector<256x16xf32>
    %102 = arith.subf %101, %98 : vector<256x16xf32>
    %103 = math.exp %98 : vector<256x16xf32>
    %cst_77 = arith.constant 1.000000e+00 : f32
    %104 = vector.broadcast %cst_77 : f32 to vector<256x16xf32>
    %105 = arith.addf %104, %103 : vector<256x16xf32>
    %106 = math.log %105 : vector<256x16xf32>
    %cst_78 = arith.constant 0.000000e+00 : f32
    %107 = vector.broadcast %cst_78 : f32 to vector<256x16xf32>
    %108 = arith.subf %107, %106 : vector<256x16xf32>
    %109 = arith.select %100, %102, %108 : vector<256x16xi1>, vector<256x16xf32>
    %110 = vector.broadcast %3 : f32 to vector<256x16xf32>
    %111 = arith.mulf %109, %110 : vector<256x16xf32>
    %112 = math.exp %111 : vector<256x16xf32>
    %113 = arith.mulf %112, %94 : vector<256x16xf32>
    %114 = arith.truncf %113 : vector<256x16xf32> to vector<256x16xbf16>
    %c0_79 = arith.constant 0 : index
    %c0_80 = arith.constant 0 : index
    %115 = vector.load %arg10[%c0_79, %c0_80] : memref<16x64xbf16, #tpu.memory_space<vmem>>, vector<16x64xbf16>
    %cst_81 = arith.constant dense<0.000000e+00> : vector<256x64xf32>
    %116 = tpu.matmul %114, %115, %cst_81 {dimension_numbers = #tpu.dot_dimension_numbers<[1], [0], [0], [1], [0, 0, 1, 1], [], []>} : vector<256x16xbf16>, vector<16x64xbf16>, vector<256x64xf32> -> vector<256x64xf32>
    %c0_82 = arith.constant 0 : index
    %c0_83 = arith.constant 0 : index
    %117 = vector.load %arg11[%c0_82, %c0_83] : memref<1x64xf32, #tpu.memory_space<vmem>>, vector<1x64xf32>
    %118 = vector.broadcast %117 : vector<1x64xf32> to vector<256x64xf32>
    %119 = arith.mulf %116, %118 : vector<256x64xf32>
    %c0_84 = arith.constant 0 : index
    %c0_85 = arith.constant 0 : index
    %120 = vector.load %arg12[%c0_84, %c0_85] : memref<1x64xf32, #tpu.memory_space<vmem>>, vector<1x64xf32>
    %121 = vector.broadcast %120 : vector<1x64xf32> to vector<256x64xf32>
    %122 = arith.addf %119, %121 : vector<256x64xf32>
    %123 = vector.shape_cast %122 : vector<256x64xf32> to vector<16x16x64xf32>
    %cst_86 = arith.constant dense<0xFF800000> : vector<16x16xf32>
    %124 = vector.multi_reduction <maximumf>, %123, %cst_86 [2] : vector<16x16x64xf32> to vector<16x16xf32>
    %cst_87 = arith.constant dense<0.000000e+00> : vector<16x16xf32>
    %125 = vector.multi_reduction <add>, %123, %cst_87 [2] : vector<16x16x64xf32> to vector<16x16xf32>
    %cst_88 = arith.constant 6.400000e+01 : f32
    %126 = vector.broadcast %cst_88 : f32 to vector<16x16xf32>
    %127 = arith.divf %125, %126 : vector<16x16xf32>
    %cst_89 = arith.constant 0.000000e+00 : f32
    %128 = vector.broadcast %cst_89 : f32 to vector<2x3x22xf32>
    %c0_90 = arith.constant 0 : index
    %c0_91 = arith.constant 0 : index
    %c0_92 = arith.constant 0 : index
    %129 = vector.load %arg16[%c0_90, %c0_91, %c0_92] : memref<2x22x22xf32, #tpu.memory_space<vmem>>, vector<2x3x22xf32>
    tpu.vector_store %arg16[%c0_90, %c0_91, %c0_92], %128 {strides = array<i32>} : memref<2x22x22xf32, #tpu.memory_space<vmem>>, vector<2x3x22xf32>,
    %c0_93 = arith.constant 0 : index
    %c19 = arith.constant 19 : index
    %c0_94 = arith.constant 0 : index
    %130 = vector.load %arg16[%c0_93, %c19, %c0_94] : memref<2x22x22xf32, #tpu.memory_space<vmem>>, vector<2x3x22xf32>
    tpu.vector_store %arg16[%c0_93, %c19, %c0_94], %128 {strides = array<i32>} : memref<2x22x22xf32, #tpu.memory_space<vmem>>, vector<2x3x22xf32>,
    %cst_95 = arith.constant 0.000000e+00 : f32
    %131 = vector.broadcast %cst_95 : f32 to vector<2x16x3xf32>
    %c0_96 = arith.constant 0 : index
    %c3_97 = arith.constant 3 : index
    %c0_98 = arith.constant 0 : index
    %132 = vector.load %arg16[%c0_96, %c3_97, %c0_98] : memref<2x22x22xf32, #tpu.memory_space<vmem>>, vector<2x16x3xf32>
    tpu.vector_store %arg16[%c0_96, %c3_97, %c0_98], %131 {strides = array<i32>} : memref<2x22x22xf32, #tpu.memory_space<vmem>>, vector<2x16x3xf32>,
    %c0_99 = arith.constant 0 : index
    %c3_100 = arith.constant 3 : index
    %c19_101 = arith.constant 19 : index
    %133 = vector.load %arg16[%c0_99, %c3_100, %c19_101] : memref<2x22x22xf32, #tpu.memory_space<vmem>>, vector<2x16x3xf32>
    tpu.vector_store %arg16[%c0_99, %c3_100, %c19_101], %131 {strides = array<i32>} : memref<2x22x22xf32, #tpu.memory_space<vmem>>, vector<2x16x3xf32>,
    %134 = vector.shape_cast %124 : vector<16x16xf32> to vector<1x16x16xf32>
    %c0_102 = arith.constant 0 : index
    %c3_103 = arith.constant 3 : index
    %c3_104 = arith.constant 3 : index
    %135 = vector.load %arg16[%c0_102, %c3_103, %c3_104] : memref<2x22x22xf32, #tpu.memory_space<vmem>>, vector<1x16x16xf32>
    tpu.vector_store %arg16[%c0_102, %c3_103, %c3_104], %134 {strides = array<i32>} : memref<2x22x22xf32, #tpu.memory_space<vmem>>, vector<1x16x16xf32>,
    %136 = vector.shape_cast %127 : vector<16x16xf32> to vector<1x16x16xf32>
    %c1_105 = arith.constant 1 : index
    %c3_106 = arith.constant 3 : index
    %c3_107 = arith.constant 3 : index
    %137 = vector.load %arg16[%c1_105, %c3_106, %c3_107] : memref<2x22x22xf32, #tpu.memory_space<vmem>>, vector<1x16x16xf32>
    tpu.vector_store %arg16[%c1_105, %c3_106, %c3_107], %136 {strides = array<i32>} : memref<2x22x22xf32, #tpu.memory_space<vmem>>, vector<1x16x16xf32>,
    %c0_108 = arith.constant 0 : index
    %c0_109 = arith.constant 0 : index
    %c0_110 = arith.constant 0 : index
    %138 = vector.load %arg16[%c0_108, %c0_109, %c0_110] : memref<2x22x22xf32, #tpu.memory_space<vmem>>, vector<1x22x22xf32>
    %139 = vector.shape_cast %138 : vector<1x22x22xf32> to vector<22x22xf32>
    %c1_111 = arith.constant 1 : index
    %c0_112 = arith.constant 0 : index
    %c0_113 = arith.constant 0 : index
    %140 = vector.load %arg16[%c1_111, %c0_112, %c0_113] : memref<2x22x22xf32, #tpu.memory_space<vmem>>, vector<1x22x22xf32>
    %141 = vector.shape_cast %140 : vector<1x22x22xf32> to vector<22x22xf32>
    %cst_114 = arith.constant 0.000000e+00 : f32
    %142 = vector.broadcast %cst_114 : f32 to vector<16x16xf32>
    %c0_115 = arith.constant 0 : index
    %143 = memref.load %arg2[%c0_115] : memref<98xf32, #tpu.memory_space<smem>>
    %144 = vector.extract_strided_slice %139 {offsets = [0, 0], sizes = [16, 16], strides = [1, 1]} : vector<22x22xf32> to vector<16x16xf32>
    %145 = vector.broadcast %143 : f32 to vector<16x16xf32>
    %146 = arith.mulf %145, %144 : vector<16x16xf32>
    %147 = arith.addf %142, %146 : vector<16x16xf32>
    %c49 = arith.constant 49 : index
    %148 = memref.load %arg2[%c49] : memref<98xf32, #tpu.memory_space<smem>>
    %149 = vector.extract_strided_slice %141 {offsets = [0, 0], sizes = [16, 16], strides = [1, 1]} : vector<22x22xf32> to vector<16x16xf32>
    %150 = vector.broadcast %148 : f32 to vector<16x16xf32>
    %151 = arith.mulf %150, %149 : vector<16x16xf32>
    %152 = arith.addf %147, %151 : vector<16x16xf32>
    %c1_116 = arith.constant 1 : index
    %153 = memref.load %arg2[%c1_116] : memref<98xf32, #tpu.memory_space<smem>>
    %154 = vector.extract_strided_slice %139 {offsets = [0, 1], sizes = [16, 16], strides = [1, 1]} : vector<22x22xf32> to vector<16x16xf32>
    %155 = vector.broadcast %153 : f32 to vector<16x16xf32>
    %156 = arith.mulf %155, %154 : vector<16x16xf32>
    %157 = arith.addf %152, %156 : vector<16x16xf32>
    %c50 = arith.constant 50 : index
    %158 = memref.load %arg2[%c50] : memref<98xf32, #tpu.memory_space<smem>>
    %159 = vector.extract_strided_slice %141 {offsets = [0, 1], sizes = [16, 16], strides = [1, 1]} : vector<22x22xf32> to vector<16x16xf32>
    %160 = vector.broadcast %158 : f32 to vector<16x16xf32>
    %161 = arith.mulf %160, %159 : vector<16x16xf32>
    %162 = arith.addf %157, %161 : vector<16x16xf32>
    %c2_117 = arith.constant 2 : index
    %163 = memref.load %arg2[%c2_117] : memref<98xf32, #tpu.memory_space<smem>>
    %164 = vector.extract_strided_slice %139 {offsets = [0, 2], sizes = [16, 16], strides = [1, 1]} : vector<22x22xf32> to vector<16x16xf32>
    %165 = vector.broadcast %163 : f32 to vector<16x16xf32>
    %166 = arith.mulf %165, %164 : vector<16x16xf32>
    %167 = arith.addf %162, %166 : vector<16x16xf32>
    %c51 = arith.constant 51 : index
    %168 = memref.load %arg2[%c51] : memref<98xf32, #tpu.memory_space<smem>>
    %169 = vector.extract_strided_slice %141 {offsets = [0, 2], sizes = [16, 16], strides = [1, 1]} : vector<22x22xf32> to vector<16x16xf32>
    %170 = vector.broadcast %168 : f32 to vector<16x16xf32>
    %171 = arith.mulf %170, %169 : vector<16x16xf32>
    %172 = arith.addf %167, %171 : vector<16x16xf32>
    %c3_118 = arith.constant 3 : index
    %173 = memref.load %arg2[%c3_118] : memref<98xf32, #tpu.memory_space<smem>>
    %174 = vector.extract_strided_slice %139 {offsets = [0, 3], sizes = [16, 16], strides = [1, 1]} : vector<22x22xf32> to vector<16x16xf32>
    %175 = vector.broadcast %173 : f32 to vector<16x16xf32>
    %176 = arith.mulf %175, %174 : vector<16x16xf32>
    %177 = arith.addf %172, %176 : vector<16x16xf32>
    %c52 = arith.constant 52 : index
    %178 = memref.load %arg2[%c52] : memref<98xf32, #tpu.memory_space<smem>>
    %179 = vector.extract_strided_slice %141 {offsets = [0, 3], sizes = [16, 16], strides = [1, 1]} : vector<22x22xf32> to vector<16x16xf32>
    %180 = vector.broadcast %178 : f32 to vector<16x16xf32>
    %181 = arith.mulf %180, %179 : vector<16x16xf32>
    %182 = arith.addf %177, %181 : vector<16x16xf32>
    %c4_119 = arith.constant 4 : index
    %183 = memref.load %arg2[%c4_119] : memref<98xf32, #tpu.memory_space<smem>>
    %184 = vector.extract_strided_slice %139 {offsets = [0, 4], sizes = [16, 16], strides = [1, 1]} : vector<22x22xf32> to vector<16x16xf32>
    %185 = vector.broadcast %183 : f32 to vector<16x16xf32>
    %186 = arith.mulf %185, %184 : vector<16x16xf32>
    %187 = arith.addf %182, %186 : vector<16x16xf32>
    %c53 = arith.constant 53 : index
    %188 = memref.load %arg2[%c53] : memref<98xf32, #tpu.memory_space<smem>>
    %189 = vector.extract_strided_slice %141 {offsets = [0, 4], sizes = [16, 16], strides = [1, 1]} : vector<22x22xf32> to vector<16x16xf32>
    %190 = vector.broadcast %188 : f32 to vector<16x16xf32>
    %191 = arith.mulf %190, %189 : vector<16x16xf32>
    %192 = arith.addf %187, %191 : vector<16x16xf32>
    %c5_120 = arith.constant 5 : index
    %193 = memref.load %arg2[%c5_120] : memref<98xf32, #tpu.memory_space<smem>>
    %194 = vector.extract_strided_slice %139 {offsets = [0, 5], sizes = [16, 16], strides = [1, 1]} : vector<22x22xf32> to vector<16x16xf32>
    %195 = vector.broadcast %193 : f32 to vector<16x16xf32>
    %196 = arith.mulf %195, %194 : vector<16x16xf32>
    %197 = arith.addf %192, %196 : vector<16x16xf32>
    %c54 = arith.constant 54 : index
    %198 = memref.load %arg2[%c54] : memref<98xf32, #tpu.memory_space<smem>>
    %199 = vector.extract_strided_slice %141 {offsets = [0, 5], sizes = [16, 16], strides = [1, 1]} : vector<22x22xf32> to vector<16x16xf32>
    %200 = vector.broadcast %198 : f32 to vector<16x16xf32>
    %201 = arith.mulf %200, %199 : vector<16x16xf32>
    %202 = arith.addf %197, %201 : vector<16x16xf32>
    %c6_121 = arith.constant 6 : index
    %203 = memref.load %arg2[%c6_121] : memref<98xf32, #tpu.memory_space<smem>>
    %204 = vector.extract_strided_slice %139 {offsets = [0, 6], sizes = [16, 16], strides = [1, 1]} : vector<22x22xf32> to vector<16x16xf32>
    %205 = vector.broadcast %203 : f32 to vector<16x16xf32>
    %206 = arith.mulf %205, %204 : vector<16x16xf32>
    %207 = arith.addf %202, %206 : vector<16x16xf32>
    %c55 = arith.constant 55 : index
    %208 = memref.load %arg2[%c55] : memref<98xf32, #tpu.memory_space<smem>>
    %209 = vector.extract_strided_slice %141 {offsets = [0, 6], sizes = [16, 16], strides = [1, 1]} : vector<22x22xf32> to vector<16x16xf32>
    %210 = vector.broadcast %208 : f32 to vector<16x16xf32>
    %211 = arith.mulf %210, %209 : vector<16x16xf32>
    %212 = arith.addf %207, %211 : vector<16x16xf32>
    %c7_122 = arith.constant 7 : index
    %213 = memref.load %arg2[%c7_122] : memref<98xf32, #tpu.memory_space<smem>>
    %214 = vector.extract_strided_slice %139 {offsets = [1, 0], sizes = [16, 16], strides = [1, 1]} : vector<22x22xf32> to vector<16x16xf32>
    %215 = vector.broadcast %213 : f32 to vector<16x16xf32>
    %216 = arith.mulf %215, %214 : vector<16x16xf32>
    %217 = arith.addf %212, %216 : vector<16x16xf32>
    %c56 = arith.constant 56 : index
    %218 = memref.load %arg2[%c56] : memref<98xf32, #tpu.memory_space<smem>>
    %219 = vector.extract_strided_slice %141 {offsets = [1, 0], sizes = [16, 16], strides = [1, 1]} : vector<22x22xf32> to vector<16x16xf32>
    %220 = vector.broadcast %218 : f32 to vector<16x16xf32>
    %221 = arith.mulf %220, %219 : vector<16x16xf32>
    %222 = arith.addf %217, %221 : vector<16x16xf32>
    %c8_123 = arith.constant 8 : index
    %223 = memref.load %arg2[%c8_123] : memref<98xf32, #tpu.memory_space<smem>>
    %224 = vector.extract_strided_slice %139 {offsets = [1, 1], sizes = [16, 16], strides = [1, 1]} : vector<22x22xf32> to vector<16x16xf32>
    %225 = vector.broadcast %223 : f32 to vector<16x16xf32>
    %226 = arith.mulf %225, %224 : vector<16x16xf32>
    %227 = arith.addf %222, %226 : vector<16x16xf32>
    %c57 = arith.constant 57 : index
    %228 = memref.load %arg2[%c57] : memref<98xf32, #tpu.memory_space<smem>>
    %229 = vector.extract_strided_slice %141 {offsets = [1, 1], sizes = [16, 16], strides = [1, 1]} : vector<22x22xf32> to vector<16x16xf32>
    %230 = vector.broadcast %228 : f32 to vector<16x16xf32>
    %231 = arith.mulf %230, %229 : vector<16x16xf32>
    %232 = arith.addf %227, %231 : vector<16x16xf32>
    %c9_124 = arith.constant 9 : index
    %233 = memref.load %arg2[%c9_124] : memref<98xf32, #tpu.memory_space<smem>>
    %234 = vector.extract_strided_slice %139 {offsets = [1, 2], sizes = [16, 16], strides = [1, 1]} : vector<22x22xf32> to vector<16x16xf32>
    %235 = vector.broadcast %233 : f32 to vector<16x16xf32>
    %236 = arith.mulf %235, %234 : vector<16x16xf32>
    %237 = arith.addf %232, %236 : vector<16x16xf32>
    %c58 = arith.constant 58 : index
    %238 = memref.load %arg2[%c58] : memref<98xf32, #tpu.memory_space<smem>>
    %239 = vector.extract_strided_slice %141 {offsets = [1, 2], sizes = [16, 16], strides = [1, 1]} : vector<22x22xf32> to vector<16x16xf32>
    %240 = vector.broadcast %238 : f32 to vector<16x16xf32>
    %241 = arith.mulf %240, %239 : vector<16x16xf32>
    %242 = arith.addf %237, %241 : vector<16x16xf32>
    %c10_125 = arith.constant 10 : index
    %243 = memref.load %arg2[%c10_125] : memref<98xf32, #tpu.memory_space<smem>>
    %244 = vector.extract_strided_slice %139 {offsets = [1, 3], sizes = [16, 16], strides = [1, 1]} : vector<22x22xf32> to vector<16x16xf32>
    %245 = vector.broadcast %243 : f32 to vector<16x16xf32>
    %246 = arith.mulf %245, %244 : vector<16x16xf32>
    %247 = arith.addf %242, %246 : vector<16x16xf32>
    %c59 = arith.constant 59 : index
    %248 = memref.load %arg2[%c59] : memref<98xf32, #tpu.memory_space<smem>>
    %249 = vector.extract_strided_slice %141 {offsets = [1, 3], sizes = [16, 16], strides = [1, 1]} : vector<22x22xf32> to vector<16x16xf32>
    %250 = vector.broadcast %248 : f32 to vector<16x16xf32>
    %251 = arith.mulf %250, %249 : vector<16x16xf32>
    %252 = arith.addf %247, %251 : vector<16x16xf32>
    %c11 = arith.constant 11 : index
    %253 = memref.load %arg2[%c11] : memref<98xf32, #tpu.memory_space<smem>>
    %254 = vector.extract_strided_slice %139 {offsets = [1, 4], sizes = [16, 16], strides = [1, 1]} : vector<22x22xf32> to vector<16x16xf32>
    %255 = vector.broadcast %253 : f32 to vector<16x16xf32>
    %256 = arith.mulf %255, %254 : vector<16x16xf32>
    %257 = arith.addf %252, %256 : vector<16x16xf32>
    %c60 = arith.constant 60 : index
    %258 = memref.load %arg2[%c60] : memref<98xf32, #tpu.memory_space<smem>>
    %259 = vector.extract_strided_slice %141 {offsets = [1, 4], sizes = [16, 16], strides = [1, 1]} : vector<22x22xf32> to vector<16x16xf32>
    %260 = vector.broadcast %258 : f32 to vector<16x16xf32>
    %261 = arith.mulf %260, %259 : vector<16x16xf32>
    %262 = arith.addf %257, %261 : vector<16x16xf32>
    %c12 = arith.constant 12 : index
    %263 = memref.load %arg2[%c12] : memref<98xf32, #tpu.memory_space<smem>>
    %264 = vector.extract_strided_slice %139 {offsets = [1, 5], sizes = [16, 16], strides = [1, 1]} : vector<22x22xf32> to vector<16x16xf32>
    %265 = vector.broadcast %263 : f32 to vector<16x16xf32>
    %266 = arith.mulf %265, %264 : vector<16x16xf32>
    %267 = arith.addf %262, %266 : vector<16x16xf32>
    %c61 = arith.constant 61 : index
    %268 = memref.load %arg2[%c61] : memref<98xf32, #tpu.memory_space<smem>>
    %269 = vector.extract_strided_slice %141 {offsets = [1, 5], sizes = [16, 16], strides = [1, 1]} : vector<22x22xf32> to vector<16x16xf32>
    %270 = vector.broadcast %268 : f32 to vector<16x16xf32>
    %271 = arith.mulf %270, %269 : vector<16x16xf32>
    %272 = arith.addf %267, %271 : vector<16x16xf32>
    %c13 = arith.constant 13 : index
    %273 = memref.load %arg2[%c13] : memref<98xf32, #tpu.memory_space<smem>>
    %274 = vector.extract_strided_slice %139 {offsets = [1, 6], sizes = [16, 16], strides = [1, 1]} : vector<22x22xf32> to vector<16x16xf32>
    %275 = vector.broadcast %273 : f32 to vector<16x16xf32>
    %276 = arith.mulf %275, %274 : vector<16x16xf32>
    %277 = arith.addf %272, %276 : vector<16x16xf32>
    %c62 = arith.constant 62 : index
    %278 = memref.load %arg2[%c62] : memref<98xf32, #tpu.memory_space<smem>>
    %279 = vector.extract_strided_slice %141 {offsets = [1, 6], sizes = [16, 16], strides = [1, 1]} : vector<22x22xf32> to vector<16x16xf32>
    %280 = vector.broadcast %278 : f32 to vector<16x16xf32>
    %281 = arith.mulf %280, %279 : vector<16x16xf32>
    %282 = arith.addf %277, %281 : vector<16x16xf32>
    %c14 = arith.constant 14 : index
    %283 = memref.load %arg2[%c14] : memref<98xf32, #tpu.memory_space<smem>>
    %284 = vector.extract_strided_slice %139 {offsets = [2, 0], sizes = [16, 16], strides = [1, 1]} : vector<22x22xf32> to vector<16x16xf32>
    %285 = vector.broadcast %283 : f32 to vector<16x16xf32>
    %286 = arith.mulf %285, %284 : vector<16x16xf32>
    %287 = arith.addf %282, %286 : vector<16x16xf32>
    %c63 = arith.constant 63 : index
    %288 = memref.load %arg2[%c63] : memref<98xf32, #tpu.memory_space<smem>>
    %289 = vector.extract_strided_slice %141 {offsets = [2, 0], sizes = [16, 16], strides = [1, 1]} : vector<22x22xf32> to vector<16x16xf32>
    %290 = vector.broadcast %288 : f32 to vector<16x16xf32>
    %291 = arith.mulf %290, %289 : vector<16x16xf32>
    %292 = arith.addf %287, %291 : vector<16x16xf32>
    %c15 = arith.constant 15 : index
    %293 = memref.load %arg2[%c15] : memref<98xf32, #tpu.memory_space<smem>>
    %294 = vector.extract_strided_slice %139 {offsets = [2, 1], sizes = [16, 16], strides = [1, 1]} : vector<22x22xf32> to vector<16x16xf32>
    %295 = vector.broadcast %293 : f32 to vector<16x16xf32>
    %296 = arith.mulf %295, %294 : vector<16x16xf32>
    %297 = arith.addf %292, %296 : vector<16x16xf32>
    %c64_126 = arith.constant 64 : index
    %298 = memref.load %arg2[%c64_126] : memref<98xf32, #tpu.memory_space<smem>>
    %299 = vector.extract_strided_slice %141 {offsets = [2, 1], sizes = [16, 16], strides = [1, 1]} : vector<22x22xf32> to vector<16x16xf32>
    %300 = vector.broadcast %298 : f32 to vector<16x16xf32>
    %301 = arith.mulf %300, %299 : vector<16x16xf32>
    %302 = arith.addf %297, %301 : vector<16x16xf32>
    %c16_127 = arith.constant 16 : index
    %303 = memref.load %arg2[%c16_127] : memref<98xf32, #tpu.memory_space<smem>>
    %304 = vector.extract_strided_slice %139 {offsets = [2, 2], sizes = [16, 16], strides = [1, 1]} : vector<22x22xf32> to vector<16x16xf32>
    %305 = vector.broadcast %303 : f32 to vector<16x16xf32>
    %306 = arith.mulf %305, %304 : vector<16x16xf32>
    %307 = arith.addf %302, %306 : vector<16x16xf32>
    %c65 = arith.constant 65 : index
    %308 = memref.load %arg2[%c65] : memref<98xf32, #tpu.memory_space<smem>>
    %309 = vector.extract_strided_slice %141 {offsets = [2, 2], sizes = [16, 16], strides = [1, 1]} : vector<22x22xf32> to vector<16x16xf32>
    %310 = vector.broadcast %308 : f32 to vector<16x16xf32>
    %311 = arith.mulf %310, %309 : vector<16x16xf32>
    %312 = arith.addf %307, %311 : vector<16x16xf32>
    %c17_128 = arith.constant 17 : index
    %313 = memref.load %arg2[%c17_128] : memref<98xf32, #tpu.memory_space<smem>>
    %314 = vector.extract_strided_slice %139 {offsets = [2, 3], sizes = [16, 16], strides = [1, 1]} : vector<22x22xf32> to vector<16x16xf32>
    %315 = vector.broadcast %313 : f32 to vector<16x16xf32>
    %316 = arith.mulf %315, %314 : vector<16x16xf32>
    %317 = arith.addf %312, %316 : vector<16x16xf32>
    %c66 = arith.constant 66 : index
    %318 = memref.load %arg2[%c66] : memref<98xf32, #tpu.memory_space<smem>>
    %319 = vector.extract_strided_slice %141 {offsets = [2, 3], sizes = [16, 16], strides = [1, 1]} : vector<22x22xf32> to vector<16x16xf32>
    %320 = vector.broadcast %318 : f32 to vector<16x16xf32>
    %321 = arith.mulf %320, %319 : vector<16x16xf32>
    %322 = arith.addf %317, %321 : vector<16x16xf32>
    %c18 = arith.constant 18 : index
    %323 = memref.load %arg2[%c18] : memref<98xf32, #tpu.memory_space<smem>>
    %324 = vector.extract_strided_slice %139 {offsets = [2, 4], sizes = [16, 16], strides = [1, 1]} : vector<22x22xf32> to vector<16x16xf32>
    %325 = vector.broadcast %323 : f32 to vector<16x16xf32>
    %326 = arith.mulf %325, %324 : vector<16x16xf32>
    %327 = arith.addf %322, %326 : vector<16x16xf32>
    %c67 = arith.constant 67 : index
    %328 = memref.load %arg2[%c67] : memref<98xf32, #tpu.memory_space<smem>>
    %329 = vector.extract_strided_slice %141 {offsets = [2, 4], sizes = [16, 16], strides = [1, 1]} : vector<22x22xf32> to vector<16x16xf32>
    %330 = vector.broadcast %328 : f32 to vector<16x16xf32>
    %331 = arith.mulf %330, %329 : vector<16x16xf32>
    %332 = arith.addf %327, %331 : vector<16x16xf32>
    %c19_129 = arith.constant 19 : index
    %333 = memref.load %arg2[%c19_129] : memref<98xf32, #tpu.memory_space<smem>>
    %334 = vector.extract_strided_slice %139 {offsets = [2, 5], sizes = [16, 16], strides = [1, 1]} : vector<22x22xf32> to vector<16x16xf32>
    %335 = vector.broadcast %333 : f32 to vector<16x16xf32>
    %336 = arith.mulf %335, %334 : vector<16x16xf32>
    %337 = arith.addf %332, %336 : vector<16x16xf32>
    %c68 = arith.constant 68 : index
    %338 = memref.load %arg2[%c68] : memref<98xf32, #tpu.memory_space<smem>>
    %339 = vector.extract_strided_slice %141 {offsets = [2, 5], sizes = [16, 16], strides = [1, 1]} : vector<22x22xf32> to vector<16x16xf32>
    %340 = vector.broadcast %338 : f32 to vector<16x16xf32>
    %341 = arith.mulf %340, %339 : vector<16x16xf32>
    %342 = arith.addf %337, %341 : vector<16x16xf32>
    %c20 = arith.constant 20 : index
    %343 = memref.load %arg2[%c20] : memref<98xf32, #tpu.memory_space<smem>>
    %344 = vector.extract_strided_slice %139 {offsets = [2, 6], sizes = [16, 16], strides = [1, 1]} : vector<22x22xf32> to vector<16x16xf32>
    %345 = vector.broadcast %343 : f32 to vector<16x16xf32>
    %346 = arith.mulf %345, %344 : vector<16x16xf32>
    %347 = arith.addf %342, %346 : vector<16x16xf32>
    %c69 = arith.constant 69 : index
    %348 = memref.load %arg2[%c69] : memref<98xf32, #tpu.memory_space<smem>>
    %349 = vector.extract_strided_slice %141 {offsets = [2, 6], sizes = [16, 16], strides = [1, 1]} : vector<22x22xf32> to vector<16x16xf32>
    %350 = vector.broadcast %348 : f32 to vector<16x16xf32>
    %351 = arith.mulf %350, %349 : vector<16x16xf32>
    %352 = arith.addf %347, %351 : vector<16x16xf32>
    %c21 = arith.constant 21 : index
    %353 = memref.load %arg2[%c21] : memref<98xf32, #tpu.memory_space<smem>>
    %354 = vector.extract_strided_slice %139 {offsets = [3, 0], sizes = [16, 16], strides = [1, 1]} : vector<22x22xf32> to vector<16x16xf32>
    %355 = vector.broadcast %353 : f32 to vector<16x16xf32>
    %356 = arith.mulf %355, %354 : vector<16x16xf32>
    %357 = arith.addf %352, %356 : vector<16x16xf32>
    %c70 = arith.constant 70 : index
    %358 = memref.load %arg2[%c70] : memref<98xf32, #tpu.memory_space<smem>>
    %359 = vector.extract_strided_slice %141 {offsets = [3, 0], sizes = [16, 16], strides = [1, 1]} : vector<22x22xf32> to vector<16x16xf32>
    %360 = vector.broadcast %358 : f32 to vector<16x16xf32>
    %361 = arith.mulf %360, %359 : vector<16x16xf32>
    %362 = arith.addf %357, %361 : vector<16x16xf32>
    %c22 = arith.constant 22 : index
    %363 = memref.load %arg2[%c22] : memref<98xf32, #tpu.memory_space<smem>>
    %364 = vector.extract_strided_slice %139 {offsets = [3, 1], sizes = [16, 16], strides = [1, 1]} : vector<22x22xf32> to vector<16x16xf32>
    %365 = vector.broadcast %363 : f32 to vector<16x16xf32>
    %366 = arith.mulf %365, %364 : vector<16x16xf32>
    %367 = arith.addf %362, %366 : vector<16x16xf32>
    %c71 = arith.constant 71 : index
    %368 = memref.load %arg2[%c71] : memref<98xf32, #tpu.memory_space<smem>>
    %369 = vector.extract_strided_slice %141 {offsets = [3, 1], sizes = [16, 16], strides = [1, 1]} : vector<22x22xf32> to vector<16x16xf32>
    %370 = vector.broadcast %368 : f32 to vector<16x16xf32>
    %371 = arith.mulf %370, %369 : vector<16x16xf32>
    %372 = arith.addf %367, %371 : vector<16x16xf32>
    %c23 = arith.constant 23 : index
    %373 = memref.load %arg2[%c23] : memref<98xf32, #tpu.memory_space<smem>>
    %374 = vector.extract_strided_slice %139 {offsets = [3, 2], sizes = [16, 16], strides = [1, 1]} : vector<22x22xf32> to vector<16x16xf32>
    %375 = vector.broadcast %373 : f32 to vector<16x16xf32>
    %376 = arith.mulf %375, %374 : vector<16x16xf32>
    %377 = arith.addf %372, %376 : vector<16x16xf32>
    %c72 = arith.constant 72 : index
    %378 = memref.load %arg2[%c72] : memref<98xf32, #tpu.memory_space<smem>>
    %379 = vector.extract_strided_slice %141 {offsets = [3, 2], sizes = [16, 16], strides = [1, 1]} : vector<22x22xf32> to vector<16x16xf32>
    %380 = vector.broadcast %378 : f32 to vector<16x16xf32>
    %381 = arith.mulf %380, %379 : vector<16x16xf32>
    %382 = arith.addf %377, %381 : vector<16x16xf32>
    %c24 = arith.constant 24 : index
    %383 = memref.load %arg2[%c24] : memref<98xf32, #tpu.memory_space<smem>>
    %384 = vector.extract_strided_slice %139 {offsets = [3, 3], sizes = [16, 16], strides = [1, 1]} : vector<22x22xf32> to vector<16x16xf32>
    %385 = vector.broadcast %383 : f32 to vector<16x16xf32>
    %386 = arith.mulf %385, %384 : vector<16x16xf32>
    %387 = arith.addf %382, %386 : vector<16x16xf32>
    %c73 = arith.constant 73 : index
    %388 = memref.load %arg2[%c73] : memref<98xf32, #tpu.memory_space<smem>>
    %389 = vector.extract_strided_slice %141 {offsets = [3, 3], sizes = [16, 16], strides = [1, 1]} : vector<22x22xf32> to vector<16x16xf32>
    %390 = vector.broadcast %388 : f32 to vector<16x16xf32>
    %391 = arith.mulf %390, %389 : vector<16x16xf32>
    %392 = arith.addf %387, %391 : vector<16x16xf32>
    %c25 = arith.constant 25 : index
    %393 = memref.load %arg2[%c25] : memref<98xf32, #tpu.memory_space<smem>>
    %394 = vector.extract_strided_slice %139 {offsets = [3, 4], sizes = [16, 16], strides = [1, 1]} : vector<22x22xf32> to vector<16x16xf32>
    %395 = vector.broadcast %393 : f32 to vector<16x16xf32>
    %396 = arith.mulf %395, %394 : vector<16x16xf32>
    %397 = arith.addf %392, %396 : vector<16x16xf32>
    %c74 = arith.constant 74 : index
    %398 = memref.load %arg2[%c74] : memref<98xf32, #tpu.memory_space<smem>>
    %399 = vector.extract_strided_slice %141 {offsets = [3, 4], sizes = [16, 16], strides = [1, 1]} : vector<22x22xf32> to vector<16x16xf32>
    %400 = vector.broadcast %398 : f32 to vector<16x16xf32>
    %401 = arith.mulf %400, %399 : vector<16x16xf32>
    %402 = arith.addf %397, %401 : vector<16x16xf32>
    %c26 = arith.constant 26 : index
    %403 = memref.load %arg2[%c26] : memref<98xf32, #tpu.memory_space<smem>>
    %404 = vector.extract_strided_slice %139 {offsets = [3, 5], sizes = [16, 16], strides = [1, 1]} : vector<22x22xf32> to vector<16x16xf32>
    %405 = vector.broadcast %403 : f32 to vector<16x16xf32>
    %406 = arith.mulf %405, %404 : vector<16x16xf32>
    %407 = arith.addf %402, %406 : vector<16x16xf32>
    %c75 = arith.constant 75 : index
    %408 = memref.load %arg2[%c75] : memref<98xf32, #tpu.memory_space<smem>>
    %409 = vector.extract_strided_slice %141 {offsets = [3, 5], sizes = [16, 16], strides = [1, 1]} : vector<22x22xf32> to vector<16x16xf32>
    %410 = vector.broadcast %408 : f32 to vector<16x16xf32>
    %411 = arith.mulf %410, %409 : vector<16x16xf32>
    %412 = arith.addf %407, %411 : vector<16x16xf32>
    %c27 = arith.constant 27 : index
    %413 = memref.load %arg2[%c27] : memref<98xf32, #tpu.memory_space<smem>>
    %414 = vector.extract_strided_slice %139 {offsets = [3, 6], sizes = [16, 16], strides = [1, 1]} : vector<22x22xf32> to vector<16x16xf32>
    %415 = vector.broadcast %413 : f32 to vector<16x16xf32>
    %416 = arith.mulf %415, %414 : vector<16x16xf32>
    %417 = arith.addf %412, %416 : vector<16x16xf32>
    %c76 = arith.constant 76 : index
    %418 = memref.load %arg2[%c76] : memref<98xf32, #tpu.memory_space<smem>>
    %419 = vector.extract_strided_slice %141 {offsets = [3, 6], sizes = [16, 16], strides = [1, 1]} : vector<22x22xf32> to vector<16x16xf32>
    %420 = vector.broadcast %418 : f32 to vector<16x16xf32>
    %421 = arith.mulf %420, %419 : vector<16x16xf32>
    %422 = arith.addf %417, %421 : vector<16x16xf32>
    %c28 = arith.constant 28 : index
    %423 = memref.load %arg2[%c28] : memref<98xf32, #tpu.memory_space<smem>>
    %424 = vector.extract_strided_slice %139 {offsets = [4, 0], sizes = [16, 16], strides = [1, 1]} : vector<22x22xf32> to vector<16x16xf32>
    %425 = vector.broadcast %423 : f32 to vector<16x16xf32>
    %426 = arith.mulf %425, %424 : vector<16x16xf32>
    %427 = arith.addf %422, %426 : vector<16x16xf32>
    %c77 = arith.constant 77 : index
    %428 = memref.load %arg2[%c77] : memref<98xf32, #tpu.memory_space<smem>>
    %429 = vector.extract_strided_slice %141 {offsets = [4, 0], sizes = [16, 16], strides = [1, 1]} : vector<22x22xf32> to vector<16x16xf32>
    %430 = vector.broadcast %428 : f32 to vector<16x16xf32>
    %431 = arith.mulf %430, %429 : vector<16x16xf32>
    %432 = arith.addf %427, %431 : vector<16x16xf32>
    %c29 = arith.constant 29 : index
    %433 = memref.load %arg2[%c29] : memref<98xf32, #tpu.memory_space<smem>>
    %434 = vector.extract_strided_slice %139 {offsets = [4, 1], sizes = [16, 16], strides = [1, 1]} : vector<22x22xf32> to vector<16x16xf32>
    %435 = vector.broadcast %433 : f32 to vector<16x16xf32>
    %436 = arith.mulf %435, %434 : vector<16x16xf32>
    %437 = arith.addf %432, %436 : vector<16x16xf32>
    %c78 = arith.constant 78 : index
    %438 = memref.load %arg2[%c78] : memref<98xf32, #tpu.memory_space<smem>>
    %439 = vector.extract_strided_slice %141 {offsets = [4, 1], sizes = [16, 16], strides = [1, 1]} : vector<22x22xf32> to vector<16x16xf32>
    %440 = vector.broadcast %438 : f32 to vector<16x16xf32>
    %441 = arith.mulf %440, %439 : vector<16x16xf32>
    %442 = arith.addf %437, %441 : vector<16x16xf32>
    %c30 = arith.constant 30 : index
    %443 = memref.load %arg2[%c30] : memref<98xf32, #tpu.memory_space<smem>>
    %444 = vector.extract_strided_slice %139 {offsets = [4, 2], sizes = [16, 16], strides = [1, 1]} : vector<22x22xf32> to vector<16x16xf32>
    %445 = vector.broadcast %443 : f32 to vector<16x16xf32>
    %446 = arith.mulf %445, %444 : vector<16x16xf32>
    %447 = arith.addf %442, %446 : vector<16x16xf32>
    %c79 = arith.constant 79 : index
    %448 = memref.load %arg2[%c79] : memref<98xf32, #tpu.memory_space<smem>>
    %449 = vector.extract_strided_slice %141 {offsets = [4, 2], sizes = [16, 16], strides = [1, 1]} : vector<22x22xf32> to vector<16x16xf32>
    %450 = vector.broadcast %448 : f32 to vector<16x16xf32>
    %451 = arith.mulf %450, %449 : vector<16x16xf32>
    %452 = arith.addf %447, %451 : vector<16x16xf32>
    %c31 = arith.constant 31 : index
    %453 = memref.load %arg2[%c31] : memref<98xf32, #tpu.memory_space<smem>>
    %454 = vector.extract_strided_slice %139 {offsets = [4, 3], sizes = [16, 16], strides = [1, 1]} : vector<22x22xf32> to vector<16x16xf32>
    %455 = vector.broadcast %453 : f32 to vector<16x16xf32>
    %456 = arith.mulf %455, %454 : vector<16x16xf32>
    %457 = arith.addf %452, %456 : vector<16x16xf32>
    %c80_130 = arith.constant 80 : index
    %458 = memref.load %arg2[%c80_130] : memref<98xf32, #tpu.memory_space<smem>>
    %459 = vector.extract_strided_slice %141 {offsets = [4, 3], sizes = [16, 16], strides = [1, 1]} : vector<22x22xf32> to vector<16x16xf32>
    %460 = vector.broadcast %458 : f32 to vector<16x16xf32>
    %461 = arith.mulf %460, %459 : vector<16x16xf32>
    %462 = arith.addf %457, %461 : vector<16x16xf32>
    %c32_131 = arith.constant 32 : index
    %463 = memref.load %arg2[%c32_131] : memref<98xf32, #tpu.memory_space<smem>>
    %464 = vector.extract_strided_slice %139 {offsets = [4, 4], sizes = [16, 16], strides = [1, 1]} : vector<22x22xf32> to vector<16x16xf32>
    %465 = vector.broadcast %463 : f32 to vector<16x16xf32>
    %466 = arith.mulf %465, %464 : vector<16x16xf32>
    %467 = arith.addf %462, %466 : vector<16x16xf32>
    %c81 = arith.constant 81 : index
    %468 = memref.load %arg2[%c81] : memref<98xf32, #tpu.memory_space<smem>>
    %469 = vector.extract_strided_slice %141 {offsets = [4, 4], sizes = [16, 16], strides = [1, 1]} : vector<22x22xf32> to vector<16x16xf32>
    %470 = vector.broadcast %468 : f32 to vector<16x16xf32>
    %471 = arith.mulf %470, %469 : vector<16x16xf32>
    %472 = arith.addf %467, %471 : vector<16x16xf32>
    %c33 = arith.constant 33 : index
    %473 = memref.load %arg2[%c33] : memref<98xf32, #tpu.memory_space<smem>>
    %474 = vector.extract_strided_slice %139 {offsets = [4, 5], sizes = [16, 16], strides = [1, 1]} : vector<22x22xf32> to vector<16x16xf32>
    %475 = vector.broadcast %473 : f32 to vector<16x16xf32>
    %476 = arith.mulf %475, %474 : vector<16x16xf32>
    %477 = arith.addf %472, %476 : vector<16x16xf32>
    %c82 = arith.constant 82 : index
    %478 = memref.load %arg2[%c82] : memref<98xf32, #tpu.memory_space<smem>>
    %479 = vector.extract_strided_slice %141 {offsets = [4, 5], sizes = [16, 16], strides = [1, 1]} : vector<22x22xf32> to vector<16x16xf32>
    %480 = vector.broadcast %478 : f32 to vector<16x16xf32>
    %481 = arith.mulf %480, %479 : vector<16x16xf32>
    %482 = arith.addf %477, %481 : vector<16x16xf32>
    %c34 = arith.constant 34 : index
    %483 = memref.load %arg2[%c34] : memref<98xf32, #tpu.memory_space<smem>>
    %484 = vector.extract_strided_slice %139 {offsets = [4, 6], sizes = [16, 16], strides = [1, 1]} : vector<22x22xf32> to vector<16x16xf32>
    %485 = vector.broadcast %483 : f32 to vector<16x16xf32>
    %486 = arith.mulf %485, %484 : vector<16x16xf32>
    %487 = arith.addf %482, %486 : vector<16x16xf32>
    %c83 = arith.constant 83 : index
    %488 = memref.load %arg2[%c83] : memref<98xf32, #tpu.memory_space<smem>>
    %489 = vector.extract_strided_slice %141 {offsets = [4, 6], sizes = [16, 16], strides = [1, 1]} : vector<22x22xf32> to vector<16x16xf32>
    %490 = vector.broadcast %488 : f32 to vector<16x16xf32>
    %491 = arith.mulf %490, %489 : vector<16x16xf32>
    %492 = arith.addf %487, %491 : vector<16x16xf32>
    %c35 = arith.constant 35 : index
    %493 = memref.load %arg2[%c35] : memref<98xf32, #tpu.memory_space<smem>>
    %494 = vector.extract_strided_slice %139 {offsets = [5, 0], sizes = [16, 16], strides = [1, 1]} : vector<22x22xf32> to vector<16x16xf32>
    %495 = vector.broadcast %493 : f32 to vector<16x16xf32>
    %496 = arith.mulf %495, %494 : vector<16x16xf32>
    %497 = arith.addf %492, %496 : vector<16x16xf32>
    %c84 = arith.constant 84 : index
    %498 = memref.load %arg2[%c84] : memref<98xf32, #tpu.memory_space<smem>>
    %499 = vector.extract_strided_slice %141 {offsets = [5, 0], sizes = [16, 16], strides = [1, 1]} : vector<22x22xf32> to vector<16x16xf32>
    %500 = vector.broadcast %498 : f32 to vector<16x16xf32>
    %501 = arith.mulf %500, %499 : vector<16x16xf32>
    %502 = arith.addf %497, %501 : vector<16x16xf32>
    %c36 = arith.constant 36 : index
    %503 = memref.load %arg2[%c36] : memref<98xf32, #tpu.memory_space<smem>>
    %504 = vector.extract_strided_slice %139 {offsets = [5, 1], sizes = [16, 16], strides = [1, 1]} : vector<22x22xf32> to vector<16x16xf32>
    %505 = vector.broadcast %503 : f32 to vector<16x16xf32>
    %506 = arith.mulf %505, %504 : vector<16x16xf32>
    %507 = arith.addf %502, %506 : vector<16x16xf32>
    %c85 = arith.constant 85 : index
    %508 = memref.load %arg2[%c85] : memref<98xf32, #tpu.memory_space<smem>>
    %509 = vector.extract_strided_slice %141 {offsets = [5, 1], sizes = [16, 16], strides = [1, 1]} : vector<22x22xf32> to vector<16x16xf32>
    %510 = vector.broadcast %508 : f32 to vector<16x16xf32>
    %511 = arith.mulf %510, %509 : vector<16x16xf32>
    %512 = arith.addf %507, %511 : vector<16x16xf32>
    %c37 = arith.constant 37 : index
    %513 = memref.load %arg2[%c37] : memref<98xf32, #tpu.memory_space<smem>>
    %514 = vector.extract_strided_slice %139 {offsets = [5, 2], sizes = [16, 16], strides = [1, 1]} : vector<22x22xf32> to vector<16x16xf32>
    %515 = vector.broadcast %513 : f32 to vector<16x16xf32>
    %516 = arith.mulf %515, %514 : vector<16x16xf32>
    %517 = arith.addf %512, %516 : vector<16x16xf32>
    %c86 = arith.constant 86 : index
    %518 = memref.load %arg2[%c86] : memref<98xf32, #tpu.memory_space<smem>>
    %519 = vector.extract_strided_slice %141 {offsets = [5, 2], sizes = [16, 16], strides = [1, 1]} : vector<22x22xf32> to vector<16x16xf32>
    %520 = vector.broadcast %518 : f32 to vector<16x16xf32>
    %521 = arith.mulf %520, %519 : vector<16x16xf32>
    %522 = arith.addf %517, %521 : vector<16x16xf32>
    %c38 = arith.constant 38 : index
    %523 = memref.load %arg2[%c38] : memref<98xf32, #tpu.memory_space<smem>>
    %524 = vector.extract_strided_slice %139 {offsets = [5, 3], sizes = [16, 16], strides = [1, 1]} : vector<22x22xf32> to vector<16x16xf32>
    %525 = vector.broadcast %523 : f32 to vector<16x16xf32>
    %526 = arith.mulf %525, %524 : vector<16x16xf32>
    %527 = arith.addf %522, %526 : vector<16x16xf32>
    %c87 = arith.constant 87 : index
    %528 = memref.load %arg2[%c87] : memref<98xf32, #tpu.memory_space<smem>>
    %529 = vector.extract_strided_slice %141 {offsets = [5, 3], sizes = [16, 16], strides = [1, 1]} : vector<22x22xf32> to vector<16x16xf32>
    %530 = vector.broadcast %528 : f32 to vector<16x16xf32>
    %531 = arith.mulf %530, %529 : vector<16x16xf32>
    %532 = arith.addf %527, %531 : vector<16x16xf32>
    %c39 = arith.constant 39 : index
    %533 = memref.load %arg2[%c39] : memref<98xf32, #tpu.memory_space<smem>>
    %534 = vector.extract_strided_slice %139 {offsets = [5, 4], sizes = [16, 16], strides = [1, 1]} : vector<22x22xf32> to vector<16x16xf32>
    %535 = vector.broadcast %533 : f32 to vector<16x16xf32>
    %536 = arith.mulf %535, %534 : vector<16x16xf32>
    %537 = arith.addf %532, %536 : vector<16x16xf32>
    %c88 = arith.constant 88 : index
    %538 = memref.load %arg2[%c88] : memref<98xf32, #tpu.memory_space<smem>>
    %539 = vector.extract_strided_slice %141 {offsets = [5, 4], sizes = [16, 16], strides = [1, 1]} : vector<22x22xf32> to vector<16x16xf32>
    %540 = vector.broadcast %538 : f32 to vector<16x16xf32>
    %541 = arith.mulf %540, %539 : vector<16x16xf32>
    %542 = arith.addf %537, %541 : vector<16x16xf32>
    %c40 = arith.constant 40 : index
    %543 = memref.load %arg2[%c40] : memref<98xf32, #tpu.memory_space<smem>>
    %544 = vector.extract_strided_slice %139 {offsets = [5, 5], sizes = [16, 16], strides = [1, 1]} : vector<22x22xf32> to vector<16x16xf32>
    %545 = vector.broadcast %543 : f32 to vector<16x16xf32>
    %546 = arith.mulf %545, %544 : vector<16x16xf32>
    %547 = arith.addf %542, %546 : vector<16x16xf32>
    %c89 = arith.constant 89 : index
    %548 = memref.load %arg2[%c89] : memref<98xf32, #tpu.memory_space<smem>>
    %549 = vector.extract_strided_slice %141 {offsets = [5, 5], sizes = [16, 16], strides = [1, 1]} : vector<22x22xf32> to vector<16x16xf32>
    %550 = vector.broadcast %548 : f32 to vector<16x16xf32>
    %551 = arith.mulf %550, %549 : vector<16x16xf32>
    %552 = arith.addf %547, %551 : vector<16x16xf32>
    %c41 = arith.constant 41 : index
    %553 = memref.load %arg2[%c41] : memref<98xf32, #tpu.memory_space<smem>>
    %554 = vector.extract_strided_slice %139 {offsets = [5, 6], sizes = [16, 16], strides = [1, 1]} : vector<22x22xf32> to vector<16x16xf32>
    %555 = vector.broadcast %553 : f32 to vector<16x16xf32>
    %556 = arith.mulf %555, %554 : vector<16x16xf32>
    %557 = arith.addf %552, %556 : vector<16x16xf32>
    %c90 = arith.constant 90 : index
    %558 = memref.load %arg2[%c90] : memref<98xf32, #tpu.memory_space<smem>>
    %559 = vector.extract_strided_slice %141 {offsets = [5, 6], sizes = [16, 16], strides = [1, 1]} : vector<22x22xf32> to vector<16x16xf32>
    %560 = vector.broadcast %558 : f32 to vector<16x16xf32>
    %561 = arith.mulf %560, %559 : vector<16x16xf32>
    %562 = arith.addf %557, %561 : vector<16x16xf32>
    %c42 = arith.constant 42 : index
    %563 = memref.load %arg2[%c42] : memref<98xf32, #tpu.memory_space<smem>>
    %564 = vector.extract_strided_slice %139 {offsets = [6, 0], sizes = [16, 16], strides = [1, 1]} : vector<22x22xf32> to vector<16x16xf32>
    %565 = vector.broadcast %563 : f32 to vector<16x16xf32>
    %566 = arith.mulf %565, %564 : vector<16x16xf32>
    %567 = arith.addf %562, %566 : vector<16x16xf32>
    %c91 = arith.constant 91 : index
    %568 = memref.load %arg2[%c91] : memref<98xf32, #tpu.memory_space<smem>>
    %569 = vector.extract_strided_slice %141 {offsets = [6, 0], sizes = [16, 16], strides = [1, 1]} : vector<22x22xf32> to vector<16x16xf32>
    %570 = vector.broadcast %568 : f32 to vector<16x16xf32>
    %571 = arith.mulf %570, %569 : vector<16x16xf32>
    %572 = arith.addf %567, %571 : vector<16x16xf32>
    %c43 = arith.constant 43 : index
    %573 = memref.load %arg2[%c43] : memref<98xf32, #tpu.memory_space<smem>>
    %574 = vector.extract_strided_slice %139 {offsets = [6, 1], sizes = [16, 16], strides = [1, 1]} : vector<22x22xf32> to vector<16x16xf32>
    %575 = vector.broadcast %573 : f32 to vector<16x16xf32>
    %576 = arith.mulf %575, %574 : vector<16x16xf32>
    %577 = arith.addf %572, %576 : vector<16x16xf32>
    %c92 = arith.constant 92 : index
    %578 = memref.load %arg2[%c92] : memref<98xf32, #tpu.memory_space<smem>>
    %579 = vector.extract_strided_slice %141 {offsets = [6, 1], sizes = [16, 16], strides = [1, 1]} : vector<22x22xf32> to vector<16x16xf32>
    %580 = vector.broadcast %578 : f32 to vector<16x16xf32>
    %581 = arith.mulf %580, %579 : vector<16x16xf32>
    %582 = arith.addf %577, %581 : vector<16x16xf32>
    %c44 = arith.constant 44 : index
    %583 = memref.load %arg2[%c44] : memref<98xf32, #tpu.memory_space<smem>>
    %584 = vector.extract_strided_slice %139 {offsets = [6, 2], sizes = [16, 16], strides = [1, 1]} : vector<22x22xf32> to vector<16x16xf32>
    %585 = vector.broadcast %583 : f32 to vector<16x16xf32>
    %586 = arith.mulf %585, %584 : vector<16x16xf32>
    %587 = arith.addf %582, %586 : vector<16x16xf32>
    %c93 = arith.constant 93 : index
    %588 = memref.load %arg2[%c93] : memref<98xf32, #tpu.memory_space<smem>>
    %589 = vector.extract_strided_slice %141 {offsets = [6, 2], sizes = [16, 16], strides = [1, 1]} : vector<22x22xf32> to vector<16x16xf32>
    %590 = vector.broadcast %588 : f32 to vector<16x16xf32>
    %591 = arith.mulf %590, %589 : vector<16x16xf32>
    %592 = arith.addf %587, %591 : vector<16x16xf32>
    %c45 = arith.constant 45 : index
    %593 = memref.load %arg2[%c45] : memref<98xf32, #tpu.memory_space<smem>>
    %594 = vector.extract_strided_slice %139 {offsets = [6, 3], sizes = [16, 16], strides = [1, 1]} : vector<22x22xf32> to vector<16x16xf32>
    %595 = vector.broadcast %593 : f32 to vector<16x16xf32>
    %596 = arith.mulf %595, %594 : vector<16x16xf32>
    %597 = arith.addf %592, %596 : vector<16x16xf32>
    %c94 = arith.constant 94 : index
    %598 = memref.load %arg2[%c94] : memref<98xf32, #tpu.memory_space<smem>>
    %599 = vector.extract_strided_slice %141 {offsets = [6, 3], sizes = [16, 16], strides = [1, 1]} : vector<22x22xf32> to vector<16x16xf32>
    %600 = vector.broadcast %598 : f32 to vector<16x16xf32>
    %601 = arith.mulf %600, %599 : vector<16x16xf32>
    %602 = arith.addf %597, %601 : vector<16x16xf32>
    %c46 = arith.constant 46 : index
    %603 = memref.load %arg2[%c46] : memref<98xf32, #tpu.memory_space<smem>>
    %604 = vector.extract_strided_slice %139 {offsets = [6, 4], sizes = [16, 16], strides = [1, 1]} : vector<22x22xf32> to vector<16x16xf32>
    %605 = vector.broadcast %603 : f32 to vector<16x16xf32>
    %606 = arith.mulf %605, %604 : vector<16x16xf32>
    %607 = arith.addf %602, %606 : vector<16x16xf32>
    %c95 = arith.constant 95 : index
    %608 = memref.load %arg2[%c95] : memref<98xf32, #tpu.memory_space<smem>>
    %609 = vector.extract_strided_slice %141 {offsets = [6, 4], sizes = [16, 16], strides = [1, 1]} : vector<22x22xf32> to vector<16x16xf32>
    %610 = vector.broadcast %608 : f32 to vector<16x16xf32>
    %611 = arith.mulf %610, %609 : vector<16x16xf32>
    %612 = arith.addf %607, %611 : vector<16x16xf32>
    %c47 = arith.constant 47 : index
    %613 = memref.load %arg2[%c47] : memref<98xf32, #tpu.memory_space<smem>>
    %614 = vector.extract_strided_slice %139 {offsets = [6, 5], sizes = [16, 16], strides = [1, 1]} : vector<22x22xf32> to vector<16x16xf32>
    %615 = vector.broadcast %613 : f32 to vector<16x16xf32>
    %616 = arith.mulf %615, %614 : vector<16x16xf32>
    %617 = arith.addf %612, %616 : vector<16x16xf32>
    %c96_132 = arith.constant 96 : index
    %618 = memref.load %arg2[%c96_132] : memref<98xf32, #tpu.memory_space<smem>>
    %619 = vector.extract_strided_slice %141 {offsets = [6, 5], sizes = [16, 16], strides = [1, 1]} : vector<22x22xf32> to vector<16x16xf32>
    %620 = vector.broadcast %618 : f32 to vector<16x16xf32>
    %621 = arith.mulf %620, %619 : vector<16x16xf32>
    %622 = arith.addf %617, %621 : vector<16x16xf32>
    %c48_133 = arith.constant 48 : index
    %623 = memref.load %arg2[%c48_133] : memref<98xf32, #tpu.memory_space<smem>>
    %624 = vector.extract_strided_slice %139 {offsets = [6, 6], sizes = [16, 16], strides = [1, 1]} : vector<22x22xf32> to vector<16x16xf32>
    %625 = vector.broadcast %623 : f32 to vector<16x16xf32>
    %626 = arith.mulf %625, %624 : vector<16x16xf32>
    %627 = arith.addf %622, %626 : vector<16x16xf32>
    %c97 = arith.constant 97 : index
    %628 = memref.load %arg2[%c97] : memref<98xf32, #tpu.memory_space<smem>>
    %629 = vector.extract_strided_slice %141 {offsets = [6, 6], sizes = [16, 16], strides = [1, 1]} : vector<22x22xf32> to vector<16x16xf32>
    %630 = vector.broadcast %628 : f32 to vector<16x16xf32>
    %631 = arith.mulf %630, %629 : vector<16x16xf32>
    %632 = arith.addf %627, %631 : vector<16x16xf32>
    %633 = vector.broadcast %9 : f32 to vector<16x16xf32>
    %634 = arith.mulf %632, %633 : vector<16x16xf32>
    %635 = vector.broadcast %10 : f32 to vector<16x16xf32>
    %636 = arith.addf %634, %635 : vector<16x16xf32>
    %637 = arith.negf %636 : vector<16x16xf32>
    %638 = math.exp %637 : vector<16x16xf32>
    %cst_134 = arith.constant 1.000000e+00 : f32
    %639 = vector.broadcast %cst_134 : f32 to vector<16x16xf32>
    %640 = arith.addf %639, %638 : vector<16x16xf32>
    %641 = arith.divf %639, %640 : vector<16x16xf32>
    %c0_135 = arith.constant 0 : index
    %c0_136 = arith.constant 0 : index
    %c0_137 = arith.constant 0 : index
    %642 = vector.load %arg3[%c0_135, %c0_136, %c0_137] : memref<1x64x256xf32, #tpu.memory_space<vmem>>, vector<1x64x256xf32>
    %643 = vector.shape_cast %642 : vector<1x64x256xf32> to vector<64x256xf32>
    %644 = tpu.transpose %643, [1, 0] : vector<64x256xf32> -> vector<256x64xf32>
    %645 = vector.shape_cast %644 : vector<256x64xf32> to vector<16x16x64xf32>
    %646 = vector.shape_cast %641 : vector<16x16xf32> to vector<16x16x1xf32>
    %647 = vector.broadcast %646 : vector<16x16x1xf32> to vector<16x16x64xf32>
    %648 = arith.mulf %123, %647 : vector<16x16x64xf32>
    %649 = arith.addf %648, %645 : vector<16x16x64xf32>
    %650 = vector.broadcast %8 : f32 to vector<16x16x64xf32>
    %651 = arith.mulf %650, %649 : vector<16x16x64xf32>
    %652 = vector.broadcast %7 : f32 to vector<16x16x64xf32>
    %653 = arith.subf %652, %651 : vector<16x16x64xf32>
    %cst_138 = arith.constant 2.000000e+01 : f32
    %654 = vector.broadcast %cst_138 : f32 to vector<16x16x64xf32>
    %655 = arith.cmpf ogt, %653, %654 : vector<16x16x64xf32>
    %cst_139 = arith.constant 0.000000e+00 : f32
    %656 = vector.broadcast %cst_139 : f32 to vector<16x16x64xf32>
    %657 = arith.subf %656, %653 : vector<16x16x64xf32>
    %658 = math.exp %653 : vector<16x16x64xf32>
    %cst_140 = arith.constant 1.000000e+00 : f32
    %659 = vector.broadcast %cst_140 : f32 to vector<16x16x64xf32>
    %660 = arith.addf %659, %658 : vector<16x16x64xf32>
    %661 = math.log %660 : vector<16x16x64xf32>
    %cst_141 = arith.constant 0.000000e+00 : f32
    %662 = vector.broadcast %cst_141 : f32 to vector<16x16x64xf32>
    %663 = arith.subf %662, %661 : vector<16x16x64xf32>
    %664 = arith.select %655, %657, %663 : vector<16x16x64xi1>, vector<16x16x64xf32>
    %665 = vector.broadcast %6 : f32 to vector<16x16x64xf32>
    %666 = arith.mulf %664, %665 : vector<16x16x64xf32>
    %667 = math.exp %666 : vector<16x16x64xf32>
    %668 = arith.mulf %667, %649 : vector<16x16x64xf32>
    %669 = vector.shape_cast %668 : vector<16x16x64xf32> to vector<256x64xf32>
    %670 = tpu.transpose %669, [1, 0] : vector<256x64xf32> -> vector<64x256xf32>
    %c0_142 = arith.constant 0 : index
    %c0_143 = arith.constant 0 : index
    %c0_144 = arith.constant 0 : index
    %671 = vector.load %arg13[%c0_142, %c0_143, %c0_144] : memref<1x64x256xf32, #tpu.memory_space<vmem>>, vector<1x64x256xf32>
    %672 = vector.shape_cast %671 : vector<1x64x256xf32> to vector<64x256xf32>
    %673 = vector.shape_cast %670 : vector<64x256xf32> to vector<1x64x256xf32>
    tpu.vector_store %arg13[%c0_142, %c0_143, %c0_144], %673 {strides = array<i32>} : memref<1x64x256xf32, #tpu.memory_space<vmem>>, vector<1x64x256xf32>,
    return
  }
  func.func @transform_0(%arg0: i32) -> i32 {
    %c0_i32 = arith.constant 0 : i32
    %c0_i32_0 = arith.constant 0 : i32
    return %c0_i32 : i32
  }
  func.func @transform_1(%arg0: i32) -> i32 {
    %c0_i32 = arith.constant 0 : i32
    %c0_i32_0 = arith.constant 0 : i32
    return %c0_i32 : i32
  }
  func.func @transform_2(%arg0: i32) -> (i32, i32, i32) {
    %c0_i32 = arith.constant 0 : i32
    %c0_i32_0 = arith.constant 0 : i32
    %c0_i32_1 = arith.constant 0 : i32
    return %arg0, %c0_i32, %c0_i32_0 : i32, i32, i32
  }
  func.func @transform_3(%arg0: i32) -> (i32, i32) {
    %c0_i32 = arith.constant 0 : i32
    %c0_i32_0 = arith.constant 0 : i32
    %c0_i32_1 = arith.constant 0 : i32
    return %c0_i32, %c0_i32_0 : i32, i32
  }
  func.func @transform_4(%arg0: i32) -> (i32, i32) {
    %c0_i32 = arith.constant 0 : i32
    %c0_i32_0 = arith.constant 0 : i32
    %c0_i32_1 = arith.constant 0 : i32
    return %c0_i32, %c0_i32_0 : i32, i32
  }
  func.func @transform_5(%arg0: i32) -> (i32, i32) {
    %c0_i32 = arith.constant 0 : i32
    %c0_i32_0 = arith.constant 0 : i32
    %c0_i32_1 = arith.constant 0 : i32
    return %c0_i32, %c0_i32_0 : i32, i32
  }
  func.func @transform_6(%arg0: i32) -> (i32, i32) {
    %c0_i32 = arith.constant 0 : i32
    %c0_i32_0 = arith.constant 0 : i32
    %c0_i32_1 = arith.constant 0 : i32
    return %c0_i32, %c0_i32_0 : i32, i32
  }
  func.func @transform_7(%arg0: i32) -> (i32, i32) {
    %c0_i32 = arith.constant 0 : i32
    %c0_i32_0 = arith.constant 0 : i32
    %c0_i32_1 = arith.constant 0 : i32
    return %c0_i32, %c0_i32_0 : i32, i32
  }
  func.func @transform_8(%arg0: i32) -> (i32, i32) {
    %c0_i32 = arith.constant 0 : i32
    %c0_i32_0 = arith.constant 0 : i32
    %c0_i32_1 = arith.constant 0 : i32
    return %c0_i32, %c0_i32_0 : i32, i32
  }
  func.func @transform_9(%arg0: i32) -> (i32, i32) {
    %c0_i32 = arith.constant 0 : i32
    %c0_i32_0 = arith.constant 0 : i32
    %c0_i32_1 = arith.constant 0 : i32
    return %c0_i32, %c0_i32_0 : i32, i32
  }
  func.func @transform_10(%arg0: i32) -> (i32, i32) {
    %c0_i32 = arith.constant 0 : i32
    %c0_i32_0 = arith.constant 0 : i32
    %c0_i32_1 = arith.constant 0 : i32
    return %c0_i32, %c0_i32_0 : i32, i32
  }
  func.func @transform_11(%arg0: i32) -> (i32, i32) {
    %c0_i32 = arith.constant 0 : i32
    %c0_i32_0 = arith.constant 0 : i32
    %c0_i32_1 = arith.constant 0 : i32
    return %c0_i32, %c0_i32_0 : i32, i32
  }
  func.func @transform_12(%arg0: i32) -> (i32, i32, i32) {
    %c0_i32 = arith.constant 0 : i32
    %c0_i32_0 = arith.constant 0 : i32
    %c0_i32_1 = arith.constant 0 : i32
    return %arg0, %c0_i32, %c0_i32_0 : i32, i32, i32
  }
}

</mosaic_0001>

<bundles_post_ra>
// kernel: _lambda_.1
= control target key start
LH: loop header
LB: loop body
LE: loop exit
PB: predicated region body
PF: predicated region fallthrough
CT: control target
= control target key end

     0   :  { %s13665_s0 = inlined_call_operand.vmem [shape: f32[11], index: 0, kind: input, shape index: {}]   ;;  %s13666_s1 = inlined_call_operand.vmem [shape: f32[98], index: 1, kind: input, shape index: {}]   ;;  %s13667_s2 = inlined_call_operand.vmem [shape: f32[2,64,256], index: 2, kind: input, shape index: {}]   ;;  %s13668_s3 = inlined_call_operand.vmem [shape: bf16[64,16], index: 3, kind: input, shape index: {}]   ;;  %s13669_s4 = inlined_call_operand.vmem [shape: f32[1,16], index: 4, kind: input, shape index: {}]   ;;  %s13670_s5 = inlined_call_operand.vmem [shape: f32[1,16], index: 5, kind: input, shape index: {}]   ;;  %s13671_s6 = inlined_call_operand.vmem [shape: bf16[144,16], index: 6, kind: input, shape index: {}]   ;;  %s13672_s7 = inlined_call_operand.vmem [shape: f32[1,16], index: 7, kind: input, shape index: {}]   ;;  %s13673_s8 = inlined_call_operand.vmem [shape: f32[1,16], index: 8, kind: input, shape index: {}]   ;;  %s13674_s9 = inlined_call_operand.vmem [shape: bf16[16,64], index: 9, kind: input, shape index: {}]   ;;  %s13675_s10 = inlined_call_operand.vmem [shape: f32[1,64], index: 10, kind: input, shape index: {}]   ;;  %s13676_s11 = inlined_call_operand.vmem [shape: f32[1,64], index: 11, kind: input, shape index: {}]   ;;  %s13677_s12 = inlined_call_operand.vmem [shape: f32[2,64,256], index: 12, kind: output, shape index: {}]  }
   0x1   :  { %13750 = sst [smem:[#allocation59_spill]] %s13665_s0 }
   0x2   :  { %13751 = sst [smem:[#allocation60_spill]] %s13666_s1 }
   0x3   :  { %17 = vsyncpa [#allocation6], 0 }
   0x4   :  { %18 = vsyncpa [#allocation8], 0  ;;  %s9094_s21 = smov 0  }
   0x5 LB: > { %s7780_s22 = sadd.s32 4294967295, %s9010_s21   ;;  %p7782_p0 = scmp.ge.s32.totalorder %s9010_s21, 1  ;;  %s9010_s21 = sphi %s9094_s21, %s24_s21  }
   0x6   : > { %p312_p1 = scmp.lt.s32.totalorder %s9010_s21, 3  ;;  %s13752_s0 = sld [smem:[#allocation59_spill]] }
   0x7   : > { %p8199_p3 = scmp.eq.s32.totalorder %s7780_s22, 0  ;;  %s13753_s1 = sld [smem:[#allocation60_spill]] }
   0x8   : > { %p313_p2 = pnand %p7782_p0, %p312_p1  ;;  %s9012_s29 = smov [#allocation5]  }
   0x9   : > { %s9013_s30 = smov [#allocation7]  }
   0xa   : > { %p8192_p4 = pneg %p313_p2 }
   0xb   : > { %382 = sbr.rel (%p313_p2) target bundleno = 3028 (0xbd4), region = 68 }
   0xc   : > { %s324_s25 = sshll.u32 %s13752_s0, 4  ;;  %p8193_p5 = pnand %p8199_p3, %p8192_p4  ;;  %s325_s25 = int_to_ptr.vmem [resolvable:$true] %s324_s25 }
   0xd   : > { %s334_s28 = sshll.u32 %s13753_s1, 4  ;;  %s335_s28 = int_to_ptr.vmem [resolvable:$true] %s334_s28 }
   0xe   : > { %8195 = dma.vmem_to_smem (!%p8193_p5), %s325_s25, 16, %s9012_s29, [#allocation6]  }
   0xf   : > { %8198 = dma.vmem_to_smem (!%p8193_p5), %s335_s28, 16, %s9013_s30, [#allocation8]  }
  0x10   : > { %9001 = dma.done.wait (%p8199_p3), [#allocation6], 16  }
  0x11   : > { %9003 = vsyncadd (%p8199_p3), [#allocation6], 4294967280 }
  0x12   : > { %9005 = dma.done.wait (%p8199_p3), [#allocation8], 16  }
  0x13   : > { %9007 = vsyncadd (%p8199_p3), [#allocation8], 4294967280 }
  0x14   : > { %394 = sfence }
  0x15   : > { %p431_p6 = scmp.lt.s32.totalorder %s7780_s22, 1  ;;  %v8141_v12 = vld [vmem:[%s13668_s3 + $0x18] sm:$0xff]  ;;  %v8140_v25 = vld [vmem:[%s13668_s3 + $0x10] sm:$0xff]  ;;  %v8139_v26 = vld [vmem:[%s13668_s3 + $0x8] sm:$0xff]  ;;  %vm581_vm0 = vcmask 523264   ;;  %vm1274_vm1 = vcmask 130048  }
  0x16   : > { %634 = vmatpush.bf16.msra.mxu0 %v8141_v12  ;;  %v8138_v27 = vld [vmem:[%s13668_s3] sm:$0xff]  ;;  %s7794_s27 = sld [smem:[#allocation5 + $0x2]]  ;;  %s9015_s17 = smov 16   ;;  %vm1277_vm2 = vcmask 123904   ;;  %vm1284_vm3 = vcmask 122880   ;;  %vm1413_vm7 = vcmask 125952  }
  0x17   : > { %s13883_s22 = smov (!%p431_p6, %s7780_s22), 1  ;;  %s7793_s28 = sld [smem:[#allocation5 + $0x1]] }
  0x18   : > { %s13684_s13 = sshll.u32 %s13883_s22, 7  ;;  %s9016_s18 = smov 32  }
  0x19   : > { %s9121_s16 = scalar_lea.vmem %s13667_s2, %s13684_s13  ;;  %s442_s19 = sld [smem:[#allocation5]] }
  0x1a   : > { %v453_v0 = vld [vmem:[%s9121_s16] sm:$0xff]  ;;  %v454_v1 = vld [vmem:[%s9121_s16 + $0x8] sm:$0xff]  ;;  %v455_v3 = vld [vmem:[%s9121_s16 + $0x10] sm:$0xff]  ;;  %635 = vmatpush.bf16.msra.mxu0 %v8140_v25  ;;  %s9017_s24 = smov 48   ;;  %s9018_s25 = smov 64  }
  0x1b   : > { %v8228_v2 = vpack.i.bf16 %v454_v1, %v453_v0  ;;  %v456_v4 = vld [vmem:[%s9121_s16 + $0x18] sm:$0xff]  ;;  %v457_v6 = vld [vmem:[%s9121_s16 + $0x20] sm:$0xff]  ;;  %v458_v7 = vld [vmem:[%s9121_s16 + $0x28] sm:$0xff]  ;;  %s9019_s26 = smov 96   ;;  %s11815_s15 = sld [smem:[#allocation7 + $0x2]] }
  0x1c   : > { %v8230_v5 = vpack.i.bf16 %v456_v4, %v455_v3  ;;  %v8232_v8 = vpack.i.bf16 %v458_v7, %v457_v6  ;;  %v459_v9 = vld [vmem:[%s9121_s16 + $0x30] sm:$0xff]  ;;  %v460_v10 = vld [vmem:[%s9121_s16 + $0x38] sm:$0xff]  ;;  %v461_v13 = vld [vmem:[%s9121_s16 + $0x40] sm:$0xff]  ;;  %v9014_v4 = vmov 0.0   ;;  %s11825_s20 = sld [smem:[#allocation7 + $0x3]]  ;;  %s13689_s23 = smov 126  }
  0x1d   : > { %8229 = vxpose.xlu0.b32.start [1/8] (short) %v8228_v2, 128  ;;  %v8234_v11 = vpack.i.bf16 %v460_v10, %v459_v9  ;;  %v462_v14 = vld [vmem:[%s9121_s16 + $0x48] sm:$0xff]  ;;  %v463_v16 = vld [vmem:[%s9121_s16 + $0x50] sm:$0xff]  ;;  %v464_v17 = vld [vmem:[%s9121_s16 + $0x58] sm:$0xff]  ;;  %1275 = vst.msk [vmem:[#allocation2] sm:$0xff] %vm1274_vm1, %v9014_v4  ;;  %s13687_s29 = smov 125   ;;  %s13712_s30 = smov 127  }
  0x1e   : > { %v8236_v15 = vpack.i.bf16 %v462_v14, %v461_v13  ;;  %v8238_v18 = vpack.i.bf16 %v464_v17, %v463_v16  ;;  %v465_v19 = vld [vmem:[%s9121_s16 + $0x60] sm:$0xff]  ;;  %v466_v20 = vld [vmem:[%s9121_s16 + $0x68] sm:$0xff]  ;;  %v467_v22 = vld [vmem:[%s9121_s16 + $0x70] sm:$0xff]  ;;  %636 = vmatpush.bf16.msra.mxu0 %v8139_v26  ;;  %1276 = vst.msk [vmem:[#allocation2 + $0x8] sm:$0xff] %vm1274_vm1, %v9014_v4  ;;  %v9229_v14 = vstv %s7794_s27  ;;  %s9020_s27 = smov 80   ;;  %s11862_s14 = sld [smem:[#allocation7 + $0x32]] }
  0x1f   : > { %v8240_v21 = vpack.i.bf16 %v466_v20, %v465_v19  ;;  %v468_v23 = vld [vmem:[%s9121_s16 + $0x78] sm:$0xff]  ;;  %1280 = vst.msk [vmem:[#allocation2 + $0x198] sm:$0xff] %vm1274_vm1, %v9014_v4  ;;  %v9224_v9 = vld [vmem:[%s13670_s5] ss:$0 sm:$0xff]  ;;  %v9235_v16 = vstv %s7793_s28  ;;  %s9021_s28 = smov 112   ;;  %s13693_s13 = smov 122  }
  0x20   : > { %v8242_v24 = vpack.i.bf16 %v468_v23, %v467_v22  ;;  %1281 = vst.msk [vmem:[#allocation2 + $0x1a0] sm:$0xff] %vm1274_vm1, %v9014_v4  ;;  %s13788_s0 = smov 123   ;;  %s13793_s1 = smov 127  }
  0x21   : > { %1278 = vst.msk [vmem:[#allocation2 + $0x10] sm:$0x3] %vm1277_vm2, %v9014_v4 }
  0x22   : > { %637 = vmatpush.bf16.msra.mxu0 %v8138_v27  ;;  %1282 = vst.msk [vmem:[#allocation2 + $0x1a8] sm:$0x3] %vm1277_vm2, %v9014_v4  ;;  %vm1638_vm2 = vcmask 257152  }
  0x23   : > { %1285 = vst.msk [vmem:[#allocation2 + $0x18] sm:$0x1] %vm1284_vm3, %v9014_v4 }
  0x24   : > { %1286 = vst.msk [vmem:[#allocation2 + $0x30] sm:$0x1] %vm1284_vm3, %v9014_v4 }
  0x25   : > { %8231 = vxpose.xlu0.b32.cont [2/8] (short) %v8230_v5, 128  ;;  %v9218_v5 = vld [vmem:[%s13669_s4] ss:$0 sm:$0xff]  ;;  %v1446_v7 = vld [vmem:[#allocation2 + $0x1] sm:$0xff]  ;;  %1287 = vst.msk [vmem:[#allocation2 + $0x48] sm:$0x1] %vm1284_vm3, %v9014_v4 }
  0x26   : > { %v1671_v26 = vld [vmem:[#allocation2 + $0x2] sm:$0xff]  ;;  %1288 = vst.msk [vmem:[#allocation2 + $0x60] sm:$0x1] %vm1284_vm3, %v9014_v4 }
  0x27   : > { %1289 = vst.msk [vmem:[#allocation2 + $0x78] sm:$0x1] %vm1284_vm3, %v9014_v4 }
  0x28   : > { %v1447_v27 = vld [vmem:[#allocation2 + $0x9] sm:$0xff]  ;;  %1290 = vst.msk [vmem:[#allocation2 + $0x90] sm:$0x1] %vm1284_vm3, %v9014_v4 }
  0x29   : > { %1291 = vst.msk [vmem:[#allocation2 + $0xa8] sm:$0x1] %vm1284_vm3, %v9014_v4 }
  0x2a   : > { %1292 = vst.msk [vmem:[#allocation2 + $0xc0] sm:$0x1] %vm1284_vm3, %v9014_v4 }
  0x2b   : > { %1293 = vst.msk [vmem:[#allocation2 + $0xd8] sm:$0x1] %vm1284_vm3, %v9014_v4 }
  0x2c   : > { %1294 = vst.msk [vmem:[#allocation2 + $0xf0] sm:$0x1] %vm1284_vm3, %v9014_v4 }
  0x2d   : > { %8233 = vxpose.xlu0.b32.cont [3/8] (short) %v8232_v8, 128  ;;  %v1478_v8 = vpack.c.bf16 %v1446_v7, %v1446_v7  ;;  %1295 = vst.msk [vmem:[#allocation2 + $0x108] sm:$0x1] %vm1284_vm3, %v9014_v4 }
  0x2e   : > { %1296 = vst.msk [vmem:[#allocation2 + $0x120] sm:$0x1] %vm1284_vm3, %v9014_v4 }
  0x2f   : > { %1542 = vrot.lane.b32.xlu1 %v1478_v8, %s9015_s17  ;;  %1297 = vst.msk [vmem:[#allocation2 + $0x138] sm:$0x1] %vm1284_vm3, %v9014_v4 }
  0x30   : > { %1298 = vst.msk [vmem:[#allocation2 + $0x150] sm:$0x1] %vm1284_vm3, %v9014_v4 }
  0x31   : > { %1299 = vst.msk [vmem:[#allocation2 + $0x168] sm:$0x1] %vm1284_vm3, %v9014_v4 }
  0x32   : > { %1300 = vst.msk [vmem:[#allocation2 + $0x180] sm:$0x1] %vm1284_vm3, %v9014_v4 }
  0x33   : > { %1301 = vst.msk [vmem:[#allocation2 + $0x29] sm:$0x1] %vm1284_vm3, %v9014_v4 }
  0x34   : > { %1302 = vst.msk [vmem:[#allocation2 + $0x41] sm:$0x1] %vm1284_vm3, %v9014_v4 }
  0x35   : > { %8235 = vxpose.xlu0.b32.cont [4/8] (short) %v8234_v11, 128  ;;  %1303 = vst.msk [vmem:[#allocation2 + $0x59] sm:$0x1] %vm1284_vm3, %v9014_v4 }
  0x36   : > { %1304 = vst.msk [vmem:[#allocation2 + $0x71] sm:$0x1] %vm1284_vm3, %v9014_v4 }
  0x37   : > { %1305 = vst.msk [vmem:[#allocation2 + $0x89] sm:$0x1] %vm1284_vm3, %v9014_v4 }
  0x38   : > { %1306 = vst.msk [vmem:[#allocation2 + $0xa1] sm:$0x1] %vm1284_vm3, %v9014_v4 }
  0x39   : > { %1307 = vst.msk [vmem:[#allocation2 + $0xb9] sm:$0x1] %vm1284_vm3, %v9014_v4 }
  0x3a   : > { %1308 = vst.msk [vmem:[#allocation2 + $0xd1] sm:$0x1] %vm1284_vm3, %v9014_v4 }
  0x3b   : > { %1309 = vst.msk [vmem:[#allocation2 + $0xe9] sm:$0x1] %vm1284_vm3, %v9014_v4 }
  0x3c   : > { %1310 = vst.msk [vmem:[#allocation2 + $0x101] sm:$0x1] %vm1284_vm3, %v9014_v4 }
  0x3d   : > { %8237 = vxpose.xlu0.b32.cont [5/8] (short) %v8236_v15, 128  ;;  %1311 = vst.msk [vmem:[#allocation2 + $0x119] sm:$0x1] %vm1284_vm3, %v9014_v4 }
  0x3e   : > { %1312 = vst.msk [vmem:[#allocation2 + $0x131] sm:$0x1] %vm1284_vm3, %v9014_v4 }
  0x3f   : > { %1313 = vst.msk [vmem:[#allocation2 + $0x149] sm:$0x1] %vm1284_vm3, %v9014_v4 }
  0x40   : > { %1314 = vst.msk [vmem:[#allocation2 + $0x161] sm:$0x1] %vm1284_vm3, %v9014_v4 }
  0x41   : > { %1315 = vst.msk [vmem:[#allocation2 + $0x179] sm:$0x1] %vm1284_vm3, %v9014_v4 }
  0x42   : > { %1316 = vst.msk [vmem:[#allocation2 + $0x191] sm:$0x1] %vm1284_vm3, %v9014_v4  ;;  %vm1863_vm3 = vcmask 388352  }
  0x45   : > { %8239 = vxpose.xlu0.b32.cont [6/8] (short) %v8238_v18, 128 }
  0x4d   : > { %8241 = vxpose.xlu0.b32.cont [7/8] (short) %v8240_v21, 128 }
  0x55   : > { %8243 = vxpose.xlu0.b32.end [8/8] (short) %v8242_v24, 128 }
  0xc1   : > { %v9151_v28 = vpop.trf.xlu0 }
  0xc2   : > { %v8245_v31 = vunpack.i.l.bf16 %v9151_v28  ;;  %v8248_v10 = vunpack.i.h.bf16 %v9151_v28  ;;  %v1703_v28 = vpack.c.bf16 %v1671_v26, %v1671_v26 }
  0xc4   : > { %1767 = vrot.lane.b32.xlu2 %v1703_v28, %s9016_s18 }
  0xc9   : > { %v9153_v29 = vpop.trf.xlu0 }
  0xca   : > { %v8250_v30 = vunpack.i.l.bf16 %v9153_v29  ;;  %v8253_v6 = vunpack.i.h.bf16 %v9153_v29  ;;  %v1479_v29 = vpack.c.bf16 %v1447_v27, %v1447_v27 }
  0xcc   : > { %v533_v32 = vpack.c.bf16 %v8250_v30, %v8245_v31  ;;  %v541_v13 = vpack.c.bf16 %v8253_v6, %v8248_v10  ;;  %1544 = vrot.lane.b32.xlu1 %v1479_v29, %s9015_s17 }
  0xce   : > { %7819 = vmatmul.msk.bf16.vlgmr.msra.gmra.mxu0 %vm581_vm0, %v533_v32 }
  0xd1   : > { %v9158_v33 = vpop.trf.xlu0 }
  0xd2   : > { %v8255_v34 = vunpack.i.l.bf16 %v9158_v33  ;;  %v8258_v25 = vunpack.i.h.bf16 %v9158_v33 }
  0xd9   : > { %v9161_v35 = vpop.trf.xlu0 }
  0xda   : > { %v8260_v36 = vunpack.i.l.bf16 %v9161_v35  ;;  %v8263_v24 = vunpack.i.h.bf16 %v9161_v35 }
  0xdc   : > { %v534_v37 = vpack.c.bf16 %v8260_v36, %v8255_v34  ;;  %v542_v35 = vpack.c.bf16 %v8263_v24, %v8258_v25 }
  0xde   : > { %7820 = vmatmul.msk.bf16.gmra.mxu0 %vm581_vm0, %v534_v37 }
  0xe1   : > { %v9165_v38 = vpop.trf.xlu0 }
  0xe2   : > { %v8265_v39 = vunpack.i.l.bf16 %v9165_v38 }
  0xe9   : > { %v9168_v40 = vpop.trf.xlu0 }
  0xea   : > { %v8270_v41 = vunpack.i.l.bf16 %v9168_v40 }
  0xec   : > { %v535_v42 = vpack.c.bf16 %v8270_v41, %v8265_v39  ;;  %v1672_v41 = vld [vmem:[#allocation2 + $0xa] sm:$0xff] }
  0xee   : > { %7821 = vmatmul.msk.bf16.gmra.mxu0 %vm581_vm0, %v535_v42  ;;  %v1704_v42 = vpack.c.bf16 %v1672_v41, %v1672_v41 }
  0xf0   : > { %1769 = vrot.lane.b32.xlu1 %v1704_v42, %s9016_s18 }
  0xf1   : > { %v9172_v43 = vpop.trf.xlu0 }
  0xf2   : > { %v8275_v44 = vunpack.i.l.bf16 %v9172_v43 }
  0xf9   : > { %v9175_v45 = vpop.trf.xlu0 }
  0xfa   : > { %v8280_v46 = vunpack.i.l.bf16 %v9175_v45 }
  0xfc   : > { %v536_v47 = vpack.c.bf16 %v8280_v46, %v8275_v44 }
  0xfe   : > { %7822 = vmatmul.msk.bf16.gmra.mxu0 %vm581_vm0, %v536_v47 }
 0x101   : > { %v9179_v48 = vpop.trf.xlu0 }
 0x102   : > { %v8285_v49 = vunpack.i.l.bf16 %v9179_v48 }
 0x109   : > { %v9182_v50 = vpop.trf.xlu0 }
 0x10a   : > { %v8290_v51 = vunpack.i.l.bf16 %v9182_v50 }
 0x10c   : > { %v537_v52 = vpack.c.bf16 %v8290_v51, %v8285_v49 }
 0x10e   : > { %7823 = vmatmul.msk.bf16.gmra.mxu0 %vm581_vm0, %v537_v52 }
 0x111   : > { %v9186_v53 = vpop.trf.xlu0 }
 0x112   : > { %v8295_v54 = vunpack.i.l.bf16 %v9186_v53 }
 0x119   : > { %v9189_v55 = vpop.trf.xlu0 }
 0x11a   : > { %v8300_v56 = vunpack.i.l.bf16 %v9189_v55 }
 0x11c   : > { %v538_v57 = vpack.c.bf16 %v8300_v56, %v8295_v54 }
 0x11e   : > { %7824 = vmatmul.msk.bf16.gmra.mxu0 %vm581_vm0, %v538_v57 }
 0x121   : > { %v9193_v58 = vpop.trf.xlu0 }
 0x122   : > { %v8305_v59 = vunpack.i.l.bf16 %v9193_v58 }
 0x129   : > { %v9196_v60 = vpop.trf.xlu0 }
 0x12a   : > { %v8310_v61 = vunpack.i.l.bf16 %v9196_v60 }
 0x12c   : > { %v539_v62 = vpack.c.bf16 %v8310_v61, %v8305_v59  ;;  %v8273_v59 = vunpack.i.h.bf16 %v9168_v40  ;;  %v8268_v61 = vunpack.i.h.bf16 %v9165_v38 }
 0x12e   : > { %7825 = vmatmul.msk.bf16.gmra.mxu0 %vm581_vm0, %v539_v62 }
 0x131   : > { %v9200_v63 = vpop.trf.xlu0 }
 0x132   : > { %v8315_v0 = vunpack.i.l.bf16 %v9200_v63 }
 0x139   : > { %v9203_v1 = vpop.trf.xlu0 }
 0x13a   : > { %v8320_v2 = vunpack.i.l.bf16 %v9203_v1 }
 0x13c   : > { %v540_v3 = vpack.c.bf16 %v8320_v2, %v8315_v0  ;;  %v9308_v2 = vstv %s442_s19  ;;  %s11820_s19 = sld [smem:[#allocation7 + $0x5]] }
 0x13e   : > { %7826 = vmatmul.msk.bf16.gmra.mxu0 %vm581_vm0, %v540_v3 }
 0x14b   : > { %v639_v11 = vpop.f32.mrf.mxu0 }
 0x14c   : > { %v723_v12 = vmul.f32 %v9218_v5, %v639_v11 }
 0x14e   : > { %v9232_v15 = vadd.f32 %v9224_v9, %v723_v12  ;;  %7827 = vmatmul.msk.bf16.gmra.mxu0 %vm581_vm0, %v541_v13  ;;  %v543_v12 = vpack.c.bf16 %v8273_v59, %v8268_v61 }
 0x150   : > { %v792_v17 = vmul.f32 %v9229_v14, %v9232_v15 }
 0x152   : > { %v9241_v18 = vsub.f32 %v9235_v16, %v792_v17 }
 0x153   : > { %v641_v19 = vpop.f32.mrf.mxu0 }
 0x154   : > { %v921_v20 = vmul.f32 1.442695, %v9241_v18  ;;  %v724_v21 = vmul.f32 %v9218_v5, %v641_v19  ;;  %v889_v62 = vsub.f32 0.0, %v9241_v18  ;;  %vm857_vm4 = vcmp.gt.f32.partialorder %v9241_v18, 20.0 }
 0x156   : > { %8360 = vpow2.f32 %v921_v20  ;;  %v9247_v22 = vadd.f32 %v9224_v9, %v724_v21 }
 0x158   : > { %v793_v23 = vmul.f32 %v9229_v14, %v9247_v22 }
 0x15a   : > { %v9256_v30 = vsub.f32 %v9235_v16, %v793_v23 }
 0x15b   : > { %v644_v31 = vpop.f32.mrf.mxu0 }
 0x15c   : > { %v8361_v32 = vpop.eup %8360  ;;  %v923_v33 = vmul.f32 1.442695, %v9256_v30  ;;  %v725_v34 = vmul.f32 %v9218_v5, %v644_v31  ;;  %v890_v21 = vsub.f32 0.0, %v9256_v30  ;;  %vm858_vm5 = vcmp.gt.f32.partialorder %v9256_v30, 20.0 }
 0x15d   : > { %v985_v36 = vadd.f32 1.0, %v8361_v32 }
 0x15e   : > { %8362 = vpow2.f32 %v923_v33  ;;  %v9271_v37 = vadd.f32 %v9224_v9, %v725_v34  ;;  %7828 = vmatmul.msk.bf16.gmra.mxu0 %vm581_vm0, %v542_v35 }
 0x15f   : > { %8364 = vlog2.f32 %v985_v36 }
 0x160   : > { %v794_v39 = vmul.f32 %v9229_v14, %v9271_v37 }
 0x162   : > { %v9285_v44 = vsub.f32 %v9235_v16, %v794_v39 }
 0x163   : > { %v646_v46 = vpop.f32.mrf.mxu0 }
 0x164   : > { %v8363_v47 = vpop.eup %8362  ;;  %v925_v49 = vmul.f32 1.442695, %v9285_v44  ;;  %v726_v51 = vmul.f32 %v9218_v5, %v646_v46  ;;  %v8278_v46 = vunpack.i.h.bf16 %v9172_v43  ;;  %vm859_vm6 = vcmp.gt.f32.partialorder %v9285_v44, 20.0 }
 0x165   : > { %v8365_v52 = vpop.eup %8364  ;;  %v986_v54 = vadd.f32 1.0, %v8363_v47  ;;  %v891_v47 = vsub.f32 0.0, %v9285_v44 }
 0x166   : > { %v1018_v56 = vmul.f32 0.6931472, %v8365_v52  ;;  %8366 = vpow2.f32 %v925_v49  ;;  %v9299_v57 = vadd.f32 %v9224_v9, %v726_v51 }
 0x167   : > { %8368 = vlog2.f32 %v986_v54 }
 0x168   : > { %v1081_v0 = vsub.f32 0.0, %v1018_v56  ;;  %v795_v3 = vmul.f32 %v9229_v14, %v9299_v57 }
 0x16a   : > { %v1113_v38 = vsel %vm857_vm4, %v889_v62, %v1081_v0  ;;  %v9318_v40 = vsub.f32 %v9235_v16, %v795_v3 }
 0x16b   : > { %v1146_v6 = vmul.f32 %v9308_v2, %v1113_v38  ;;  %v649_v7 = vpop.f32.mrf.mxu0 }
 0x16c   : > { %v8367_v8 = vpop.eup %8366  ;;  %v927_v10 = vmul.f32 1.442695, %v9318_v40  ;;  %v727_v11 = vmul.f32 %v9218_v5, %v649_v7  ;;  %vm860_vm8 = vcmp.gt.f32.partialorder %v9318_v40, 20.0 }
 0x16d   : > { %v8369_v13 = vpop.eup %8368  ;;  %v1178_v17 = vmul.f32 1.442695, %v1146_v6  ;;  %v987_v18 = vadd.f32 1.0, %v8367_v8 }
 0x16e   : > { %v1020_v19 = vmul.f32 0.6931472, %v8369_v13  ;;  %8370 = vpow2.f32 %v927_v10  ;;  %v9332_v20 = vadd.f32 %v9224_v9, %v727_v11  ;;  %7829 = vmatmul.msk.bf16.gmra.mxu0 %vm581_vm0, %v543_v12  ;;  %v892_v13 = vsub.f32 0.0, %v9318_v40 }
 0x16f   : > { %8372 = vpow2.f32 %v1178_v17  ;;  %v8288_v40 = vunpack.i.h.bf16 %v9179_v48 }
 0x170   : > { %v1082_v23 = vsub.f32 0.0, %v1020_v19  ;;  %8374 = vlog2.f32 %v987_v18  ;;  %v796_v24 = vmul.f32 %v9229_v14, %v9332_v20 }
 0x172   : > { %v1114_v25 = vsel %vm858_vm5, %v890_v21, %v1082_v23  ;;  %v9348_v26 = vsub.f32 %v9235_v16, %v796_v24 }
 0x173   : > { %v1147_v27 = vmul.f32 %v9308_v2, %v1114_v25  ;;  %v651_v28 = vpop.f32.mrf.mxu0 }
 0x174   : > { %v8371_v29 = vpop.eup %8370  ;;  %v929_v31 = vmul.f32 1.442695, %v9348_v26  ;;  %v728_v30 = vmul.f32 %v9218_v5, %v651_v28  ;;  %vm861_vm9 = vcmp.gt.f32.partialorder %v9348_v26, 20.0 }
 0x175   : > { %v8373_v32 = vpop.eup %8372  ;;  %v1180_v33 = vmul.f32 1.442695, %v1147_v27  ;;  %v988_v34 = vadd.f32 1.0, %v8371_v29 }
 0x176   : > { %v8375_v35 = vpop.eup %8374  ;;  %v1242_v36 = vmul.f32 %v8373_v32, %v9232_v15  ;;  %8376 = vpow2.f32 %v929_v31  ;;  %v9363_v39 = vadd.f32 %v9224_v9, %v728_v30  ;;  %v8283_v15 = vunpack.i.h.bf16 %v9175_v45 }
 0x177   : > { %8378 = vpow2.f32 %v1180_v33  ;;  %v1022_v41 = vmul.f32 0.6931472, %v8375_v35  ;;  %v893_v33 = vsub.f32 0.0, %v9348_v26 }
 0x178   : > { %1317 = vst.msk [vmem:[#allocation2 + $0x19] sm:$0xff] %vm1274_vm1, %v1242_v36  ;;  %8380 = vlog2.f32 %v988_v34  ;;  %v797_v42 = vmul.f32 %v9229_v14, %v9363_v39  ;;  %v544_v61 = vpack.c.bf16 %v8283_v15, %v8278_v46  ;;  %v8293_v36 = vunpack.i.h.bf16 %v9182_v50 }
 0x179   : > { %v1083_v49 = vsub.f32 0.0, %v1022_v41 }
 0x17a   : > { %v9379_v51 = vsub.f32 %v9235_v16, %v797_v42 }
 0x17b   : > { %v1115_v52 = vsel %vm859_vm6, %v891_v47, %v1083_v49  ;;  %v654_v54 = vpop.f32.mrf.mxu0 }
 0x17c   : > { %v8377_v56 = vpop.eup %8376  ;;  %v1148_v59 = vmul.f32 %v9308_v2, %v1115_v52  ;;  %v931_v45 = vmul.f32 1.442695, %v9379_v51  ;;  %v729_v0 = vmul.f32 %v9218_v5, %v654_v54  ;;  %vm862_vm10 = vcmp.gt.f32.partialorder %v9379_v51, 20.0 }
 0x17d   : > { %v8379_v43 = vpop.eup %8378  ;;  %v989_v62 = vadd.f32 1.0, %v8377_v56 }
 0x17e   : > { %v8381_v3 = vpop.eup %8380  ;;  %v1243_v38 = vmul.f32 %v8379_v43, %v9247_v22  ;;  %v1182_v6 = vmul.f32 1.442695, %v1148_v59  ;;  %8382 = vpow2.f32 %v931_v45  ;;  %7830 = vmatmul.msk.bf16.gmra.mxu0 %vm581_vm0, %v544_v61  ;;  %v9387_v7 = vadd.f32 %v9224_v9, %v729_v0  ;;  %v8182_v22 = vld [vmem:[%s13671_s6 + $0x40] sm:$0xff] }
 0x17f   : > { %v1024_v44 = vmul.f32 0.6931472, %v8381_v3  ;;  %8384 = vlog2.f32 %v989_v62  ;;  %v1896_v8 = vld [vmem:[#allocation2 + $0x18] sm:$0xff]  ;;  %3510 = vmatpush.bf16.msra.mxu2 %v8182_v22  ;;  %v545_v61 = vpack.c.bf16 %v8293_v36, %v8288_v40  ;;  %v894_v3 = vsub.f32 0.0, %v9379_v51 }
 0x180   : > { %v1448_v10 = vld [vmem:[#allocation2 + $0x19] sm:$0xff]  ;;  %1318 = vst.msk [vmem:[#allocation2 + $0x21] sm:$0xff] %vm1274_vm1, %v1243_v38  ;;  %8386 = vpow2.f32 %v1182_v6  ;;  %v1928_v11 = vpack.c.bf16 %v1896_v8, %v1896_v8  ;;  %v798_v18 = vmul.f32 %v9229_v14, %v9387_v7 }
 0x181   : > { %v1480_v12 = vpack.c.bf16 %v1448_v10, %v1448_v10  ;;  %v1084_v17 = vsub.f32 0.0, %v1024_v44 }
 0x182   : > { %1992 = vrot.lane.b32.xlu0 %v1928_v11, %s9017_s24  ;;  %1416 = vst.msk [vmem:[#allocation3 + $0x10] sm:$0xf] %vm1413_vm7, %v1928_v11  ;;  %v9401_v21 = vsub.f32 %v9235_v16, %v798_v18 }
 0x183   : > { %1546 = vrot.lane.b32.xlu2 %v1480_v12, %s9015_s17  ;;  %v1116_v19 = vsel %vm860_vm8, %v892_v13, %v1084_v17  ;;  %v656_v23 = vpop.f32.mrf.mxu0 }
 0x184   : > { %v8383_v24 = vpop.eup %8382  ;;  %v1149_v25 = vmul.f32 %v9308_v2, %v1116_v19  ;;  %v730_v27 = vmul.f32 %v9218_v5, %v656_v23  ;;  %v933_v31 = vmul.f32 1.442695, %v9401_v21  ;;  %vm863_vm11 = vcmp.gt.f32.partialorder %v9401_v21, 20.0 }
 0x185   : > { %v8385_v28 = vpop.eup %8384  ;;  %v990_v29 = vadd.f32 1.0, %v8383_v24 }
 0x186   : > { %v8387_v30 = vpop.eup %8386  ;;  %v1184_v32 = vmul.f32 1.442695, %v1149_v25  ;;  %v1026_v34 = vmul.f32 0.6931472, %v8385_v28  ;;  %v9409_v35 = vadd.f32 %v9224_v9, %v730_v27 }
 0x187   : > { %v1244_v41 = vmul.f32 %v8387_v30, %v9271_v37  ;;  %8388 = vlog2.f32 %v990_v29  ;;  %v2122_v42 = vld [vmem:[#allocation2 + $0x21] sm:$0xff] }
 0x188   : > { %v1674_v48 = vld [vmem:[#allocation2 + $0x22] sm:$0xff]  ;;  %8390 = vpow2.f32 %v1184_v32  ;;  %v1085_v46 = vsub.f32 0.0, %v1026_v34  ;;  %v799_v47 = vmul.f32 %v9229_v14, %v9409_v35  ;;  %v2154_v49 = vpack.c.bf16 %v2122_v42, %v2122_v42 }
 0x189   : > { %v1897_v15 = vld [vmem:[#allocation2 + $0x20] sm:$0xff]  ;;  %1319 = vst.msk [vmem:[#allocation2 + $0x31] sm:$0xff] %vm1274_vm1, %v1244_v41  ;;  %8392 = vpow2.f32 %v933_v31  ;;  %v9417_v52 = vpack.c.bf16 %v1674_v48, %v1674_v48  ;;  %v8303_v34 = vunpack.i.h.bf16 %v9189_v55  ;;  %v895_v41 = vsub.f32 0.0, %v9401_v21 }
 0x18a   : > { %v1929_v50 = vpack.c.bf16 %v1897_v15, %v1897_v15  ;;  %v1117_v54 = vsel %vm861_vm9, %v893_v33, %v1085_v46  ;;  %v9420_v37 = vsub.f32 %v9235_v16, %v799_v47  ;;  %2219 = vrot.lane.b32.xlu0 %v2154_v49, %s9018_s25  ;;  %v2346_v31 = vld [vmem:[#allocation2 + $0x1a] sm:$0xff]  ;;  %v8298_v33 = vunpack.i.h.bf16 %v9186_v53 }
 0x18b   : > { %2217 = vrot.lane.b32.xlu2 %v1480_v12, %s9018_s25  ;;  %v1150_v26 = vmul.f32 %v9308_v2, %v1117_v54  ;;  %1773 = vrot.lane.b32.xlu1 %v9417_v52, %s9016_s18  ;;  %v659_v56 = vpop.f32.mrf.mxu0  ;;  %v2378_v48 = vpack.c.bf16 %v2346_v31, %v2346_v31 }
 0x18c   : > { %1417 = vst.msk [vmem:[#allocation3 + $0x18] sm:$0xf] %vm1413_vm7, %v1929_v50  ;;  %v935_v59 = vmul.f32 1.442695, %v9420_v37  ;;  %v731_v45 = vmul.f32 %v9218_v5, %v659_v56  ;;  %vm864_vm12 = vcmp.gt.f32.partialorder %v9420_v37, 20.0 }
 0x18d   : > { %v8389_v43 = vpop.eup %8388  ;;  %v1186_v62 = vmul.f32 1.442695, %v1150_v26 }
 0x18e   : > { %v8391_v0 = vpop.eup %8390  ;;  %v1028_v38 = vmul.f32 0.6931472, %v8389_v43  ;;  %8394 = vpow2.f32 %v935_v59  ;;  %v9432_v6 = vadd.f32 %v9224_v9, %v731_v45  ;;  %7831 = vmatmul.msk.bf16.gmra.mxu0 %vm581_vm0, %v545_v61 }
 0x18f   : > { %v8393_v44 = vpop.eup %8392  ;;  %v1245_v8 = vmul.f32 %v8391_v0, %v9299_v57  ;;  %8396 = vpow2.f32 %v1186_v62  ;;  %v546_v62 = vpack.c.bf16 %v8303_v34, %v8298_v33  ;;  %v8308_v33 = vunpack.i.h.bf16 %v9193_v58 }
 0x190   : > { %v1086_v10 = vsub.f32 0.0, %v1028_v38  ;;  %v991_v11 = vadd.f32 1.0, %v8393_v44  ;;  %v800_v12 = vmul.f32 %v9229_v14, %v9432_v6  ;;  %v2572_v22 = vld [vmem:[#allocation2 + $0x30] sm:$0xff] }
 0x191   : > { %v1353_v13 = vld [vmem:[#allocation2 + $0x30] sm:$0xff]  ;;  %1320 = vst.msk [vmem:[#allocation2 + $0x39] sm:$0xff] %vm1274_vm1, %v1245_v8  ;;  %v9440_v17 = vpack.c.bf16 %v2572_v22, %v2572_v22  ;;  %v896_v22 = vsub.f32 0.0, %v9420_v37 }
 0x192   : > { %v1385_v18 = vpack.c.bf16 %v1353_v13, %v1353_v13  ;;  %v1118_v19 = vsel %vm862_vm10, %v894_v3, %v1086_v10  ;;  %8398 = vlog2.f32 %v991_v11  ;;  %v9443_v23 = vsub.f32 %v9235_v16, %v800_v12  ;;  %v1450_v12 = vld [vmem:[#allocation2 + $0x31] sm:$0xff] }
 0x193   : > { %1548 = vrot.lane.b32.xlu2 %v2154_v49, %s9015_s17  ;;  %v1151_v57 = vmul.f32 %v9308_v2, %v1118_v19  ;;  %1994 = vrot.lane.b32.xlu1 %v1929_v50, %s9017_s24  ;;  %v661_v51 = vpop.f32.mrf.mxu0 }
 0x194   : > { %2668 = vrot.lane.b32.xlu0 %v9440_v17, %s9019_s26  ;;  %1418 = vst.msk [vmem:[#allocation3 + $0x20] sm:$0xf] %vm1413_vm7, %v1385_v18  ;;  %v8395_v24 = vpop.eup %8394  ;;  %v937_v25 = vmul.f32 1.442695, %v9443_v23  ;;  %v732_v27 = vmul.f32 %v9218_v5, %v661_v51  ;;  %vm865_vm13 = vcmp.gt.f32.partialorder %v9443_v23, 20.0 }
 0x195   : > { %v8397_v28 = vpop.eup %8396  ;;  %v1188_v40 = vmul.f32 1.442695, %v1151_v57  ;;  %v992_v29 = vadd.f32 1.0, %v8395_v24  ;;  %v1482_v57 = vpack.c.bf16 %v1450_v12, %v1450_v12 }
 0x196   : > { %v1246_v30 = vmul.f32 %v8397_v28, %v9332_v20  ;;  %8400 = vpow2.f32 %v937_v25  ;;  %v9455_v32 = vadd.f32 %v9224_v9, %v732_v27 }
 0x197   : > { %8402 = vpow2.f32 %v1188_v40 }
 0x198   : > { %v8399_v36 = vpop.eup %8398  ;;  %1321 = vst.msk [vmem:[#allocation2 + $0x49] sm:$0xff] %vm1274_vm1, %v1246_v30  ;;  %8404 = vlog2.f32 %v992_v29  ;;  %v801_v42 = vmul.f32 %v9229_v14, %v9455_v32  ;;  %v1899_v20 = vld [vmem:[#allocation2 + $0x38] sm:$0xff] }
 0x199   : > { %v2348_v15 = vld [vmem:[#allocation2 + $0x32] sm:$0xff]  ;;  %v3023_v46 = vld [vmem:[#allocation2 + $0x3a] sm:$0xff]  ;;  %v1030_v47 = vmul.f32 0.6931472, %v8399_v36  ;;  %v9463_v49 = vpack.c.bf16 %v1899_v20, %v1899_v20 }
 0x19a   : > { %v9465_v53 = vpack.c.bf16 %v2348_v15, %v2348_v15  ;;  %v9467_v55 = vpack.c.bf16 %v3023_v46, %v3023_v46  ;;  %v1354_v50 = vld [vmem:[#allocation2 + $0x38] sm:$0xff]  ;;  %v9471_v54 = vsub.f32 %v9235_v16, %v801_v42  ;;  %v897_v42 = vsub.f32 0.0, %v9443_v23 }
 0x19b   : > { %1771 = vrot.lane.b32.xlu2 %v2378_v48, %s9016_s18  ;;  %v1386_v26 = vpack.c.bf16 %v1354_v50, %v1354_v50  ;;  %v1087_v56 = vsub.f32 0.0, %v1030_v47  ;;  %2442 = vrot.lane.b32.xlu1 %v2378_v48, %s9020_s27  ;;  %v664_v59 = vpop.f32.mrf.mxu0  ;;  %v8313_v15 = vunpack.i.h.bf16 %v9196_v60 }
 0x19c   : > { %1998 = vrot.lane.b32.xlu0 %v9463_v49, %s9017_s24  ;;  %3086 = vst.msk [vmem:[#allocation3 + $0x4] sm:$0xf] %vm1413_vm7, %v9465_v53  ;;  %v8401_v45 = vpop.eup %8400  ;;  %v939_v61 = vmul.f32 1.442695, %v9471_v54  ;;  %v733_v43 = vmul.f32 %v9218_v5, %v664_v59  ;;  %v898_v12 = vsub.f32 0.0, %v9471_v54  ;;  %vm866_vm14 = vcmp.gt.f32.partialorder %v9471_v54, 20.0 }
 0x19d   : > { %3087 = vst.msk [vmem:[#allocation3 + $0xc] sm:$0xf] %vm1413_vm7, %v9467_v55  ;;  %v8403_v0 = vpop.eup %8402  ;;  %v1119_v3 = vsel %vm863_vm11, %v895_v41, %v1087_v56  ;;  %v993_v38 = vadd.f32 1.0, %v8401_v45 }
 0x19e   : > { %1419 = vst.msk [vmem:[#allocation3 + $0x28] sm:$0xf] %vm1413_vm7, %v1386_v26  ;;  %v8405_v44 = vpop.eup %8404  ;;  %v1247_v8 = vmul.f32 %v8403_v0, %v9363_v39  ;;  %v1152_v10 = vmul.f32 %v9308_v2, %v1119_v3  ;;  %8406 = vpow2.f32 %v939_v61  ;;  %v9489_v11 = vadd.f32 %v9224_v9, %v733_v43  ;;  %7832 = vmatmul.msk.bf16.gmra.mxu0 %vm581_vm0, %v546_v62 }
 0x19f   : > { %v1032_v13 = vmul.f32 0.6931472, %v8405_v44  ;;  %8408 = vlog2.f32 %v993_v38  ;;  %v1355_v21 = vld [vmem:[#allocation2 + $0x48] sm:$0xff]  ;;  %v547_v44 = vpack.c.bf16 %v8313_v15, %v8308_v33 }
 0x1a0   : > { %1322 = vst.msk [vmem:[#allocation2 + $0x51] sm:$0xff] %vm1274_vm1, %v1247_v8  ;;  %v1190_v18 = vmul.f32 1.442695, %v1152_v10  ;;  %v802_v39 = vmul.f32 %v9229_v14, %v9489_v11  ;;  %v1387_v51 = vpack.c.bf16 %v1355_v21, %v1355_v21  ;;  %v2125_v20 = vld [vmem:[#allocation2 + $0x49] sm:$0xff] }
 0x1a1   : > { %v1088_v19 = vsub.f32 0.0, %v1032_v13  ;;  %v9524_v61 = vpack.c.bf16 %v2125_v20, %v2125_v20  ;;  %v1451_v13 = vld [vmem:[#allocation2 + $0x39] sm:$0xff]  ;;  %v8323_v20 = vunpack.i.h.bf16 %v9203_v1 }
 0x1a2   : > { %8410 = vpow2.f32 %v1190_v18  ;;  %v9498_v24 = vsub.f32 %v9235_v16, %v802_v39  ;;  %1420 = vst.msk [vmem:[#allocation3 + $0x30] sm:$0xf] %vm1413_vm7, %v1387_v51 }
 0x1a3   : > { %2444 = vrot.lane.b32.xlu2 %v9417_v52, %s9020_s27  ;;  %v8142_v25 = vld [vmem:[#allocation3 + $0x4] sm:$0xf]  ;;  %v1120_v27 = vsel %vm864_vm12, %v896_v22, %v1088_v19  ;;  %1550 = vrot.lane.b32.xlu1 %v1482_v57, %s9015_s17  ;;  %v666_v37 = vpop.f32.mrf.mxu0  ;;  %vm2088_vm12 = vcmask 519552  }
 0x1a4   : > { %2446 = vrot.lane.b32.xlu0 %v9465_v53, %s9020_s27  ;;  %v7839_v28 = vld [vmem:[#allocation3 + $0x8] sm:$0xf0]  ;;  %v8407_v40 = vpop.eup %8406  ;;  %v1153_v29 = vmul.f32 %v9308_v2, %v1120_v27  ;;  %v941_v31 = vmul.f32 1.442695, %v9498_v24  ;;  %v734_v34 = vmul.f32 %v9218_v5, %v666_v37  ;;  %v9552_v27 = vpack.c.bf16 %v1451_v13, %v1451_v13 }
 0x1a5   : > { %v8409_v30 = vpop.eup %8408  ;;  %v994_v52 = vadd.f32 1.0, %v8407_v40  ;;  %v7842_v36 = vor.u32 %v8142_v25, %v7839_v28  ;;  %vm867_vm15 = vcmp.gt.f32.partialorder %v9498_v24, 20.0 }
 0x1a6   : > { %v1192_v41 = vmul.f32 1.442695, %v1153_v29  ;;  %v1034_v48 = vmul.f32 0.6931472, %v8409_v30  ;;  %8412 = vpow2.f32 %v941_v31  ;;  %v9514_v46 = vadd.f32 %v9224_v9, %v734_v34 }
 0x1a7   : > { %8414 = vlog2.f32 %v994_v52  ;;  %7999 = vmatmul.msk.bf16.vlgmr.msra.gmra.mxu2 %vm1274_vm1, %v7842_v36  ;;  %v2351_v58 = vld [vmem:[#allocation2 + $0x52] sm:$0xff]  ;;  %v3024_v47 = vld [vmem:[#allocation2 + $0x4a] sm:$0xff]  ;;  %v8318_v36 = vunpack.i.h.bf16 %v9200_v63 }
 0x1a8   : > { %v8411_v50 = vpop.eup %8410  ;;  %8416 = vpow2.f32 %v1192_v41  ;;  %v1089_v26 = vsub.f32 0.0, %v1034_v48  ;;  %v9517_v56 = vpack.c.bf16 %v2351_v58, %v2351_v58  ;;  %v9519_v59 = vpack.c.bf16 %v3024_v47, %v3024_v47  ;;  %v1356_v45 = vld [vmem:[#allocation2 + $0x50] sm:$0xff] }
 0x1a9   : > { %v1248_v60 = vmul.f32 %v8411_v50, %v9387_v7  ;;  %v803_v23 = vmul.f32 %v9229_v14, %v9514_v46  ;;  %v1388_v62 = vpack.c.bf16 %v1356_v45, %v1356_v45  ;;  %v2575_v47 = vld [vmem:[#allocation2 + $0x50] sm:$0xff] }
 0x1aa   : > { %v1121_v43 = vsel %vm865_vm13, %v897_v42, %v1089_v26  ;;  %3088 = vst.msk [vmem:[#allocation3 + $0x14] sm:$0xf] %vm1413_vm7, %v9519_v59  ;;  %v899_v26 = vsub.f32 0.0, %v9498_v24  ;;  %v548_v24 = vpack.c.bf16 %v8323_v20, %v8318_v36  ;;  %vm2313_vm13 = vcmask 650752  }
 0x1ab   : > { %1996 = vrot.lane.b32.xlu2 %v9440_v17, %s9017_s24  ;;  %1323 = vst.msk [vmem:[#allocation2 + $0x61] sm:$0xff] %vm1274_vm1, %v1248_v60  ;;  %v1154_v0 = vmul.f32 %v9308_v2, %v1121_v43  ;;  %v9533_v3 = vsub.f32 %v9235_v16, %v803_v23  ;;  %2221 = vrot.lane.b32.xlu1 %v1482_v57, %s9018_s25  ;;  %v669_v7 = vpop.f32.mrf.mxu0 }
 0x1ac   : > { %2225 = vrot.lane.b32.xlu0 %v9524_v61, %s9018_s25  ;;  %v8413_v38 = vpop.eup %8412  ;;  %v735_v17 = vmul.f32 %v9218_v5, %v669_v7  ;;  %3089 = vst.msk [vmem:[#allocation3 + $0x1c] sm:$0xf] %vm1413_vm7, %v9517_v56  ;;  %v9580_v43 = vpack.c.bf16 %v2575_v47, %v2575_v47 }
 0x1ad   : > { %v8415_v8 = vpop.eup %8414  ;;  %v1194_v10 = vmul.f32 1.442695, %v1154_v0  ;;  %v995_v22 = vadd.f32 1.0, %v8413_v38  ;;  %v943_v39 = vmul.f32 1.442695, %v9533_v3  ;;  %vm868_vm4 = vcmp.gt.f32.partialorder %v9533_v3, 20.0 }
 0x1ae   : > { %v8417_v21 = vpop.eup %8416  ;;  %v1036_v18 = vmul.f32 0.6931472, %v8415_v8  ;;  %v9544_v19 = vadd.f32 %v9224_v9, %v735_v17  ;;  %7833 = vmatmul.msk.bf16.gmra.mxu0 %vm581_vm0, %v547_v44  ;;  %1421 = vst.msk [vmem:[#allocation3 + $0x38] sm:$0xf] %vm1413_vm7, %v1388_v62 }
 0x1af   : > { %v1249_v57 = vmul.f32 %v8417_v21, %v9409_v35  ;;  %8418 = vpow2.f32 %v1194_v10 }
 0x1b0   : > { %v1090_v51 = vsub.f32 0.0, %v1036_v18  ;;  %8420 = vlog2.f32 %v995_v22  ;;  %v804_v25 = vmul.f32 %v9229_v14, %v9544_v19 }
 0x1b1   : > { %1324 = vst.msk [vmem:[#allocation2 + $0x69] sm:$0xff] %vm1274_vm1, %v1249_v57  ;;  %8422 = vpow2.f32 %v943_v39  ;;  %v8144_v37 = vld [vmem:[#allocation3 + $0x14] sm:$0xf] }
 0x1b2   : > { %v1122_v28 = vsel %vm866_vm14, %v898_v12, %v1090_v51  ;;  %v9556_v40 = vsub.f32 %v9235_v16, %v804_v25  ;;  %v1357_v35 = vld [vmem:[#allocation2 + $0x60] sm:$0xff] }
 0x1b3   : > { %1552 = vrot.lane.b32.xlu2 %v9552_v27, %s9015_s17  ;;  %v1155_v54 = vmul.f32 %v9308_v2, %v1122_v28  ;;  %1777 = vrot.lane.b32.xlu1 %v9467_v55, %s9016_s18  ;;  %v671_v29 = vpop.f32.mrf.mxu0  ;;  %v7847_v31 = vld [vmem:[#allocation3 + $0x18] sm:$0xf0]  ;;  %v1389_v42 = vpack.c.bf16 %v1357_v35, %v1357_v35  ;;  %v1902_v57 = vld [vmem:[#allocation2 + $0x60] sm:$0xff]  ;;  %v900_v35 = vsub.f32 0.0, %v9533_v3 }
 0x1b4   : > { %2452 = vrot.lane.b32.xlu0 %v9517_v56, %s9020_s27  ;;  %v945_v30 = vmul.f32 1.442695, %v9556_v40  ;;  %v736_v33 = vmul.f32 %v9218_v5, %v671_v29  ;;  %v7850_v52 = vor.u32 %v8144_v37, %v7847_v31  ;;  %v1543_v37 = vpop.permute.xlu1 %1542  ;;  %v9615_v29 = vpack.c.bf16 %v1902_v57, %v1902_v57 }
 0x1b5   : > { %v8419_v34 = vpop.eup %8418  ;;  %v1196_v41 = vmul.f32 1.442695, %v1155_v54  ;;  %1422 = vst.msk [vmem:[#allocation3 + $0x40] sm:$0xf] %vm1413_vm7, %v1389_v42  ;;  %v901_v47 = vsub.f32 0.0, %v9556_v40  ;;  %vm869_vm5 = vcmp.gt.f32.partialorder %v9556_v40, 20.0 }
 0x1b6   : > { %v8421_v48 = vpop.eup %8420  ;;  %v1250_v15 = vmul.f32 %v8419_v34, %v9432_v6  ;;  %8424 = vpow2.f32 %v945_v30  ;;  %v9571_v58 = vadd.f32 %v9224_v9, %v736_v33  ;;  %v2574_v30 = vld [vmem:[#allocation2 + $0x48] sm:$0xff]  ;;  %v1768_v33 = vpop.permute.xlu2 %1767 }
 0x1b7   : > { %v8423_v50 = vpop.eup %8422  ;;  %8426 = vpow2.f32 %v1196_v41  ;;  %v1038_v45 = vmul.f32 0.6931472, %v8421_v48  ;;  %8000 = vmatmul.msk.bf16.gmra.mxu2 %vm1274_vm1, %v7850_v52 }
 0x1b8   : > { %1325 = vst.msk [vmem:[#allocation2 + $0x79] sm:$0xff] %vm1274_vm1, %v1250_v15  ;;  %v996_v63 = vadd.f32 1.0, %v8423_v50  ;;  %v805_v1 = vmul.f32 %v9229_v14, %v9571_v58  ;;  %v3026_v6 = vld [vmem:[#allocation2 + $0x62] sm:$0xff]  ;;  %v3027_v60 = vld [vmem:[#allocation2 + $0x6a] sm:$0xff] }
 0x1b9   : > { %v1091_v23 = vsub.f32 0.0, %v1038_v45  ;;  %v9582_v62 = vpack.c.bf16 %v3026_v6, %v3026_v6  ;;  %v9584_v0 = vpack.c.bf16 %v3027_v60, %v3027_v60  ;;  %v1903_v7 = vld [vmem:[#allocation2 + $0x68] sm:$0xff] }
 0x1ba   : > { %8428 = vlog2.f32 %v996_v63  ;;  %v9587_v38 = vsub.f32 %v9235_v16, %v805_v1  ;;  %v9591_v17 = vpack.c.bf16 %v1903_v7, %v1903_v7 }
 0x1bb   : > { %1775 = vrot.lane.b32.xlu2 %v9465_v53, %s9016_s18  ;;  %v1123_v44 = vsel %vm867_vm15, %v899_v26, %v1091_v23  ;;  %2448 = vrot.lane.b32.xlu1 %v9467_v55, %s9020_s27  ;;  %v674_v8 = vpop.f32.mrf.mxu0  ;;  %3090 = vst.msk [vmem:[#allocation3 + $0x24] sm:$0xf] %vm1413_vm7, %v9582_v62  ;;  %v1349_v55 = vld [vmem:[#allocation2] sm:$0xff]  ;;  %v9634_v26 = vpack.c.bf16 %v2574_v30, %v2574_v30 }
 0x1bc   : > { %2674 = vrot.lane.b32.xlu0 %v9580_v43, %s9019_s26  ;;  %v8425_v10 = vpop.eup %8424  ;;  %v1156_v12 = vmul.f32 %v9308_v2, %v1123_v44  ;;  %v947_v22 = vmul.f32 1.442695, %v9587_v38  ;;  %3091 = vst.msk [vmem:[#allocation3 + $0x2c] sm:$0xf] %vm1413_vm7, %v9584_v0  ;;  %v737_v21 = vmul.f32 %v9218_v5, %v674_v8  ;;  %v1381_v51 = vpack.c.bf16 %v1349_v55, %v1349_v55  ;;  %v1453_v55 = vld [vmem:[#allocation2 + $0x51] sm:$0xff] }
 0x1bd   : > { %v8427_v53 = vpop.eup %8426  ;;  %v997_v13 = vadd.f32 1.0, %v8425_v10  ;;  %1423 = vst.msk [vmem:[#allocation3 + $0x48] sm:$0xf] %vm1413_vm7, %v9591_v17  ;;  %v9681_v30 = vpack.c.bf16 %v1453_v55, %v1453_v55  ;;  %vm870_vm6 = vcmp.gt.f32.partialorder %v9587_v38, 20.0 }
 0x1be   : > { %v1251_v18 = vmul.f32 %v8427_v53, %v9455_v32  ;;  %v1198_v39 = vmul.f32 1.442695, %v1156_v12  ;;  %8430 = vpow2.f32 %v947_v22  ;;  %7834 = vmatmul.msk.bf16.gmra.mxu0 %vm581_vm0, %v548_v24  ;;  %v9609_v25 = vadd.f32 %v9224_v9, %v737_v21  ;;  %1414 = vst.msk [vmem:[#allocation3] sm:$0xf] %vm1413_vm7, %v1381_v51 }
 0x1bf   : > { %8432 = vlog2.f32 %v997_v13  ;;  %1639 = vst.msk [vmem:[#allocation3] sm:$0xf] %vm1638_vm2, %v1543_v37  ;;  %v1359_v60 = vld [vmem:[#allocation2 + $0x78] sm:$0xff] }
 0x1c0   : > { %v8429_v28 = vpop.eup %8428  ;;  %1326 = vst.msk [vmem:[#allocation2 + $0x81] sm:$0xff] %vm1274_vm1, %v1251_v18  ;;  %8434 = vpow2.f32 %v1198_v39  ;;  %v806_v54 = vmul.f32 %v9229_v14, %v9609_v25  ;;  %v1391_v24 = vpack.c.bf16 %v1359_v60, %v1359_v60  ;;  %v9667_v39 = vld [vmem:[%s13669_s4] ss:$0 sm:$0xff]  ;;  %v2578_v51 = vld [vmem:[#allocation2 + $0x78] sm:$0xff] }
 0x1c1   : > { %v1040_v32 = vmul.f32 0.6931472, %v8429_v28  ;;  %1864 = vst.msk [vmem:[#allocation3] sm:$0xf] %vm1863_vm3, %v1768_v33  ;;  %v1350_v33 = vld [vmem:[#allocation2 + $0x8] sm:$0xff] }
 0x1c2   : > { %v8146_v31 = vld [vmem:[#allocation3 + $0x24] sm:$0xf]  ;;  %v9623_v34 = vsub.f32 %v9235_v16, %v806_v54  ;;  %1424 = vst.msk [vmem:[#allocation3 + $0x50] sm:$0xf] %vm1413_vm7, %v1391_v24  ;;  %v9676_v54 = vld [vmem:[%s13670_s5] ss:$0 sm:$0xff] }
 0x1c3   : > { %2223 = vrot.lane.b32.xlu2 %v9552_v27, %s9018_s25  ;;  %v1092_v52 = vsub.f32 0.0, %v1040_v32  ;;  %2670 = vrot.lane.b32.xlu1 %v9463_v49, %s9019_s26  ;;  %v676_v36 = vpop.f32.mrf.mxu0  ;;  %v7855_v41 = vld [vmem:[#allocation3 + $0x28] sm:$0xf0] }
 0x1c4   : > { %2004 = vrot.lane.b32.xlu0 %v9615_v29, %s9017_s24  ;;  %v8431_v27 = vpop.eup %8430  ;;  %v738_v42 = vmul.f32 %v9218_v5, %v676_v36  ;;  %v7858_v48 = vor.u32 %v8146_v31, %v7855_v41  ;;  %v949_v1 = vmul.f32 1.442695, %v9623_v34  ;;  %v2128_v5 = vld [vmem:[#allocation2 + $0x69] sm:$0xff]  ;;  %v9685_v36 = vpack.c.bf16 %v2578_v51, %v2578_v51 }
 0x1c5   : > { %v8433_v20 = vpop.eup %8432  ;;  %v1124_v15 = vsel %vm868_vm4, %v900_v35, %v1092_v52  ;;  %v998_v50 = vadd.f32 1.0, %v8431_v27  ;;  %v9649_v22 = vpack.c.bf16 %v2128_v5, %v2128_v5  ;;  %v902_v35 = vsub.f32 0.0, %v9587_v38 }
 0x1c6   : > { %v8435_v49 = vpop.eup %8434  ;;  %v1157_v45 = vmul.f32 %v9308_v2, %v1124_v15  ;;  %v1042_v63 = vmul.f32 0.6931472, %v8433_v20  ;;  %v9639_v6 = vadd.f32 %v9224_v9, %v738_v42  ;;  %v1382_v41 = vpack.c.bf16 %v1350_v33, %v1350_v33  ;;  %v1545_v15 = vpop.permute.xlu1 %1544 }
 0x1c7   : > { %v3028_v23 = vld [vmem:[#allocation2 + $0x7a] sm:$0xff]  ;;  %v3029_v7 = vld [vmem:[#allocation2 + $0x82] sm:$0xff]  ;;  %v1252_v3 = vmul.f32 %v8435_v49, %v9489_v11  ;;  %8436 = vlog2.f32 %v998_v50  ;;  %8001 = vmatmul.msk.bf16.gmra.mxu2 %vm1274_vm1, %v7858_v48  ;;  %vm871_vm8 = vcmp.gt.f32.partialorder %v9623_v34, 20.0  ;;  %vm2538_vm4 = vcmask 781952  }
 0x1c8   : > { %v9644_v44 = vpack.c.bf16 %v3028_v23, %v3028_v23  ;;  %v3061_v8 = vpack.c.bf16 %v3029_v7, %v3029_v7  ;;  %v1200_v10 = vmul.f32 1.442695, %v1157_v45  ;;  %v1093_v12 = vsub.f32 0.0, %v1042_v63  ;;  %v1360_v11 = vld [vmem:[#allocation2 + $0x80] sm:$0xff]  ;;  %1415 = vst.msk [vmem:[#allocation3 + $0x8] sm:$0xf] %vm1413_vm7, %v1382_v41 }
 0x1c9   : > { %1327 = vst.msk [vmem:[#allocation2 + $0x91] sm:$0xff] %vm1274_vm1, %v1252_v3  ;;  %8438 = vpow2.f32 %v949_v1  ;;  %v807_v9 = vmul.f32 %v9229_v14, %v9639_v6  ;;  %v1392_v18 = vpack.c.bf16 %v1360_v11, %v1360_v11  ;;  %v1905_v23 = vld [vmem:[#allocation2 + $0x80] sm:$0xff] }
 0x1ca   : > { %8440 = vpow2.f32 %v1200_v10  ;;  %3092 = vst.msk [vmem:[#allocation3 + $0x34] sm:$0xf] %vm1413_vm7, %v9644_v44  ;;  %v1125_v40 = vsel %vm869_vm5, %v901_v47, %v1093_v12  ;;  %v9710_v12 = vpack.c.bf16 %v1905_v23, %v1905_v23 }
 0x1cb   : > { %2672 = vrot.lane.b32.xlu2 %v9634_v26, %s9019_s26  ;;  %3093 = vst.msk [vmem:[#allocation3 + $0x3c] sm:$0xf] %vm1413_vm7, %v3061_v8  ;;  %v1158_v53 = vmul.f32 %v9308_v2, %v1125_v40  ;;  %v9658_v13 = vsub.f32 %v9235_v16, %v807_v9  ;;  %1554 = vrot.lane.b32.xlu1 %v9524_v61, %s9015_s17  ;;  %v679_v21 = vpop.f32.mrf.mxu0 }
 0x1cc   : > { %2231 = vrot.lane.b32.xlu0 %v9649_v22, %s9018_s25  ;;  %v739_v57 = vmul.f32 %v9667_v39, %v679_v21  ;;  %1425 = vst.msk [vmem:[#allocation3 + $0x58] sm:$0xf] %vm1413_vm7, %v1392_v18 }
 0x1cd   : > { %v8437_v37 = vpop.eup %8436  ;;  %v1202_v28 = vmul.f32 1.442695, %v1158_v53  ;;  %v951_v61 = vmul.f32 1.442695, %v9658_v13  ;;  %1640 = vst.msk [vmem:[#allocation3 + $0x8] sm:$0xf] %vm1638_vm2, %v1545_v15 }
 0x1ce   : > { %v1044_v32 = vmul.f32 0.6931472, %v8437_v37  ;;  %v9679_v31 = vadd.f32 %v9676_v54, %v739_v57  ;;  %v1770_v40 = vpop.permute.xlu1 %1769  ;;  %v903_v53 = vsub.f32 0.0, %v9623_v34  ;;  %v904_v15 = vsub.f32 0.0, %v9658_v13 }
 0x1cf   : > { %v8439_v52 = vpop.eup %8438  ;;  %8442 = vpow2.f32 %v1202_v28  ;;  %1865 = vst.msk [vmem:[#allocation3 + $0x8] sm:$0xf] %vm1863_vm3, %v1770_v40  ;;  %vm872_vm9 = vcmp.gt.f32.partialorder %v9658_v13, 20.0 }
 0x1d0   : > { %v8441_v27 = vpop.eup %8440  ;;  %v1094_v42 = vsub.f32 0.0, %v1044_v32  ;;  %v999_v48 = vadd.f32 1.0, %v8439_v52  ;;  %8444 = vpow2.f32 %v951_v61  ;;  %v808_v20 = vmul.f32 %v9229_v14, %v9679_v31  ;;  %v2131_v23 = vld [vmem:[#allocation2 + $0x91] sm:$0xff] }
 0x1d1   : > { %v1253_v47 = vmul.f32 %v8441_v27, %v9514_v46  ;;  %v8148_v50 = vld [vmem:[#allocation3 + $0x34] sm:$0xf] }
 0x1d2   : > { %v1126_v49 = vsel %vm870_vm6, %v902_v35, %v1094_v42  ;;  %8446 = vlog2.f32 %v999_v48  ;;  %v9692_v38 = vsub.f32 %v9235_v16, %v808_v20  ;;  %v7863_v45 = vld [vmem:[#allocation3 + $0x38] sm:$0xf0]  ;;  %vm2764_vm6 = vcmask 913152  }
 0x1d3   : > { %1556 = vrot.lane.b32.xlu2 %v9681_v30, %s9015_s17  ;;  %1328 = vst.msk [vmem:[#allocation2 + $0x99] sm:$0xff] %vm1274_vm1, %v1253_v47  ;;  %v1159_v63 = vmul.f32 %v9308_v2, %v1126_v49  ;;  %2000 = vrot.lane.b32.xlu1 %v9634_v26, %s9017_s24  ;;  %v681_v46 = vpop.f32.mrf.mxu0  ;;  %v7866_v1 = vor.u32 %v8148_v50, %v7863_v45 }
 0x1d4   : > { %2680 = vrot.lane.b32.xlu0 %v9685_v36, %s9019_s26  ;;  %v953_v5 = vmul.f32 1.442695, %v9692_v38  ;;  %v740_v60 = vmul.f32 %v9667_v39, %v681_v46  ;;  %vm873_vm10 = vcmp.gt.f32.partialorder %v9692_v38, 20.0 }
 0x1d5   : > { %v8443_v7 = vpop.eup %8442  ;;  %v1204_v3 = vmul.f32 1.442695, %v1159_v63  ;;  %v1454_v63 = vld [vmem:[#allocation2 + $0x61] sm:$0xff] }
 0x1d6   : > { %v8445_v24 = vpop.eup %8444  ;;  %v1254_v8 = vmul.f32 %v8443_v7, %v9544_v19  ;;  %8448 = vpow2.f32 %v953_v5  ;;  %v9707_v10 = vadd.f32 %v9676_v54, %v740_v60 }
 0x1d7   : > { %8450 = vpow2.f32 %v1204_v3  ;;  %v1000_v26 = vadd.f32 1.0, %v8445_v24  ;;  %8002 = vmatmul.msk.bf16.gmra.mxu2 %vm1274_vm1, %v7866_v1 }
 0x1d8   : > { %v8447_v9 = vpop.eup %8446  ;;  %1329 = vst.msk [vmem:[#allocation2 + $0xa9] sm:$0xff] %vm1274_vm1, %v1254_v8  ;;  %v809_v11 = vmul.f32 %v9229_v14, %v9707_v10 }
 0x1d9   : > { %v1046_v19 = vmul.f32 0.6931472, %v8447_v9  ;;  %8452 = vlog2.f32 %v1000_v26  ;;  %v1486_v26 = vpack.c.bf16 %v1454_v63, %v1454_v63 }
 0x1da   : > { %v3030_v21 = vld [vmem:[#allocation2 + $0x92] sm:$0xff]  ;;  %v3031_v55 = vld [vmem:[#allocation2 + $0x9a] sm:$0xff]  ;;  %v9719_v18 = vsub.f32 %v9235_v16, %v809_v11 }
 0x1db   : > { %1779 = vrot.lane.b32.xlu2 %v9519_v59, %s9016_s18  ;;  %v3062_v57 = vpack.c.bf16 %v3030_v21, %v3030_v21  ;;  %v9723_v51 = vpack.c.bf16 %v3031_v55, %v3031_v55  ;;  %v1095_v37 = vsub.f32 0.0, %v1046_v19  ;;  %1781 = vrot.lane.b32.xlu1 %v9517_v56, %s9016_s18  ;;  %v684_v28 = vpop.f32.mrf.mxu0  ;;  %v9762_v19 = vpack.c.bf16 %v2131_v23, %v2131_v23 }
 0x1dc   : > { %2010 = vrot.lane.b32.xlu0 %v9710_v12, %s9017_s24  ;;  %v8449_v61 = vpop.eup %8448  ;;  %v955_v34 = vmul.f32 1.442695, %v9719_v18  ;;  %v741_v35 = vmul.f32 %v9667_v39, %v684_v28  ;;  %vm874_vm11 = vcmp.gt.f32.partialorder %v9719_v18, 20.0 }
 0x1dd   : > { %v1547_v32 = vpop.permute.xlu2 %1546  ;;  %v8451_v33 = vpop.eup %8450  ;;  %3094 = vst.msk [vmem:[#allocation3 + $0x44] sm:$0xf] %vm1413_vm7, %v3062_v57  ;;  %v1127_v52 = vsel %vm871_vm8, %v903_v53, %v1095_v37  ;;  %v1001_v41 = vadd.f32 1.0, %v8449_v61  ;;  %v905_v37 = vsub.f32 0.0, %v9692_v38 }
 0x1de   : > { %3095 = vst.msk [vmem:[#allocation3 + $0x4c] sm:$0xf] %vm1413_vm7, %v9723_v51  ;;  %v1255_v56 = vmul.f32 %v8451_v33, %v9571_v58  ;;  %v1160_v27 = vmul.f32 %v9308_v2, %v1127_v52  ;;  %8454 = vpow2.f32 %v955_v34  ;;  %v9737_v42 = vadd.f32 %v9676_v54, %v741_v35 }
 0x1df   : > { %v8453_v48 = vpop.eup %8452  ;;  %8456 = vlog2.f32 %v1001_v41  ;;  %1641 = vst.msk [vmem:[#allocation3 + $0x10] sm:$0xf] %vm1638_vm2, %v1547_v32 }
 0x1e0   : > { %1330 = vst.msk [vmem:[#allocation2 + $0xb1] sm:$0xff] %vm1274_vm1, %v1255_v56  ;;  %v1206_v20 = vmul.f32 1.442695, %v1160_v27  ;;  %v1048_v47 = vmul.f32 0.6931472, %v8453_v48  ;;  %v810_v50 = vmul.f32 %v9229_v14, %v9737_v42 }
 0x1e2   : > { %8458 = vpow2.f32 %v1206_v20  ;;  %v1096_v58 = vsub.f32 0.0, %v1048_v47  ;;  %v9746_v49 = vsub.f32 %v9235_v16, %v810_v50  ;;  %v906_v50 = vsub.f32 0.0, %v9719_v18 }
 0x1e3   : > { %2002 = vrot.lane.b32.xlu2 %v9580_v43, %s9017_s24  ;;  %2227 = vrot.lane.b32.xlu1 %v9681_v30, %s9018_s25  ;;  %v686_v45 = vpop.f32.mrf.mxu0 }
 0x1e4   : > { %2458 = vrot.lane.b32.xlu0 %v9644_v44, %s9020_s27  ;;  %v8455_v46 = vpop.eup %8454  ;;  %v1128_v1 = vsel %vm872_vm9, %v904_v15, %v1096_v58  ;;  %v957_v13 = vmul.f32 1.442695, %v9746_v49  ;;  %v8150_v60 = vld [vmem:[#allocation3 + $0x44] sm:$0xf]  ;;  %v742_v24 = vmul.f32 %v9667_v39, %v686_v45  ;;  %vm875_vm14 = vcmp.gt.f32.partialorder %v9746_v49, 20.0 }
 0x1e5   : > { %v9755_v5 = vpop.permute.xlu2 %2217  ;;  %v8457_v7 = vpop.eup %8456  ;;  %v1161_v3 = vmul.f32 %v9308_v2, %v1128_v1  ;;  %v1002_v43 = vadd.f32 1.0, %v8455_v46  ;;  %v7871_v30 = vld [vmem:[#allocation3 + $0x48] sm:$0xf0]  ;;  %v2580_v58 = vld [vmem:[#allocation2 + $0x90] sm:$0xff] }
 0x1e6   : > { %v1050_v8 = vmul.f32 0.6931472, %v8457_v7  ;;  %8460 = vpow2.f32 %v957_v13  ;;  %v7874_v44 = vor.u32 %v8150_v60, %v7871_v30  ;;  %v9760_v53 = vadd.f32 %v9676_v54, %v742_v24  ;;  %v1362_v7 = vld [vmem:[#allocation2 + $0x98] sm:$0xff] }
 0x1e7   : > { %v3032_v9 = vld [vmem:[#allocation2 + $0xaa] sm:$0xff]  ;;  %v3033_v11 = vld [vmem:[#allocation2 + $0xb2] sm:$0xff]  ;;  %v1208_v40 = vmul.f32 1.442695, %v1161_v3  ;;  %8462 = vlog2.f32 %v1002_v43  ;;  %v9793_v13 = vpack.c.bf16 %v2580_v58, %v2580_v58 }
 0x1e8   : > { %v8459_v21 = vpop.eup %8458  ;;  %v3064_v55 = vpack.c.bf16 %v3032_v9, %v3032_v9  ;;  %v3065_v57 = vpack.c.bf16 %v3033_v11, %v3033_v11  ;;  %v1097_v28 = vsub.f32 0.0, %v1050_v8  ;;  %8003 = vmatmul.msk.bf16.gmra.mxu2 %vm1274_vm1, %v7874_v44  ;;  %v811_v34 = vmul.f32 %v9229_v14, %v9760_v53 }
 0x1e9   : > { %v1256_v61 = vmul.f32 %v8459_v21, %v9609_v25  ;;  %8464 = vpow2.f32 %v1208_v40  ;;  %1426 = vst.msk [vmem:[#allocation3 + $0x60] sm:$0xf] %vm1413_vm7, %v9793_v13 }
 0x1ea   : > { %3096 = vst.msk [vmem:[#allocation3 + $0x54] sm:$0xf] %vm1413_vm7, %v3064_v55  ;;  %v1129_v35 = vsel %vm873_vm10, %v905_v37, %v1097_v28  ;;  %v9776_v33 = vsub.f32 %v9235_v16, %v811_v34 }
 0x1eb   : > { %2450 = vrot.lane.b32.xlu2 %v9519_v59, %s9020_s27  ;;  %3097 = vst.msk [vmem:[#allocation3 + $0x5c] sm:$0xf] %vm1413_vm7, %v3065_v57  ;;  %v1162_v32 = vmul.f32 %v9308_v2, %v1129_v35  ;;  %1558 = vrot.lane.b32.xlu1 %v1486_v26, %s9015_s17  ;;  %v689_v25 = vpop.f32.mrf.mxu0  ;;  %v907_v35 = vsub.f32 0.0, %v9746_v49 }
 0x1ec   : > { %2237 = vrot.lane.b32.xlu0 %v9762_v19, %s9018_s25  ;;  %v8461_v38 = vpop.eup %8460  ;;  %1331 = vst.msk [vmem:[#allocation2 + $0xc1] sm:$0xff] %vm1274_vm1, %v1256_v61  ;;  %v743_v52 = vmul.f32 %v9667_v39, %v689_v25  ;;  %v959_v20 = vmul.f32 1.442695, %v9776_v33  ;;  %vm876_vm15 = vcmp.gt.f32.partialorder %v9776_v33, 20.0 }
 0x1ed   : > { %v1549_v41 = vpop.permute.xlu2 %1548  ;;  %v8463_v59 = vpop.eup %8462  ;;  %v1210_v56 = vmul.f32 1.442695, %v1162_v32  ;;  %v1003_v27 = vadd.f32 1.0, %v8461_v38 }
 0x1ee   : > { %v1052_v48 = vmul.f32 0.6931472, %v8463_v59  ;;  %v9785_v15 = vadd.f32 %v9676_v54, %v743_v52  ;;  %1642 = vst.msk [vmem:[#allocation3 + $0x18] sm:$0xf] %vm1638_vm2, %v1549_v41 }
 0x1ef   : > { %v8465_v47 = vpop.eup %8464  ;;  %8466 = vpow2.f32 %v1210_v56 }
 0x1f0   : > { %v1257_v45 = vmul.f32 %v8465_v47, %v9639_v6  ;;  %v1098_v63 = vsub.f32 0.0, %v1052_v48  ;;  %8468 = vlog2.f32 %v1003_v27  ;;  %v812_v46 = vmul.f32 %v9229_v14, %v9785_v15 }
 0x1f1   : > { %8470 = vpow2.f32 %v959_v20  ;;  %v8152_v1 = vld [vmem:[#allocation3 + $0x54] sm:$0xf] }
 0x1f2   : > { %1332 = vst.msk [vmem:[#allocation2 + $0xc9] sm:$0xff] %vm1274_vm1, %v1257_v45  ;;  %v1130_v60 = vsel %vm874_vm11, %v906_v50, %v1098_v63  ;;  %v9797_v23 = vsub.f32 %v9235_v16, %v812_v46  ;;  %v7879_v6 = vld [vmem:[#allocation3 + $0x58] sm:$0xf0] }
 0x1f3   : > { %2229 = vrot.lane.b32.xlu2 %v1486_v26, %s9018_s25  ;;  %v1163_v3 = vmul.f32 %v9308_v2, %v1130_v60  ;;  %2676 = vrot.lane.b32.xlu1 %v9615_v29, %s9019_s26  ;;  %v691_v18 = vpop.f32.mrf.mxu0  ;;  %v7882_v44 = vor.u32 %v8152_v1, %v7879_v6  ;;  %v2581_v26 = vld [vmem:[#allocation2 + $0x98] sm:$0xff]  ;;  %v1394_v29 = vpack.c.bf16 %v1362_v7, %v1362_v7  ;;  %v2584_v45 = vld [vmem:[#allocation2 + $0xc0] sm:$0xff] }
 0x1f4   : > { %2464 = vrot.lane.b32.xlu0 %v9723_v51, %s9020_s27  ;;  %v961_v43 = vmul.f32 1.442695, %v9797_v23  ;;  %v744_v24 = vmul.f32 %v9667_v39, %v691_v18  ;;  %v1993_v30 = vpop.permute.xlu0 %1992  ;;  %v9815_v37 = vpack.c.bf16 %v2581_v26, %v2581_v26  ;;  %v9852_v6 = vpack.c.bf16 %v2584_v45, %v2584_v45 }
 0x1f5   : > { %v1772_v8 = vpop.permute.xlu2 %1771  ;;  %v8467_v9 = vpop.eup %8466  ;;  %v1212_v11 = vmul.f32 1.442695, %v1163_v3  ;;  %2089 = vst.msk [vmem:[#allocation3] sm:$0xf] %vm2088_vm12, %v1993_v30  ;;  %v908_v30 = vsub.f32 0.0, %v9776_v33  ;;  %vm877_vm5 = vcmp.gt.f32.partialorder %v9797_v23, 20.0 }
 0x1f6   : > { %v8469_v40 = vpop.eup %8468  ;;  %v1258_v51 = vmul.f32 %v8467_v9, %v9679_v31  ;;  %8472 = vpow2.f32 %v961_v43  ;;  %v9812_v21 = vadd.f32 %v9676_v54, %v744_v24  ;;  %1866 = vst.msk [vmem:[#allocation3 + $0x10] sm:$0xf] %vm1863_vm3, %v1772_v8  ;;  %v2134_v24 = vld [vmem:[#allocation2 + $0xb1] sm:$0xff] }
 0x1f7   : > { %v8471_v55 = vpop.eup %8470  ;;  %8474 = vpow2.f32 %v1212_v11  ;;  %v1054_v57 = vmul.f32 0.6931472, %v8469_v40  ;;  %2314 = vst.msk [vmem:[#allocation3] sm:$0xf] %vm2313_vm13, %v9755_v5 }
 0x1f8   : > { %1333 = vst.msk [vmem:[#allocation2 + $0xd9] sm:$0xff] %vm1274_vm1, %v1258_v51  ;;  %v1004_v28 = vadd.f32 1.0, %v8471_v55  ;;  %v813_v31 = vmul.f32 %v9229_v14, %v9812_v21  ;;  %8004 = vmatmul.msk.bf16.gmra.mxu2 %vm1274_vm1, %v7882_v44 }
 0x1f9   : > { %v3034_v61 = vld [vmem:[#allocation2 + $0xc2] sm:$0xff]  ;;  %v3035_v34 = vld [vmem:[#allocation2 + $0xca] sm:$0xff]  ;;  %v1099_v32 = vsub.f32 0.0, %v1054_v57  ;;  %1427 = vst.msk [vmem:[#allocation3 + $0x68] sm:$0xf] %vm1413_vm7, %v1394_v29 }
 0x1fa   : > { %v9826_v25 = vpack.c.bf16 %v3034_v61, %v3034_v61  ;;  %v3067_v5 = vpack.c.bf16 %v3035_v34, %v3035_v34  ;;  %8476 = vlog2.f32 %v1004_v28  ;;  %v9829_v38 = vsub.f32 %v9235_v16, %v813_v31  ;;  %1430 = vst.msk [vmem:[#allocation3 + $0x80] sm:$0xf] %vm1413_vm7, %v9852_v6 }
 0x1fb   : > { %1560 = vrot.lane.b32.xlu2 %v9649_v22, %s9015_s17  ;;  %v1131_v52 = vsel %vm875_vm14, %v907_v35, %v1099_v32  ;;  %1785 = vrot.lane.b32.xlu1 %v9584_v0, %s9016_s18  ;;  %v694_v49 = vpop.f32.mrf.mxu0  ;;  %v1908_v22 = vld [vmem:[#allocation2 + $0xa8] sm:$0xff]  ;;  %v9878_v34 = vpack.c.bf16 %v2134_v24, %v2134_v24 }
 0x1fc   : > { %2686 = vrot.lane.b32.xlu0 %v9815_v37, %s9019_s26  ;;  %v8473_v41 = vpop.eup %8472  ;;  %3098 = vst.msk [vmem:[#allocation3 + $0x64] sm:$0xf] %vm1413_vm7, %v9826_v25  ;;  %v1164_v59 = vmul.f32 %v9308_v2, %v1131_v52  ;;  %v963_v56 = vmul.f32 1.442695, %v9829_v38  ;;  %v2220_v27 = vpop.permute.xlu0 %2219  ;;  %v745_v50 = vmul.f32 %v9667_v39, %v694_v49  ;;  %v9850_v60 = vpack.c.bf16 %v1908_v22, %v1908_v22 }
 0x1fd   : > { %v9841_v48 = vpop.permute.xlu2 %2444  ;;  %v8475_v20 = vpop.eup %8474  ;;  %3099 = vst.msk [vmem:[#allocation3 + $0x6c] sm:$0xf] %vm1413_vm7, %v3067_v5  ;;  %v1005_v47 = vadd.f32 1.0, %v8473_v41  ;;  %vm878_vm8 = vcmp.gt.f32.partialorder %v9829_v38, 20.0 }
 0x1fe   : > { %v1774_v58 = vpop.permute.xlu1 %1773  ;;  %v1259_v63 = vmul.f32 %v8475_v20, %v9707_v10  ;;  %v1214_v46 = vmul.f32 1.442695, %v1164_v59  ;;  %8478 = vpow2.f32 %v963_v56  ;;  %v9848_v1 = vadd.f32 %v9676_v54, %v745_v50 }
 0x1ff   : > { %1867 = vst.msk [vmem:[#allocation3 + $0x18] sm:$0xf] %vm1863_vm3, %v1774_v58  ;;  %8480 = vlog2.f32 %v1005_v47  ;;  %v1912_v7 = vld [vmem:[#allocation2 + $0xd8] sm:$0xff]  ;;  %v909_v56 = vsub.f32 0.0, %v9797_v23 }
 0x200   : > { %v8477_v3 = vpop.eup %8476  ;;  %1334 = vst.msk [vmem:[#allocation2 + $0xe1] sm:$0xff] %vm1274_vm1, %v1259_v63  ;;  %8482 = vpow2.f32 %v1214_v46  ;;  %v9855_v18 = vpack.c.bf16 %v1912_v7, %v1912_v7  ;;  %v814_v43 = vmul.f32 %v9229_v14, %v9848_v1 }
 0x201   : > { %v1056_v10 = vmul.f32 0.6931472, %v8477_v3 }
 0x202   : > { %1432 = vst.msk [vmem:[#allocation3 + $0x90] sm:$0xf] %vm1413_vm7, %v9855_v18  ;;  %v9867_v44 = vsub.f32 %v9235_v16, %v814_v43 }
 0x203   : > { %1783 = vrot.lane.b32.xlu2 %v9582_v62, %s9016_s18  ;;  %v1100_v8 = vsub.f32 0.0, %v1056_v10  ;;  %2006 = vrot.lane.b32.xlu1 %v9591_v17, %s9017_s24  ;;  %v696_v26 = vpop.f32.mrf.mxu0  ;;  %v8154_v40 = vld [vmem:[#allocation3 + $0x64] sm:$0xf] }
 0x204   : > { %2016 = vrot.lane.b32.xlu0 %v9850_v60, %s9017_s24  ;;  %v8479_v9 = vpop.eup %8478  ;;  %v746_v11 = vmul.f32 %v9667_v39, %v696_v26  ;;  %v7887_v51 = vld [vmem:[#allocation3 + $0x68] sm:$0xf0]  ;;  %v965_v5 = vmul.f32 1.442695, %v9867_v44  ;;  %vm879_vm9 = vcmp.gt.f32.partialorder %v9867_v44, 20.0 }
 0x205   : > { %v1997_v29 = vpop.permute.xlu2 %1996  ;;  %v8481_v55 = vpop.eup %8480  ;;  %v1132_v57 = vsel %vm876_vm15, %v908_v30, %v1100_v8  ;;  %v1006_v28 = vadd.f32 1.0, %v8479_v9  ;;  %v7890_v22 = vor.u32 %v8154_v40, %v7887_v51  ;;  %v1909_v51 = vld [vmem:[#allocation2 + $0xb0] sm:$0xff] }
 0x206   : > { %v1995_v31 = vpop.permute.xlu1 %1994  ;;  %v9875_v61 = vpop.permute.xlu0 %2668  ;;  %2091 = vst.msk [vmem:[#allocation3 + $0x10] sm:$0xf] %vm2088_vm12, %v1997_v29  ;;  %v1165_v32 = vmul.f32 %v9308_v2, %v1132_v57  ;;  %v1058_v33 = vmul.f32 0.6931472, %v8481_v55  ;;  %v9883_v52 = vadd.f32 %v9676_v54, %v746_v11  ;;  %v910_v29 = vsub.f32 0.0, %v9829_v38 }
 0x207   : > { %v8483_v35 = vpop.eup %8482  ;;  %2090 = vst.msk [vmem:[#allocation3 + $0x8] sm:$0xf] %vm2088_vm12, %v1995_v31  ;;  %v3036_v49 = vld [vmem:[#allocation2 + $0xda] sm:$0xff]  ;;  %v3037_v41 = vld [vmem:[#allocation2 + $0xe2] sm:$0xff]  ;;  %8484 = vlog2.f32 %v1006_v28 }
 0x208   : > { %v1260_v59 = vmul.f32 %v8483_v35, %v9737_v42  ;;  %2315 = vst.msk [vmem:[#allocation3 + $0x8] sm:$0xf] %vm2313_vm13, %v2220_v27  ;;  %v3068_v20 = vpack.c.bf16 %v3036_v49, %v3036_v49  ;;  %v9889_v47 = vpack.c.bf16 %v3037_v41, %v3037_v41  ;;  %v1216_v50 = vmul.f32 1.442695, %v1165_v32  ;;  %8005 = vmatmul.msk.bf16.gmra.mxu2 %vm1274_vm1, %v7890_v22  ;;  %v1368_v63 = vld [vmem:[#allocation2 + $0xe0] sm:$0xff]  ;;  %v1363_v35 = vld [vmem:[#allocation2 + $0xa8] sm:$0xff] }
 0x209   : > { %v1101_v58 = vsub.f32 0.0, %v1058_v33  ;;  %2540 = vst.msk [vmem:[#allocation3 + $0x8] sm:$0xf] %vm2538_vm4, %v9841_v48  ;;  %8486 = vpow2.f32 %v965_v5  ;;  %v815_v42 = vmul.f32 %v9229_v14, %v9883_v52  ;;  %v1400_v9 = vpack.c.bf16 %v1368_v63, %v1368_v63 }
 0x20a   : > { %1335 = vst.msk [vmem:[#allocation2 + $0xf1] sm:$0xff] %vm1274_vm1, %v1260_v59  ;;  %8488 = vpow2.f32 %v1216_v50  ;;  %v9928_v49 = vpack.c.bf16 %v1909_v51, %v1909_v51 }
 0x20b   : > { %3100 = vst.msk [vmem:[#allocation3 + $0x74] sm:$0xf] %vm1413_vm7, %v3068_v20  ;;  %v1133_v27 = vsel %vm877_vm5, %v909_v56, %v1101_v58  ;;  %2456 = vrot.lane.b32.xlu2 %v9584_v0, %s9020_s27  ;;  %v9905_v23 = vsub.f32 %v9235_v16, %v815_v42  ;;  %2454 = vrot.lane.b32.xlu1 %v9582_v62, %s9020_s27  ;;  %v699_v45 = vpop.f32.mrf.mxu0  ;;  %v1462_v0 = vld [vmem:[#allocation2 + $0xc1] sm:$0xff]  ;;  %v1456_v62 = vld [vmem:[#allocation2 + $0x79] sm:$0xff] }
 0x20c   : > { %3101 = vst.msk [vmem:[#allocation3 + $0x7c] sm:$0xf] %vm1413_vm7, %v9889_v47  ;;  %v1166_v48 = vmul.f32 %v9308_v2, %v1133_v27  ;;  %2243 = vrot.lane.b32.xlu0 %v9878_v34, %s9018_s25  ;;  %v747_v46 = vmul.f32 %v9667_v39, %v699_v45  ;;  %v9919_v40 = vpack.c.bf16 %v1462_v0, %v1462_v0 }
 0x20d   : > { %v1553_v7 = vpop.permute.xlu2 %1552  ;;  %v8485_v3 = vpop.eup %8484  ;;  %v967_v43 = vmul.f32 1.442695, %v9905_v23  ;;  %v1488_v33 = vpack.c.bf16 %v1456_v62, %v1456_v62  ;;  %1433 = vst.msk [vmem:[#allocation3 + $0x98] sm:$0xf] %vm1413_vm7, %v1400_v9  ;;  %vm880_vm10 = vcmp.gt.f32.partialorder %v9905_v23, 20.0 }
 0x20e   : > { %v1218_v10 = vmul.f32 1.442695, %v1166_v48  ;;  %v2443_v24 = vpop.permute.xlu1 %2442  ;;  %v1999_v30 = vpop.permute.xlu0 %1998  ;;  %v1060_v8 = vmul.f32 0.6931472, %v8485_v3  ;;  %v9914_v26 = vadd.f32 %v9676_v54, %v747_v46  ;;  %1644 = vst.msk [vmem:[#allocation3 + $0x28] sm:$0xf] %vm1638_vm2, %v1553_v7 }
 0x20f   : > { %2539 = vst.msk [vmem:[#allocation3] sm:$0xf] %vm2538_vm4, %v2443_v24  ;;  %v8487_v11 = vpop.eup %8486 }
 0x210   : > { %8490 = vpow2.f32 %v1218_v10  ;;  %2092 = vst.msk [vmem:[#allocation3 + $0x18] sm:$0xf] %vm2088_vm12, %v1999_v30  ;;  %v8489_v55 = vpop.eup %8488  ;;  %v1102_v57 = vsub.f32 0.0, %v1060_v8  ;;  %v1007_v28 = vadd.f32 1.0, %v8487_v11  ;;  %v816_v31 = vmul.f32 %v9229_v14, %v9914_v26 }
 0x211   : > { %8492 = vpow2.f32 %v967_v43  ;;  %v1261_v32 = vmul.f32 %v8489_v55, %v9760_v53  ;;  %2765 = vst.msk [vmem:[#allocation3] sm:$0xf] %vm2764_vm6, %v9875_v61  ;;  %v1914_v5 = vld [vmem:[#allocation2 + $0xf0] sm:$0xff]  ;;  %v1395_v61 = vpack.c.bf16 %v1363_v35, %v1363_v35  ;;  %v911_v11 = vsub.f32 0.0, %v9867_v44 }
 0x212   : > { %v1134_v41 = vsel %vm878_vm8, %v910_v29, %v1102_v57  ;;  %8494 = vlog2.f32 %v1007_v28  ;;  %v9931_v59 = vsub.f32 %v9235_v16, %v816_v31  ;;  %v8156_v56 = vld [vmem:[#allocation3 + $0x74] sm:$0xf]  ;;  %1429 = vst.msk [vmem:[#allocation3 + $0x78] sm:$0xf] %vm1413_vm7, %v9928_v49  ;;  %v9945_v63 = vpack.c.bf16 %v1914_v5, %v1914_v5 }
 0x213   : > { %2678 = vrot.lane.b32.xlu2 %v9591_v17, %s9019_s26  ;;  %v7895_v22 = vld [vmem:[#allocation3 + $0x78] sm:$0xf0]  ;;  %1336 = vst.msk [vmem:[#allocation2 + $0xf9] sm:$0xff] %vm1274_vm1, %v1261_v32  ;;  %v1167_v53 = vmul.f32 %v9308_v2, %v1134_v41  ;;  %1562 = vrot.lane.b32.xlu1 %v1488_v33, %s9015_s17  ;;  %v701_v38 = vpop.f32.mrf.mxu0 }
 0x214   : > { %1574 = vrot.lane.b32.xlu0 %v9919_v40, %s9015_s17  ;;  %v969_v20 = vmul.f32 1.442695, %v9931_v59  ;;  %v748_v50 = vmul.f32 %v9667_v39, %v701_v38  ;;  %v7898_v45 = vor.u32 %v8156_v56, %v7895_v22  ;;  %1428 = vst.msk [vmem:[#allocation3 + $0x70] sm:$0xf] %vm1413_vm7, %v1395_v61  ;;  %v1457_v22 = vld [vmem:[#allocation2 + $0x81] sm:$0xff]  ;;  %vm881_vm11 = vcmp.gt.f32.partialorder %v9931_v59, 20.0 }
 0x215   : > { %v1776_v17 = vpop.permute.xlu2 %1775  ;;  %v1220_v42 = vmul.f32 1.442695, %v1167_v53  ;;  %1434 = vst.msk [vmem:[#allocation3 + $0xa0] sm:$0xf] %vm1413_vm7, %v9945_v63  ;;  %v1682_v61 = vld [vmem:[#allocation2 + $0x82] sm:$0xff] }
 0x216   : > { %v8491_v58 = vpop.eup %8490  ;;  %v1551_v27 = vpop.permute.xlu1 %1550  ;;  %8496 = vpow2.f32 %v969_v20  ;;  %v9950_v0 = vadd.f32 %v9676_v54, %v748_v50 }
 0x217   : > { %v2447_v48 = vpop.permute.xlu0 %2446  ;;  %v8493_v46 = vpop.eup %8492  ;;  %v1262_v7 = vmul.f32 %v8491_v58, %v9785_v15  ;;  %1643 = vst.msk [vmem:[#allocation3 + $0x20] sm:$0xf] %vm1638_vm2, %v1551_v27  ;;  %8498 = vpow2.f32 %v1220_v42  ;;  %v9989_v27 = vpack.c.bf16 %v1457_v22, %v1457_v22 }
 0x218   : > { %v1008_v3 = vadd.f32 1.0, %v8493_v46  ;;  %1868 = vst.msk [vmem:[#allocation3 + $0x20] sm:$0xf] %vm1863_vm3, %v1776_v17  ;;  %v8495_v10 = vpop.eup %8494  ;;  %v817_v43 = vmul.f32 %v9229_v14, %v9950_v0  ;;  %8006 = vmatmul.msk.bf16.gmra.mxu2 %vm1274_vm1, %v7898_v45  ;;  %v1714_v45 = vpack.c.bf16 %v1682_v61, %v1682_v61 }
 0x219   : > { %1337 = vst.msk [vmem:[#allocation2 + $0x109] sm:$0xff] %vm1274_vm1, %v1262_v7  ;;  %v1062_v24 = vmul.f32 0.6931472, %v8495_v10  ;;  %v912_v7 = vsub.f32 0.0, %v9905_v23 }
 0x21a   : > { %8500 = vlog2.f32 %v1008_v3  ;;  %v3038_v15 = vld [vmem:[#allocation2 + $0xf2] sm:$0xff]  ;;  %v3039_v30 = vld [vmem:[#allocation2 + $0xfa] sm:$0xff]  ;;  %v9961_v8 = vsub.f32 %v9235_v16, %v817_v43 }
 0x21b   : > { %2008 = vrot.lane.b32.xlu2 %v9685_v36, %s9017_s24  ;;  %v3070_v62 = vpack.c.bf16 %v3038_v15, %v3038_v15  ;;  %v3071_v9 = vpack.c.bf16 %v3039_v30, %v3039_v30  ;;  %v1103_v29 = vsub.f32 0.0, %v1062_v24  ;;  %2233 = vrot.lane.b32.xlu1 %v1488_v33, %s9018_s25  ;;  %v704_v51 = vpop.f32.mrf.mxu0  ;;  %v1911_v36 = vld [vmem:[#allocation2 + $0xc8] sm:$0xff]  ;;  %v1915_v35 = vld [vmem:[#allocation2 + $0xf8] sm:$0xff] }
 0x21c   : > { %2692 = vrot.lane.b32.xlu0 %v9852_v6, %s9019_s26  ;;  %v8497_v55 = vpop.eup %8496  ;;  %v971_v57 = vmul.f32 1.442695, %v9961_v8  ;;  %v749_v28 = vmul.f32 %v9667_v39, %v704_v51  ;;  %v9982_v50 = vpack.c.bf16 %v1911_v36, %v1911_v36  ;;  %v9984_v17 = vpack.c.bf16 %v1915_v35, %v1915_v35 }
 0x21d   : > { %v2224_v31 = vpop.permute.xlu2 %2223  ;;  %v8499_v32 = vpop.eup %8498  ;;  %3102 = vst.msk [vmem:[#allocation3 + $0x84] sm:$0xf] %vm1413_vm7, %v3070_v62  ;;  %v1135_v5 = vsel %vm879_vm9, %v911_v11, %v1103_v29  ;;  %v1009_v41 = vadd.f32 1.0, %v8497_v55  ;;  %vm882_vm14 = vcmp.gt.f32.partialorder %v9961_v8, 20.0 }
 0x21e   : > { %v2222_v33 = vpop.permute.xlu1 %2221  ;;  %3103 = vst.msk [vmem:[#allocation3 + $0x8c] sm:$0xf] %vm1413_vm7, %v3071_v9  ;;  %v1263_v44 = vmul.f32 %v8499_v32, %v9812_v21  ;;  %v1168_v53 = vmul.f32 %v9308_v2, %v1135_v5  ;;  %8502 = vpow2.f32 %v971_v57  ;;  %v9979_v38 = vadd.f32 %v9676_v54, %v749_v28  ;;  %v1681_v9 = vld [vmem:[#allocation2 + $0x7a] sm:$0xff] }
 0x21f   : > { %v9973_v56 = vpop.permute.xlu0 %2225  ;;  %8504 = vlog2.f32 %v1009_v41  ;;  %2316 = vst.msk [vmem:[#allocation3 + $0x10] sm:$0xf] %vm2313_vm13, %v2222_v33  ;;  %v1713_v22 = vpack.c.bf16 %v1681_v9, %v1681_v9 }
 0x220   : > { %v8501_v20 = vpop.eup %8500  ;;  %1338 = vst.msk [vmem:[#allocation2 + $0x111] sm:$0xff] %vm1274_vm1, %v1263_v44  ;;  %v1222_v58 = vmul.f32 1.442695, %v1168_v53  ;;  %v818_v21 = vmul.f32 %v9229_v14, %v9979_v38  ;;  %v2590_v46 = vld [vmem:[#allocation2 + $0x108] sm:$0xff] }
 0x221   : > { %v1064_v42 = vmul.f32 0.6931472, %v8501_v20  ;;  %2541 = vst.msk [vmem:[#allocation3 + $0x10] sm:$0xf] %vm2538_vm4, %v2447_v48  ;;  %v10006_v11 = vpack.c.bf16 %v2590_v46, %v2590_v46  ;;  %v913_v20 = vsub.f32 0.0, %v9931_v59 }
 0x222   : > { %8506 = vpow2.f32 %v1222_v58  ;;  %v9994_v10 = vsub.f32 %v9235_v16, %v818_v21  ;;  %2317 = vst.msk [vmem:[#allocation3 + $0x18] sm:$0xf] %vm2313_vm13, %v2224_v31 }
 0x223   : > { %v1104_v3 = vsub.f32 0.0, %v1064_v42  ;;  %1564 = vrot.lane.b32.xlu2 %v9989_v27, %s9015_s17  ;;  %1789 = vrot.lane.b32.xlu1 %v1714_v45, %s9016_s18  ;;  %v706_v48 = vpop.f32.mrf.mxu0  ;;  %1435 = vst.msk [vmem:[#allocation3 + $0xa8] sm:$0xf] %vm1413_vm7, %v9984_v17 }
 0x224   : > { %2022 = vrot.lane.b32.xlu0 %v9982_v50, %s9017_s24  ;;  %v8503_v43 = vpop.eup %8502  ;;  %v973_v15 = vmul.f32 1.442695, %v9994_v10  ;;  %v8158_v62 = vld [vmem:[#allocation3 + $0x84] sm:$0xf]  ;;  %v750_v55 = vmul.f32 %v9667_v39, %v706_v48  ;;  %1436 = vst.msk [vmem:[#allocation3 + $0xb0] sm:$0xf] %vm1413_vm7, %v10006_v11 }
 0x225   : > { %v1136_v24 = vsel %vm880_vm10, %v912_v7, %v1104_v3  ;;  %v2673_v30 = vpop.permute.xlu2 %2672  ;;  %v8505_v29 = vpop.eup %8504  ;;  %v1010_v51 = vadd.f32 1.0, %v8503_v43  ;;  %v7903_v31 = vld [vmem:[#allocation3 + $0x88] sm:$0xf0]  ;;  %vm883_vm15 = vcmp.gt.f32.partialorder %v9994_v10, 20.0 }
 0x226   : > { %v1169_v23 = vmul.f32 %v9308_v2, %v1136_v24  ;;  %v1778_v57 = vpop.permute.xlu1 %1777  ;;  %2767 = vst.msk [vmem:[#allocation3 + $0x10] sm:$0xf] %vm2764_vm6, %v2673_v30  ;;  %v1066_v36 = vmul.f32 0.6931472, %v8505_v29  ;;  %8508 = vpow2.f32 %v973_v15  ;;  %v7906_v35 = vor.u32 %v8158_v62, %v7903_v31 }
 0x227   : > { %v10011_v28 = vpop.permute.xlu0 %2452  ;;  %1869 = vst.msk [vmem:[#allocation3 + $0x28] sm:$0xf] %vm1863_vm3, %v1778_v57  ;;  %v3040_v32 = vld [vmem:[#allocation2 + $0x10a] sm:$0xff]  ;;  %v3041_v5 = vld [vmem:[#allocation2 + $0x112] sm:$0xff]  ;;  %8510 = vlog2.f32 %v1010_v51  ;;  %v10015_v33 = vadd.f32 %v9676_v54, %v750_v55 }
 0x228   : > { %v1224_v41 = vmul.f32 1.442695, %v1169_v23  ;;  %v8507_v44 = vpop.eup %8506  ;;  %v10017_v53 = vpack.c.bf16 %v3040_v32, %v3040_v32  ;;  %v3073_v61 = vpack.c.bf16 %v3041_v5, %v3041_v5  ;;  %v1105_v58 = vsub.f32 0.0, %v1066_v36  ;;  %8007 = vmatmul.msk.bf16.gmra.mxu2 %vm1274_vm1, %v7906_v35  ;;  %v1372_v7 = vld [vmem:[#allocation2 + $0x110] sm:$0xff]  ;;  %v2137_v23 = vld [vmem:[#allocation2 + $0xd9] sm:$0xff] }
 0x229   : > { %v1264_v42 = vmul.f32 %v8507_v44, %v9848_v1  ;;  %v819_v21 = vmul.f32 %v9229_v14, %v10015_v33  ;;  %v10040_v51 = vpack.c.bf16 %v1372_v7, %v1372_v7 }
 0x22a   : > { %8512 = vpow2.f32 %v1224_v41  ;;  %3104 = vst.msk [vmem:[#allocation3 + $0x94] sm:$0xf] %vm1413_vm7, %v10017_v53  ;;  %v1137_v46 = vsel %vm881_vm11, %v913_v20, %v1105_v58  ;;  %v10073_v20 = vld [vmem:[%s13669_s4] ss:$0 sm:$0xff] }
 0x22b   : > { %1787 = vrot.lane.b32.xlu2 %v1713_v22, %s9016_s18  ;;  %3105 = vst.msk [vmem:[#allocation3 + $0x9c] sm:$0xf] %vm1413_vm7, %v3073_v61  ;;  %v1170_v3 = vmul.f32 %v9308_v2, %v1137_v46  ;;  %v10033_v1 = vsub.f32 %v9235_v16, %v819_v21  ;;  %2460 = vrot.lane.b32.xlu1 %v1714_v45, %s9020_s27  ;;  %v709_v59 = vpop.f32.mrf.mxu0 }
 0x22c   : > { %2470 = vrot.lane.b32.xlu0 %v9826_v25, %s9020_s27  ;;  %v8509_v48 = vpop.eup %8508  ;;  %1339 = vst.msk [vmem:[#allocation2 + $0x121] sm:$0xff] %vm1274_vm1, %v1264_v42  ;;  %v751_v43 = vmul.f32 %v9667_v39, %v709_v59  ;;  %v914_v39 = vsub.f32 0.0, %v9961_v8 }
 0x22d   : > { %v1557_v24 = vpop.permute.xlu2 %1556  ;;  %v8511_v15 = vpop.eup %8510  ;;  %v1226_v30 = vmul.f32 1.442695, %v1170_v3  ;;  %v1011_v62 = vadd.f32 1.0, %v8509_v48  ;;  %v975_v45 = vmul.f32 1.442695, %v10033_v1  ;;  %vm884_vm5 = vcmp.gt.f32.partialorder %v10033_v1, 20.0 }
 0x22e   : > { %v2449_v9 = vpop.permute.xlu1 %2448  ;;  %v1068_v55 = vmul.f32 0.6931472, %v8511_v15  ;;  %v10044_v25 = vadd.f32 %v9676_v54, %v751_v43  ;;  %1646 = vst.msk [vmem:[#allocation3 + $0x38] sm:$0xf] %vm1638_vm2, %v1557_v24  ;;  %v10054_v54 = vpack.c.bf16 %v2137_v23, %v2137_v23  ;;  %v10084_v43 = vld [vmem:[%s13670_s5] ss:$0 sm:$0xff] }
 0x22f   : > { %v2675_v29 = vpop.permute.xlu0 %2674  ;;  %2542 = vst.msk [vmem:[#allocation3 + $0x18] sm:$0xf] %vm2538_vm4, %v2449_v9  ;;  %8514 = vpow2.f32 %v1226_v30  ;;  %v1366_v9 = vld [vmem:[#allocation2 + $0xc8] sm:$0xff] }
 0x230   : > { %v8513_v57 = vpop.eup %8512  ;;  %2768 = vst.msk [vmem:[#allocation3 + $0x18] sm:$0xf] %vm2764_vm6, %v2675_v29  ;;  %v1106_v36 = vsub.f32 0.0, %v1068_v55  ;;  %8516 = vlog2.f32 %v1011_v62  ;;  %v820_v35 = vmul.f32 %v9229_v14, %v10044_v25  ;;  %v915_v55 = vsub.f32 0.0, %v9994_v10 }
 0x231   : > { %v1265_v31 = vmul.f32 %v8513_v57, %v9883_v52  ;;  %8518 = vpow2.f32 %v975_v45  ;;  %1437 = vst.msk [vmem:[#allocation3 + $0xb8] sm:$0xf] %vm1413_vm7, %v10040_v51  ;;  %v8160_v5 = vld [vmem:[#allocation3 + $0x94] sm:$0xf]  ;;  %v1398_v57 = vpack.c.bf16 %v1366_v9, %v1366_v9 }
 0x232   : > { %v1138_v32 = vsel %vm882_vm14, %v914_v39, %v1106_v36  ;;  %v10060_v52 = vsub.f32 %v9235_v16, %v820_v35  ;;  %v7911_v41 = vld [vmem:[#allocation3 + $0x98] sm:$0xf0]  ;;  %vm2989_vm14 = vcmask 1044352  }
 0x233   : > { %1340 = vst.msk [vmem:[#allocation2 + $0x129] sm:$0xff] %vm1274_vm1, %v1265_v31  ;;  %2235 = vrot.lane.b32.xlu2 %v9989_v27, %s9018_s25  ;;  %v1171_v22 = vmul.f32 %v9308_v2, %v1138_v32  ;;  %2682 = vrot.lane.b32.xlu1 %v9710_v12, %s9019_s26  ;;  %v711_v8 = vpop.f32.mrf.mxu0  ;;  %v1918_v44 = vld [vmem:[#allocation2 + $0x120] sm:$0xff]  ;;  %v7914_v12 = vor.u32 %v8160_v5, %v7911_v41 }
 0x234   : > { %2249 = vrot.lane.b32.xlu0 %v10054_v54, %s9018_s25  ;;  %v977_v61 = vmul.f32 1.442695, %v10060_v52  ;;  %v752_v27 = vmul.f32 %v10073_v20, %v711_v8  ;;  %v10078_v3 = vpack.c.bf16 %v1918_v44, %v1918_v44  ;;  %1431 = vst.msk [vmem:[#allocation3 + $0x88] sm:$0xf] %vm1413_vm7, %v1398_v57  ;;  %vm885_vm8 = vcmp.gt.f32.partialorder %v10060_v52, 20.0 }
 0x235   : > { %v1780_v58 = vpop.permute.xlu2 %1779  ;;  %v8515_v42 = vpop.eup %8514  ;;  %v1228_v21 = vmul.f32 1.442695, %v1171_v22 }
 0x236   : > { %v2671_v46 = vpop.permute.xlu1 %2670  ;;  %v8517_v59 = vpop.eup %8516  ;;  %v1266_v48 = vmul.f32 %v8515_v42, %v9914_v26  ;;  %8520 = vpow2.f32 %v977_v61  ;;  %v10087_v24 = vadd.f32 %v10084_v43, %v752_v27  ;;  %1438 = vst.msk [vmem:[#allocation3 + $0xc0] sm:$0xf] %vm1413_vm7, %v10078_v3  ;;  %v1459_v42 = vld [vmem:[#allocation2 + $0x99] sm:$0xff] }
 0x237   : > { %v10076_v7 = vpop.permute.xlu0 %2004  ;;  %2766 = vst.msk [vmem:[#allocation3 + $0x8] sm:$0xf] %vm2764_vm6, %v2671_v46  ;;  %v8519_v15 = vpop.eup %8518  ;;  %8522 = vpow2.f32 %v1228_v21  ;;  %v1070_v30 = vmul.f32 0.6931472, %v8517_v59 }
 0x238   : > { %1341 = vst.msk [vmem:[#allocation2 + $0x139] sm:$0xff] %vm1274_vm1, %v1266_v48  ;;  %v1012_v26 = vadd.f32 1.0, %v8519_v15  ;;  %v821_v62 = vmul.f32 %v9229_v14, %v10087_v24  ;;  %8008 = vmatmul.msk.bf16.gmra.mxu2 %vm1274_vm1, %v7914_v12  ;;  %v2587_v12 = vld [vmem:[#allocation2 + $0xe0] sm:$0xff] }
 0x239   : > { %v1107_v45 = vsub.f32 0.0, %v1070_v30 }
 0x23a   : > { %v3042_v29 = vld [vmem:[#allocation2 + $0x122] sm:$0xff]  ;;  %v3043_v23 = vld [vmem:[#allocation2 + $0x12a] sm:$0xff]  ;;  %8524 = vlog2.f32 %v1012_v26  ;;  %v10101_v36 = vsub.f32 %v9235_v16, %v821_v62  ;;  %v10127_v26 = vpack.c.bf16 %v1459_v42, %v1459_v42 }
 0x23b   : > { %v3074_v39 = vpack.c.bf16 %v3042_v29, %v3042_v29  ;;  %v10098_v31 = vpack.c.bf16 %v3043_v23, %v3043_v23  ;;  %2684 = vrot.lane.b32.xlu2 %v9793_v13, %s9019_s26  ;;  %v1139_v35 = vsel %vm883_vm15, %v915_v55, %v1107_v45  ;;  %1566 = vrot.lane.b32.xlu1 %v9762_v19, %s9015_s17  ;;  %v714_v10 = vpop.f32.mrf.mxu0  ;;  %v2593_v8 = vld [vmem:[#allocation2 + $0x128] sm:$0xff]  ;;  %v916_v23 = vsub.f32 0.0, %v10033_v1 }
 0x23c   : > { %2476 = vrot.lane.b32.xlu0 %v9889_v47, %s9020_s27  ;;  %v8521_v32 = vpop.eup %8520  ;;  %v1172_v5 = vmul.f32 %v9308_v2, %v1139_v35  ;;  %v979_v41 = vmul.f32 1.442695, %v10101_v36  ;;  %v753_v61 = vmul.f32 %v10073_v20, %v714_v10  ;;  %v10124_v48 = vpack.c.bf16 %v2593_v8, %v2593_v8  ;;  %v1684_v8 = vld [vmem:[#allocation2 + $0x9a] sm:$0xff] }
 0x23d   : > { %3106 = vst.msk [vmem:[#allocation3 + $0xa4] sm:$0xf] %vm1413_vm7, %v3074_v39  ;;  %v2003_v22 = vpop.permute.xlu2 %2002  ;;  %v8523_v44 = vpop.eup %8522  ;;  %v1013_v19 = vadd.f32 1.0, %v8521_v32  ;;  %v10135_v29 = vpack.c.bf16 %v2587_v12, %v2587_v12  ;;  %vm886_vm9 = vcmp.gt.f32.partialorder %v10101_v36, 20.0 }
 0x23e   : > { %3107 = vst.msk [vmem:[#allocation3 + $0xac] sm:$0xf] %vm1413_vm7, %v10098_v31  ;;  %v1555_v47 = vpop.permute.xlu1 %1554  ;;  %v1267_v21 = vmul.f32 %v8523_v44, %v9950_v0  ;;  %v1230_v46 = vmul.f32 1.442695, %v1172_v5  ;;  %8526 = vpow2.f32 %v979_v41  ;;  %v10121_v59 = vadd.f32 %v10084_v43, %v753_v61 }
 0x23f   : > { %v10116_v27 = vpop.permute.xlu0 %2231  ;;  %1645 = vst.msk [vmem:[#allocation3 + $0x30] sm:$0xf] %vm1638_vm2, %v1555_v47  ;;  %8528 = vlog2.f32 %v1013_v19  ;;  %v1375_v15 = vld [vmem:[#allocation2 + $0x138] sm:$0xff] }
 0x240   : > { %1870 = vst.msk [vmem:[#allocation3 + $0x30] sm:$0xf] %vm1863_vm3, %v1780_v58  ;;  %v8525_v30 = vpop.eup %8524  ;;  %8530 = vpow2.f32 %v1230_v46  ;;  %v10129_v0 = vpack.c.bf16 %v1375_v15, %v1375_v15  ;;  %v822_v9 = vmul.f32 %v9229_v14, %v10121_v59  ;;  %v1683_v58 = vld [vmem:[#allocation2 + $0x92] sm:$0xff]  ;;  %v917_v15 = vsub.f32 0.0, %v10060_v52 }
 0x241   : > { %1342 = vst.msk [vmem:[#allocation2 + $0x141] sm:$0xff] %vm1274_vm1, %v1267_v21  ;;  %v1072_v62 = vmul.f32 0.6931472, %v8525_v30  ;;  %v10156_v44 = vpack.c.bf16 %v1683_v58, %v1683_v58 }
 0x242   : > { %2095 = vst.msk [vmem:[#allocation3 + $0x30] sm:$0xf] %vm2088_vm12, %v10076_v7  ;;  %v10143_v45 = vsub.f32 %v9235_v16, %v822_v9 }
 0x243   : > { %2094 = vst.msk [vmem:[#allocation3 + $0x28] sm:$0xf] %vm2088_vm12, %v2003_v22  ;;  %1568 = vrot.lane.b32.xlu2 %v10127_v26, %s9015_s17  ;;  %v1108_v55 = vsub.f32 0.0, %v1072_v62  ;;  %2012 = vrot.lane.b32.xlu1 %v9793_v13, %s9017_s24  ;;  %v716_v7 = vpop.f32.mrf.mxu0 }
 0x244   : > { %2698 = vrot.lane.b32.xlu0 %v10135_v29, %s9019_s26  ;;  %1439 = vst.msk [vmem:[#allocation3 + $0xc8] sm:$0xf] %vm1413_vm7, %v10124_v48  ;;  %v8527_v57 = vpop.eup %8526  ;;  %v754_v39 = vmul.f32 %v10073_v20, %v716_v7  ;;  %v8162_v10 = vld [vmem:[#allocation3 + $0xa4] sm:$0xf]  ;;  %v981_v20 = vmul.f32 1.442695, %v10143_v45 }
 0x245   : > { %v2451_v35 = vpop.permute.xlu2 %2450  ;;  %v7919_v1 = vld [vmem:[#allocation3 + $0xa8] sm:$0xf0]  ;;  %1440 = vst.msk [vmem:[#allocation3 + $0xd0] sm:$0xf] %vm1413_vm7, %v10129_v0  ;;  %v8529_v32 = vpop.eup %8528  ;;  %v1140_v5 = vsel %vm884_vm5, %v916_v23, %v1108_v55  ;;  %v1014_v41 = vadd.f32 1.0, %v8527_v57  ;;  %vm887_vm10 = vcmp.gt.f32.partialorder %v10143_v45, 20.0 }
 0x246   : > { %v2001_v13 = vpop.permute.xlu1 %2000  ;;  %v8531_v19 = vpop.eup %8530  ;;  %v1173_v61 = vmul.f32 %v9308_v2, %v1140_v5  ;;  %v1074_v47 = vmul.f32 0.6931472, %v8529_v32  ;;  %v10161_v42 = vadd.f32 %v10084_v43, %v754_v39  ;;  %v7922_v30 = vor.u32 %v8162_v10, %v7919_v1 }
 0x247   : > { %v10154_v22 = vpop.permute.xlu0 %2680  ;;  %2093 = vst.msk [vmem:[#allocation3 + $0x20] sm:$0xf] %vm2088_vm12, %v2001_v13  ;;  %v1268_v12 = vmul.f32 %v8531_v19, %v9979_v38  ;;  %8532 = vlog2.f32 %v1014_v41  ;;  %v1716_v43 = vpack.c.bf16 %v1684_v8, %v1684_v8  ;;  %v918_v8 = vsub.f32 0.0, %v10101_v36 }
 0x248   : > { %v3044_v21 = vld [vmem:[#allocation2 + $0x13a] sm:$0xff]  ;;  %v3045_v46 = vld [vmem:[#allocation2 + $0x142] sm:$0xff]  ;;  %2318 = vst.msk [vmem:[#allocation3 + $0x20] sm:$0xf] %vm2313_vm13, %v9973_v56  ;;  %v1232_v58 = vmul.f32 1.442695, %v1173_v61  ;;  %8534 = vpow2.f32 %v981_v20  ;;  %v823_v38 = vmul.f32 %v9229_v14, %v10161_v42  ;;  %8009 = vmatmul.msk.bf16.gmra.mxu2 %vm1274_vm1, %v7922_v30 }
 0x249   : > { %v3076_v62 = vpack.c.bf16 %v3044_v21, %v3044_v21  ;;  %v3077_v9 = vpack.c.bf16 %v3045_v46, %v3045_v46  ;;  %v1109_v23 = vsub.f32 0.0, %v1074_v47  ;;  %2543 = vst.msk [vmem:[#allocation3 + $0x20] sm:$0xf] %vm2538_vm4, %v2451_v35  ;;  %v1921_v55 = vld [vmem:[#allocation2 + $0x140] sm:$0xff] }
 0x24a   : > { %1343 = vst.msk [vmem:[#allocation2 + $0x151] sm:$0xff] %vm1274_vm1, %v1268_v12  ;;  %8536 = vpow2.f32 %v1232_v58  ;;  %v10177_v7 = vpack.c.bf16 %v1921_v55, %v1921_v55  ;;  %v10182_v57 = vsub.f32 %v9235_v16, %v823_v38  ;;  %v2140_v16 = vld [vmem:[#allocation2 + $0xf9] sm:$0xff]  ;;  %v1460_v55 = vld [vmem:[#allocation2 + $0xa9] sm:$0xff] }
 0x24b   : > { %3108 = vst.msk [vmem:[#allocation3 + $0xb4] sm:$0xf] %vm1413_vm7, %v3076_v62  ;;  %v1141_v56 = vsel %vm885_vm8, %v917_v15, %v1109_v23  ;;  %1791 = vrot.lane.b32.xlu2 %v10156_v44, %s9016_s18  ;;  %1793 = vrot.lane.b32.xlu1 %v1716_v43, %s9016_s18  ;;  %v10197_v21 = vpack.c.bf16 %v2140_v16, %v2140_v16  ;;  %v10214_v43 = vpop.f32.mrf.mxu2 }
 0x24c   : > { %3109 = vst.msk [vmem:[#allocation3 + $0xbc] sm:$0xf] %vm1413_vm7, %v3077_v9  ;;  %v1174_v52 = vmul.f32 %v9308_v2, %v1141_v56  ;;  %2028 = vrot.lane.b32.xlu0 %v9945_v63, %s9017_s24  ;;  %v983_v10 = vmul.f32 1.442695, %v10182_v57  ;;  %v1917_v56 = vld [vmem:[#allocation2 + $0x110] sm:$0xff]  ;;  %vm888_vm11 = vcmp.gt.f32.partialorder %v10182_v57, 20.0 }
 0x24d   : > { %v2230_v14 = vpop.permute.xlu2 %2229  ;;  %1441 = vst.msk [vmem:[#allocation3 + $0xd8] sm:$0xf] %vm1413_vm7, %v10177_v7  ;;  %v8533_v39 = vpop.eup %8532 }
 0x24e   : > { %v1234_v35 = vmul.f32 1.442695, %v1174_v52  ;;  %v1782_v1 = vpop.permute.xlu1 %1781  ;;  %v1076_v5 = vmul.f32 0.6931472, %v8533_v39  ;;  %v8535_v41 = vpop.eup %8534  ;;  %2320 = vst.msk [vmem:[#allocation3 + $0x30] sm:$0xf] %vm2313_vm13, %v2230_v14 }
 0x24f   : > { %v10190_v32 = vpop.permute.xlu0 %2010  ;;  %1871 = vst.msk [vmem:[#allocation3 + $0x38] sm:$0xf] %vm1863_vm3, %v1782_v1  ;;  %v1015_v61 = vadd.f32 1.0, %v8535_v41 }
 0x250   : > { %8538 = vpow2.f32 %v1234_v35  ;;  %v8537_v13 = vpop.eup %8536  ;;  %v1110_v19 = vsub.f32 0.0, %v1076_v5  ;;  %v10222_v35 = vpack.c.bf16 %v1460_v55, %v1460_v55 }
 0x251   : > { %8540 = vpow2.f32 %v983_v10  ;;  %v2596_v47 = vld [vmem:[#allocation2 + $0x150] sm:$0xff]  ;;  %v1269_v20 = vmul.f32 %v8537_v13, %v10015_v33  ;;  %v1949_v10 = vpack.c.bf16 %v1917_v56, %v1917_v56 }
 0x252   : > { %v10199_v46 = vpack.c.bf16 %v2596_v47, %v2596_v47  ;;  %v1142_v12 = vsel %vm886_vm9, %v918_v8, %v1110_v19  ;;  %8542 = vlog2.f32 %v1015_v61  ;;  %v8164_v15 = vld [vmem:[#allocation3 + $0xb4] sm:$0xf] }
 0x253   : > { %2014 = vrot.lane.b32.xlu2 %v9815_v37, %s9017_s24  ;;  %v7927_v30 = vld [vmem:[#allocation3 + $0xb8] sm:$0xf0]  ;;  %1344 = vst.msk [vmem:[#allocation2 + $0x159] sm:$0xff] %vm1274_vm1, %v1269_v20  ;;  %v1175_v62 = vmul.f32 %v9308_v2, %v1142_v12  ;;  %2239 = vrot.lane.b32.xlu1 %v10127_v26, %s9018_s25 }
 0x254   : > { %2255 = vrot.lane.b32.xlu0 %v10197_v21, %s9018_s25  ;;  %1442 = vst.msk [vmem:[#allocation3 + $0xe0] sm:$0xf] %vm1413_vm7, %v10199_v46  ;;  %v7930_v23 = vor.u32 %v8164_v15, %v7927_v30 }
 0x255   : > { %v1561_v33 = vpop.permute.xlu2 %1560  ;;  %v1236_v9 = vmul.f32 1.442695, %v1175_v62  ;;  %v10246_v62 = vpop.f32.mrf.mxu2 }
 0x256   : > { %v8539_v36 = vpop.eup %8538  ;;  %v2228_v58 = vpop.permute.xlu1 %2227  ;;  %1648 = vst.msk [vmem:[#allocation3 + $0x48] sm:$0xf] %vm1638_vm2, %v1561_v33 }
 0x257   : > { %v10212_v37 = vpop.permute.xlu0 %2458  ;;  %v8541_v38 = vpop.eup %8540  ;;  %v1270_v26 = vmul.f32 %v8539_v36, %v10044_v25  ;;  %2319 = vst.msk [vmem:[#allocation3 + $0x28] sm:$0xf] %vm2313_vm13, %v2228_v58  ;;  %8544 = vpow2.f32 %v1236_v9 }
 0x258   : > { %v1016_v52 = vadd.f32 1.0, %v8541_v38  ;;  %2544 = vst.msk [vmem:[#allocation3 + $0x28] sm:$0xf] %vm2538_vm4, %v10011_v28  ;;  %v8543_v14 = vpop.eup %8542  ;;  %8010 = vmatmul.msk.bf16.gmra.mxu2 %vm1274_vm1, %v7930_v23  ;;  %v919_v28 = vsub.f32 0.0, %v10143_v45 }
 0x259   : > { %1345 = vst.msk [vmem:[#allocation2 + $0x169] sm:$0xff] %vm1274_vm1, %v1270_v26  ;;  %v1078_v39 = vmul.f32 0.6931472, %v8543_v14 }
 0x25a   : > { %8546 = vlog2.f32 %v1016_v52  ;;  %v3046_v25 = vld [vmem:[#allocation2 + $0x152] sm:$0xff]  ;;  %v3047_v1 = vld [vmem:[#allocation2 + $0x15a] sm:$0xff] }
 0x25b   : > { %2462 = vrot.lane.b32.xlu2 %v10156_v44, %s9020_s27  ;;  %v10226_v5 = vpack.c.bf16 %v3046_v25, %v3046_v25  ;;  %v10228_v16 = vpack.c.bf16 %v3047_v1, %v3047_v1  ;;  %v1111_v41 = vsub.f32 0.0, %v1078_v39  ;;  %1570 = vrot.lane.b32.xlu1 %v10222_v35, %s9015_s17  ;;  %v2597_v8 = vld [vmem:[#allocation2 + $0x158] sm:$0xff] }
 0x25c   : > { %2034 = vrot.lane.b32.xlu0 %v1949_v10, %s9017_s24  ;;  %v10243_v15 = vpack.c.bf16 %v2597_v8, %v2597_v8  ;;  %v1686_v39 = vld [vmem:[#allocation2 + $0xb2] sm:$0xff] }
 0x25d   : > { %v1784_v13 = vpop.permute.xlu2 %1783  ;;  %v8545_v19 = vpop.eup %8544  ;;  %3110 = vst.msk [vmem:[#allocation3 + $0xc4] sm:$0xf] %vm1413_vm7, %v10226_v5  ;;  %v1143_v44 = vsel %vm887_vm10, %v919_v28, %v1111_v41 }
 0x25e   : > { %v1559_v61 = vpop.permute.xlu1 %1558  ;;  %3111 = vst.msk [vmem:[#allocation3 + $0xcc] sm:$0xf] %vm1413_vm7, %v10228_v16  ;;  %v1271_v20 = vmul.f32 %v8545_v19, %v10087_v24  ;;  %v1176_v12 = vmul.f32 %v9308_v2, %v1143_v44  ;;  %v920_v24 = vsub.f32 0.0, %v10182_v57  ;;  %v10275_v44 = vpop.f32.mrf.mxu2 }
 0x25f   : > { %v10237_v47 = vpop.permute.xlu0 %2237  ;;  %1647 = vst.msk [vmem:[#allocation3 + $0x40] sm:$0xf] %vm1638_vm2, %v1559_v61 }
 0x260   : > { %v8547_v45 = vpop.eup %8546  ;;  %v1924_v30 = vld [vmem:[#allocation2 + $0x168] sm:$0xff]  ;;  %1346 = vst.msk [vmem:[#allocation2 + $0x171] sm:$0xff] %vm1274_vm1, %v1271_v20  ;;  %v1238_v33 = vmul.f32 1.442695, %v1176_v12 }
 0x261   : > { %v1080_v36 = vmul.f32 0.6931472, %v8547_v45  ;;  %v10249_v9 = vpack.c.bf16 %v1924_v30, %v1924_v30  ;;  %1872 = vst.msk [vmem:[#allocation3 + $0x40] sm:$0xf] %vm1863_vm3, %v1784_v13  ;;  %v1685_v45 = vld [vmem:[#allocation2 + $0xaa] sm:$0xff] }
 0x262   : > { %8548 = vpow2.f32 %v1238_v33  ;;  %1443 = vst.msk [vmem:[#allocation3 + $0xe8] sm:$0xf] %vm1413_vm7, %v10243_v15  ;;  %v1717_v33 = vpack.c.bf16 %v1685_v45, %v1685_v45 }
 0x263   : > { %v1112_v58 = vsub.f32 0.0, %v1080_v36  ;;  %2241 = vrot.lane.b32.xlu2 %v10222_v35, %s9018_s25  ;;  %2688 = vrot.lane.b32.xlu1 %v9850_v60, %s9019_s26  ;;  %1444 = vst.msk [vmem:[#allocation3 + $0xf0] sm:$0xf] %vm1413_vm7, %v10249_v9  ;;  %v2143_v60 = vld [vmem:[#allocation2 + $0x121] sm:$0xff] }
 0x264   : > { %2482 = vrot.lane.b32.xlu0 %v10017_v53, %s9020_s27  ;;  %v8166_v26 = vld [vmem:[#allocation3 + $0xc4] sm:$0xf]  ;;  %v10272_v8 = vpack.c.bf16 %v2143_v60, %v2143_v60 }
 0x265   : > { %v1144_v23 = vsel %vm888_vm11, %v920_v24, %v1112_v58  ;;  %v2457_v38 = vpop.permute.xlu2 %2456  ;;  %v7935_v14 = vld [vmem:[#allocation3 + $0xc8] sm:$0xf0] }
 0x266   : > { %v1177_v55 = vmul.f32 %v9308_v2, %v1144_v23  ;;  %v2677_v56 = vpop.permute.xlu1 %2676  ;;  %v7938_v57 = vor.u32 %v8166_v26, %v7935_v14  ;;  %v1718_v2 = vpack.c.bf16 %v1686_v39, %v1686_v39  ;;  %v10302_v58 = vpop.f32.mrf.mxu2 }
 0x267   : > { %v10265_v52 = vpop.permute.xlu0 %2464  ;;  %2769 = vst.msk [vmem:[#allocation3 + $0x20] sm:$0xf] %vm2764_vm6, %v2677_v56  ;;  %v3048_v10 = vld [vmem:[#allocation2 + $0x16a] sm:$0xff]  ;;  %v3049_v25 = vld [vmem:[#allocation2 + $0x172] sm:$0xff] }
 0x268   : > { %v1240_v53 = vmul.f32 1.442695, %v1177_v55  ;;  %v8549_v1 = vpop.eup %8548  ;;  %v3080_v28 = vpack.c.bf16 %v3048_v10, %v3048_v10  ;;  %v10268_v41 = vpack.c.bf16 %v3049_v25, %v3049_v25  ;;  %8011 = vmatmul.msk.bf16.gmra.mxu2 %vm1274_vm1, %v7938_v57  ;;  %v2599_v19 = vld [vmem:[#allocation2 + $0x170] sm:$0xff]  ;;  %v1920_v55 = vld [vmem:[#allocation2 + $0x138] sm:$0xff]  ;;  %v2146_v10 = vld [vmem:[#allocation2 + $0x141] sm:$0xff] }
 0x269   : > { %v1272_v13 = vmul.f32 %v8549_v1, %v10121_v59  ;;  %v10285_v61 = vpack.c.bf16 %v2599_v19, %v2599_v19 }
 0x26a   : > { %8550 = vpow2.f32 %v1240_v53  ;;  %3112 = vst.msk [vmem:[#allocation3 + $0xd4] sm:$0xf] %vm1413_vm7, %v3080_v28  ;;  %v10325_v53 = vpack.c.bf16 %v2146_v10, %v2146_v10 }
 0x26b   : > { %1572 = vrot.lane.b32.xlu2 %v9878_v34, %s9015_s17  ;;  %3113 = vst.msk [vmem:[#allocation3 + $0xdc] sm:$0xf] %vm1413_vm7, %v10268_v41  ;;  %1797 = vrot.lane.b32.xlu1 %v1718_v2, %s9016_s18 }
 0x26c   : > { %2261 = vrot.lane.b32.xlu0 %v10272_v8, %s9018_s25  ;;  %1347 = vst.msk [vmem:[#allocation2 + $0x181] sm:$0xff] %vm1274_vm1, %v1272_v13 }
 0x26d   : > { %v2679_v59 = vpop.permute.xlu2 %2678  ;;  %1445 = vst.msk [vmem:[#allocation3 + $0xf8] sm:$0xf] %vm1413_vm7, %v10285_v61 }
 0x26e   : > { %v1786_v20 = vpop.permute.xlu1 %1785  ;;  %2770 = vst.msk [vmem:[#allocation3 + $0x28] sm:$0xf] %vm2764_vm6, %v2679_v59  ;;  %v10320_v25 = vpop.f32.mrf.mxu2 }
 0x26f   : > { %v10288_v12 = vpop.permute.xlu0 %2686  ;;  %1873 = vst.msk [vmem:[#allocation3 + $0x48] sm:$0xf] %vm1863_vm3, %v1786_v20 }
 0x270   : > { %v8551_v34 = vpop.eup %8550  ;;  %2098 = vst.msk [vmem:[#allocation3 + $0x48] sm:$0xf] %vm2088_vm12, %v10190_v32 }
 0x271   : > { %v1273_v30 = vmul.f32 %v8551_v34, %v10161_v42  ;;  %v8168_v36 = vld [vmem:[#allocation3 + $0xd4] sm:$0xf] }
 0x272   : > { %v7943_v24 = vld [vmem:[#allocation3 + $0xd8] sm:$0xf0] }
 0x273   : > { %1348 = vst.msk [vmem:[#allocation2 + $0x189] sm:$0xff] %vm1274_vm1, %v1273_v30  ;;  %1795 = vrot.lane.b32.xlu2 %v1717_v33, %s9016_s18  ;;  %2018 = vrot.lane.b32.xlu1 %v9928_v49, %s9017_s24  ;;  %v7946_v26 = vor.u32 %v8168_v36, %v7943_v24  ;;  %v1687_v30 = vld [vmem:[#allocation2 + $0xc2] sm:$0xff]  ;;  %v1923_v36 = vld [vmem:[#allocation2 + $0x158] sm:$0xff] }
 0x274   : > { %2488 = vrot.lane.b32.xlu0 %v10098_v31, %s9020_s27  ;;  %v1952_v31 = vpack.c.bf16 %v1920_v55, %v1920_v55  ;;  %v1926_v10 = vld [vmem:[#allocation2 + $0x180] sm:$0xff] }
 0x275   : > { %v2009_v32 = vpop.permute.xlu2 %2008 }
 0x276   : > { %v2007_v42 = vpop.permute.xlu1 %2006  ;;  %2097 = vst.msk [vmem:[#allocation3 + $0x40] sm:$0xf] %vm2088_vm12, %v2009_v32  ;;  %v1955_v32 = vpack.c.bf16 %v1923_v36, %v1923_v36  ;;  %v1466_v36 = vld [vmem:[#allocation2 + $0xf1] sm:$0xff] }
 0x277   : > { %v10305_v23 = vpop.permute.xlu0 %2016  ;;  %2096 = vst.msk [vmem:[#allocation3 + $0x38] sm:$0xf] %vm2088_vm12, %v2007_v42 }
 0x278   : > { %2321 = vst.msk [vmem:[#allocation3 + $0x38] sm:$0xf] %vm2313_vm13, %v10116_v27  ;;  %8012 = vmatmul.msk.bf16.gmra.mxu2 %vm1274_vm1, %v7946_v26 }
 0x279   : > { %2546 = vst.msk [vmem:[#allocation3 + $0x38] sm:$0xf] %vm2538_vm4, %v2457_v38 }
 0x27a   : > { %v3050_v56 = vld [vmem:[#allocation2 + $0x182] sm:$0xff]  ;;  %v3051_v14 = vld [vmem:[#allocation2 + $0x18a] sm:$0xff] }
 0x27b   : > { %v3082_v57 = vpack.c.bf16 %v3050_v56, %v3050_v56  ;;  %v3083_v39 = vpack.c.bf16 %v3051_v14, %v3051_v14  ;;  %2468 = vrot.lane.b32.xlu2 %v1718_v2, %s9020_s27  ;;  %2466 = vrot.lane.b32.xlu1 %v1717_v33, %s9020_s27  ;;  %v1688_v33 = vld [vmem:[#allocation2 + $0xca] sm:$0xff] }
 0x27c   : > { %2040 = vrot.lane.b32.xlu0 %v1952_v31, %s9017_s24  ;;  %v1720_v24 = vpack.c.bf16 %v1688_v33, %v1688_v33  ;;  %v2149_v14 = vld [vmem:[#allocation2 + $0x169] sm:$0xff] }
 0x27d   : > { %3114 = vst.msk [vmem:[#allocation3 + $0xe4] sm:$0xf] %vm1413_vm7, %v3082_v57  ;;  %v1565_v60 = vpop.permute.xlu2 %1564  ;;  %v10371_v31 = vpack.c.bf16 %v2149_v14, %v2149_v14 }
 0x27e   : > { %3115 = vst.msk [vmem:[#allocation3 + $0xec] sm:$0xf] %vm1413_vm7, %v3083_v39  ;;  %v2455_v27 = vpop.permute.xlu1 %2454 }
 0x27f   : > { %v10317_v38 = vpop.permute.xlu0 %2243  ;;  %2545 = vst.msk [vmem:[#allocation3 + $0x30] sm:$0xf] %vm2538_vm4, %v2455_v27  ;;  %v1465_v27 = vld [vmem:[#allocation2 + $0xe1] sm:$0xff] }
 0x280   : > { %2771 = vst.msk [vmem:[#allocation3 + $0x30] sm:$0xf] %vm2764_vm6, %v10154_v22  ;;  %v1463_v22 = vld [vmem:[#allocation2 + $0xc9] sm:$0xff] }
 0x281   : > { %1650 = vst.msk [vmem:[#allocation3 + $0x58] sm:$0xf] %vm1638_vm2, %v1565_v60  ;;  %v1689_v60 = vld [vmem:[#allocation2 + $0xda] sm:$0xff] }
 0x283   : > { %2690 = vrot.lane.b32.xlu2 %v9928_v49, %s9019_s26  ;;  %2245 = vrot.lane.b32.xlu1 %v9919_v40, %s9018_s25  ;;  %v10336_v49 = vpop.f32.mrf.mxu2  ;;  %v10339_v40 = vpack.c.bf16 %v1463_v22, %v1463_v22 }
 0x284   : > { %2267 = vrot.lane.b32.xlu0 %v10325_v53, %s9018_s25  ;;  %v8170_v1 = vld [vmem:[#allocation3 + $0xe4] sm:$0xf] }
 0x285   : > { %v1788_v28 = vpop.permute.xlu2 %1787  ;;  %v7951_v13 = vld [vmem:[#allocation3 + $0xe8] sm:$0xf0] }
 0x286   : > { %v1563_v2 = vpop.permute.xlu1 %1562  ;;  %v7954_v59 = vor.u32 %v8170_v1, %v7951_v13  ;;  %v1497_v1 = vpack.c.bf16 %v1465_v27, %v1465_v27 }
 0x287   : > { %v1575_v19 = vpop.permute.xlu0 %1574  ;;  %1649 = vst.msk [vmem:[#allocation3 + $0x50] sm:$0xf] %vm1638_vm2, %v1563_v2 }
 0x288   : > { %1874 = vst.msk [vmem:[#allocation3 + $0x50] sm:$0xf] %vm1863_vm3, %v1788_v28  ;;  %8013 = vmatmul.msk.bf16.gmra.mxu2 %vm1274_vm1, %v7954_v59  ;;  %v10395_v28 = vpack.c.bf16 %v1926_v10, %v1926_v10  ;;  %v2152_v59 = vld [vmem:[#allocation2 + $0x189] sm:$0xff] }
 0x289   : > { %1655 = vst.msk [vmem:[#allocation3 + $0x80] sm:$0xf] %vm1638_vm2, %v1575_v19  ;;  %v1690_v19 = vld [vmem:[#allocation2 + $0xe2] sm:$0xff]  ;;  %v2184_v22 = vpack.c.bf16 %v2152_v59, %v2152_v59 }
 0x28a   : > { %v2141_v59 = vld [vmem:[#allocation2 + $0x109] sm:$0xff] }
 0x28b   : > { %2020 = vrot.lane.b32.xlu2 %v9852_v6, %s9017_s24  ;;  %1576 = vrot.lane.b32.xlu1 %v10339_v40, %s9015_s17  ;;  %v1719_v6 = vpack.c.bf16 %v1687_v30, %v1687_v30 }
 0x28c   : > { %1825 = vrot.lane.b32.xlu0 %v10228_v16, %s9016_s18 }
 0x28d   : > { %v2236_v20 = vpop.permute.xlu2 %2235 }
 0x28e   : > { %v2234_v45 = vpop.permute.xlu1 %2233  ;;  %2323 = vst.msk [vmem:[#allocation3 + $0x48] sm:$0xf] %vm2313_vm13, %v2236_v20 }
 0x28f   : > { %v10348_v34 = vpop.permute.xlu0 %2692  ;;  %2322 = vst.msk [vmem:[#allocation3 + $0x40] sm:$0xf] %vm2313_vm13, %v2234_v45 }
 0x290   : > { %2547 = vst.msk [vmem:[#allocation3 + $0x40] sm:$0xf] %vm2538_vm4, %v10212_v37 }
 0x293   : > { %1799 = vrot.lane.b32.xlu2 %v1719_v6, %s9016_s18  ;;  %1801 = vrot.lane.b32.xlu1 %v1720_v24, %s9016_s18  ;;  %v10425_v6 = vpack.c.bf16 %v1466_v36, %v1466_v36 }
 0x294   : > { %2046 = vrot.lane.b32.xlu0 %v1955_v32, %s9017_s24 }
 0x295   : > { %v2685_v16 = vpop.permute.xlu2 %2684 }
 0x296   : > { %v1790_v42 = vpop.permute.xlu1 %1789  ;;  %2773 = vst.msk [vmem:[#allocation3 + $0x40] sm:$0xf] %vm2764_vm6, %v2685_v16 }
 0x297   : > { %v10357_v26 = vpop.permute.xlu0 %2022  ;;  %1875 = vst.msk [vmem:[#allocation3 + $0x58] sm:$0xf] %vm1863_vm3, %v1790_v42 }
 0x29b   : > { %2247 = vrot.lane.b32.xlu2 %v10339_v40, %s9018_s25  ;;  %2472 = vrot.lane.b32.xlu1 %v1720_v24, %s9020_s27 }
 0x29c   : > { %2494 = vrot.lane.b32.xlu0 %v10226_v5, %s9020_s27 }
 0x29d   : > { %v1569_v37 = vpop.permute.xlu2 %1568 }
 0x29e   : > { %v2461_v55 = vpop.permute.xlu1 %2460  ;;  %1652 = vst.msk [vmem:[#allocation3 + $0x68] sm:$0xf] %vm1638_vm2, %v1569_v37  ;;  %v1691_v37 = vld [vmem:[#allocation2 + $0xf2] sm:$0xff] }
 0x29f   : > { %v10366_v56 = vpop.permute.xlu0 %2470  ;;  %2548 = vst.msk [vmem:[#allocation3 + $0x48] sm:$0xf] %vm2538_vm4, %v2461_v55  ;;  %v1692_v55 = vld [vmem:[#allocation2 + $0xfa] sm:$0xff]  ;;  %v1723_v14 = vpack.c.bf16 %v1691_v37, %v1691_v37  ;;  %v1694_v37 = vld [vmem:[#allocation2 + $0x112] sm:$0xff] }
 0x2a0   : > { %2774 = vst.msk [vmem:[#allocation3 + $0x48] sm:$0xf] %vm2764_vm6, %v10288_v12 }
 0x2a3   : > { %1578 = vrot.lane.b32.xlu2 %v10054_v54, %s9015_s17  ;;  %2694 = vrot.lane.b32.xlu1 %v9982_v50, %s9019_s26 }
 0x2a4   : > { %2273 = vrot.lane.b32.xlu0 %v10371_v31, %s9018_s25 }
 0x2a5   : > { %v1792_v5 = vpop.permute.xlu2 %1791 }
 0x2a6   : > { %v2683_v57 = vpop.permute.xlu1 %2682 }
 0x2a7   : > { %v10379_v39 = vpop.permute.xlu0 %2249  ;;  %2772 = vst.msk [vmem:[#allocation3 + $0x38] sm:$0xf] %vm2764_vm6, %v2683_v57  ;;  %v2602_v57 = vld [vmem:[#allocation2 + $0x198] sm:$0xff] }
 0x2ab   : > { %2696 = vrot.lane.b32.xlu2 %v9855_v18, %s9019_s26  ;;  %2024 = vrot.lane.b32.xlu1 %v9855_v18, %s9017_s24  ;;  %v1721_v18 = vpack.c.bf16 %v1689_v60, %v1689_v60  ;;  %v2634_v60 = vpack.c.bf16 %v2602_v57, %v2602_v57 }
 0x2ac   : > { %2500 = vrot.lane.b32.xlu0 %v10268_v41, %s9020_s27 }
 0x2ad   : > { %v2015_v54 = vpop.permute.xlu2 %2014 }
 0x2ae   : > { %v1567_v50 = vpop.permute.xlu1 %1566  ;;  %2100 = vst.msk [vmem:[#allocation3 + $0x58] sm:$0xf] %vm2088_vm12, %v2015_v54 }
 0x2af   : > { %v10389_v12 = vpop.permute.xlu0 %2476  ;;  %1651 = vst.msk [vmem:[#allocation3 + $0x60] sm:$0xf] %vm1638_vm2, %v1567_v50 }
 0x2b0   : > { %1876 = vst.msk [vmem:[#allocation3 + $0x60] sm:$0xf] %vm1863_vm3, %v1792_v5  ;;  %v1724_v5 = vpack.c.bf16 %v1692_v55, %v1692_v55  ;;  %v1726_v55 = vpack.c.bf16 %v1694_v37, %v1694_v37  ;;  %v1698_v37 = vld [vmem:[#allocation2 + $0x142] sm:$0xff] }
 0x2b1   : > { %2101 = vst.msk [vmem:[#allocation3 + $0x60] sm:$0xf] %vm2088_vm12, %v10305_v23  ;;  %v1722_v23 = vpack.c.bf16 %v1690_v19, %v1690_v19 }
 0x2b3   : > { %1803 = vrot.lane.b32.xlu2 %v1721_v18, %s9016_s18  ;;  %1580 = vrot.lane.b32.xlu1 %v1497_v1, %s9015_s17 }
 0x2b4   : > { %2052 = vrot.lane.b32.xlu0 %v10395_v28, %s9017_s24 }
 0x2b5   : > { %v2463_v41 = vpop.permute.xlu2 %2462 }
 0x2b6   : > { %v2013_v13 = vpop.permute.xlu1 %2012 }
 0x2b7   : > { %v10401_v2 = vpop.permute.xlu0 %2698  ;;  %2099 = vst.msk [vmem:[#allocation3 + $0x50] sm:$0xf] %vm2088_vm12, %v2013_v13 }
 0x2b8   : > { %2324 = vst.msk [vmem:[#allocation3 + $0x50] sm:$0xf] %vm2313_vm13, %v10237_v47 }
 0x2b9   : > { %2549 = vst.msk [vmem:[#allocation3 + $0x50] sm:$0xf] %vm2538_vm4, %v2463_v41 }
 0x2bb   : > { %2026 = vrot.lane.b32.xlu2 %v10135_v29, %s9017_s24  ;;  %1805 = vrot.lane.b32.xlu1 %v1722_v23, %s9016_s18  ;;  %v10477_v23 = vpack.c.bf16 %v2141_v59, %v2141_v59 }
 0x2bc   : > { %2279 = vrot.lane.b32.xlu0 %v2184_v22, %s9018_s25 }
 0x2bd   : > { %v2242_v20 = vpop.permute.xlu2 %2241 }
 0x2be   : > { %v1794_v45 = vpop.permute.xlu1 %1793  ;;  %2326 = vst.msk [vmem:[#allocation3 + $0x60] sm:$0xf] %vm2313_vm13, %v2242_v20 }
 0x2bf   : > { %v10412_v30 = vpop.permute.xlu0 %2028  ;;  %1877 = vst.msk [vmem:[#allocation3 + $0x68] sm:$0xf] %vm1863_vm3, %v1794_v45 }
 0x2c3   : > { %2474 = vrot.lane.b32.xlu2 %v1721_v18, %s9020_s27  ;;  %2251 = vrot.lane.b32.xlu1 %v1497_v1, %s9018_s25  ;;  %v2798_v1 = vld [vmem:[#allocation2 + $0x39] sm:$0xff] }
 0x2c4   : > { %2704 = vrot.lane.b32.xlu0 %v10006_v11, %s9019_s26 }
 0x2c5   : > { %v1573_v29 = vpop.permute.xlu2 %1572 }
 0x2c6   : > { %v2240_v47 = vpop.permute.xlu1 %2239  ;;  %1654 = vst.msk [vmem:[#allocation3 + $0x78] sm:$0xf] %vm1638_vm2, %v1573_v29  ;;  %v2804_v29 = vld [vmem:[#allocation2 + $0x81] sm:$0xff] }
 0x2c7   : > { %v10420_v33 = vpop.permute.xlu0 %2255  ;;  %2325 = vst.msk [vmem:[#allocation3 + $0x58] sm:$0xf] %vm2313_vm13, %v2240_v47  ;;  %v2836_v36 = vpack.c.bf16 %v2804_v29, %v2804_v29 }
 0x2c8   : > { %2550 = vst.msk [vmem:[#allocation3 + $0x58] sm:$0xf] %vm2538_vm4, %v10265_v52 }
 0x2cb   : > { %1582 = vrot.lane.b32.xlu2 %v10425_v6, %s9015_s17  ;;  %2700 = vrot.lane.b32.xlu1 %v9945_v63, %s9019_s26 }
 0x2cc   : > { %2710 = vrot.lane.b32.xlu0 %v10124_v48, %s9019_s26 }
 0x2cd   : > { %v1796_v24 = vpop.permute.xlu2 %1795 }
 0x2ce   : > { %v1571_v32 = vpop.permute.xlu1 %1570 }
 0x2cf   : > { %v10433_v16 = vpop.permute.xlu0 %2034  ;;  %1653 = vst.msk [vmem:[#allocation3 + $0x70] sm:$0xf] %vm1638_vm2, %v1571_v32 }
 0x2d0   : > { %1878 = vst.msk [vmem:[#allocation3 + $0x70] sm:$0xf] %vm1863_vm3, %v1796_v24 }
 0x2d3   : > { %2253 = vrot.lane.b32.xlu2 %v10425_v6, %s9018_s25  ;;  %1584 = vrot.lane.b32.xlu1 %v10197_v21, %s9015_s17 }
 0x2d4   : > { %2716 = vrot.lane.b32.xlu0 %v10199_v46, %s9019_s26 }
 0x2d5   : > { %v2469_v63 = vpop.permute.xlu2 %2468 }
 0x2d6   : > { %v2689_v52 = vpop.permute.xlu1 %2688 }
 0x2d7   : > { %v10443_v42 = vpop.permute.xlu0 %2482  ;;  %2775 = vst.msk [vmem:[#allocation3 + $0x50] sm:$0xf] %vm2764_vm6, %v2689_v52  ;;  %v1693_v52 = vld [vmem:[#allocation2 + $0x10a] sm:$0xff] }
 0x2db   : > { %1807 = vrot.lane.b32.xlu2 %v1723_v14, %s9016_s18  ;;  %1809 = vrot.lane.b32.xlu1 %v1724_v5, %s9016_s18 }
 0x2dc   : > { %2722 = vrot.lane.b32.xlu0 %v10285_v61, %s9019_s26 }
 0x2dd   : > { %v2691_v21 = vpop.permute.xlu2 %2690 }
 0x2de   : > { %v1798_v54 = vpop.permute.xlu1 %1797  ;;  %2776 = vst.msk [vmem:[#allocation3 + $0x58] sm:$0xf] %vm2764_vm6, %v2691_v21 }
 0x2df   : > { %v10451_v50 = vpop.permute.xlu0 %2261  ;;  %1879 = vst.msk [vmem:[#allocation3 + $0x78] sm:$0xf] %vm1863_vm3, %v1798_v54 }
 0x2e0   : > { %2104 = vst.msk [vmem:[#allocation3 + $0x78] sm:$0xf] %vm2088_vm12, %v10357_v26  ;;  %v2830_v26 = vpack.c.bf16 %v2798_v1, %v2798_v1 }
 0x2e3   : > { %2480 = vrot.lane.b32.xlu2 %v1724_v5, %s9020_s27  ;;  %2030 = vrot.lane.b32.xlu1 %v9984_v17, %s9017_s24 }
 0x2e4   : > { %2728 = vrot.lane.b32.xlu0 %v2634_v60, %s9019_s26 }
 0x2e5   : > { %v2021_v27 = vpop.permute.xlu2 %2020 }
 0x2e6   : > { %v2019_v10 = vpop.permute.xlu1 %2018  ;;  %2103 = vst.msk [vmem:[#allocation3 + $0x70] sm:$0xf] %vm2088_vm12, %v2021_v27  ;;  %v1695_v27 = vld [vmem:[#allocation2 + $0x122] sm:$0xff] }
 0x2e7   : > { %v10461_v18 = vpop.permute.xlu0 %2488  ;;  %2102 = vst.msk [vmem:[#allocation3 + $0x68] sm:$0xf] %vm2088_vm12, %v2019_v10 }
 0x2e8   : > { %2327 = vst.msk [vmem:[#allocation3 + $0x68] sm:$0xf] %vm2313_vm13, %v10317_v38  ;;  %v2801_v38 = vld [vmem:[#allocation2 + $0x61] sm:$0xff] }
 0x2e9   : > { %2552 = vst.msk [vmem:[#allocation3 + $0x68] sm:$0xf] %vm2538_vm4, %v2469_v63 }
 0x2eb   : > { %2702 = vrot.lane.b32.xlu2 %v9984_v17, %s9019_s26  ;;  %2478 = vrot.lane.b32.xlu1 %v1723_v14, %s9020_s27  ;;  %v2833_v17 = vpack.c.bf16 %v2801_v38, %v2801_v38 }
 0x2ec   : > { %2895 = vrot.lane.b32.xlu0 %v2830_v26, %s9021_s28  ;;  %v1696_v26 = vld [vmem:[#allocation2 + $0x12a] sm:$0xff] }
 0x2ed   : > { %v1800_v41 = vpop.permute.xlu2 %1799 }
 0x2ee   : > { %v2467_v13 = vpop.permute.xlu1 %2466  ;;  %1880 = vst.msk [vmem:[#allocation3 + $0x80] sm:$0xf] %vm1863_vm3, %v1800_v41  ;;  %v2819_v41 = vld [vmem:[#allocation2 + $0x139] sm:$0xff] }
 0x2ef   : > { %v10472_v19 = vpop.permute.xlu0 %2040  ;;  %2551 = vst.msk [vmem:[#allocation3 + $0x60] sm:$0xf] %vm2538_vm4, %v2467_v13  ;;  %v1728_v13 = vpack.c.bf16 %v1696_v26, %v1696_v26  ;;  %v2851_v59 = vpack.c.bf16 %v2819_v41, %v2819_v41 }
 0x2f0   : > { %2777 = vst.msk [vmem:[#allocation3 + $0x60] sm:$0xf] %vm2764_vm6, %v10348_v34  ;;  %v1469_v34 = vld [vmem:[#allocation2 + $0x111] sm:$0xff] }
 0x2f1   : > { %v1501_v47 = vpack.c.bf16 %v1469_v34, %v1469_v34 }
 0x2f3   : > { %1586 = vrot.lane.b32.xlu2 %v10477_v23, %s9015_s17  ;;  %2257 = vrot.lane.b32.xlu1 %v10477_v23, %s9018_s25 }
 0x2f4   : > { %2901 = vrot.lane.b32.xlu0 %v2833_v17, %s9021_s28 }
 0x2f5   : > { %v2248_v22 = vpop.permute.xlu2 %2247 }
 0x2f6   : > { %v2246_v20 = vpop.permute.xlu1 %2245  ;;  %2329 = vst.msk [vmem:[#allocation3 + $0x78] sm:$0xf] %vm2313_vm13, %v2248_v22 }
 0x2f7   : > { %v10485_v45 = vpop.permute.xlu0 %2267  ;;  %2328 = vst.msk [vmem:[#allocation3 + $0x70] sm:$0xf] %vm2313_vm13, %v2246_v20 }
 0x2f8   : > { %2553 = vst.msk [vmem:[#allocation3 + $0x70] sm:$0xf] %vm2538_vm4, %v10366_v56  ;;  %v1725_v56 = vpack.c.bf16 %v1693_v52, %v1693_v52 }
 0x2fb   : > { %2032 = vrot.lane.b32.xlu2 %v10006_v11, %s9017_s24  ;;  %1588 = vrot.lane.b32.xlu1 %v1501_v47, %s9015_s17 }
 0x2fc   : > { %2907 = vrot.lane.b32.xlu0 %v2836_v36, %s9021_s28 }
 0x2fd   : > { %v1579_v24 = vpop.permute.xlu2 %1578 }
 0x2fe   : > { %v1577_v32 = vpop.permute.xlu1 %1576  ;;  %1657 = vst.msk [vmem:[#allocation3 + $0x90] sm:$0xf] %vm1638_vm2, %v1579_v24 }
 0x2ff   : > { %v10495_v63 = vpop.permute.xlu0 %1825  ;;  %1656 = vst.msk [vmem:[#allocation3 + $0x88] sm:$0xf] %vm1638_vm2, %v1577_v32 }
 0x303   : > { %1811 = vrot.lane.b32.xlu2 %v1725_v56, %s9016_s18  ;;  %1813 = vrot.lane.b32.xlu1 %v1726_v55, %s9016_s18  ;;  %v1730_v56 = vpack.c.bf16 %v1698_v37, %v1698_v37 }
 0x304   : > { %2913 = vrot.lane.b32.xlu0 %v10222_v35, %s9021_s28 }
 0x305   : > { %v2697_v11 = vpop.permute.xlu2 %2696 }
 0x306   : > { %v1802_v14 = vpop.permute.xlu1 %1801  ;;  %2779 = vst.msk [vmem:[#allocation3 + $0x70] sm:$0xf] %vm2764_vm6, %v2697_v11 }
 0x307   : > { %v10503_v5 = vpop.permute.xlu0 %2046  ;;  %1881 = vst.msk [vmem:[#allocation3 + $0x88] sm:$0xf] %vm1863_vm3, %v1802_v14  ;;  %v1697_v14 = vld [vmem:[#allocation2 + $0x13a] sm:$0xff] }
 0x30b   : > { %2259 = vrot.lane.b32.xlu2 %v1501_v47, %s9018_s25  ;;  %2484 = vrot.lane.b32.xlu1 %v1726_v55, %s9020_s27 }
 0x30c   : > { %2919 = vrot.lane.b32.xlu0 %v10339_v40, %s9021_s28 }
 0x30d   : > { %v1804_v21 = vpop.permute.xlu2 %1803 }
 0x30e   : > { %v2473_v57 = vpop.permute.xlu1 %2472  ;;  %1882 = vst.msk [vmem:[#allocation3 + $0x90] sm:$0xf] %vm1863_vm3, %v1804_v21  ;;  %v1729_v21 = vpack.c.bf16 %v1697_v14, %v1697_v14 }
 0x30f   : > { %v10511_v35 = vpop.permute.xlu0 %2494  ;;  %2554 = vst.msk [vmem:[#allocation3 + $0x78] sm:$0xf] %vm2538_vm4, %v2473_v57 }
 0x310   : > { %2780 = vst.msk [vmem:[#allocation3 + $0x78] sm:$0xf] %vm2764_vm6, %v10401_v2  ;;  %v1471_v2 = vld [vmem:[#allocation2 + $0x129] sm:$0xff] }
 0x311   : > { %2107 = vst.msk [vmem:[#allocation3 + $0x90] sm:$0xf] %vm2088_vm12, %v10412_v30  ;;  %v1727_v30 = vpack.c.bf16 %v1695_v27, %v1695_v27  ;;  %v10528_v10 = vpack.c.bf16 %v1471_v2, %v1471_v2 }
 0x313   : > { %1590 = vrot.lane.b32.xlu2 %v10272_v8, %s9015_s17  ;;  %2036 = vrot.lane.b32.xlu1 %v10078_v3, %s9017_s24 }
 0x314   : > { %2925 = vrot.lane.b32.xlu0 %v10425_v6, %s9021_s28 }
 0x315   : > { %v2027_v40 = vpop.permute.xlu2 %2026 }
 0x316   : > { %v2695_v54 = vpop.permute.xlu1 %2694  ;;  %2106 = vst.msk [vmem:[#allocation3 + $0x88] sm:$0xf] %vm2088_vm12, %v2027_v40 }
 0x317   : > { %v10525_v60 = vpop.permute.xlu0 %2273  ;;  %2778 = vst.msk [vmem:[#allocation3 + $0x68] sm:$0xf] %vm2764_vm6, %v2695_v54 }
 0x31b   : > { %1815 = vrot.lane.b32.xlu2 %v1727_v30, %s9016_s18  ;;  %1592 = vrot.lane.b32.xlu1 %v10528_v10, %s9015_s17 }
 0x31c   : > { %2931 = vrot.lane.b32.xlu0 %v1501_v47, %s9021_s28  ;;  %v2825_v47 = vld [vmem:[#allocation2 + $0x181] sm:$0xff] }
 0x31d   : > { %v2475_v8 = vpop.permute.xlu2 %2474  ;;  %v10559_v36 = vpack.c.bf16 %v2825_v47, %v2825_v47 }
 0x31e   : > { %v2025_v6 = vpop.permute.xlu1 %2024 }
 0x31f   : > { %v10534_v1 = vpop.permute.xlu0 %2500  ;;  %2105 = vst.msk [vmem:[#allocation3 + $0x80] sm:$0xf] %vm2088_vm12, %v2025_v6 }
 0x320   : > { %2330 = vst.msk [vmem:[#allocation3 + $0x80] sm:$0xf] %vm2313_vm13, %v10379_v39  ;;  %v2822_v39 = vld [vmem:[#allocation2 + $0x159] sm:$0xff] }
 0x321   : > { %2555 = vst.msk [vmem:[#allocation3 + $0x80] sm:$0xf] %vm2538_vm4, %v2475_v8  ;;  %v10548_v20 = vpack.c.bf16 %v2822_v39, %v2822_v39 }
 0x323   : > { %2038 = vrot.lane.b32.xlu2 %v10124_v48, %s9017_s24  ;;  %1817 = vrot.lane.b32.xlu1 %v1728_v13, %s9016_s18 }
 0x324   : > { %2937 = vrot.lane.b32.xlu0 %v2851_v59, %s9021_s28 }
 0x325   : > { %v1583_v38 = vpop.permute.xlu2 %1582 }
 0x326   : > { %v1581_v17 = vpop.permute.xlu1 %1580  ;;  %1659 = vst.msk [vmem:[#allocation3 + $0xa0] sm:$0xf] %vm1638_vm2, %v1583_v38  ;;  %v1699_v38 = vld [vmem:[#allocation2 + $0x152] sm:$0xff] }
 0x327   : > { %v10545_v22 = vpop.permute.xlu0 %2052  ;;  %1658 = vst.msk [vmem:[#allocation3 + $0x98] sm:$0xf] %vm1638_vm2, %v1581_v17  ;;  %v2373_v17 = vld [vmem:[#allocation2 + $0x15a] sm:$0xff] }
 0x328   : > { %v2405_v39 = vpack.c.bf16 %v2373_v17, %v2373_v17 }
 0x32b   : > { %2486 = vrot.lane.b32.xlu2 %v1727_v30, %s9020_s27  ;;  %2263 = vrot.lane.b32.xlu1 %v10528_v10, %s9018_s25  ;;  %v2147_v30 = vld [vmem:[#allocation2 + $0x151] sm:$0xff] }
 0x32c   : > { %2943 = vrot.lane.b32.xlu0 %v10548_v20, %s9021_s28  ;;  %v10590_v8 = vpack.c.bf16 %v2147_v30, %v2147_v30  ;;  %v1927_v30 = vld [vmem:[#allocation2 + $0x188] sm:$0xff] }
 0x32d   : > { %v2254_v48 = vpop.permute.xlu2 %2253 }
 0x32e   : > { %v1806_v34 = vpop.permute.xlu1 %1805  ;;  %2332 = vst.msk [vmem:[#allocation3 + $0x90] sm:$0xf] %vm2313_vm13, %v2254_v48 }
 0x32f   : > { %v10556_v29 = vpop.permute.xlu0 %2279  ;;  %1883 = vst.msk [vmem:[#allocation3 + $0x98] sm:$0xf] %vm1863_vm3, %v1806_v34 }
 0x333   : > { %1594 = vrot.lane.b32.xlu2 %v2851_v59, %s9015_s17  ;;  %1596 = vrot.lane.b32.xlu1 %v10325_v53, %s9015_s17 }
 0x334   : > { %2949 = vrot.lane.b32.xlu0 %v10559_v36, %s9021_s28 }
 0x335   : > { %v1808_v24 = vpop.permute.xlu2 %1807 }
 0x336   : > { %v2252_v32 = vpop.permute.xlu1 %2251  ;;  %1884 = vst.msk [vmem:[#allocation3 + $0xa0] sm:$0xf] %vm1863_vm3, %v1808_v24 }
 0x337   : > { %v2705_v52 = vpop.permute.xlu0 %2704  ;;  %2331 = vst.msk [vmem:[#allocation3 + $0x88] sm:$0xf] %vm2313_vm13, %v2252_v32 }
 0x338   : > { %2556 = vst.msk [vmem:[#allocation3 + $0x88] sm:$0xf] %vm2538_vm4, %v10389_v12 }
 0x33b   : > { %2265 = vrot.lane.b32.xlu2 %v2851_v59, %s9018_s25  ;;  %1821 = vrot.lane.b32.xlu1 %v1730_v56, %s9016_s18 }
 0x33d   : > { %v2481_v53 = vpop.permute.xlu2 %2480 }
 0x33e   : > { %v2701_v55 = vpop.permute.xlu1 %2700 }
 0x33f   : > { %v10572_v11 = vpop.permute.xlu0 %2710  ;;  %2781 = vst.msk [vmem:[#allocation3 + $0x80] sm:$0xf] %vm2764_vm6, %v2701_v55  ;;  %v1701_v55 = vld [vmem:[#allocation2 + $0x16a] sm:$0xff] }
 0x343   : > { %1819 = vrot.lane.b32.xlu2 %v1729_v21, %s9016_s18  ;;  %2042 = vrot.lane.b32.xlu1 %v10177_v7, %s9017_s24 }
 0x345   : > { %v2703_v57 = vpop.permute.xlu2 %2702 }
 0x346   : > { %2782 = vst.msk [vmem:[#allocation3 + $0x88] sm:$0xf] %vm2764_vm6, %v2703_v57  ;;  %v1585_v12 = vpop.permute.xlu1 %1584 }
 0x347   : > { %v10579_v40 = vpop.permute.xlu0 %2716  ;;  %1660 = vst.msk [vmem:[#allocation3 + $0xa8] sm:$0xf] %vm1638_vm2, %v1585_v12 }
 0x34b   : > { %2492 = vrot.lane.b32.xlu2 %v1730_v56, %s9020_s27  ;;  %2490 = vrot.lane.b32.xlu1 %v1729_v21, %s9020_s27  ;;  %v1733_v21 = vpack.c.bf16 %v1701_v55, %v1701_v55 }
 0x34d   : > { %v1587_v54 = vpop.permute.xlu2 %1586 }
 0x34e   : > { %v1810_v27 = vpop.permute.xlu1 %1809  ;;  %1661 = vst.msk [vmem:[#allocation3 + $0xb0] sm:$0xf] %vm1638_vm2, %v1587_v54 }
 0x34f   : > { %v10585_v2 = vpop.permute.xlu0 %2722  ;;  %1885 = vst.msk [vmem:[#allocation3 + $0xa8] sm:$0xf] %vm1863_vm3, %v1810_v27 }
 0x350   : > { %2110 = vst.msk [vmem:[#allocation3 + $0xa8] sm:$0xf] %vm2088_vm12, %v10433_v16 }
 0x353   : > { %1598 = vrot.lane.b32.xlu2 %v10590_v8, %s9015_s17  ;;  %2269 = vrot.lane.b32.xlu1 %v10590_v8, %s9018_s25 }
 0x355   : > { %v2033_v6 = vpop.permute.xlu2 %2032 }
 0x356   : > { %v2031_v26 = vpop.permute.xlu1 %2030  ;;  %2109 = vst.msk [vmem:[#allocation3 + $0xa0] sm:$0xf] %vm2088_vm12, %v2033_v6 }
 0x357   : > { %v10597_v41 = vpop.permute.xlu0 %2728  ;;  %2108 = vst.msk [vmem:[#allocation3 + $0x98] sm:$0xf] %vm2088_vm12, %v2031_v26  ;;  %v2376_v26 = vld [vmem:[#allocation2 + $0x182] sm:$0xff] }
 0x358   : > { %2333 = vst.msk [vmem:[#allocation3 + $0x98] sm:$0xf] %vm2313_vm13, %v10420_v33  ;;  %v1731_v33 = vpack.c.bf16 %v1699_v38, %v1699_v38 }
 0x359   : > { %2558 = vst.msk [vmem:[#allocation3 + $0x98] sm:$0xf] %vm2538_vm4, %v2481_v53  ;;  %v1702_v53 = vld [vmem:[#allocation2 + $0x172] sm:$0xff] }
 0x35a   : > { %v1734_v14 = vpack.c.bf16 %v1702_v53, %v1702_v53  ;;  %v2805_v53 = vld [vmem:[#allocation2 + $0x91] sm:$0xff] }
 0x35b   : > { %2044 = vrot.lane.b32.xlu2 %v10199_v46, %s9017_s24  ;;  %1600 = vrot.lane.b32.xlu1 %v10548_v20, %s9015_s17 }
 0x35d   : > { %v1812_v16 = vpop.permute.xlu2 %1811 }
 0x35e   : > { %v2479_v13 = vpop.permute.xlu1 %2478  ;;  %1886 = vst.msk [vmem:[#allocation3 + $0xb0] sm:$0xf] %vm1863_vm3, %v1812_v16  ;;  %v2408_v16 = vpack.c.bf16 %v2376_v26, %v2376_v26  ;;  %v2812_v26 = vld [vmem:[#allocation2 + $0xe1] sm:$0xff] }
 0x35f   : > { %v2896_v59 = vpop.permute.xlu0 %2895  ;;  %2557 = vst.msk [vmem:[#allocation3 + $0x90] sm:$0xf] %vm2538_vm4, %v2479_v13 }
 0x360   : > { %2783 = vst.msk [vmem:[#allocation3 + $0x90] sm:$0xf] %vm2764_vm6, %v2705_v52  ;;  %v1477_v52 = vld [vmem:[#allocation2 + $0x171] sm:$0xff] }
 0x361   : > { %2991 = vst.msk [vmem:[#allocation3 + $0x8] sm:$0xf] %vm2989_vm14, %v2896_v59  ;;  %v10625_v37 = vpack.c.bf16 %v1477_v52, %v1477_v52  ;;  %v2377_v59 = vld [vmem:[#allocation2 + $0x18a] sm:$0xff] }
 0x362   : > { %v2409_v38 = vpack.c.bf16 %v2377_v59, %v2377_v59  ;;  %v8180_v59 = vld [vmem:[%s13671_s6 + $0x30] sm:$0xff] }
 0x363   : > { %1823 = vrot.lane.b32.xlu2 %v1731_v33, %s9016_s18  ;;  %2496 = vrot.lane.b32.xlu1 %v2405_v39, %s9020_s27 }
 0x365   : > { %v2260_v46 = vpop.permute.xlu2 %2259 }
 0x366   : > { %v2258_v48 = vpop.permute.xlu1 %2257  ;;  %2335 = vst.msk [vmem:[#allocation3 + $0xa8] sm:$0xf] %vm2313_vm13, %v2260_v46 }
 0x367   : > { %v2902_v34 = vpop.permute.xlu0 %2901  ;;  %2334 = vst.msk [vmem:[#allocation3 + $0xa0] sm:$0xf] %vm2313_vm13, %v2258_v48 }
 0x368   : > { %2559 = vst.msk [vmem:[#allocation3 + $0xa0] sm:$0xf] %vm2538_vm4, %v10443_v42 }
 0x369   : > { %2994 = vst.msk [vmem:[#allocation3 + $0x20] sm:$0xf] %vm2989_vm14, %v2902_v34 }
 0x36b   : > { %2271 = vrot.lane.b32.xlu2 %v10548_v20, %s9018_s25  ;;  %2048 = vrot.lane.b32.xlu1 %v10249_v9, %s9017_s24 }
 0x36d   : > { %v1591_v47 = vpop.permute.xlu2 %1590 }
 0x36e   : > { %v1589_v24 = vpop.permute.xlu1 %1588  ;;  %1663 = vst.msk [vmem:[#allocation3 + $0xc0] sm:$0xf] %vm1638_vm2, %v1591_v47 }
 0x36f   : > { %v2908_v32 = vpop.permute.xlu0 %2907  ;;  %1662 = vst.msk [vmem:[#allocation3 + $0xb8] sm:$0xf] %vm1638_vm2, %v1589_v24  ;;  %v2800_v24 = vld [vmem:[#allocation2 + $0x51] sm:$0xff] }
 0x370   : > { %2997 = vst.msk [vmem:[#allocation3 + $0x38] sm:$0xf] %vm2989_vm14, %v2908_v32  ;;  %v2802_v32 = vld [vmem:[#allocation2 + $0x69] sm:$0xff]  ;;  %v2832_v52 = vpack.c.bf16 %v2800_v24, %v2800_v24 }
 0x373   : > { %1602 = vrot.lane.b32.xlu2 %v10371_v31, %s9015_s17  ;;  %1604 = vrot.lane.b32.xlu1 %v10625_v37, %s9015_s17  ;;  %s11828_s17 = sld [smem:[#allocation7 + $0x1]] }
 0x375   : > { %v1816_v42 = vpop.permute.xlu2 %1815 }
 0x376   : > { %v1814_v20 = vpop.permute.xlu1 %1813  ;;  %1888 = vst.msk [vmem:[#allocation3 + $0xc0] sm:$0xf] %vm1863_vm3, %v1816_v42  ;;  %v2834_v42 = vpack.c.bf16 %v2802_v32, %v2802_v32 }
 0x377   : > { %v2914_v56 = vpop.permute.xlu0 %2913  ;;  %1887 = vst.msk [vmem:[#allocation3 + $0xb8] sm:$0xf] %vm1863_vm3, %v1814_v20 }
 0x378   : > { %2113 = vst.msk [vmem:[#allocation3 + $0xc0] sm:$0xf] %vm2088_vm12, %v10472_v19 }
 0x379   : > { %3000 = vst.msk [vmem:[#allocation3 + $0x50] sm:$0xf] %vm2989_vm14, %v2914_v56  ;;  %v2803_v56 = vld [vmem:[#allocation2 + $0x79] sm:$0xff] }
 0x37a   : > { %v2835_v55 = vpack.c.bf16 %v2803_v56, %v2803_v56  ;;  %v8143_v56 = vld [vmem:[#allocation3 + $0x4] sm:$0xf0] }
 0x37b   : > { %1829 = vrot.lane.b32.xlu2 %v1734_v14, %s9016_s18  ;;  %1827 = vrot.lane.b32.xlu1 %v1733_v21, %s9016_s18  ;;  %v2837_v14 = vpack.c.bf16 %v2805_v53, %v2805_v53  ;;  %s11831_s18 = sld [smem:[#allocation7 + $0x34]] }
 0x37d   : > { %v2039_v31 = vpop.permute.xlu2 %2038 }
 0x37e   : > { %v2485_v57 = vpop.permute.xlu1 %2484  ;;  %2112 = vst.msk [vmem:[#allocation3 + $0xb8] sm:$0xf] %vm2088_vm12, %v2039_v31  ;;  %v2806_v31 = vld [vmem:[#allocation2 + $0x99] sm:$0xff] }
 0x37f   : > { %v2920_v12 = vpop.permute.xlu0 %2919  ;;  %2560 = vst.msk [vmem:[#allocation3 + $0xa8] sm:$0xf] %vm2538_vm4, %v2485_v57  ;;  %v2808_v57 = vld [vmem:[#allocation2 + $0xb1] sm:$0xff] }
 0x380   : > { %2786 = vst.msk [vmem:[#allocation3 + $0xa8] sm:$0xf] %vm2764_vm6, %v10572_v11  ;;  %v1959_v11 = vpack.c.bf16 %v1927_v30, %v1927_v30  ;;  %v2811_v30 = vld [vmem:[#allocation2 + $0xd9] sm:$0xff] }
 0x381   : > { %3003 = vst.msk [vmem:[#allocation3 + $0x68] sm:$0xf] %vm2989_vm14, %v2920_v12  ;;  %v2838_v12 = vpack.c.bf16 %v2806_v31, %v2806_v31 }
 0x383   : > { %2050 = vrot.lane.b32.xlu2 %v10285_v61, %s9017_s24  ;;  %2275 = vrot.lane.b32.xlu1 %v10625_v37, %s9018_s25 }
 0x385   : > { %v2487_v19 = vpop.permute.xlu2 %2486 }
 0x386   : > { %v2037_v54 = vpop.permute.xlu1 %2036 }
 0x387   : > { %2111 = vst.msk [vmem:[#allocation3 + $0xb0] sm:$0xf] %vm2088_vm12, %v2037_v54  ;;  %v2926_v27 = vpop.permute.xlu0 %2925 }
 0x388   : > { %2336 = vst.msk [vmem:[#allocation3 + $0xb0] sm:$0xf] %vm2313_vm13, %v10451_v50 }
 0x389   : > { %2561 = vst.msk [vmem:[#allocation3 + $0xb0] sm:$0xf] %vm2538_vm4, %v2487_v19  ;;  %v2840_v19 = vpack.c.bf16 %v2808_v57, %v2808_v57 }
 0x38a   : > { %3006 = vst.msk [vmem:[#allocation3 + $0x80] sm:$0xf] %vm2989_vm14, %v2926_v27  ;;  %v2809_v27 = vld [vmem:[#allocation2 + $0xc1] sm:$0xff] }
 0x38b   : > { %2498 = vrot.lane.b32.xlu2 %v1733_v21, %s9020_s27  ;;  %2054 = vrot.lane.b32.xlu1 %v1959_v11, %s9017_s24  ;;  %s11837_s24 = sld [smem:[#allocation7 + $0x6]] }
 0x38d   : > { %v1595_v61 = vpop.permute.xlu2 %1594 }
 0x38e   : > { %v1593_v6 = vpop.permute.xlu1 %1592  ;;  %1665 = vst.msk [vmem:[#allocation3 + $0xd0] sm:$0xf] %vm1638_vm2, %v1595_v61  ;;  %v2843_v61 = vpack.c.bf16 %v2811_v30, %v2811_v30 }
 0x38f   : > { %1664 = vst.msk [vmem:[#allocation3 + $0xc8] sm:$0xf] %vm1638_vm2, %v1593_v6 }
 0x393   : > { %2277 = vrot.lane.b32.xlu2 %v10559_v36, %s9018_s25  ;;  %2502 = vrot.lane.b32.xlu1 %v2408_v16, %s9020_s27  ;;  %v2814_v16 = vld [vmem:[#allocation2 + $0xf9] sm:$0xff]  ;;  %s7797_s25 = sld [smem:[#allocation5 + $0x5]] }
 0x395   : > { %v2266_v50 = vpop.permute.xlu2 %2265 }
 0x396   : > { %v1818_v13 = vpop.permute.xlu1 %1817  ;;  %2338 = vst.msk [vmem:[#allocation3 + $0xc0] sm:$0xf] %vm2313_vm13, %v2266_v50  ;;  %v2844_v50 = vpack.c.bf16 %v2812_v26, %v2812_v26  ;;  %v7853_v26 = vld [vmem:[#allocation3 + $0x20] sm:$0xf] }
 0x397   : > { %1889 = vst.msk [vmem:[#allocation3 + $0xc8] sm:$0xf] %vm1863_vm3, %v1818_v13  ;;  %v2846_v13 = vpack.c.bf16 %v2814_v16, %v2814_v16 }
 0x39b   : > { %2504 = vrot.lane.b32.xlu2 %v2409_v38, %s9020_s27  ;;  %2706 = vrot.lane.b32.xlu1 %v10040_v51, %s9019_s26  ;;  %s11852_s27 = sld [smem:[#allocation7 + $0x37]] }
 0x39d   : > { %v1820_v17 = vpop.permute.xlu2 %1819 }
 0x39e   : > { %v2264_v33 = vpop.permute.xlu1 %2263  ;;  %1890 = vst.msk [vmem:[#allocation3 + $0xd0] sm:$0xf] %vm1863_vm3, %v1820_v17 }
 0x39f   : > { %2337 = vst.msk [vmem:[#allocation3 + $0xb8] sm:$0xf] %vm2313_vm13, %v2264_v33  ;;  %v2817_v33 = vld [vmem:[#allocation2 + $0x121] sm:$0xff] }
 0x3a0   : > { %2562 = vst.msk [vmem:[#allocation3 + $0xb8] sm:$0xf] %vm2538_vm4, %v10461_v18 }
 0x3a3   : > { %2708 = vrot.lane.b32.xlu2 %v10078_v3, %s9019_s26  ;;  %2712 = vrot.lane.b32.xlu1 %v10129_v0, %s9019_s26  ;;  %v2603_v0 = vld [vmem:[#allocation2 + $0x1a0] sm:$0xff] }
 0x3a5   : > { %v2493_v36 = vpop.permute.xlu2 %2492 }
 0x3a6   : > { %v1597_v39 = vpop.permute.xlu1 %1596 }
 0x3a7   : > { %1666 = vst.msk [vmem:[#allocation3 + $0xd8] sm:$0xf] %vm1638_vm2, %v1597_v39  ;;  %v2849_v39 = vpack.c.bf16 %v2817_v33, %v2817_v33 }
 0x3ab   : > { %2714 = vrot.lane.b32.xlu2 %v10177_v7, %s9019_s26  ;;  %2718 = vrot.lane.b32.xlu1 %v10243_v15, %s9019_s26  ;;  %v2635_v15 = vpack.c.bf16 %v2603_v0, %v2603_v0  ;;  %v8177_v0 = vld [vmem:[%s13671_s6 + $0x18] sm:$0xff] }
 0x3ad   : > { %v1599_v51 = vpop.permute.xlu2 %1598 }
 0x3ae   : > { %v1822_v46 = vpop.permute.xlu1 %1821  ;;  %1667 = vst.msk [vmem:[#allocation3 + $0xe0] sm:$0xf] %vm1638_vm2, %v1599_v51  ;;  %v8178_v51 = vld [vmem:[%s13671_s6 + $0x20] sm:$0xff] }
 0x3af   : > { %1891 = vst.msk [vmem:[#allocation3 + $0xd8] sm:$0xf] %vm1863_vm3, %v1822_v46 }
 0x3b0   : > { %2116 = vst.msk [vmem:[#allocation3 + $0xd8] sm:$0xf] %vm2088_vm12, %v10503_v5  ;;  %v2799_v5 = vld [vmem:[#allocation2 + $0x49] sm:$0xff] }
 0x3b3   : > { %2720 = vrot.lane.b32.xlu2 %v10249_v9, %s9019_s26  ;;  %2724 = vrot.lane.b32.xlu1 %v10395_v28, %s9019_s26  ;;  %v2797_v28 = vld [vmem:[#allocation2 + $0x31] sm:$0xff] }
 0x3b4   : > { %v2829_v48 = vpack.c.bf16 %v2797_v28, %v2797_v28  ;;  %v8174_v28 = vld [vmem:[%s13671_s6] sm:$0xff] }
 0x3b5   : > { %v2045_v3 = vpop.permute.xlu2 %2044 }
 0x3b6   : > { %v2043_v7 = vpop.permute.xlu1 %2042  ;;  %2115 = vst.msk [vmem:[#allocation3 + $0xd0] sm:$0xf] %vm2088_vm12, %v2045_v3 }
 0x3b7   : > { %2114 = vst.msk [vmem:[#allocation3 + $0xc8] sm:$0xf] %vm2088_vm12, %v2043_v7 }
 0x3b8   : > { %2339 = vst.msk [vmem:[#allocation3 + $0xc8] sm:$0xf] %vm2313_vm13, %v10485_v45  ;;  %v2831_v45 = vpack.c.bf16 %v2799_v5, %v2799_v5 }
 0x3b9   : > { %2564 = vst.msk [vmem:[#allocation3 + $0xc8] sm:$0xf] %vm2538_vm4, %v2493_v36  ;;  %v8179_v36 = vld [vmem:[%s13671_s6 + $0x28] sm:$0xff] }
 0x3bb   : > { %2726 = vrot.lane.b32.xlu2 %v1959_v11, %s9019_s26  ;;  %2730 = vrot.lane.b32.xlu1 %v2635_v15, %s9019_s26  ;;  %v2841_v11 = vpack.c.bf16 %v2809_v27, %v2809_v27  ;;  %s7796_s26 = sld [smem:[#allocation5 + $0x4]] }
 0x3bd   : > { %v1824_v9 = vpop.permute.xlu2 %1823 }
 0x3be   : > { %v2491_v18 = vpop.permute.xlu1 %2490  ;;  %1892 = vst.msk [vmem:[#allocation3 + $0xe0] sm:$0xf] %vm1863_vm3, %v1824_v9 }
 0x3bf   : > { %2563 = vst.msk [vmem:[#allocation3 + $0xc0] sm:$0xf] %vm2538_vm4, %v2491_v18  ;;  %v8175_v18 = vld [vmem:[%s13671_s6 + $0x8] sm:$0xff] }
 0x3c0   : > { %2789 = vst.msk [vmem:[#allocation3 + $0xc0] sm:$0xf] %vm2764_vm6, %v10579_v40 }
 0x3c3   : > { %2893 = vrot.lane.b32.xlu2 %v2829_v48, %s9021_s28  ;;  %2897 = vrot.lane.b32.xlu1 %v2831_v45, %s9021_s28  ;;  %v2826_v48 = vld [vmem:[#allocation2 + $0x189] sm:$0xff]  ;;  %v2932_v45 = vpop.permute.xlu0 %2931 }
 0x3c5   : > { %v2272_v34 = vpop.permute.xlu2 %2271 }
 0x3c6   : > { %v2270_v47 = vpop.permute.xlu1 %2269  ;;  %2341 = vst.msk [vmem:[#allocation3 + $0xd8] sm:$0xf] %vm2313_vm13, %v2272_v34  ;;  %v2858_v34 = vpack.c.bf16 %v2826_v48, %v2826_v48 }
 0x3c7   : > { %2340 = vst.msk [vmem:[#allocation3 + $0xd0] sm:$0xf] %vm2313_vm13, %v2270_v47 }
 0x3c8   : > { %2565 = vst.msk [vmem:[#allocation3 + $0xd0] sm:$0xf] %vm2538_vm4, %v10511_v35 }
 0x3cb   : > { %2899 = vrot.lane.b32.xlu2 %v2832_v52, %s9021_s28  ;;  %2903 = vrot.lane.b32.xlu1 %v2834_v42, %s9021_s28  ;;  %v2938_v24 = vpop.permute.xlu0 %2937 }
 0x3cd   : > { %v1603_v40 = vpop.permute.xlu2 %1602 }
 0x3ce   : > { %v1601_v20 = vpop.permute.xlu1 %1600  ;;  %1669 = vst.msk [vmem:[#allocation3 + $0xf0] sm:$0xf] %vm1638_vm2, %v1603_v40 }
 0x3cf   : > { %1668 = vst.msk [vmem:[#allocation3 + $0xe8] sm:$0xf] %vm1638_vm2, %v1601_v20 }
 0x3d0   : > { %1893 = vst.msk [vmem:[#allocation3 + $0xe8] sm:$0xf] %vm1863_vm3, %v10495_v63 }
 0x3d3   : > { %2905 = vrot.lane.b32.xlu2 %v2835_v55, %s9021_s28  ;;  %2909 = vrot.lane.b32.xlu1 %v2837_v14, %s9021_s28 }
 0x3d5   : > { %v1830_v35 = vpop.permute.xlu2 %1829 }
 0x3d6   : > { %v2497_v21 = vpop.permute.xlu1 %2496 }
 0x3d7   : > { %2566 = vst.msk [vmem:[#allocation3 + $0xd8] sm:$0xf] %vm2538_vm4, %v2497_v21 }
 0x3d8   : > { %2792 = vst.msk [vmem:[#allocation3 + $0xd8] sm:$0xf] %vm2764_vm6, %v10585_v2 }
 0x3db   : > { %2911 = vrot.lane.b32.xlu2 %v2838_v12, %s9021_s28  ;;  %2915 = vrot.lane.b32.xlu1 %v2840_v19, %s9021_s28 }
 0x3dd   : > { %v2051_v63 = vpop.permute.xlu2 %2050 }
 0x3de   : > { %v2049_v54 = vpop.permute.xlu1 %2048  ;;  %2118 = vst.msk [vmem:[#allocation3 + $0xe8] sm:$0xf] %vm2088_vm12, %v2051_v63 }
 0x3df   : > { %2117 = vst.msk [vmem:[#allocation3 + $0xe0] sm:$0xf] %vm2088_vm12, %v2049_v54 }
 0x3e0   : > { %2342 = vst.msk [vmem:[#allocation3 + $0xe0] sm:$0xf] %vm2313_vm13, %v10525_v60  ;;  %v8181_v60 = vld [vmem:[%s13671_s6 + $0x38] sm:$0xff] }
 0x3e1   : > { %3414 = vmatpush.bf16.msra.mxu1 %v8181_v60 }
 0x3e3   : > { %2917 = vrot.lane.b32.xlu2 %v2841_v11, %s9021_s28  ;;  %2921 = vrot.lane.b32.xlu1 %v2843_v61, %s9021_s28 }
 0x3e5   : > { %v2499_v2 = vpop.permute.xlu2 %2498  ;;  %3415 = vmatpush.bf16.msra.mxu1 %v8180_v59 }
 0x3e6   : > { %2567 = vst.msk [vmem:[#allocation3 + $0xe0] sm:$0xf] %vm2538_vm4, %v2499_v2  ;;  %v1605_v6 = vpop.permute.xlu1 %1604 }
 0x3e7   : > { %1670 = vst.msk [vmem:[#allocation3 + $0xf8] sm:$0xf] %vm1638_vm2, %v1605_v6 }
 0x3e8   : > { %1895 = vst.msk [vmem:[#allocation3 + $0xf8] sm:$0xf] %vm1863_vm3, %v1830_v35 }
 0x3e9   : > { %3416 = vmatpush.bf16.msra.mxu1 %v8179_v36 }
 0x3eb   : > { %2923 = vrot.lane.b32.xlu2 %v2844_v50, %s9021_s28  ;;  %2927 = vrot.lane.b32.xlu1 %v2846_v13, %s9021_s28 }
 0x3ed   : > { %v2278_v38 = vpop.permute.xlu2 %2277  ;;  %3417 = vmatpush.bf16.msra.mxu1 %v8178_v51 }
 0x3ee   : > { %v1828_v17 = vpop.permute.xlu1 %1827 }
 0x3ef   : > { %1894 = vst.msk [vmem:[#allocation3 + $0xf0] sm:$0xf] %vm1863_vm3, %v1828_v17  ;;  %v8149_v17 = vld [vmem:[#allocation3 + $0x34] sm:$0xf0] }
 0x3f0   : > { %2119 = vst.msk [vmem:[#allocation3 + $0xf0] sm:$0xf] %vm2088_vm12, %v10545_v22  ;;  %v2820_v22 = vld [vmem:[#allocation2 + $0x141] sm:$0xff] }
 0x3f1   : > { %2344 = vst.msk [vmem:[#allocation3 + $0xf0] sm:$0xf] %vm2313_vm13, %v2278_v38  ;;  %v2852_v7 = vpack.c.bf16 %v2820_v22, %v2820_v22  ;;  %3418 = vmatpush.bf16.msra.mxu1 %v8177_v0 }
 0x3f3   : > { %2929 = vrot.lane.b32.xlu2 %v10477_v23, %s9021_s28  ;;  %2933 = vrot.lane.b32.xlu1 %v2849_v39, %s9021_s28  ;;  %v8176_v23 = vld [vmem:[%s13671_s6 + $0x10] sm:$0xff] }
 0x3f5   : > { %v2505_v46 = vpop.permute.xlu2 %2504  ;;  %3419 = vmatpush.bf16.msra.mxu1 %v8176_v23 }
 0x3f6   : > { %v2276_v3 = vpop.permute.xlu1 %2275 }
 0x3f7   : > { %2343 = vst.msk [vmem:[#allocation3 + $0xe8] sm:$0xf] %vm2313_vm13, %v2276_v3 }
 0x3f8   : > { %2568 = vst.msk [vmem:[#allocation3 + $0xe8] sm:$0xf] %vm2538_vm4, %v10534_v1  ;;  %v2823_v1 = vld [vmem:[#allocation2 + $0x169] sm:$0xff] }
 0x3f9   : > { %3420 = vmatpush.bf16.msra.mxu1 %v8175_v18 }
 0x3fb   : > { %2935 = vrot.lane.b32.xlu2 %v10528_v10, %s9021_s28  ;;  %2939 = vrot.lane.b32.xlu1 %v2852_v7, %s9021_s28  ;;  %v2855_v10 = vpack.c.bf16 %v2823_v1, %v2823_v1  ;;  %v2828_v1 = vld [vmem:[#allocation2 + $0x1a1] sm:$0xff] }
 0x3fc   : > { %v2860_v18 = vpack.c.bf16 %v2828_v1, %v2828_v1 }
 0x3fd   : > { %v2709_v15 = vpop.permute.xlu2 %2708  ;;  %3421 = vmatpush.bf16.msra.mxu1 %v8174_v28  ;;  %v8155_v28 = vld [vmem:[#allocation3 + $0x64] sm:$0xf0] }
 0x3fe   : > { %2785 = vst.msk [vmem:[#allocation3 + $0xa0] sm:$0xf] %vm2764_vm6, %v2709_v15  ;;  %v2055_v9 = vpop.permute.xlu1 %2054  ;;  %v7877_v15 = vld [vmem:[#allocation3 + $0x50] sm:$0xf]  ;;  %2955 = vrot.lane.b32.xlu0 %v2860_v18, %s9021_s28 }
 0x3ff   : > { %2120 = vst.msk [vmem:[#allocation3 + $0xf8] sm:$0xf] %vm2088_vm12, %v2055_v9 }
 0x400   : > { %2345 = vst.msk [vmem:[#allocation3 + $0xf8] sm:$0xf] %vm2313_vm13, %v10556_v29 }
 0x401   : > { %2570 = vst.msk [vmem:[#allocation3 + $0xf8] sm:$0xf] %vm2538_vm4, %v2505_v46 }
 0x403   : > { %2941 = vrot.lane.b32.xlu2 %v10590_v8, %s9021_s28  ;;  %2945 = vrot.lane.b32.xlu1 %v2855_v10, %s9021_s28 }
 0x405   : > { %v2715_v5 = vpop.permute.xlu2 %2714 }
 0x406   : > { %2788 = vst.msk [vmem:[#allocation3 + $0xb8] sm:$0xf] %vm2764_vm6, %v2715_v5  ;;  %v2503_v29 = vpop.permute.xlu1 %2502 }
 0x407   : > { %2569 = vst.msk [vmem:[#allocation3 + $0xf0] sm:$0xf] %vm2538_vm4, %v2503_v29 }
 0x408   : > { %2795 = vst.msk [vmem:[#allocation3 + $0xf0] sm:$0xf] %vm2764_vm6, %v10597_v41 }
 0x40b   : > { %2947 = vrot.lane.b32.xlu2 %v10625_v37, %s9021_s28  ;;  %2951 = vrot.lane.b32.xlu1 %v2858_v34, %s9021_s28  ;;  %v2944_v37 = vpop.permute.xlu0 %2943  ;;  %v2827_v34 = vld [vmem:[#allocation2 + $0x199] sm:$0xff] }
 0x40d   : > { %v2721_v8 = vpop.permute.xlu2 %2720 }
 0x40e   : > { %2791 = vst.msk [vmem:[#allocation3 + $0xd0] sm:$0xf] %vm2764_vm6, %v2721_v8  ;;  %v2707_v47 = vpop.permute.xlu1 %2706  ;;  %v2859_v8 = vpack.c.bf16 %v2827_v34, %v2827_v34 }
 0x40f   : > { %2784 = vst.msk [vmem:[#allocation3 + $0x98] sm:$0xf] %vm2764_vm6, %v2707_v47  ;;  %v10813_v47 = vld [vmem:[%s13672_s7] ss:$0 sm:$0xff] }
 0x410   : > { %3009 = vst.msk [vmem:[#allocation3 + $0x98] sm:$0xf] %vm2989_vm14, %v2932_v45 }
 0x413   : > { %v2950_v14 = vpop.permute.xlu0 %2949  ;;  %2953 = vrot.lane.b32.xlu2 %v2859_v8, %s9021_s28  ;;  %s7795_s28 = sld [smem:[#allocation5 + $0x3]] }
 0x415   : > { %v2727_v32 = vpop.permute.xlu2 %2726 }
 0x416   : > { %2794 = vst.msk [vmem:[#allocation3 + $0xe8] sm:$0xf] %vm2764_vm6, %v2727_v32  ;;  %v2713_v41 = vpop.permute.xlu1 %2712 }
 0x417   : > { %2787 = vst.msk [vmem:[#allocation3 + $0xb0] sm:$0xf] %vm2764_vm6, %v2713_v41  ;;  %v10820_v41 = vld [vmem:[%s13673_s8] ss:$0 sm:$0xff] }
 0x418   : > { %3012 = vst.msk [vmem:[#allocation3 + $0xb0] sm:$0xf] %vm2989_vm14, %v2938_v24 }
 0x41d   : > { %v2894_v52 = vpop.permute.xlu2 %2893 }
 0x41e   : > { %2990 = vst.msk [vmem:[#allocation3] sm:$0xf] %vm2989_vm14, %v2894_v52  ;;  %v2719_v42 = vpop.permute.xlu1 %2718  ;;  %v10823_v52 = vstv %s7797_s25  ;;  %s13685_s25 = smov 123  }
 0x41f   : > { %2790 = vst.msk [vmem:[#allocation3 + $0xc8] sm:$0xf] %vm2764_vm6, %v2719_v42 }
 0x420   : > { %3015 = vst.msk [vmem:[#allocation3 + $0xc8] sm:$0xf] %vm2989_vm14, %v2944_v37 }
 0x425   : > { %v2900_v40 = vpop.permute.xlu2 %2899  ;;  %v7837_v20 = vld [vmem:[#allocation3] sm:$0xf] }
 0x426   : > { %2993 = vst.msk [vmem:[#allocation3 + $0x18] sm:$0xf] %vm2989_vm14, %v2900_v40  ;;  %v2725_v53 = vpop.permute.xlu1 %2724  ;;  %v7838_v55 = vor.u32 %v8143_v56, %v7837_v20  ;;  %v10828_v40 = vstv %s7796_s26  ;;  %s11841_s26 = sld [smem:[#allocation7 + $0x4]] }
 0x427   : > { %2793 = vst.msk [vmem:[#allocation3 + $0xe0] sm:$0xf] %vm2764_vm6, %v2725_v53  ;;  %v10832_v53 = vpop.f32.mrf.mxu2 }
 0x428   : > { %3018 = vst.msk [vmem:[#allocation3 + $0xe0] sm:$0xf] %vm2989_vm14, %v2950_v14  ;;  %3422 = vmatmul.bf16.vlgmr.msra.gmra.mxu1 %v7838_v55 }
 0x42d   : > { %v2906_v35 = vpop.permute.xlu2 %2905  ;;  %v8145_v54 = vld [vmem:[#allocation3 + $0x14] sm:$0xf0] }
 0x42e   : > { %2996 = vst.msk [vmem:[#allocation3 + $0x30] sm:$0xf] %vm2989_vm14, %v2906_v35  ;;  %v2731_v21 = vpop.permute.xlu1 %2730  ;;  %v7901_v35 = vld [vmem:[#allocation3 + $0x80] sm:$0xf] }
 0x42f   : > { %2796 = vst.msk [vmem:[#allocation3 + $0xf8] sm:$0xf] %vm2764_vm6, %v2731_v21 }
 0x435   : > { %v2912_v31 = vpop.permute.xlu2 %2911  ;;  %v7861_v13 = vld [vmem:[#allocation3 + $0x30] sm:$0xf] }
 0x436   : > { %2999 = vst.msk [vmem:[#allocation3 + $0x48] sm:$0xf] %vm2989_vm14, %v2912_v31  ;;  %v2898_v57 = vpop.permute.xlu1 %2897  ;;  %v7862_v33 = vor.u32 %v8149_v17, %v7861_v13  ;;  %v8183_v17 = vld [vmem:[%s13674_s9] sm:$0xff] }
 0x437   : > { %2992 = vst.msk [vmem:[#allocation3 + $0x10] sm:$0xf] %vm2989_vm14, %v2898_v57  ;;  %4226 = vmatpush.bf16.msra.mxu3 %v8183_v17 }
 0x43d   : > { %v2918_v12 = vpop.permute.xlu2 %2917  ;;  %v8151_v3 = vld [vmem:[#allocation3 + $0x44] sm:$0xf0] }
 0x43e   : > { %3002 = vst.msk [vmem:[#allocation3 + $0x60] sm:$0xf] %vm2989_vm14, %v2918_v12  ;;  %v2904_v19 = vpop.permute.xlu1 %2903  ;;  %v7845_v63 = vld [vmem:[#allocation3 + $0x10] sm:$0xf] }
 0x43f   : > { %2995 = vst.msk [vmem:[#allocation3 + $0x28] sm:$0xf] %vm2989_vm14, %v2904_v19  ;;  %v7846_v27 = vor.u32 %v8145_v54, %v7845_v63  ;;  %v10843_v54 = vpop.f32.mrf.mxu2 }
 0x441   : > { %3427 = vmatmul.bf16.gmra.mxu1 %v7846_v27 }
 0x445   : > { %v2924_v30 = vpop.permute.xlu2 %2923  ;;  %v7885_v10 = vld [vmem:[#allocation3 + $0x60] sm:$0xf] }
 0x446   : > { %3005 = vst.msk [vmem:[#allocation3 + $0x78] sm:$0xf] %vm2989_vm14, %v2924_v30  ;;  %v2910_v11 = vpop.permute.xlu1 %2909  ;;  %v8147_v61 = vld [vmem:[#allocation3 + $0x24] sm:$0xf0]  ;;  %v7886_v5 = vor.u32 %v8155_v28, %v7885_v10 }
 0x447   : > { %2998 = vst.msk [vmem:[#allocation3 + $0x40] sm:$0xf] %vm2989_vm14, %v2910_v11  ;;  %v7854_v16 = vor.u32 %v8147_v61, %v7853_v26 }
 0x44d   : > { %v2930_v2 = vpop.permute.xlu2 %2929  ;;  %v8157_v48 = vld [vmem:[#allocation3 + $0x74] sm:$0xf0] }
 0x44e   : > { %3008 = vst.msk [vmem:[#allocation3 + $0x90] sm:$0xf] %vm2989_vm14, %v2930_v2  ;;  %v2916_v6 = vpop.permute.xlu1 %2915  ;;  %v7869_v51 = vld [vmem:[#allocation3 + $0x40] sm:$0xf]  ;;  %v8161_v2 = vld [vmem:[#allocation3 + $0x94] sm:$0xf0] }
 0x44f   : > { %3001 = vst.msk [vmem:[#allocation3 + $0x58] sm:$0xf] %vm2989_vm14, %v2916_v6  ;;  %v7870_v22 = vor.u32 %v8151_v3, %v7869_v51 }
 0x451   : > { %3432 = vmatmul.bf16.gmra.mxu1 %v7854_v16 }
 0x455   : > { %v2936_v60 = vpop.permute.xlu2 %2935  ;;  %v7909_v11 = vld [vmem:[#allocation3 + $0x90] sm:$0xf] }
 0x456   : > { %3011 = vst.msk [vmem:[#allocation3 + $0xa8] sm:$0xf] %vm2989_vm14, %v2936_v60  ;;  %v2922_v50 = vpop.permute.xlu1 %2921  ;;  %v8153_v7 = vld [vmem:[#allocation3 + $0x54] sm:$0xf0]  ;;  %v7910_v26 = vor.u32 %v8161_v2, %v7909_v11 }
 0x457   : > { %3004 = vst.msk [vmem:[#allocation3 + $0x70] sm:$0xf] %vm2989_vm14, %v2922_v50  ;;  %v7878_v9 = vor.u32 %v8153_v7, %v7877_v15  ;;  %v10846_v50 = vpop.f32.mrf.mxu2 }
 0x45d   : > { %v2942_v59 = vpop.permute.xlu2 %2941 }
 0x45e   : > { %3014 = vst.msk [vmem:[#allocation3 + $0xc0] sm:$0xf] %vm2989_vm14, %v2942_v59  ;;  %v2928_v38 = vpop.permute.xlu1 %2927  ;;  %v7893_v29 = vld [vmem:[#allocation3 + $0x70] sm:$0xf] }
 0x45f   : > { %3007 = vst.msk [vmem:[#allocation3 + $0x88] sm:$0xf] %vm2989_vm14, %v2928_v38  ;;  %v7894_v45 = vor.u32 %v8157_v48, %v7893_v29  ;;  %v10866_v18 = vpop.f32.mrf.mxu2 }
 0x461   : > { %3437 = vmatmul.bf16.gmra.mxu1 %v7862_v33 }
 0x465   : > { %v2948_v36 = vpop.permute.xlu2 %2947 }
 0x466   : > { %3017 = vst.msk [vmem:[#allocation3 + $0xd8] sm:$0xf] %vm2989_vm14, %v2948_v36  ;;  %v2934_v39 = vpop.permute.xlu1 %2933  ;;  %v8159_v56 = vld [vmem:[#allocation3 + $0x84] sm:$0xf0] }
 0x467   : > { %3010 = vst.msk [vmem:[#allocation3 + $0xa0] sm:$0xf] %vm2989_vm14, %v2934_v39  ;;  %v7902_v21 = vor.u32 %v8159_v56, %v7901_v35 }
 0x46e   : > { %v2940_v46 = vpop.permute.xlu1 %2939 }
 0x46f   : > { %3013 = vst.msk [vmem:[#allocation3 + $0xb8] sm:$0xf] %vm2989_vm14, %v2940_v46 }
 0x471   : > { %3442 = vmatmul.bf16.gmra.mxu1 %v7870_v22 }
 0x476   : > { %v2946_v0 = vpop.permute.xlu1 %2945 }
 0x477   : > { %3016 = vst.msk [vmem:[#allocation3 + $0xd0] sm:$0xf] %vm2989_vm14, %v2946_v0  ;;  %v10861_v0 = vstv %s7795_s28  ;;  %s11866_s28 = sld [smem:[#allocation7 + $0x33]] }
 0x47e   : > { %v2952_v23 = vpop.permute.xlu1 %2951 }
 0x47f   : > { %3019 = vst.msk [vmem:[#allocation3 + $0xe8] sm:$0xf] %vm2989_vm14, %v2952_v23 }
 0x481   : > { %3447 = vmatmul.bf16.gmra.mxu1 %v7878_v9 }
 0x491   : > { %3452 = vmatmul.bf16.gmra.mxu1 %v7886_v5 }
 0x4a1   : > { %3457 = vmatmul.bf16.gmra.mxu1 %v7894_v45  ;;  %v8163_v45 = vld [vmem:[#allocation3 + $0xa4] sm:$0xf0] }
 0x4a5   : > { %v3423_v24 = vpop.f32.mrf.mxu1 }
 0x4a6   : > { %v3513_v32 = vadd.f32 %v10214_v43, %v3423_v24 }
 0x4a8   : > { %v3596_v37 = vmul.f32 %v10813_v47, %v3513_v32 }
 0x4aa   : > { %v10826_v42 = vadd.f32 %v10820_v41, %v3596_v37 }
 0x4ac   : > { %v3665_v20 = vmul.f32 %v10823_v52, %v10826_v42 }
 0x4ad   : > { %v3425_v43 = vpop.f32.mrf.mxu1 }
 0x4ae   : > { %v3698_v55 = vsub.f32 %v10828_v40, %v3665_v20  ;;  %v3515_v14 = vadd.f32 %v10246_v62, %v3425_v43 }
 0x4b0   : > { %v3794_v31 = vmul.f32 1.442695, %v3698_v55  ;;  %v3597_v57 = vmul.f32 %v10813_v47, %v3515_v14  ;;  %v3762_v36 = vsub.f32 0.0, %v3698_v55  ;;  %vm3730_vm2 = vcmp.gt.f32.partialorder %v3698_v55, 20.0 }
 0x4b1   : > { %3462 = vmatmul.bf16.gmra.mxu1 %v7902_v21 }
 0x4b2   : > { %8552 = vpow2.f32 %v3794_v31  ;;  %v10838_v12 = vadd.f32 %v10820_v41, %v3597_v57  ;;  %v10883_v31 = vpop.f32.mrf.mxu2 }
 0x4b4   : > { %v3666_v19 = vmul.f32 %v10823_v52, %v10838_v12 }
 0x4b6   : > { %v3699_v63 = vsub.f32 %v10828_v40, %v3666_v19 }
 0x4b8   : > { %v8553_v27 = vpop.eup %8552  ;;  %v3796_v30 = vmul.f32 1.442695, %v3699_v63  ;;  %v3763_v28 = vsub.f32 0.0, %v3699_v63  ;;  %vm3731_vm3 = vcmp.gt.f32.partialorder %v3699_v63, 20.0 }
 0x4b9   : > { %v3858_v62 = vadd.f32 1.0, %v8553_v27 }
 0x4ba   : > { %8554 = vpow2.f32 %v3796_v30 }
 0x4bb   : > { %8556 = vlog2.f32 %v3858_v62 }
 0x4be   : > { %v3428_v61 = vpop.f32.mrf.mxu1 }
 0x4bf   : > { %v3518_v6 = vadd.f32 %v10275_v44, %v3428_v61 }
 0x4c0   : > { %v8555_v16 = vpop.eup %8554 }
 0x4c1   : > { %v8557_v60 = vpop.eup %8556  ;;  %v3859_v13 = vadd.f32 1.0, %v8555_v16  ;;  %v3598_v59 = vmul.f32 %v10813_v47, %v3518_v6  ;;  %3467 = vmatmul.bf16.gmra.mxu1 %v7910_v26 }
 0x4c2   : > { %v3891_v38 = vmul.f32 0.6931472, %v8557_v60 }
 0x4c3   : > { %8558 = vlog2.f32 %v3859_v13  ;;  %v10853_v33 = vadd.f32 %v10820_v41, %v3598_v59 }
 0x4c4   : > { %v3954_v44 = vsub.f32 0.0, %v3891_v38 }
 0x4c5   : > { %v3667_v39 = vmul.f32 %v10823_v52, %v10853_v33 }
 0x4c6   : > { %v3430_v51 = vpop.f32.mrf.mxu1  ;;  %v3986_v22 = vsel %vm3730_vm2, %v3762_v36, %v3954_v44 }
 0x4c7   : > { %v10858_v46 = vsub.f32 %v10828_v40, %v3667_v39  ;;  %v3520_v3 = vadd.f32 %v10302_v58, %v3430_v51  ;;  %v4019_v1 = vmul.f32 %v10861_v0, %v3986_v22  ;;  %v7917_v58 = vld [vmem:[#allocation3 + $0xa0] sm:$0xf]  ;;  %v7925_v39 = vld [vmem:[#allocation3 + $0xb0] sm:$0xf]  ;;  %v10902_v51 = vpop.f32.mrf.mxu2 }
 0x4c8   : > { %v7918_v37 = vor.u32 %v8163_v45, %v7917_v58 }
 0x4c9   : > { %v8559_v7 = vpop.eup %8558  ;;  %v3798_v23 = vmul.f32 1.442695, %v10858_v46  ;;  %v3599_v15 = vmul.f32 %v10813_v47, %v3520_v3  ;;  %v4051_v8 = vmul.f32 1.442695, %v4019_v1  ;;  %v3764_v59 = vsub.f32 0.0, %v10858_v46 }
 0x4ca   : > { %v3893_v9 = vmul.f32 0.6931472, %v8559_v7  ;;  %vm3732_vm12 = vcmp.gt.f32.partialorder %v10858_v46, 20.0 }
 0x4cb   : > { %8560 = vpow2.f32 %v3798_v23  ;;  %v10869_v10 = vadd.f32 %v10820_v41, %v3599_v15 }
 0x4cc   : > { %v3955_v5 = vsub.f32 0.0, %v3893_v9  ;;  %8562 = vpow2.f32 %v4051_v8 }
 0x4cd   : > { %v3668_v29 = vmul.f32 %v10823_v52, %v10869_v10 }
 0x4ce   : > { %v3433_v48 = vpop.f32.mrf.mxu1  ;;  %v3987_v34 = vsel %vm3731_vm3, %v3763_v28, %v3955_v5 }
 0x4cf   : > { %v10874_v24 = vsub.f32 %v10828_v40, %v3668_v29  ;;  %v3523_v32 = vadd.f32 %v10320_v25, %v3433_v48  ;;  %v4020_v20 = vmul.f32 %v10861_v0, %v3987_v34 }
 0x4d1   : > { %v8561_v56 = vpop.eup %8560  ;;  %v3800_v43 = vmul.f32 1.442695, %v10874_v24  ;;  %v3600_v55 = vmul.f32 %v10813_v47, %v3523_v32  ;;  %3472 = vmatmul.bf16.gmra.mxu1 %v7918_v37  ;;  %v4053_v35 = vmul.f32 1.442695, %v4020_v20  ;;  %vm3733_vm13 = vcmp.gt.f32.partialorder %v10874_v24, 20.0 }
 0x4d2   : > { %v3860_v14 = vadd.f32 1.0, %v8561_v56  ;;  %v8563_v27 = vpop.eup %8562  ;;  %v10924_v56 = vpop.f32.mrf.mxu2 }
 0x4d3   : > { %8564 = vpow2.f32 %v3800_v43  ;;  %v10881_v21 = vadd.f32 %v10820_v41, %v3600_v55  ;;  %v4115_v60 = vmul.f32 %v8563_v27, %v10826_v42 }
 0x4d4   : > { %8566 = vlog2.f32 %v3860_v14 }
 0x4d5   : > { %v3669_v25 = vmul.f32 %v10823_v52, %v10881_v21  ;;  %8568 = vpow2.f32 %v4053_v35 }
 0x4d6   : > { %v3435_v57 = vpop.f32.mrf.mxu1 }
 0x4d7   : > { %v10888_v19 = vsub.f32 %v10828_v40, %v3669_v25  ;;  %v3525_v63 = vadd.f32 %v10336_v49, %v3435_v57  ;;  %v8165_v49 = vld [vmem:[#allocation3 + $0xb4] sm:$0xf0] }
 0x4d9   : > { %v8565_v30 = vpop.eup %8564  ;;  %v3802_v62 = vmul.f32 1.442695, %v10888_v19  ;;  %v3601_v11 = vmul.f32 %v10813_v47, %v3525_v63  ;;  %v3766_v63 = vsub.f32 0.0, %v10888_v19  ;;  %vm3734_vm4 = vcmp.gt.f32.partialorder %v10888_v19, 20.0 }
 0x4da   : > { %v8567_v61 = vpop.eup %8566  ;;  %v3861_v2 = vadd.f32 1.0, %v8565_v30 }
 0x4db   : > { %v8569_v6 = vpop.eup %8568  ;;  %v3895_v26 = vmul.f32 0.6931472, %v8567_v61  ;;  %8570 = vpow2.f32 %v3802_v62  ;;  %v10894_v16 = vadd.f32 %v10820_v41, %v3601_v11  ;;  %v8167_v62 = vld [vmem:[#allocation3 + $0xc4] sm:$0xf0] }
 0x4dc   : > { %8572 = vlog2.f32 %v3861_v2  ;;  %v4116_v13 = vmul.f32 %v8569_v6, %v10838_v12  ;;  %v7926_v12 = vor.u32 %v8165_v49, %v7925_v39  ;;  %v3052_v2 = vld [vmem:[#allocation2 + $0x19a] sm:$0xff]  ;;  %v3053_v6 = vld [vmem:[#allocation2 + $0x1a2] sm:$0xff] }
 0x4dd   : > { %v3956_v38 = vsub.f32 0.0, %v3895_v26  ;;  %v3670_v17 = vmul.f32 %v10823_v52, %v10894_v16  ;;  %v3084_v49 = vpack.c.bf16 %v3052_v2, %v3052_v2 }
 0x4de   : > { %v3438_v44 = vpop.f32.mrf.mxu1  ;;  %v4147_v36 = vpack.c.bf16 %v4116_v13, %v4115_v60 }
 0x4df   : > { %v10905_v3 = vsub.f32 %v10828_v40, %v3670_v17  ;;  %v3528_v42 = vadd.f32 %v10832_v53, %v3438_v44  ;;  %v3988_v22 = vsel %vm3732_vm12, %v3764_v59, %v3956_v38  ;;  %v3765_v53 = vsub.f32 0.0, %v10874_v24  ;;  %3116 = vst.msk [vmem:[#allocation3 + $0xf4] sm:$0xf] %vm1413_vm7, %v3084_v49 }
 0x4e0   : > { %8019 = vmatmul.msk.bf16.vlgmr.msra.gmra.mxu3 %vm1274_vm1, %v4147_v36  ;;  %v4021_v1 = vmul.f32 %v10861_v0, %v3988_v22  ;;  %v3085_v38 = vpack.c.bf16 %v3053_v6, %v3053_v6 }
 0x4e1   : > { %v8571_v7 = vpop.eup %8570  ;;  %v3804_v23 = vmul.f32 1.442695, %v10905_v3  ;;  %v3602_v15 = vmul.f32 %v10813_v47, %v3528_v42  ;;  %3477 = vmatmul.bf16.gmra.mxu1 %v7926_v12 }
 0x4e2   : > { %v8573_v46 = vpop.eup %8572  ;;  %v3862_v9 = vadd.f32 1.0, %v8571_v7  ;;  %v4055_v45 = vmul.f32 1.442695, %v4021_v1  ;;  %3117 = vst.msk [vmem:[#allocation3 + $0xfc] sm:$0xf] %vm1413_vm7, %v3085_v38  ;;  %vm3735_vm7 = vcmp.gt.f32.partialorder %v10905_v3, 20.0 }
 0x4e3   : > { %v3897_v28 = vmul.f32 0.6931472, %v8573_v46  ;;  %8574 = vpow2.f32 %v3804_v23  ;;  %v10913_v5 = vadd.f32 %v10820_v41, %v3602_v15  ;;  %v3767_v46 = vsub.f32 0.0, %v10905_v3 }
 0x4e4   : > { %8576 = vlog2.f32 %v3862_v9 }
 0x4e5   : > { %v3957_v58 = vsub.f32 0.0, %v3897_v28  ;;  %v3671_v29 = vmul.f32 %v10823_v52, %v10913_v5  ;;  %8578 = vpow2.f32 %v4055_v45 }
 0x4e6   : > { %v3440_v48 = vpop.f32.mrf.mxu1 }
 0x4e7   : > { %v10920_v34 = vsub.f32 %v10828_v40, %v3671_v29  ;;  %v3530_v8 = vadd.f32 %v10843_v54, %v3440_v48  ;;  %v3989_v32 = vsel %vm3733_vm13, %v3765_v53, %v3957_v58  ;;  %v7933_v54 = vld [vmem:[#allocation3 + $0xc0] sm:$0xf] }
 0x4e8   : > { %v4022_v37 = vmul.f32 %v10861_v0, %v3989_v32  ;;  %v7934_v61 = vor.u32 %v8167_v62, %v7933_v54  ;;  %v8169_v62 = vld [vmem:[#allocation3 + $0xd4] sm:$0xf0] }
 0x4e9   : > { %v8575_v20 = vpop.eup %8574  ;;  %v3806_v43 = vmul.f32 1.442695, %v10920_v34  ;;  %v3603_v55 = vmul.f32 %v10813_v47, %v3530_v8  ;;  %v7959_v3 = vld [vmem:[#allocation3 + $0xf8] sm:$0xf0]  ;;  %v3768_v54 = vsub.f32 0.0, %v10920_v34  ;;  %vm3736_vm6 = vcmp.gt.f32.partialorder %v10920_v34, 20.0 }
 0x4ea   : > { %v8577_v14 = vpop.eup %8576  ;;  %v3863_v35 = vadd.f32 1.0, %v8575_v20  ;;  %v4057_v24 = vmul.f32 1.442695, %v4022_v37 }
 0x4eb   : > { %v3899_v25 = vmul.f32 0.6931472, %v8577_v14  ;;  %8580 = vpow2.f32 %v3806_v43  ;;  %v10929_v57 = vadd.f32 %v10820_v41, %v3603_v55  ;;  %v8579_v59 = vpop.eup %8578 }
 0x4ec   : > { %8582 = vlog2.f32 %v3863_v35  ;;  %v4117_v23 = vmul.f32 %v8579_v59, %v10853_v33 }
 0x4ed   : > { %v3958_v27 = vsub.f32 0.0, %v3899_v25  ;;  %v3672_v30 = vmul.f32 %v10823_v52, %v10929_v57  ;;  %8584 = vpow2.f32 %v4057_v24  ;;  %v7941_v24 = vld [vmem:[#allocation3 + $0xd0] sm:$0xf] }
 0x4ee   : > { %v3443_v11 = vpop.f32.mrf.mxu1  ;;  %v7942_v6 = vor.u32 %v8169_v62, %v7941_v24 }
 0x4ef   : > { %v10936_v26 = vsub.f32 %v10828_v40, %v3672_v30  ;;  %v3533_v60 = vadd.f32 %v10846_v50, %v3443_v11  ;;  %v3990_v13 = vsel %vm3734_vm4, %v3766_v63, %v3958_v27  ;;  %v10944_v50 = vpop.f32.mrf.mxu2  ;;  %v2954_v11 = vpop.permute.xlu2 %2953 }
 0x4f0   : > { %v4023_v42 = vmul.f32 %v10861_v0, %v3990_v13  ;;  %3020 = vst.msk [vmem:[#allocation3 + $0xf0] sm:$0xf] %vm2989_vm14, %v2954_v11 }
 0x4f1   : > { %v8581_v17 = vpop.eup %8580  ;;  %v3808_v44 = vmul.f32 1.442695, %v10936_v26  ;;  %v3604_v36 = vmul.f32 %v10813_v47, %v3533_v60  ;;  %3482 = vmatmul.bf16.gmra.mxu1 %v7934_v61  ;;  %v2956_v60 = vpop.permute.xlu0 %2955  ;;  %vm3737_vm15 = vcmp.gt.f32.partialorder %v10936_v26, 20.0 }
 0x4f2   : > { %v8583_v19 = vpop.eup %8582  ;;  %v3864_v39 = vadd.f32 1.0, %v8581_v17  ;;  %v4059_v58 = vmul.f32 1.442695, %v4023_v42  ;;  %3021 = vst.msk [vmem:[#allocation3 + $0xf8] sm:$0xf] %vm2989_vm14, %v2956_v60 }
 0x4f3   : > { %v8585_v12 = vpop.eup %8584  ;;  %v3901_v22 = vmul.f32 0.6931472, %v8583_v19  ;;  %8586 = vpow2.f32 %v3808_v44  ;;  %v10947_v7 = vadd.f32 %v10820_v41, %v3604_v36 }
 0x4f4   : > { %8588 = vlog2.f32 %v3864_v39  ;;  %v4118_v15 = vmul.f32 %v8585_v12, %v10869_v10  ;;  %v8172_v10 = vld [vmem:[#allocation3 + $0xf4] sm:$0xf] }
 0x4f5   : > { %v3959_v9 = vsub.f32 0.0, %v3901_v22  ;;  %v3673_v1 = vmul.f32 %v10823_v52, %v10947_v7  ;;  %8590 = vpow2.f32 %v4059_v58  ;;  %v7962_v14 = vor.u32 %v8172_v10, %v7959_v3 }
 0x4f6   : > { %v3445_v28 = vpop.f32.mrf.mxu1  ;;  %v4148_v53 = vpack.c.bf16 %v4118_v15, %v4117_v23  ;;  %v3769_v22 = vsub.f32 0.0, %v10936_v26 }
 0x4f7   : > { %v10956_v29 = vsub.f32 %v10828_v40, %v3673_v1  ;;  %v3535_v48 = vadd.f32 %v10866_v18, %v3445_v28  ;;  %v3991_v45 = vsel %vm3735_vm7, %v3767_v46, %v3959_v9  ;;  %8014 = vmatmul.msk.bf16.gmra.mxu2 %vm1274_vm1, %v7962_v14  ;;  %v10967_v25 = vpop.f32.mrf.mxu2  ;;  %v7949_v14 = vld [vmem:[#allocation3 + $0xe0] sm:$0xf] }
 0x4f8   : > { %8020 = vmatmul.msk.bf16.gmra.mxu3 %vm1274_vm1, %v4148_v53  ;;  %v4024_v33 = vmul.f32 %v10861_v0, %v3991_v45 }
 0x4f9   : > { %v8587_v8 = vpop.eup %8586  ;;  %v3810_v32 = vmul.f32 1.442695, %v10956_v29  ;;  %v3605_v37 = vmul.f32 %v10813_v47, %v3535_v48  ;;  %v3770_v3 = vsub.f32 0.0, %v10956_v29  ;;  %vm3738_vm5 = vcmp.gt.f32.partialorder %v10956_v29, 20.0 }
 0x4fa   : > { %v8589_v20 = vpop.eup %8588  ;;  %v3865_v43 = vadd.f32 1.0, %v8587_v8  ;;  %v4061_v55 = vmul.f32 1.442695, %v4024_v33 }
 0x4fb   : > { %v3903_v35 = vmul.f32 0.6931472, %v8589_v20  ;;  %8592 = vpow2.f32 %v3810_v32  ;;  %v10964_v18 = vadd.f32 %v10820_v41, %v3605_v37  ;;  %v8591_v49 = vpop.eup %8590  ;;  %v8171_v37 = vld [vmem:[#allocation3 + $0xe4] sm:$0xf0] }
 0x4fc   : > { %8594 = vlog2.f32 %v3865_v43  ;;  %v4119_v42 = vmul.f32 %v8591_v49, %v10881_v21 }
 0x4fd   : > { %v3960_v63 = vsub.f32 0.0, %v3903_v35  ;;  %v3674_v27 = vmul.f32 %v10823_v52, %v10964_v18  ;;  %8596 = vpow2.f32 %v4061_v55 }
 0x4fe   : > { %v3448_v30 = vpop.f32.mrf.mxu1 }
 0x4ff   : > { %v10974_v61 = vsub.f32 %v10828_v40, %v3674_v27  ;;  %v3538_v2 = vadd.f32 %v10883_v31, %v3448_v30  ;;  %v3992_v13 = vsel %vm3736_vm6, %v3768_v54, %v3960_v63  ;;  %v10995_v21 = vpop.f32.mrf.mxu2  ;;  %v7950_v54 = vor.u32 %v8171_v37, %v7949_v14 }
 0x500   : > { %v4025_v36 = vmul.f32 %v10861_v0, %v3992_v13 }
 0x501   : > { %v8593_v59 = vpop.eup %8592  ;;  %v3812_v38 = vmul.f32 1.442695, %v10974_v61  ;;  %v3606_v34 = vmul.f32 %v10813_v47, %v3538_v2  ;;  %3487 = vmatmul.bf16.gmra.mxu1 %v7942_v6  ;;  %vm3739_vm8 = vcmp.gt.f32.partialorder %v10974_v61, 20.0 }
 0x502   : > { %v8595_v17 = vpop.eup %8594  ;;  %v3866_v44 = vadd.f32 1.0, %v8593_v59  ;;  %v4063_v1 = vmul.f32 1.442695, %v4025_v36 }
 0x503   : > { %v8597_v19 = vpop.eup %8596  ;;  %v3905_v31 = vmul.f32 0.6931472, %v8595_v17  ;;  %8598 = vpow2.f32 %v3812_v38  ;;  %v10983_v39 = vadd.f32 %v10820_v41, %v3606_v34  ;;  %v3771_v34 = vsub.f32 0.0, %v10974_v61  ;;  %v8173_v61 = vld [vmem:[#allocation3 + $0xf4] sm:$0xf0] }
 0x504   : > { %8600 = vlog2.f32 %v3866_v44  ;;  %v4120_v12 = vmul.f32 %v8597_v19, %v10894_v16 }
 0x505   : > { %v3961_v23 = vsub.f32 0.0, %v3905_v31  ;;  %v3675_v15 = vmul.f32 %v10823_v52, %v10983_v39  ;;  %8602 = vpow2.f32 %v4063_v1 }
 0x506   : > { %v3450_v46 = vpop.f32.mrf.mxu1  ;;  %v4149_v9 = vpack.c.bf16 %v4120_v12, %v4119_v42 }
 0x507   : > { %v10992_v28 = vsub.f32 %v10828_v40, %v3675_v15  ;;  %v3540_v53 = vadd.f32 %v10902_v51, %v3450_v46  ;;  %v3993_v58 = vsel %vm3737_vm15, %v3769_v22, %v3961_v23  ;;  %v11014_v6 = vpop.f32.mrf.mxu2  ;;  %v7957_v46 = vld [vmem:[#allocation3 + $0xf0] sm:$0xf] }
 0x508   : > { %8021 = vmatmul.msk.bf16.gmra.mxu3 %vm1274_vm1, %v4149_v9  ;;  %v4026_v16 = vmul.f32 %v10861_v0, %v3993_v58 }
 0x509   : > { %v8599_v48 = vpop.eup %8598  ;;  %v3814_v45 = vmul.f32 1.442695, %v10992_v28  ;;  %v3607_v26 = vmul.f32 %v10813_v47, %v3540_v53  ;;  %vm3740_vm9 = vcmp.gt.f32.partialorder %v10992_v28, 20.0 }
 0x50a   : > { %v8601_v33 = vpop.eup %8600  ;;  %v3867_v10 = vadd.f32 1.0, %v8599_v48  ;;  %v4065_v8 = vmul.f32 1.442695, %v4026_v16  ;;  %v7958_v48 = vor.u32 %v8173_v61, %v7957_v46 }
 0x50b   : > { %v3907_v32 = vmul.f32 0.6931472, %v8601_v33  ;;  %8604 = vpow2.f32 %v3814_v45  ;;  %v11002_v51 = vadd.f32 %v10820_v41, %v3607_v26  ;;  %v8603_v27 = vpop.eup %8602  ;;  %v3772_v45 = vsub.f32 0.0, %v10992_v28 }
 0x50c   : > { %8606 = vlog2.f32 %v3867_v10  ;;  %v4121_v59 = vmul.f32 %v8603_v27, %v10913_v5 }
 0x50d   : > { %v3962_v20 = vsub.f32 0.0, %v3907_v32  ;;  %v3676_v43 = vmul.f32 %v10823_v52, %v11002_v51  ;;  %8608 = vpow2.f32 %v4065_v8 }
 0x50e   : > { %v3453_v55 = vpop.f32.mrf.mxu1 }
 0x50f   : > { %v11009_v35 = vsub.f32 %v10828_v40, %v3676_v43  ;;  %v3543_v24 = vadd.f32 %v10924_v56, %v3453_v55  ;;  %v3994_v63 = vsel %vm3738_vm5, %v3770_v3, %v3962_v20  ;;  %v11037_v16 = vpop.f32.mrf.mxu2 }
 0x510   : > { %v4027_v60 = vmul.f32 %v10861_v0, %v3994_v63 }
 0x511   : > { %v8605_v30 = vpop.eup %8604  ;;  %v3816_v62 = vmul.f32 1.442695, %v11009_v35  ;;  %v3608_v11 = vmul.f32 %v10813_v47, %v3543_v24  ;;  %3492 = vmatmul.bf16.gmra.mxu1 %v7950_v54  ;;  %vm3741_vm10 = vcmp.gt.f32.partialorder %v11009_v35, 20.0 }
 0x512   : > { %v8607_v2 = vpop.eup %8606  ;;  %v3868_v29 = vadd.f32 1.0, %v8605_v30  ;;  %v4067_v31 = vmul.f32 1.442695, %v4027_v60 }
 0x513   : > { %v8609_v13 = vpop.eup %8608  ;;  %v3909_v49 = vmul.f32 0.6931472, %v8607_v2  ;;  %8610 = vpow2.f32 %v3816_v62  ;;  %v11018_v56 = vadd.f32 %v10820_v41, %v3608_v11  ;;  %v3773_v62 = vsub.f32 0.0, %v11009_v35 }
 0x514   : > { %8612 = vlog2.f32 %v3868_v29  ;;  %v4122_v38 = vmul.f32 %v8609_v13, %v10929_v57 }
 0x515   : > { %v3963_v17 = vsub.f32 0.0, %v3909_v49  ;;  %v3677_v44 = vmul.f32 %v10823_v52, %v11018_v56  ;;  %8614 = vpow2.f32 %v4067_v31 }
 0x516   : > { %v3455_v36 = vpop.f32.mrf.mxu1  ;;  %v4150_v19 = vpack.c.bf16 %v4122_v38, %v4121_v59 }
 0x517   : > { %v11027_v42 = vsub.f32 %v10828_v40, %v3677_v44  ;;  %v3545_v12 = vadd.f32 %v10944_v50, %v3455_v36  ;;  %v3995_v22 = vsel %vm3739_vm8, %v3771_v34, %v3963_v17  ;;  %v11058_v29 = vpop.f32.mrf.mxu2 }
 0x518   : > { %8022 = vmatmul.msk.bf16.gmra.mxu3 %vm1274_vm1, %v4150_v19  ;;  %v4028_v5 = vmul.f32 %v10861_v0, %v3995_v22 }
 0x519   : > { %v8611_v57 = vpop.eup %8610  ;;  %v3818_v23 = vmul.f32 1.442695, %v11027_v42  ;;  %v3609_v15 = vmul.f32 %v10813_v47, %v3545_v12  ;;  %vm3742_vm11 = vcmp.gt.f32.partialorder %v11027_v42, 20.0 }
 0x51a   : > { %v8613_v9 = vpop.eup %8612  ;;  %v3869_v1 = vadd.f32 1.0, %v8611_v57  ;;  %v4069_v53 = vmul.f32 1.442695, %v4028_v5 }
 0x51b   : > { %v3911_v58 = vmul.f32 0.6931472, %v8613_v9  ;;  %8616 = vpow2.f32 %v3818_v23  ;;  %v11035_v50 = vadd.f32 %v10820_v41, %v3609_v15  ;;  %v8615_v3 = vpop.eup %8614 }
 0x51c   : > { %8618 = vlog2.f32 %v3869_v1 }
 0x51d   : > { %v3964_v26 = vsub.f32 0.0, %v3911_v58  ;;  %v3678_v33 = vmul.f32 %v10823_v52, %v11035_v50  ;;  %8620 = vpow2.f32 %v4069_v53 }
 0x51e   : > { %v3458_v10 = vpop.f32.mrf.mxu1 }
 0x51f   : > { %v11044_v8 = vsub.f32 %v10828_v40, %v3678_v33  ;;  %v3548_v32 = vadd.f32 %v10967_v25, %v3458_v10  ;;  %v3996_v37 = vsel %vm3740_vm9, %v3772_v45, %v3964_v26  ;;  %v4123_v25 = vmul.f32 %v8615_v3, %v10947_v7  ;;  %v11080_v9 = vpop.f32.mrf.mxu2 }
 0x520   : > { %v4029_v54 = vmul.f32 %v10861_v0, %v3996_v37 }
 0x521   : > { %v8617_v20 = vpop.eup %8616  ;;  %v3820_v43 = vmul.f32 1.442695, %v11044_v8  ;;  %v3610_v55 = vmul.f32 %v10813_v47, %v3548_v32  ;;  %3497 = vmatmul.bf16.gmra.mxu1 %v7958_v48  ;;  %v3775_v37 = vsub.f32 0.0, %v11044_v8  ;;  %vm3743_vm14 = vcmp.gt.f32.partialorder %v11044_v8, 20.0 }
 0x522   : > { %v8619_v14 = vpop.eup %8618  ;;  %v3870_v24 = vadd.f32 1.0, %v8617_v20  ;;  %v4071_v49 = vmul.f32 1.442695, %v4029_v54 }
 0x523   : > { %v8621_v63 = vpop.eup %8620  ;;  %v3913_v28 = vmul.f32 0.6931472, %v8619_v14  ;;  %8622 = vpow2.f32 %v3820_v43  ;;  %v11051_v27 = vadd.f32 %v10820_v41, %v3610_v55 }
 0x524   : > { %8624 = vlog2.f32 %v3870_v24  ;;  %v4124_v30 = vmul.f32 %v8621_v63, %v10964_v18 }
 0x525   : > { %v3965_v11 = vsub.f32 0.0, %v3913_v28  ;;  %v3679_v2 = vmul.f32 %v10823_v52, %v11051_v27  ;;  %8626 = vpow2.f32 %v4071_v49 }
 0x526   : > { %v3460_v60 = vpop.f32.mrf.mxu1  ;;  %v4151_v13 = vpack.c.bf16 %v4124_v30, %v4123_v25 }
 0x527   : > { %v11062_v59 = vsub.f32 %v10828_v40, %v3679_v2  ;;  %v3550_v7 = vadd.f32 %v10995_v21, %v3460_v60  ;;  %v3997_v38 = vsel %vm3741_vm10, %v3773_v62, %v3965_v11  ;;  %v3774_v21 = vsub.f32 0.0, %v11027_v42  ;;  %v11102_v8 = vpop.f32.mrf.mxu2 }
 0x528   : > { %8023 = vmatmul.msk.bf16.gmra.mxu3 %vm1274_vm1, %v4151_v13  ;;  %v4030_v18 = vmul.f32 %v10861_v0, %v3997_v38 }
 0x529   : > { %v8623_v34 = vpop.eup %8622  ;;  %v3822_v17 = vmul.f32 1.442695, %v11062_v59  ;;  %v3611_v44 = vmul.f32 %v10813_v47, %v3550_v7  ;;  %v3776_v60 = vsub.f32 0.0, %v11062_v59  ;;  %vm3744_vm2 = vcmp.gt.f32.partialorder %v11062_v59, 20.0 }
 0x52a   : > { %v8625_v36 = vpop.eup %8624  ;;  %v3871_v35 = vadd.f32 1.0, %v8623_v34  ;;  %v4073_v19 = vmul.f32 1.442695, %v4030_v18 }
 0x52b   : > { %v3915_v31 = vmul.f32 0.6931472, %v8625_v36  ;;  %8628 = vpow2.f32 %v3822_v17  ;;  %v11070_v12 = vadd.f32 %v10820_v41, %v3611_v44  ;;  %v8627_v61 = vpop.eup %8626 }
 0x52c   : > { %8630 = vlog2.f32 %v3871_v35 }
 0x52d   : > { %v3966_v22 = vsub.f32 0.0, %v3915_v31  ;;  %v3680_v5 = vmul.f32 %v10823_v52, %v11070_v12  ;;  %8632 = vpow2.f32 %v4073_v19 }
 0x52e   : > { %v3463_v57 = vpop.f32.mrf.mxu1 }
 0x52f   : > { %v11077_v23 = vsub.f32 %v10828_v40, %v3680_v5  ;;  %v3553_v15 = vadd.f32 %v11014_v6, %v3463_v57  ;;  %v3998_v46 = vsel %vm3742_vm11, %v3774_v21, %v3966_v22  ;;  %v4125_v6 = vmul.f32 %v8627_v61, %v10983_v39  ;;  %v3564_v57 = vpop.f32.mrf.mxu2 }
 0x530   : > { %v4031_v26 = vmul.f32 %v10861_v0, %v3998_v46 }
 0x531   : > { %v8629_v1 = vpop.eup %8628  ;;  %v3824_v53 = vmul.f32 1.442695, %v11077_v23  ;;  %v3612_v58 = vmul.f32 %v10813_v47, %v3553_v15  ;;  %v3777_v46 = vsub.f32 0.0, %v11077_v23  ;;  %vm3745_vm3 = vcmp.gt.f32.partialorder %v11077_v23, 20.0 }
 0x532   : > { %v8631_v48 = vpop.eup %8630  ;;  %v3872_v45 = vadd.f32 1.0, %v8629_v1  ;;  %v4075_v14 = vmul.f32 1.442695, %v4031_v26 }
 0x533   : > { %v8633_v42 = vpop.eup %8632  ;;  %v3917_v33 = vmul.f32 0.6931472, %v8631_v48  ;;  %8634 = vpow2.f32 %v3824_v53  ;;  %v11086_v10 = vadd.f32 %v10820_v41, %v3612_v58 }
 0x534   : > { %8636 = vlog2.f32 %v3872_v45  ;;  %v4126_v32 = vmul.f32 %v8633_v42, %v11002_v51 }
 0x535   : > { %v3967_v3 = vsub.f32 0.0, %v3917_v33  ;;  %v3681_v20 = vmul.f32 %v10823_v52, %v11086_v10  ;;  %8638 = vpow2.f32 %v4075_v14 }
 0x536   : > { %v3465_v43 = vpop.f32.mrf.mxu1  ;;  %v4152_v55 = vpack.c.bf16 %v4126_v32, %v4125_v6 }
 0x537   : > { %v11095_v24 = vsub.f32 %v10828_v40, %v3681_v20  ;;  %v3555_v54 = vadd.f32 %v11037_v16, %v3465_v43  ;;  %v3999_v63 = vsel %vm3743_vm14, %v3775_v37, %v3967_v3  ;;  %v3567_v14 = vpop.f32.mrf.mxu2 }
 0x538   : > { %8024 = vmatmul.msk.bf16.gmra.mxu3 %vm1274_vm1, %v4152_v55  ;;  %v4032_v39 = vmul.f32 %v10861_v0, %v3999_v63 }
 0x539   : > { %v8635_v51 = vpop.eup %8634  ;;  %v3826_v28 = vmul.f32 1.442695, %v11095_v24  ;;  %v3613_v25 = vmul.f32 %v10813_v47, %v3555_v54  ;;  %vm3746_vm12 = vcmp.gt.f32.partialorder %v11095_v24, 20.0 }
 0x53a   : > { %v8637_v30 = vpop.eup %8636  ;;  %v3873_v62 = vadd.f32 1.0, %v8635_v51  ;;  %v4077_v11 = vmul.f32 1.442695, %v4032_v39 }
 0x53b   : > { %v3919_v2 = vmul.f32 0.6931472, %v8637_v30  ;;  %8640 = vpow2.f32 %v3826_v28  ;;  %v11105_v16 = vadd.f32 %v10820_v41, %v3613_v25  ;;  %v8639_v17 = vpop.eup %8638 }
 0x53c   : > { %8642 = vlog2.f32 %v3873_v62 }
 0x53d   : > { %v3968_v13 = vsub.f32 0.0, %v3919_v2  ;;  %v3682_v49 = vmul.f32 %v10823_v52, %v11105_v16  ;;  %8644 = vpow2.f32 %v4077_v11 }
 0x53e   : > { %v3468_v7 = vpop.f32.mrf.mxu1 }
 0x53f   : > { %v11112_v38 = vsub.f32 %v10828_v40, %v3682_v49  ;;  %v3558_v18 = vadd.f32 %v11058_v29, %v3468_v7  ;;  %v4000_v34 = vsel %vm3744_vm2, %v3776_v60, %v3968_v13  ;;  %v4127_v29 = vmul.f32 %v8639_v17, %v11018_v56 }
 0x540   : > { %v4033_v21 = vmul.f32 %v10861_v0, %v4000_v34 }
 0x541   : > { %v8641_v44 = vpop.eup %8640  ;;  %v3828_v36 = vmul.f32 1.442695, %v11112_v38  ;;  %v3614_v35 = vmul.f32 %v10813_v47, %v3558_v18  ;;  %v3779_v18 = vsub.f32 0.0, %v11112_v38  ;;  %vm3747_vm13 = vcmp.gt.f32.partialorder %v11112_v38, 20.0 }
 0x542   : > { %v8643_v19 = vpop.eup %8642  ;;  %v3874_v31 = vadd.f32 1.0, %v8641_v44  ;;  %v4079_v48 = vmul.f32 1.442695, %v4033_v21 }
 0x543   : > { %v8645_v22 = vpop.eup %8644  ;;  %v3921_v5 = vmul.f32 0.6931472, %v8643_v19  ;;  %8646 = vpow2.f32 %v3828_v36  ;;  %v11119_v59 = vadd.f32 %v10820_v41, %v3614_v35 }
 0x544   : > { %8648 = vlog2.f32 %v3874_v31  ;;  %v4128_v15 = vmul.f32 %v8645_v22, %v11035_v50  ;;  %v3569_v22 = vpop.f32.mrf.mxu2 }
 0x545   : > { %v3969_v61 = vsub.f32 0.0, %v3921_v5  ;;  %v3683_v1 = vmul.f32 %v10823_v52, %v11119_v59  ;;  %8650 = vpow2.f32 %v4079_v48 }
 0x546   : > { %v3470_v53 = vpop.f32.mrf.mxu1  ;;  %v4153_v58 = vpack.c.bf16 %v4128_v15, %v4127_v29 }
 0x547   : > { %v11128_v45 = vsub.f32 %v10828_v40, %v3683_v1  ;;  %v3560_v26 = vadd.f32 %v11080_v9, %v3470_v53  ;;  %v4001_v42 = vsel %vm3745_vm3, %v3777_v46, %v3969_v61  ;;  %v3778_v9 = vsub.f32 0.0, %v11095_v24 }
 0x548   : > { %8025 = vmatmul.msk.bf16.gmra.mxu3 %vm1274_vm1, %v4153_v58  ;;  %v4034_v56 = vmul.f32 %v10861_v0, %v4001_v42 }
 0x549   : > { %v8647_v50 = vpop.eup %8646  ;;  %v3830_v33 = vmul.f32 1.442695, %v11128_v45  ;;  %v3615_v6 = vmul.f32 %v10813_v47, %v3560_v26  ;;  %vm3748_vm4 = vcmp.gt.f32.partialorder %v11128_v45, 20.0 }
 0x54a   : > { %v8649_v32 = vpop.eup %8648  ;;  %v3875_v23 = vadd.f32 1.0, %v8647_v50  ;;  %v4081_v37 = vmul.f32 1.442695, %v4034_v56 }
 0x54b   : > { %v3923_v3 = vmul.f32 0.6931472, %v8649_v32  ;;  %8652 = vpow2.f32 %v3830_v33  ;;  %v11136_v20 = vadd.f32 %v10820_v41, %v3615_v6  ;;  %v8651_v28 = vpop.eup %8650  ;;  %v11184_v6 = vld [vmem:[%s13672_s7] ss:$0 sm:$0xff] }
 0x54c   : > { %8654 = vlog2.f32 %v3875_v23  ;;  %v3572_v23 = vpop.f32.mrf.mxu2 }
 0x54d   : > { %v3970_v43 = vsub.f32 0.0, %v3923_v3  ;;  %v3684_v55 = vmul.f32 %v10823_v52, %v11136_v20  ;;  %8656 = vpow2.f32 %v4081_v37  ;;  %v11190_v3 = vld [vmem:[%s13676_s11] ss:$0 sm:$0xff] }
 0x54e   : > { %v3473_v54 = vpop.f32.mrf.mxu1 }
 0x54f   : > { %v11143_v63 = vsub.f32 %v10828_v40, %v3684_v55  ;;  %v3563_v39 = vadd.f32 %v11102_v8, %v3473_v54  ;;  %v4002_v51 = vsel %vm3746_vm12, %v3778_v9, %v3970_v43  ;;  %v4129_v8 = vmul.f32 %v8651_v28, %v11051_v27 }
 0x550   : > { %v4035_v60 = vmul.f32 %v10861_v0, %v4002_v51 }
 0x551   : > { %v8653_v25 = vpop.eup %8652  ;;  %v3832_v30 = vmul.f32 1.442695, %v11143_v63  ;;  %v3616_v62 = vmul.f32 %v10813_v47, %v3563_v39  ;;  %vm3749_vm7 = vcmp.gt.f32.partialorder %v11143_v63, 20.0 }
 0x552   : > { %v8655_v11 = vpop.eup %8654  ;;  %v3876_v2 = vadd.f32 1.0, %v8653_v25  ;;  %v4083_v35 = vmul.f32 1.442695, %v4035_v60 }
 0x553   : > { %v8657_v13 = vpop.eup %8656  ;;  %v3925_v49 = vmul.f32 0.6931472, %v8655_v11  ;;  %8658 = vpow2.f32 %v3832_v30  ;;  %v11150_v24 = vadd.f32 %v10820_v41, %v3616_v62  ;;  %v3781_v30 = vsub.f32 0.0, %v11143_v63 }
 0x554   : > { %8660 = vlog2.f32 %v3876_v2  ;;  %v4130_v7 = vmul.f32 %v8657_v13, %v11070_v12 }
 0x555   : > { %v3971_v34 = vsub.f32 0.0, %v3925_v49  ;;  %v3685_v17 = vmul.f32 %v10823_v52, %v11150_v24  ;;  %8662 = vpow2.f32 %v4083_v35 }
 0x556   : > { %v3475_v44 = vpop.f32.mrf.mxu1  ;;  %v4154_v36 = vpack.c.bf16 %v4130_v7, %v4129_v8 }
 0x557   : > { %v11159_v19 = vsub.f32 %v10828_v40, %v3685_v17  ;;  %v3565_v31 = vadd.f32 %v3564_v57, %v3475_v44  ;;  %v4003_v21 = vsel %vm3747_vm13, %v3779_v18, %v3971_v34  ;;  %v3780_v57 = vsub.f32 0.0, %v11128_v45 }
 0x558   : > { %8026 = vmatmul.msk.bf16.gmra.mxu3 %vm1274_vm1, %v4154_v36  ;;  %v4036_v27 = vmul.f32 %v10861_v0, %v4003_v21 }
 0x559   : > { %v8659_v12 = vpop.eup %8658  ;;  %v3834_v5 = vmul.f32 1.442695, %v11159_v19  ;;  %v3617_v29 = vmul.f32 %v10813_v47, %v3565_v31  ;;  %vm3750_vm6 = vcmp.gt.f32.partialorder %v11159_v19, 20.0 }
 0x55a   : > { %v8661_v15 = vpop.eup %8660  ;;  %v3877_v38 = vadd.f32 1.0, %v8659_v12  ;;  %v4085_v46 = vmul.f32 1.442695, %v4036_v27  ;;  %v3574_v12 = vpop.f32.mrf.mxu2 }
 0x55b   : > { %v3927_v61 = vmul.f32 0.6931472, %v8661_v15  ;;  %8664 = vpow2.f32 %v3834_v5  ;;  %v11166_v1 = vadd.f32 %v10820_v41, %v3617_v29  ;;  %v8663_v56 = vpop.eup %8662  ;;  %v11178_v41 = vld [vmem:[%s13675_s10] ss:$0 sm:$0xff]  ;;  %v3782_v29 = vsub.f32 0.0, %v11159_v19 }
 0x55c   : > { %8666 = vlog2.f32 %v3877_v38  ;;  %v4131_v28 = vmul.f32 %v8663_v56, %v11086_v10 }
 0x55d   : > { %v3972_v53 = vsub.f32 0.0, %v3927_v61  ;;  %v3686_v58 = vmul.f32 %v10823_v52, %v11166_v1  ;;  %8668 = vpow2.f32 %v4085_v46 }
 0x55e   : > { %v3478_v47 = vpop.f32.mrf.mxu1 }
 0x55f   : > { %v11173_v48 = vsub.f32 %v10828_v40, %v3686_v58  ;;  %v3568_v26 = vadd.f32 %v3567_v14, %v3478_v47  ;;  %v4004_v42 = vsel %vm3748_vm4, %v3780_v57, %v3972_v53  ;;  %v11196_v14 = vld [vmem:[%s13673_s8] ss:$0 sm:$0xff]  ;;  %vm4616_vm4 = vcmask 23552  }
 0x560   : > { %v4037_v9 = vmul.f32 %v10861_v0, %v4004_v42  ;;  %4619 = vst.msk [vmem:[#allocation4 + $0x1b] sm:$0xff] %vm4616_vm4, %v9014_v4 }
 0x561   : > { %v8665_v50 = vpop.eup %8664  ;;  %v3836_v33 = vmul.f32 1.442695, %v11173_v48  ;;  %v3618_v45 = vmul.f32 %v11184_v6, %v3568_v26  ;;  %vm3751_vm15 = vcmp.gt.f32.partialorder %v11173_v48, 20.0  ;;  %4617 = vst.msk [vmem:[#allocation4 + $0x3] sm:$0xff] %vm4616_vm4, %v9014_v4 }
 0x562   : > { %v8667_v32 = vpop.eup %8666  ;;  %v3878_v37 = vadd.f32 1.0, %v8665_v50  ;;  %v4087_v49 = vmul.f32 1.442695, %v4037_v9  ;;  %4618 = vst.msk [vmem:[#allocation4 + $0xb] sm:$0xff] %vm4616_vm4, %v9014_v4 }
 0x563   : > { %v8669_v43 = vpop.eup %8668  ;;  %v3929_v55 = vmul.f32 0.6931472, %v8667_v32  ;;  %8670 = vpow2.f32 %v3836_v33  ;;  %v11199_v54 = vadd.f32 %v11196_v14, %v3618_v45  ;;  %v4228_v39 = vpop.f32.mrf.mxu3  ;;  %4620 = vst.msk [vmem:[#allocation4 + $0x23] sm:$0xff] %vm4616_vm4, %v9014_v4  ;;  %vm6178_vm4 = vcmask 1042432  }
 0x564   : > { %8672 = vlog2.f32 %v3878_v37  ;;  %v4312_v51 = vmul.f32 %v11178_v41, %v4228_v39  ;;  %v4132_v25 = vmul.f32 %v8669_v43, %v11105_v16 }
 0x565   : > { %v3973_v62 = vsub.f32 0.0, %v3929_v55  ;;  %v3687_v11 = vmul.f32 %v10823_v52, %v11199_v54  ;;  %8674 = vpow2.f32 %v4087_v49  ;;  %v3783_v55 = vsub.f32 0.0, %v11173_v48 }
 0x566   : > { %v11209_v2 = vadd.f32 %v11190_v3, %v4312_v51  ;;  %v3480_v60 = vpop.f32.mrf.mxu1  ;;  %v4155_v13 = vpack.c.bf16 %v4132_v25, %v4131_v28  ;;  %v3577_v28 = vpop.f32.mrf.mxu2 }
 0x567   : > { %v11212_v8 = vsub.f32 %v10828_v40, %v3687_v11  ;;  %v3570_v10 = vadd.f32 %v3569_v22, %v3480_v60  ;;  %v4005_v7 = vsel %vm3749_vm7, %v3781_v30, %v3973_v62  ;;  %vm4621_vm7 = vcmask 179352  }
 0x568   : > { %13754 = vst [vmem:[#allocation11_spill] sm:$0xff] %v11209_v2  ;;  %8027 = vmatmul.msk.bf16.gmra.mxu3 %vm1274_vm1, %v4155_v13  ;;  %v4476_v16 = vsel %vm581_vm0, %v11209_v2, 0.0  ;;  %v4380_v18 = vsel %vm581_vm0, %v11209_v2, -inf  ;;  %v4038_v63 = vmul.f32 %v10861_v0, %v4005_v7 }
 0x569   : > { %v8671_v34 = vpop.eup %8670  ;;  %v3838_v17 = vmul.f32 1.442695, %v11212_v8  ;;  %v3619_v44 = vmul.f32 %v11184_v6, %v3570_v10  ;;  %4477 = vadd.xlane.f32.xlu0 %v4476_v16  ;;  %4381 = vmax.xlane.f32.xlu1 %v4380_v18  ;;  %vm3752_vm5 = vcmp.gt.f32.partialorder %v11212_v8, 20.0  ;;  %4624 = vst.msk [vmem:[#allocation4 + $0x1b] sm:$0xff] %vm4621_vm7, %v9014_v4 }
 0x56a   : > { %v8673_v36 = vpop.eup %8672  ;;  %v3879_v35 = vadd.f32 1.0, %v8671_v34  ;;  %v4089_v31 = vmul.f32 1.442695, %v4038_v63  ;;  %4622 = vst.msk [vmem:[#allocation4 + $0x3] sm:$0xff] %vm4621_vm7, %v9014_v4 }
 0x56b   : > { %v3931_v21 = vmul.f32 0.6931472, %v8673_v36  ;;  %8676 = vpow2.f32 %v3838_v17  ;;  %v11223_v22 = vadd.f32 %v11196_v14, %v3619_v44  ;;  %v4230_v27 = vpop.f32.mrf.mxu3  ;;  %v8675_v47 = vpop.eup %8674  ;;  %v3784_v36 = vsub.f32 0.0, %v11212_v8  ;;  %4623 = vst.msk [vmem:[#allocation4 + $0xb] sm:$0xff] %vm4621_vm7, %v9014_v4 }
 0x56c   : > { %8678 = vlog2.f32 %v3879_v35  ;;  %v4313_v5 = vmul.f32 %v11178_v41, %v4230_v27  ;;  %v4133_v9 = vmul.f32 %v8675_v47, %v11119_v59  ;;  %4625 = vst.msk [vmem:[#allocation4 + $0x23] sm:$0xff] %vm4621_vm7, %v9014_v4  ;;  %vm6465_vm7 = vcmask 1041408  }
 0x56d   : > { %v3974_v15 = vsub.f32 0.0, %v3931_v21  ;;  %v3688_v38 = vmul.f32 %v10823_v52, %v11223_v22  ;;  %8680 = vpow2.f32 %v4089_v31 }
 0x56e   : > { %v11231_v46 = vadd.f32 %v11190_v3, %v4313_v5  ;;  %v3483_v61 = vpop.f32.mrf.mxu1 }
 0x56f   : > { %v11234_v57 = vsub.f32 %v10828_v40, %v3688_v38  ;;  %v3573_v53 = vadd.f32 %v3572_v23, %v3483_v61  ;;  %v4006_v58 = vsel %vm3750_vm6, %v3782_v29, %v3974_v15  ;;  %v3579_v38 = vpop.f32.mrf.mxu2 }
 0x570   : > { %13755 = vst [vmem:[#allocation12_spill] sm:$0xff] %v11231_v46  ;;  %v4383_v26 = vsel %vm581_vm0, %v11231_v46, -inf  ;;  %v4039_v45 = vmul.f32 %v10861_v0, %v4006_v58  ;;  %v4479_v59 = vsel %vm581_vm0, %v11231_v46, 0.0 }
 0x571   : > { %v8677_v42 = vpop.eup %8676  ;;  %v3840_v56 = vmul.f32 1.442695, %v11234_v57  ;;  %v3620_v50 = vmul.f32 %v11184_v6, %v3573_v53  ;;  %4384 = vmax.xlane.f32.xlu2 %v4383_v26  ;;  %vm3753_vm8 = vcmp.gt.f32.partialorder %v11234_v57, 20.0 }
 0x572   : > { %v8679_v19 = vpop.eup %8678  ;;  %v3880_v33 = vadd.f32 1.0, %v8677_v42  ;;  %v4091_v62 = vmul.f32 1.442695, %v4039_v45 }
 0x573   : > { %v8681_v32 = vpop.eup %8680  ;;  %v3933_v37 = vmul.f32 0.6931472, %v8679_v19  ;;  %8682 = vpow2.f32 %v3840_v56  ;;  %v11242_v23 = vadd.f32 %v11196_v14, %v3620_v50 }
 0x574   : > { %8684 = vlog2.f32 %v3880_v33  ;;  %v4134_v43 = vmul.f32 %v8681_v32, %v11136_v20 }
 0x575   : > { %v3975_v39 = vsub.f32 0.0, %v3933_v37  ;;  %v3689_v51 = vmul.f32 %v10823_v52, %v11242_v23  ;;  %8686 = vpow2.f32 %v4091_v62 }
 0x576   : > { %v3485_v25 = vpop.f32.mrf.mxu1  ;;  %v4156_v30 = vpack.c.bf16 %v4134_v43, %v4133_v9  ;;  %v3785_v43 = vsub.f32 0.0, %v11234_v57 }
 0x577   : > { %v11251_v11 = vsub.f32 %v10828_v40, %v3689_v51  ;;  %v3575_v60 = vadd.f32 %v3574_v12, %v3485_v25  ;;  %v4007_v13 = vsel %vm3751_vm15, %v3783_v55, %v3975_v39  ;;  %vm4664_vm15 = vcmask 154712  }
 0x578   : > { %8028 = vmatmul.msk.bf16.gmra.mxu3 %vm1274_vm1, %v4156_v30  ;;  %v4040_v20 = vmul.f32 %v10861_v0, %v4007_v13 }
 0x579   : > { %v8683_v49 = vpop.eup %8682  ;;  %v3842_v10 = vmul.f32 1.442695, %v11251_v11  ;;  %v3621_v48 = vmul.f32 %v11184_v6, %v3575_v60  ;;  %4480 = vadd.xlane.f32.xlu2 %v4479_v59  ;;  %vm3754_vm9 = vcmp.gt.f32.partialorder %v11251_v11, 20.0 }
 0x57a   : > { %v8685_v7 = vpop.eup %8684  ;;  %v3881_v16 = vadd.f32 1.0, %v8683_v49  ;;  %v4093_v18 = vmul.f32 1.442695, %v4040_v20 }
 0x57b   : > { %v3935_v63 = vmul.f32 0.6931472, %v8685_v7  ;;  %8688 = vpow2.f32 %v3842_v10  ;;  %v11260_v34 = vadd.f32 %v11196_v14, %v3621_v48  ;;  %v4233_v17 = vpop.f32.mrf.mxu3  ;;  %v8687_v15 = vpop.eup %8686 }
 0x57c   : > { %8690 = vlog2.f32 %v3881_v16  ;;  %v4314_v44 = vmul.f32 %v11178_v41, %v4233_v17  ;;  %v4135_v37 = vmul.f32 %v8687_v15, %v11150_v24  ;;  %v3582_v48 = vpop.f32.mrf.mxu2 }
 0x57d   : > { %v3976_v35 = vsub.f32 0.0, %v3935_v63  ;;  %v3690_v31 = vmul.f32 %v10823_v52, %v11260_v34  ;;  %8692 = vpow2.f32 %v4093_v18 }
 0x57e   : > { %v11268_v21 = vadd.f32 %v11190_v3, %v4314_v44  ;;  %v3488_v27 = vpop.f32.mrf.mxu1 }
 0x57f   : > { %v11271_v12 = vsub.f32 %v10828_v40, %v3690_v31  ;;  %v3578_v5 = vadd.f32 %v3577_v28, %v3488_v27  ;;  %v4008_v29 = vsel %vm3752_vm5, %v3784_v36, %v3976_v35  ;;  %v3786_v36 = vsub.f32 0.0, %v11251_v11 }
 0x580   : > { %13756 = vst [vmem:[#allocation13_spill] sm:$0xff] %v11268_v21  ;;  %v4482_v61 = vsel %vm581_vm0, %v11268_v21, 0.0  ;;  %v4386_v53 = vsel %vm581_vm0, %v11268_v21, -inf  ;;  %v4041_v56 = vmul.f32 %v10861_v0, %v4008_v29  ;;  %vm4711_vm5 = vcmask 1041409  }
 0x581   : > { %v8689_v58 = vpop.eup %8688  ;;  %v3844_v8 = vmul.f32 1.442695, %v11271_v12  ;;  %v3622_v47 = vmul.f32 %v11184_v6, %v3578_v5  ;;  %4483 = vadd.xlane.f32.xlu1 %v4482_v61  ;;  %4387 = vmax.xlane.f32.xlu0 %v4386_v53  ;;  %vm3755_vm10 = vcmp.gt.f32.partialorder %v11271_v12, 20.0 }
 0x582   : > { %v8691_v26 = vpop.eup %8690  ;;  %v3882_v42 = vadd.f32 1.0, %v8689_v58  ;;  %v4095_v30 = vmul.f32 1.442695, %v4041_v56 }
 0x583   : > { %v8693_v50 = vpop.eup %8692  ;;  %v3937_v19 = vmul.f32 0.6931472, %v8691_v26  ;;  %8694 = vpow2.f32 %v3844_v8  ;;  %v11281_v33 = vadd.f32 %v11196_v14, %v3622_v47  ;;  %v4235_v45 = vpop.f32.mrf.mxu3 }
 0x584   : > { %8696 = vlog2.f32 %v3882_v42  ;;  %v4315_v32 = vmul.f32 %v11178_v41, %v4235_v45  ;;  %v4136_v9 = vmul.f32 %v8693_v50, %v11166_v1 }
 0x585   : > { %v3977_v55 = vsub.f32 0.0, %v3937_v19  ;;  %v3691_v39 = vmul.f32 %v10823_v52, %v11281_v33  ;;  %8698 = vpow2.f32 %v4095_v30 }
 0x586   : > { %v11291_v51 = vadd.f32 %v11190_v3, %v4315_v32  ;;  %v3490_v28 = vpop.f32.mrf.mxu1  ;;  %v4157_v25 = vpack.c.bf16 %v4136_v9, %v4135_v37  ;;  %v3584_v37 = vpop.f32.mrf.mxu2 }
 0x587   : > { %v11294_v62 = vsub.f32 %v10828_v40, %v3691_v39  ;;  %v3580_v24 = vadd.f32 %v3579_v38, %v3490_v28  ;;  %v4009_v60 = vsel %vm3753_vm8, %v3785_v43, %v3977_v55  ;;  %v3787_v39 = vsub.f32 0.0, %v11271_v12 }
 0x588   : > { %13757 = vst [vmem:[#allocation14_spill] sm:$0xff] %v11291_v51  ;;  %8029 = vmatmul.msk.bf16.gmra.mxu3 %vm1274_vm1, %v4157_v25  ;;  %v4485_v1 = vsel %vm581_vm0, %v11291_v51, 0.0  ;;  %v4389_v13 = vsel %vm581_vm0, %v11291_v51, -inf  ;;  %v4042_v57 = vmul.f32 %v10861_v0, %v4009_v60  ;;  %vm4713_vm8 = vcmask 1042434  }
 0x589   : > { %v8695_v59 = vpop.eup %8694  ;;  %v3846_v20 = vmul.f32 1.442695, %v11294_v62  ;;  %v3623_v49 = vmul.f32 %v11184_v6, %v3580_v24  ;;  %4486 = vadd.xlane.f32.xlu0 %v4485_v1  ;;  %4390 = vmax.xlane.f32.xlu2 %v4389_v13  ;;  %vm3756_vm11 = vcmp.gt.f32.partialorder %v11294_v62, 20.0 }
 0x58a   : > { %v8697_v10 = vpop.eup %8696  ;;  %v3883_v7 = vadd.f32 1.0, %v8695_v59  ;;  %v4097_v16 = vmul.f32 1.442695, %v4042_v57 }
 0x58b   : > { %v3939_v18 = vmul.f32 0.6931472, %v8697_v10  ;;  %8700 = vpow2.f32 %v3846_v20  ;;  %v11305_v63 = vadd.f32 %v11196_v14, %v3623_v49  ;;  %v4238_v17 = vpop.f32.mrf.mxu3  ;;  %v8699_v61 = vpop.eup %8698 }
 0x58c   : > { %8702 = vlog2.f32 %v3883_v7  ;;  %v4316_v44 = vmul.f32 %v11178_v41, %v4238_v17  ;;  %v4137_v43 = vmul.f32 %v8699_v61, %v11199_v54 }
 0x58d   : > { %v3978_v35 = vsub.f32 0.0, %v3939_v18  ;;  %v3692_v31 = vmul.f32 %v10823_v52, %v11305_v63  ;;  %8704 = vpow2.f32 %v4097_v16 }
 0x58e   : > { %v11313_v27 = vadd.f32 %v11190_v3, %v4316_v44  ;;  %v3493_v5 = vpop.f32.mrf.mxu1 }
 0x58f   : > { %v4010_v29 = vsel %vm3754_vm9, %v3786_v36, %v3978_v35  ;;  %v11316_v15 = vsub.f32 %v10828_v40, %v3692_v31  ;;  %v3583_v38 = vadd.f32 %v3582_v48, %v3493_v5  ;;  %v3587_v36 = vpop.f32.mrf.mxu2  ;;  %v3788_v5 = vsub.f32 0.0, %v11294_v62 }
 0x590   : > { %13758 = vst [vmem:[#allocation15_spill] sm:$0xff] %v11313_v27  ;;  %v4488_v53 = vsel %vm581_vm0, %v11313_v27, 0.0  ;;  %v4392_v58 = vsel %vm581_vm0, %v11313_v27, -inf  ;;  %v4043_v42 = vmul.f32 %v10861_v0, %v4010_v29  ;;  %vm4715_vm9 = vcmask 1043459  }
 0x591   : > { %v8701_v8 = vpop.eup %8700  ;;  %v3848_v47 = vmul.f32 1.442695, %v11316_v15  ;;  %v3624_v11 = vmul.f32 %v11184_v6, %v3583_v38  ;;  %4489 = vadd.xlane.f32.xlu2 %v4488_v53  ;;  %4393 = vmax.xlane.f32.xlu1 %v4392_v58  ;;  %vm3757_vm14 = vcmp.gt.f32.partialorder %v11316_v15, 20.0 }
 0x592   : > { %v8703_v26 = vpop.eup %8702  ;;  %v3884_v56 = vadd.f32 1.0, %v8701_v8  ;;  %v4099_v30 = vmul.f32 1.442695, %v4043_v42 }
 0x593   : > { %v8705_v50 = vpop.eup %8704  ;;  %v3941_v19 = vmul.f32 0.6931472, %v8703_v26  ;;  %8706 = vpow2.f32 %v3848_v47  ;;  %v11326_v45 = vadd.f32 %v11196_v14, %v3624_v11  ;;  %v4240_v32 = vpop.f32.mrf.mxu3 }
 0x594   : > { %v4317_v9 = vmul.f32 %v11178_v41, %v4240_v32  ;;  %v4138_v55 = vmul.f32 %v8705_v50, %v11223_v22  ;;  %8708 = vlog2.f32 %v3884_v56 }
 0x595   : > { %v3979_v28 = vsub.f32 0.0, %v3941_v19  ;;  %v3693_v25 = vmul.f32 %v10823_v52, %v11326_v45  ;;  %8710 = vpow2.f32 %v4099_v30 }
 0x596   : > { %v11336_v24 = vadd.f32 %v11190_v3, %v4317_v9  ;;  %v3495_v60 = vpop.f32.mrf.mxu1  ;;  %v4158_v1 = vpack.c.bf16 %v4138_v55, %v4137_v43 }
 0x597   : > { %v4011_v13 = vsel %vm3755_vm10, %v3787_v39, %v3979_v28  ;;  %v11339_v54 = vsub.f32 %v10828_v40, %v3693_v25  ;;  %v3585_v22 = vadd.f32 %v3584_v37, %v3495_v60  ;;  %v3789_v60 = vsub.f32 0.0, %v11316_v15 }
 0x598   : > { %13759 = vst [vmem:[#allocation16_spill] sm:$0xff] %v11336_v24  ;;  %v4044_v57 = vmul.f32 %v10861_v0, %v4011_v13  ;;  %8030 = vmatmul.msk.bf16.gmra.mxu3 %vm1274_vm1, %v4158_v1  ;;  %v4491_v59 = vsel %vm581_vm0, %v11336_v24, 0.0  ;;  %v4395_v12 = vsel %vm581_vm0, %v11336_v24, -inf  ;;  %v3589_v13 = vpop.f32.mrf.mxu2  ;;  %vm4717_vm10 = vcmask 1044484  }
 0x599   : > { %v8707_v20 = vpop.eup %8706  ;;  %v3850_v49 = vmul.f32 1.442695, %v11339_v54  ;;  %v3625_v10 = vmul.f32 %v11184_v6, %v3585_v22  ;;  %4492 = vadd.xlane.f32.xlu1 %v4491_v59  ;;  %4396 = vmax.xlane.f32.xlu0 %v4395_v12  ;;  %vm3758_vm2 = vcmp.gt.f32.partialorder %v11339_v54, 20.0 }
 0x59a   : > { %v4101_v48 = vmul.f32 1.442695, %v4044_v57  ;;  %v3885_v7 = vadd.f32 1.0, %v8707_v20  ;;  %v8709_v16 = vpop.eup %8708 }
 0x59b   : > { %8712 = vpow2.f32 %v3850_v49  ;;  %v11350_v18 = vadd.f32 %v11196_v14, %v3625_v10  ;;  %v4243_v17 = vpop.f32.mrf.mxu3  ;;  %v3943_v44 = vmul.f32 0.6931472, %v8709_v16  ;;  %v8711_v8 = vpop.eup %8710 }
 0x59c   : > { %8714 = vpow2.f32 %v4101_v48  ;;  %v4318_v35 = vmul.f32 %v11178_v41, %v4243_v17  ;;  %v4139_v37 = vmul.f32 %v8711_v8, %v11242_v23 }
 0x59d   : > { %8716 = vlog2.f32 %v3885_v7  ;;  %v3694_v31 = vmul.f32 %v10823_v52, %v11350_v18  ;;  %v3980_v29 = vsub.f32 0.0, %v3943_v44 }
 0x59e   : > { %v11357_v38 = vadd.f32 %v11190_v3, %v4318_v35  ;;  %v3498_v61 = vpop.f32.mrf.mxu1 }
 0x59f   : > { %v11361_v53 = vsub.f32 %v10828_v40, %v3694_v31  ;;  %v3588_v58 = vadd.f32 %v3587_v36, %v3498_v61  ;;  %v4012_v47 = vsel %vm3756_vm11, %v3788_v5, %v3980_v29  ;;  %v3790_v61 = vsub.f32 0.0, %v11339_v54 }
 0x5a0   : > { %13760 = vst [vmem:[#allocation17_spill] sm:$0xff] %v11357_v38  ;;  %v4494_v11 = vsel %vm581_vm0, %v11357_v38, 0.0  ;;  %v4398_v26 = vsel %vm581_vm0, %v11357_v38, -inf  ;;  %v4045_v43 = vmul.f32 %v10861_v0, %v4012_v47  ;;  %vm4719_vm11 = vcmask 1045509  }
 0x5a1   : > { %v8713_v42 = vpop.eup %8712  ;;  %v3852_v56 = vmul.f32 1.442695, %v11361_v53  ;;  %4495 = vadd.xlane.f32.xlu0 %v4494_v11  ;;  %4399 = vmax.xlane.f32.xlu2 %v4398_v26  ;;  %v3626_v62 = vmul.f32 %v11184_v6, %v3588_v58  ;;  %vm3759_vm3 = vcmp.gt.f32.partialorder %v11361_v53, 20.0 }
 0x5a2   : > { %v8715_v50 = vpop.eup %8714  ;;  %v3886_v19 = vadd.f32 1.0, %v8713_v42  ;;  %v4103_v57 = vmul.f32 1.442695, %v4045_v43  ;;  %v3791_v43 = vsub.f32 0.0, %v11361_v53 }
 0x5a3   : > { %v8717_v32 = vpop.eup %8716  ;;  %v4140_v9 = vmul.f32 %v8715_v50, %v11260_v34  ;;  %8718 = vpow2.f32 %v3852_v56  ;;  %v4245_v55 = vpop.f32.mrf.mxu3  ;;  %v11373_v28 = vadd.f32 %v11196_v14, %v3626_v62 }
 0x5a4   : > { %v3945_v39 = vmul.f32 0.6931472, %v8717_v32  ;;  %8720 = vlog2.f32 %v3886_v19  ;;  %v4319_v25 = vmul.f32 %v11178_v41, %v4245_v55 }
 0x5a5   : > { %v4159_v30 = vpack.c.bf16 %v4140_v9, %v4139_v37  ;;  %v3695_v23 = vmul.f32 %v10823_v52, %v11373_v28  ;;  %8722 = vpow2.f32 %v4103_v57 }
 0x5a6   : > { %v3981_v1 = vsub.f32 0.0, %v3945_v39  ;;  %v11380_v34 = vadd.f32 %v11190_v3, %v4319_v25  ;;  %v3500_v22 = vpop.f32.mrf.mxu1 }
 0x5a7   : > { %v3590_v59 = vadd.f32 %v3589_v13, %v3500_v22  ;;  %v11384_v20 = vsub.f32 %v10828_v40, %v3695_v23 }
 0x5a8   : > { %13761 = vst [vmem:[#allocation18_spill] sm:$0xff] %v11380_v34  ;;  %v4013_v12 = vsel %vm3757_vm14, %v3789_v60, %v3981_v1  ;;  %8031 = vmatmul.msk.bf16.gmra.mxu3 %vm1274_vm1, %v4159_v30  ;;  %v4497_v49 = vsel %vm581_vm0, %v11380_v34, 0.0  ;;  %v4401_v10 = vsel %vm581_vm0, %v11380_v34, -inf  ;;  %vm4721_vm14 = vcmask 1046534  }
 0x5a9   : > { %v8719_v48 = vpop.eup %8718  ;;  %v4046_v7 = vmul.f32 %v10861_v0, %v4013_v12  ;;  %v3627_v16 = vmul.f32 %v11184_v6, %v3590_v59  ;;  %4498 = vadd.xlane.f32.xlu2 %v4497_v49  ;;  %4402 = vmax.xlane.f32.xlu1 %v4401_v10  ;;  %v3854_v44 = vmul.f32 1.442695, %v11384_v20  ;;  %vm3760_vm12 = vcmp.gt.f32.partialorder %v11384_v20, 20.0 }
 0x5aa   : > { %v8721_v15 = vpop.eup %8720  ;;  %v3887_v17 = vadd.f32 1.0, %v8719_v48 }
 0x5ab   : > { %v4105_v36 = vmul.f32 1.442695, %v4046_v7  ;;  %v3947_v35 = vmul.f32 0.6931472, %v8721_v15  ;;  %v11395_v31 = vadd.f32 %v11196_v14, %v3627_v16  ;;  %v4248_v5 = vpop.f32.mrf.mxu3  ;;  %v8723_v42 = vpop.eup %8722  ;;  %v3792_v7 = vsub.f32 0.0, %v11384_v20 }
 0x5ac   : > { %8724 = vlog2.f32 %v3887_v17  ;;  %v4320_v29 = vmul.f32 %v11178_v41, %v4248_v5  ;;  %v4141_v32 = vmul.f32 %v8723_v42, %v11281_v33 }
 0x5ad   : > { %8726 = vpow2.f32 %v4105_v36  ;;  %v3982_v6 = vsub.f32 0.0, %v3947_v35  ;;  %v3696_v58 = vmul.f32 %v10823_v52, %v11395_v31 }
 0x5ae   : > { %8728 = vpow2.f32 %v3854_v44  ;;  %v11403_v8 = vadd.f32 %v11190_v3, %v4320_v29 }
 0x5af   : > { %v4014_v47 = vsel %vm3758_vm2, %v3790_v61, %v3982_v6  ;;  %v11406_v14 = vsub.f32 %v10828_v40, %v3696_v58  ;;  %vm4723_vm2 = vcmask 1047559  }
 0x5b0   : > { %13762 = vst [vmem:[#allocation19_spill] sm:$0xff] %v11403_v8  ;;  %v4500_v11 = vsel %vm581_vm0, %v11403_v8, 0.0  ;;  %v4404_v26 = vsel %vm581_vm0, %v11403_v8, -inf  ;;  %v4047_v54 = vmul.f32 %v10861_v0, %v4014_v47 }
 0x5b1   : > { %v3856_v56 = vmul.f32 1.442695, %v11406_v14  ;;  %4501 = vadd.xlane.f32.xlu1 %v4500_v11  ;;  %4405 = vmax.xlane.f32.xlu0 %v4404_v26  ;;  %v3793_v26 = vsub.f32 0.0, %v11406_v14  ;;  %vm3761_vm13 = vcmp.gt.f32.partialorder %v11406_v14, 20.0 }
 0x5b2   : > { %v8725_v52 = vpop.eup %8724  ;;  %v4107_v25 = vmul.f32 1.442695, %v4047_v54 }
 0x5b3   : > { %v8727_v50 = vpop.eup %8726  ;;  %v3949_v19 = vmul.f32 0.6931472, %v8725_v52  ;;  %8730 = vpow2.f32 %v3856_v56  ;;  %v4250_v62 = vpop.f32.mrf.mxu3 }
 0x5b4   : > { %v8729_v40 = vpop.eup %8728  ;;  %v4142_v37 = vmul.f32 %v8727_v50, %v11305_v63  ;;  %v4321_v9 = vmul.f32 %v11178_v41, %v4250_v62 }
 0x5b5   : > { %v3983_v55 = vsub.f32 0.0, %v3949_v19  ;;  %v3888_v39 = vadd.f32 1.0, %v8729_v40 }
 0x5b6   : > { %v11420_v30 = vadd.f32 %v11190_v3, %v4321_v9  ;;  %v4160_v60 = vpack.c.bf16 %v4142_v37, %v4141_v32 }
 0x5b7   : > { %v4015_v1 = vsel %vm3759_vm3, %v3791_v43, %v3983_v55  ;;  %8732 = vlog2.f32 %v3888_v39  ;;  %vm4734_vm3 = vcmask 154648  }
 0x5b8   : > { %13763 = vst [vmem:[#allocation20_spill] sm:$0xff] %v11420_v30  ;;  %v4048_v23 = vmul.f32 %v10861_v0, %v4015_v1  ;;  %8032 = vmatmul.msk.bf16.gmra.mxu3 %vm1274_vm1, %v4160_v60  ;;  %v4503_v33 = vsel %vm581_vm0, %v11420_v30, 0.0  ;;  %v4407_v63 = vsel %vm581_vm0, %v11420_v30, -inf  ;;  %8734 = vpow2.f32 %v4107_v25 }
 0x5b9   : > { %v8731_v13 = vpop.eup %8730  ;;  %4504 = vadd.xlane.f32.xlu0 %v4503_v33  ;;  %4408 = vmax.xlane.f32.xlu2 %v4407_v63 }
 0x5ba   : > { %v4109_v53 = vmul.f32 1.442695, %v4048_v23  ;;  %v3889_v22 = vadd.f32 1.0, %v8731_v13 }
 0x5bb   : > { %v4253_v57 = vpop.f32.mrf.mxu3 }
 0x5bc   : > { %8736 = vpow2.f32 %v4109_v53  ;;  %v4322_v59 = vmul.f32 %v11178_v41, %v4253_v57 }
 0x5bd   : > { %v8733_v12 = vpop.eup %8732  ;;  %8738 = vlog2.f32 %v3889_v22 }
 0x5be   : > { %v3951_v49 = vmul.f32 0.6931472, %v8733_v12  ;;  %v11430_v10 = vadd.f32 %v11190_v3, %v4322_v59  ;;  %v8735_v48 = vpop.eup %8734 }
 0x5bf   : > { %v4143_v5 = vmul.f32 %v8735_v48, %v11326_v45 }
 0x5c0   : > { %13764 = vst [vmem:[#allocation21_spill] sm:$0xff] %v11430_v10  ;;  %v3984_v16 = vsub.f32 0.0, %v3951_v49  ;;  %v4506_v15 = vsel %vm581_vm0, %v11430_v10, 0.0  ;;  %v4410_v17 = vsel %vm581_vm0, %v11430_v10, -inf }
 0x5c1   : > { %4507 = vadd.xlane.f32.xlu2 %v4506_v15  ;;  %4411 = vmax.xlane.f32.xlu1 %v4410_v17 }
 0x5c2   : > { %v8737_v44 = vpop.eup %8736  ;;  %v4016_v36 = vsel %vm3760_vm12, %v3792_v7, %v3984_v16  ;;  %vm5317_vm12 = vcmask 1045504  }
 0x5c3   : > { %v8739_v35 = vpop.eup %8738  ;;  %v4144_v29 = vmul.f32 %v8737_v44, %v11350_v18  ;;  %v4049_v61 = vmul.f32 %v10861_v0, %v4016_v36  ;;  %v4255_v6 = vpop.f32.mrf.mxu3 }
 0x5c4   : > { %v3953_v58 = vmul.f32 0.6931472, %v8739_v35  ;;  %v4323_v47 = vmul.f32 %v11178_v41, %v4255_v6 }
 0x5c5   : > { %v4161_v11 = vpack.c.bf16 %v4144_v29, %v4143_v5  ;;  %v4111_v56 = vmul.f32 1.442695, %v4049_v61 }
 0x5c6   : > { %v3985_v42 = vsub.f32 0.0, %v3953_v58  ;;  %v11444_v20 = vadd.f32 %v11190_v3, %v4323_v47 }
 0x5c7   : > { %8740 = vpow2.f32 %v4111_v56 }
 0x5c8   : > { %13765 = vst [vmem:[#allocation22_spill] sm:$0xff] %v11444_v20  ;;  %v4017_v52 = vsel %vm3761_vm13, %v3793_v26, %v3985_v42  ;;  %8033 = vmatmul.msk.bf16.gmra.mxu3 %vm1274_vm1, %v4161_v11  ;;  %v4509_v45 = vsel %vm581_vm0, %v11444_v20, 0.0  ;;  %v4413_v18 = vsel %vm581_vm0, %v11444_v20, -inf  ;;  %vm5604_vm13 = vcmask 1044480  }
 0x5c9   : > { %v4050_v54 = vmul.f32 %v10861_v0, %v4017_v52  ;;  %4510 = vadd.xlane.f32.xlu1 %v4509_v45  ;;  %4414 = vmax.xlane.f32.xlu0 %v4413_v18 }
 0x5cb   : > { %v4113_v50 = vmul.f32 1.442695, %v4050_v54  ;;  %v4258_v19 = vpop.f32.mrf.mxu3 }
 0x5cc   : > { %v4324_v62 = vmul.f32 %v11178_v41, %v4258_v19 }
 0x5cd   : > { %8742 = vpow2.f32 %v4113_v50  ;;  %v8741_v37 = vpop.eup %8740 }
 0x5ce   : > { %v11455_v14 = vadd.f32 %v11190_v3, %v4324_v62  ;;  %v4145_v43 = vmul.f32 %v8741_v37, %v11373_v28 }
 0x5d0   : > { %13766 = vst [vmem:[#allocation23_spill] sm:$0xff] %v11455_v14  ;;  %v4512_v40 = vsel %vm581_vm0, %v11455_v14, 0.0  ;;  %v4416_v32 = vsel %vm581_vm0, %v11455_v14, -inf }
 0x5d1   : > { %4513 = vadd.xlane.f32.xlu0 %v4512_v40  ;;  %4417 = vmax.xlane.f32.xlu2 %v4416_v32 }
 0x5d3   : > { %v8743_v0 = vpop.eup %8742  ;;  %v4260_v9 = vpop.f32.mrf.mxu3 }
 0x5d4   : > { %v4146_v55 = vmul.f32 %v8743_v0, %v11395_v31  ;;  %v4325_v39 = vmul.f32 %v11178_v41, %v4260_v9 }
 0x5d6   : > { %v11465_v25 = vadd.f32 %v11190_v3, %v4325_v39  ;;  %v4162_v60 = vpack.c.bf16 %v4146_v55, %v4145_v43 }
 0x5d8   : > { %13767 = vst [vmem:[#allocation24_spill] sm:$0xff] %v11465_v25  ;;  %8034 = vmatmul.msk.bf16.gmra.mxu3 %vm1274_vm1, %v4162_v60  ;;  %v4515_v1 = vsel %vm581_vm0, %v11465_v25, 0.0  ;;  %v4419_v23 = vsel %vm581_vm0, %v11465_v25, -inf  ;;  %vm4611_vm1 = vcmask 174080  }
 0x5d9   : > { %4516 = vadd.xlane.f32.xlu2 %v4515_v1  ;;  %4420 = vmax.xlane.f32.xlu1 %v4419_v23  ;;  %4613 = vst.msk [vmem:[#allocation4 + $0x18] sm:$0x7] %vm4611_vm1, %v9014_v4 }
 0x5da   : > { %4612 = vst.msk [vmem:[#allocation4] sm:$0x7] %vm4611_vm1, %v9014_v4 }
 0x5db   : > { %v4263_v33 = vpop.f32.mrf.mxu3  ;;  %4614 = vst.msk [vmem:[#allocation4 + $0x13] sm:$0x7] %vm4611_vm1, %v9014_v4 }
 0x5dc   : > { %v4326_v28 = vmul.f32 %v11178_v41, %v4263_v33  ;;  %v11514_v42 = vpop.xlane.xlu0 %4477  ;;  %v11520_v45 = vpop.xlane.xlu1 %4381  ;;  %4615 = vst.msk [vmem:[#allocation4 + $0x2b] sm:$0x7] %vm4611_vm1, %v9014_v4  ;;  %vm5891_vm1 = vcmask 1043456  }
 0x5de   : > { %v11474_v31 = vadd.f32 %v11190_v3, %v4326_v28 }
 0x5e0   : > { %13768 = vst [vmem:[#allocation25_spill] sm:$0xff] %v11474_v31  ;;  %v4518_v63 = vsel %vm581_vm0, %v11474_v31, 0.0  ;;  %v4422_v13 = vsel %vm581_vm0, %v11474_v31, -inf }
 0x5e1   : > { %4519 = vadd.xlane.f32.xlu1 %v4518_v63  ;;  %4423 = vmax.xlane.f32.xlu0 %v4422_v13 }
 0x5e3   : > { %v4265_v53 = vpop.f32.mrf.mxu3 }
 0x5e4   : > { %v4327_v22 = vmul.f32 %v11178_v41, %v4265_v53  ;;  %v11512_v11 = vpop.xlane.xlu2 %4384 }
 0x5e6   : > { %v11482_v57 = vadd.f32 %v11190_v3, %v4327_v22 }
 0x5e8   : > { %13769 = vst [vmem:[#allocation26_spill] sm:$0xff] %v11482_v57  ;;  %v4521_v59 = vsel %vm581_vm0, %v11482_v57, 0.0  ;;  %v4425_v12 = vsel %vm581_vm0, %v11482_v57, -inf }
 0x5e9   : > { %4522 = vadd.xlane.f32.xlu0 %v4521_v59  ;;  %4426 = vmax.xlane.f32.xlu2 %v4425_v12 }
 0x5eb   : > { %v4268_v49 = vpop.f32.mrf.mxu3 }
 0x5ec   : > { %v4328_v48 = vmul.f32 %v11178_v41, %v4268_v49  ;;  %v11526_v50 = vpop.xlane.xlu2 %4480 }
 0x5ee   : > { %v11490_v7 = vadd.f32 %v11190_v3, %v4328_v48 }
 0x5f0   : > { %13770 = vst [vmem:[#allocation27_spill] sm:$0xff] %v11490_v7  ;;  %v4524_v16 = vsel %vm581_vm0, %v11490_v7, 0.0  ;;  %v4428_v15 = vsel %vm581_vm0, %v11490_v7, -inf }
 0x5f1   : > { %4525 = vadd.xlane.f32.xlu2 %v4524_v16  ;;  %4429 = vmax.xlane.f32.xlu1 %v4428_v15 }
 0x5f3   : > { %v4270_v17 = vpop.f32.mrf.mxu3 }
 0x5f4   : > { %v4329_v44 = vmul.f32 %v11178_v41, %v4270_v17  ;;  %v11528_v62 = vpop.xlane.xlu0 %4387  ;;  %v11534_v37 = vpop.xlane.xlu1 %4483 }
 0x5f6   : > { %v11498_v36 = vadd.f32 %v11190_v3, %v4329_v44 }
 0x5f8   : > { %13771 = vst [vmem:[#allocation28_spill] sm:$0xff] %v11498_v36  ;;  %v4527_v35 = vsel %vm581_vm0, %v11498_v36, 0.0  ;;  %v4431_v5 = vsel %vm581_vm0, %v11498_v36, -inf }
 0x5f9   : > { %4528 = vadd.xlane.f32.xlu1 %v4527_v35  ;;  %4432 = vmax.xlane.f32.xlu0 %v4431_v5 }
 0x5fb   : > { %v4273_v29 = vpop.f32.mrf.mxu3 }
 0x5fc   : > { %v4330_v61 = vmul.f32 %v11178_v41, %v4273_v29  ;;  %v11540_v43 = vpop.xlane.xlu2 %4390  ;;  %v11543_v60 = vpop.xlane.xlu0 %4486 }
 0x5fe   : > { %v11506_v6 = vadd.f32 %v11190_v3, %v4330_v61 }
 0x600   : > { %13772 = vst [vmem:[#allocation29_spill] sm:$0xff] %v11506_v6  ;;  %v4530_v58 = vsel %vm581_vm0, %v11506_v6, 0.0  ;;  %v4434_v47 = vsel %vm581_vm0, %v11506_v6, -inf }
 0x601   : > { %4531 = vadd.xlane.f32.xlu0 %v4530_v58  ;;  %4435 = vmax.xlane.f32.xlu2 %v4434_v47  ;;  %v9022_v58 = vmov 64.0  }
 0x602   : > { %8744 = vrcp.f32 %v9022_v58 }
 0x603   : > { %v4275_v26 = vpop.f32.mrf.mxu3 }
 0x604   : > { %v4331_v56 = vmul.f32 %v11178_v41, %v4275_v26  ;;  %v11548_v23 = vpop.xlane.xlu1 %4393  ;;  %v11555_v53 = vpop.xlane.xlu2 %4489 }
 0x606   : > { %v11518_v52 = vadd.f32 %v11190_v3, %v4331_v56 }
 0x608   : > { %13773 = vst [vmem:[#allocation30_spill] sm:$0xff] %v11518_v52  ;;  %v4533_v18 = vsel %vm581_vm0, %v11518_v52, 0.0  ;;  %v4437_v54 = vsel %vm581_vm0, %v11518_v52, -inf }
 0x609   : > { %4534 = vadd.xlane.f32.xlu2 %v4533_v18  ;;  %4438 = vmax.xlane.f32.xlu1 %v4437_v54 }
 0x60b   : > { %v4278_v19 = vpop.f32.mrf.mxu3 }
 0x60c   : > { %v4332_v40 = vmul.f32 %v11178_v41, %v4278_v19  ;;  %v11557_v22 = vpop.xlane.xlu0 %4396  ;;  %v11566_v48 = vpop.xlane.xlu1 %4492 }
 0x60e   : > { %v11532_v32 = vadd.f32 %v11190_v3, %v4332_v40 }
 0x610   : > { %13774 = vst [vmem:[#allocation31_spill] sm:$0xff] %v11532_v32  ;;  %v4536_v0 = vsel %vm581_vm0, %v11532_v32, 0.0  ;;  %v4440_v9 = vsel %vm581_vm0, %v11532_v32, -inf }
 0x611   : > { %4537 = vadd.xlane.f32.xlu1 %v4536_v0  ;;  %4441 = vmax.xlane.f32.xlu0 %v4440_v9  ;;  %v8745_v0 = vpop.eup %8744 }
 0x612   : > { %vm4577_vm6 = vweird.f32 %v8745_v0 }
 0x613   : > { %v4280_v55 = vpop.f32.mrf.mxu3 }
 0x614   : > { %v4333_v39 = vmul.f32 %v11178_v41, %v4280_v55  ;;  %v11569_v17 = vpop.xlane.xlu2 %4399  ;;  %v11574_v35 = vpop.xlane.xlu0 %4495  ;;  %v4573_v55 = vmul.f32 64.0, %v8745_v0 }
 0x616   : > { %v11546_v1 = vadd.f32 %v11190_v3, %v4333_v39 }
 0x618   : > { %13775 = vst [vmem:[#allocation32_spill] sm:$0xff] %v11546_v1  ;;  %v4539_v33 = vsel %vm581_vm0, %v11546_v1, 0.0  ;;  %v4443_v28 = vsel %vm581_vm0, %v11546_v1, -inf }
 0x619   : > { %4540 = vadd.xlane.f32.xlu0 %v4539_v33  ;;  %4444 = vmax.xlane.f32.xlu2 %v4443_v28 }
 0x61b   : > { %v4283_v63 = vpop.f32.mrf.mxu3 }
 0x61c   : > { %v4334_v13 = vmul.f32 %v11178_v41, %v4283_v63  ;;  %v11580_v61 = vpop.xlane.xlu1 %4402  ;;  %v11586_v18 = vpop.xlane.xlu2 %4498 }
 0x61e   : > { %v11560_v59 = vadd.f32 %v11190_v3, %v4334_v13  ;;  %v4574_v13 = vsub.f32 1.0, %v4573_v55 }
 0x620   : > { %13776 = vst [vmem:[#allocation33_spill] sm:$0xff] %v11560_v59  ;;  %v4542_v12 = vsel %vm581_vm0, %v11560_v59, 0.0  ;;  %v4446_v49 = vsel %vm581_vm0, %v11560_v59, -inf }
 0x621   : > { %4543 = vadd.xlane.f32.xlu2 %v4542_v12  ;;  %4447 = vmax.xlane.f32.xlu1 %v4446_v49 }
 0x623   : > { %v4285_v16 = vpop.f32.mrf.mxu3 }
 0x624   : > { %v4335_v15 = vmul.f32 %v11178_v41, %v4285_v16  ;;  %v11588_v54 = vpop.xlane.xlu0 %4405  ;;  %v11594_v39 = vpop.xlane.xlu1 %4501 }
 0x626   : > { %v11572_v44 = vadd.f32 %v11190_v3, %v4335_v15 }
 0x628   : > { %13777 = vst [vmem:[#allocation34_spill] sm:$0xff] %v11572_v44  ;;  %v4545_v5 = vsel %vm581_vm0, %v11572_v44, 0.0  ;;  %v4449_v29 = vsel %vm581_vm0, %v11572_v44, -inf }
 0x629   : > { %4546 = vadd.xlane.f32.xlu1 %v4545_v5  ;;  %4450 = vmax.xlane.f32.xlu0 %v4449_v29  ;;  %v4575_v5 = vmul.f32 %v8745_v0, %v4574_v13 }
 0x62b   : > { %v4288_v47 = vpop.f32.mrf.mxu3 }
 0x62c   : > { %v4336_v26 = vmul.f32 %v11178_v41, %v4288_v47  ;;  %v11600_v63 = vpop.xlane.xlu2 %4408  ;;  %v11606_v16 = vpop.xlane.xlu0 %4504 }
 0x62e   : > { %v11584_v56 = vadd.f32 %v11190_v3, %v4336_v26  ;;  %v13678_v26 = vlaneseq }
 0x630   : > { %13778 = vst [vmem:[#allocation35_spill] sm:$0xff] %v11584_v56  ;;  %v4548_v19 = vsel %vm581_vm0, %v11584_v56, 0.0  ;;  %v4452_v40 = vsel %vm581_vm0, %v11584_v56, -inf  ;;  %v4659_v55 = vand.u32 127, %v13678_v26 }
 0x631   : > { %4549 = vadd.xlane.f32.xlu0 %v4548_v19  ;;  %4453 = vmax.xlane.f32.xlu2 %v4452_v40  ;;  %v4576_v19 = vadd.f32 %v8745_v0, %v4575_v5 }
 0x633   : > { %v4290_v9 = vpop.f32.mrf.mxu3  ;;  %v11633_v13 = vsel %vm4577_vm6, %v8745_v0, %v4576_v19 }
 0x634   : > { %v4337_v33 = vmul.f32 %v11178_v41, %v4290_v9  ;;  %v11608_v29 = vpop.xlane.xlu1 %4411  ;;  %v4580_v5 = vmul.f32 %v11633_v13, %v11526_v50  ;;  %v4579_v50 = vmul.f32 %v11633_v13, %v11514_v42  ;;  %v4584_v31 = vmul.f32 %v11633_v13, %v11566_v48 }
 0x636   : > { %v11598_v28 = vadd.f32 %v11190_v3, %v4337_v33 }
 0x638   : > { %13779 = vst [vmem:[#allocation36_spill] sm:$0xff] %v11598_v28  ;;  %v4551_v12 = vsel %vm581_vm0, %v11598_v28, 0.0  ;;  %v4455_v49 = vsel %vm581_vm0, %v11598_v28, -inf }
 0x639   : > { %4552 = vadd.xlane.f32.xlu2 %v4551_v12  ;;  %4456 = vmax.xlane.f32.xlu1 %v4455_v49  ;;  %v11638_v12 = vld [vmem:[%s13675_s10] ss:$0 sm:$0xff] }
 0x63b   : > { %v4293_v15 = vpop.f32.mrf.mxu3 }
 0x63c   : > { %v4338_v58 = vmul.f32 %v11178_v41, %v4293_v15  ;;  %v11622_v41 = vpop.xlane.xlu2 %4507  ;;  %v11643_v15 = vadd.s32 4294967285, %v4659_v55  ;;  %v11649_v0 = vpop.xlane.xlu1 %4510 }
 0x63e   : > { %v11612_v47 = vadd.f32 %v11190_v3, %v4338_v58  ;;  %v11626_v3 = vpop.xlane.xlu0 %4414  ;;  %v11654_v58 = vld [vmem:[%s13676_s11] ss:$0 sm:$0xff]  ;;  %v4770_v42 = vperm.slane %v4580_v5, %v11643_v15  ;;  %v4667_v57 = vperm.slane %v11540_v43, %v11643_v15  ;;  %v4583_v43 = vmul.f32 %v11633_v13, %v11555_v53 }
 0x640   : > { %13780 = vst [vmem:[#allocation37_spill] sm:$0xff] %v11612_v47  ;;  %v4554_v40 = vsel %vm581_vm0, %v11612_v47, 0.0  ;;  %v4458_v9 = vsel %vm581_vm0, %v11612_v47, -inf }
 0x641   : > { %4555 = vadd.xlane.f32.xlu1 %v4554_v40  ;;  %4459 = vmax.xlane.f32.xlu0 %v4458_v9  ;;  %v11661_v40 = vadd.s32 4294967293, %v4659_v55  ;;  %v4582_v9 = vmul.f32 %v11633_v13, %v11543_v60  ;;  %v4663_v55 = vperm.slane %v11512_v11, %v11643_v15  ;;  %v4581_v60 = vmul.f32 %v11633_v13, %v11534_v37 }
 0x643   : > { %v4295_v33 = vpop.f32.mrf.mxu3  ;;  %v4769_v11 = vperm.slane %v4579_v50, %v11661_v40  ;;  %v4661_v37 = vperm.slane %v11520_v45, %v11661_v40  ;;  %v4773_v5 = vperm.slane %v4582_v9, %v11643_v15  ;;  %v4772_v14 = vperm.slane %v4581_v60, %v11661_v40 }
 0x644   : > { %v4339_v49 = vmul.f32 %v11638_v12, %v4295_v33  ;;  %v11680_v26 = vpop.xlane.xlu2 %4417  ;;  %v4670_v45 = vperm.slane %v11557_v22, %v11643_v15  ;;  %v4673_v22 = vperm.slane %v11580_v61, %v11643_v15  ;;  %v4672_v61 = vperm.slane %v11569_v17, %v11661_v40 }
 0x645   : > { %v4665_v4 = vsel %vm4664_vm15, %v4663_v55, %v4661_v37  ;;  %v4771_v50 = vsel %vm4664_vm15, %v4770_v42, %v4769_v11  ;;  %v4774_v55 = vsel %vm4664_vm15, %v4773_v5, %v4772_v14  ;;  %v4669_v42 = vperm.slane %v11548_v23, %v11661_v40 }
 0x646   : > { %v11657_v19 = vadd.f32 %v11654_v58, %v4339_v49  ;;  %v4514_v25 = vpop.xlane.xlu0 %4513  ;;  %v4817_v5 = vsel %vm4711_vm5, %v4774_v55, %v4771_v50  ;;  %v4676_v17 = vperm.slane %v11600_v63, %v11643_v15  ;;  %v4675_v50 = vperm.slane %v11588_v54, %v11661_v40 }
 0x647   : > { %v4671_v23 = vsel %vm4664_vm15, %v4670_v45, %v4669_v42  ;;  %v4590_v63 = vmul.f32 %v11633_v13, %v11649_v0  ;;  %v4589_v54 = vmul.f32 %v11633_v13, %v11622_v41  ;;  %v4591_v0 = vmul.f32 %v11633_v13, %v4514_v25 }
 0x648   : > { %13781 = vst [vmem:[#allocation38_spill] sm:$0xff] %v11657_v19  ;;  %v4557_v33 = vsel %vm581_vm0, %v11657_v19, 0.0  ;;  %v4461_v49 = vsel %vm581_vm0, %v11657_v19, -inf  ;;  %v4586_v19 = vmul.f32 %v11633_v13, %v11586_v18  ;;  %v4585_v18 = vmul.f32 %v11633_v13, %v11574_v35 }
 0x649   : > { %4558 = vadd.xlane.f32.xlu0 %v4557_v33  ;;  %4462 = vmax.xlane.f32.xlu2 %v4461_v49  ;;  %v4666_v49 = vperm.slane %v11528_v62, %v11661_v40  ;;  %v4776_v62 = vperm.slane %v4584_v31, %v11643_v15  ;;  %v4775_v31 = vperm.slane %v4583_v43, %v11661_v40 }
 0x64a   : > { %v4779_v37 = vperm.slane %v4586_v19, %v11643_v15  ;;  %v4678_v41 = vperm.slane %v11608_v29, %v11661_v40 }
 0x64b   : > { %v4298_v33 = vpop.f32.mrf.mxu3  ;;  %v4668_v9 = vsel %vm4664_vm15, %v4667_v57, %v4666_v49  ;;  %v4588_v57 = vmul.f32 %v11633_v13, %v11606_v16  ;;  %v4587_v16 = vmul.f32 %v11633_v13, %v11594_v39  ;;  %v4777_v35 = vsel %vm4664_vm15, %v4776_v62, %v4775_v31 }
 0x64c   : > { %v4340_v48 = vmul.f32 %v11638_v12, %v4298_v33  ;;  %v11711_v33 = vpop.xlane.xlu1 %4420  ;;  %v4712_v11 = vsel %vm4711_vm5, %v4668_v9, %v4665_v4  ;;  %v4674_v49 = vsel %vm4664_vm15, %v4673_v22, %v4672_v61  ;;  %v4778_v4 = vperm.slane %v4585_v18, %v11661_v40 }
 0x64d   : > { %v4782_v43 = vperm.slane %v4588_v57, %v11643_v15  ;;  %v4714_v45 = vsel %vm4713_vm8, %v4671_v23, %v4712_v11  ;;  %v4818_v19 = vsel %vm4713_vm8, %v4777_v35, %v4817_v5  ;;  %v4781_v55 = vperm.slane %v4587_v16, %v11661_v40 }
 0x64e   : > { %v11709_v53 = vadd.f32 %v11654_v58, %v4340_v48  ;;  %v4517_v48 = vpop.xlane.xlu2 %4516  ;;  %v4780_v42 = vsel %vm4664_vm15, %v4779_v37, %v4778_v4  ;;  %v4716_v22 = vsel %vm4715_vm9, %v4674_v49, %v4714_v45  ;;  %v4682_v23 = vperm.slane %v11711_v33, %v11643_v15 }
 0x64f   : > { %v4592_v57 = vmul.f32 %v11633_v13, %v4517_v48  ;;  %v4783_v18 = vsel %vm4664_vm15, %v4782_v43, %v4781_v55  ;;  %v4819_v35 = vsel %vm4715_vm9, %v4780_v42, %v4818_v19  ;;  %v4681_v33 = vperm.slane %v11680_v26, %v11661_v40 }
 0x650   : > { %13782 = vst [vmem:[#allocation39_spill] sm:$0xff] %v11709_v53  ;;  %v4560_v60 = vsel %vm581_vm0, %v11709_v53, 0.0  ;;  %v4464_v14 = vsel %vm581_vm0, %v11709_v53, -inf  ;;  %v4820_v5 = vsel %vm4717_vm10, %v4783_v18, %v4819_v35  ;;  %v4784_v49 = vperm.slane %v4589_v54, %v11661_v40 }
 0x651   : > { %4561 = vadd.xlane.f32.xlu2 %v4560_v60  ;;  %4465 = vmax.xlane.f32.xlu1 %v4464_v14  ;;  %v4677_v60 = vsel %vm4664_vm15, %v4676_v17, %v4675_v50  ;;  %v4679_v14 = vperm.slane %v11626_v3, %v11643_v15  ;;  %v4785_v3 = vperm.slane %v4590_v63, %v11643_v15 }
 0x652   : > { %v4718_v25 = vsel %vm4717_vm10, %v4677_v60, %v4716_v22  ;;  %v4788_v37 = vperm.slane %v4592_v57, %v11643_v15  ;;  %v4787_v48 = vperm.slane %v4591_v0, %v11661_v40 }
 0x653   : > { %v4300_v39 = vpop.f32.mrf.mxu3  ;;  %v4680_v43 = vsel %vm4664_vm15, %v4679_v14, %v4678_v41 }
 0x654   : > { %v4341_v9 = vmul.f32 %v11638_v12, %v4300_v39  ;;  %v4424_v62 = vpop.xlane.xlu0 %4423  ;;  %v4520_v61 = vpop.xlane.xlu1 %4519  ;;  %v4683_v39 = vsel %vm4664_vm15, %v4682_v23, %v4681_v33  ;;  %v4720_v63 = vsel %vm4719_vm11, %v4680_v43, %v4718_v25  ;;  %v4789_v42 = vsel %vm4664_vm15, %v4788_v37, %v4787_v48 }
 0x655   : > { %v4593_v29 = vmul.f32 %v11633_v13, %v4520_v61  ;;  %v4684_v19 = vperm.slane %v4424_v62, %v11661_v40  ;;  %v4722_v57 = vsel %vm4721_vm14, %v4683_v39, %v4720_v63  ;;  %v13706_v43 = vstv %s11825_s20 }
 0x656   : > { %v11753_v31 = vadd.f32 %v11654_v58, %v4341_v9  ;;  %v4786_v9 = vsel %vm4664_vm15, %v4785_v3, %v4784_v49 }
 0x657   : > { %v4790_v18 = vperm.slane %v4593_v29, %v11661_v40  ;;  %v4821_v54 = vsel %vm4719_vm11, %v4786_v9, %v4820_v5  ;;  %v13705_v5 = vstv %s11815_s15  ;;  %v13704_v29 = vstv %s11828_s17 }
 0x658   : > { %13783 = vst [vmem:[#allocation40_spill] sm:$0xff] %v11753_v31  ;;  %v4563_v16 = vsel %vm581_vm0, %v11753_v31, 0.0  ;;  %v4467_v11 = vsel %vm581_vm0, %v11753_v31, -inf  ;;  %v4822_v61 = vsel %vm4721_vm14, %v4789_v42, %v4821_v54  ;;  %v13700_v54 = vstv %s11862_s14 }
 0x659   : > { %4564 = vadd.xlane.f32.xlu1 %v4563_v16  ;;  %4468 = vmax.xlane.f32.xlu0 %v4467_v11 }
 0x65b   : > { %v4303_v17 = vpop.f32.mrf.mxu3 }
 0x65c   : > { %v4342_v45 = vmul.f32 %v11638_v12, %v4303_v17  ;;  %v4523_v26 = vpop.xlane.xlu0 %4522  ;;  %v4427_v4 = vpop.xlane.xlu2 %4426 }
 0x65d   : > { %v4594_v50 = vmul.f32 %v11633_v13, %v4523_v26  ;;  %v4685_v55 = vperm.slane %v4427_v4, %v11643_v15 }
 0x65e   : > { %v11790_v22 = vadd.f32 %v11654_v58, %v4342_v45  ;;  %v13698_v45 = vstv %s11831_s18 }
 0x65f   : > { %v4791_v60 = vperm.slane %v4594_v50, %v11643_v15  ;;  %v4686_v62 = vsel %vm4664_vm15, %v4685_v55, %v4684_v19  ;;  %v13703_v19 = vstv %s11837_s24  ;;  %v13701_v50 = vstv %s11841_s26 }
 0x660   : > { %13784 = vst [vmem:[#allocation41_spill] sm:$0xff] %v11790_v22  ;;  %v4724_v14 = vsel %vm4723_vm2, %v4686_v62, %v4722_v57  ;;  %v4566_v0 = vsel %vm581_vm0, %v11790_v22, 0.0  ;;  %v4470_v23 = vsel %vm581_vm0, %v11790_v22, -inf  ;;  %v13695_v57 = vstv %s11852_s27 }
 0x661   : > { %v4792_v16 = vsel %vm4664_vm15, %v4791_v60, %v4790_v18  ;;  %4735 = vst.msk [vmem:[#allocation4 + $0x3] sm:$0xff] %vm4734_vm3, %v4724_v14  ;;  %4567 = vadd.xlane.f32.xlu0 %v4566_v0  ;;  %4471 = vmax.xlane.f32.xlu2 %v4470_v23  ;;  %v13697_v14 = vstv %s11866_s28 }
 0x662   : > { %v4823_v11 = vsel %vm4723_vm2, %v4792_v16, %v4822_v61 }
 0x663   : > { %4834 = vst.msk [vmem:[#allocation4 + $0x1b] sm:$0xff] %vm4734_vm3, %v4823_v11  ;;  %v4305_v35 = vpop.f32.mrf.mxu3 }
 0x664   : > { %v4343_v41 = vmul.f32 %v11638_v12, %v4305_v35  ;;  %v11854_v26 = vpop.xlane.xlu1 %4429  ;;  %v4526_v9 = vpop.xlane.xlu2 %4525 }
 0x666   : > { %v11809_v3 = vadd.f32 %v11654_v58, %v4343_v41  ;;  %v13702_v58 = vstv %s11820_s19 }
 0x668   : > { %13785 = vst [vmem:[#allocation42_spill] sm:$0xff] %v11809_v3  ;;  %v4569_v25 = vsel %vm581_vm0, %v11809_v3, 0.0  ;;  %v4473_v33 = vsel %vm581_vm0, %v11809_v3, -inf  ;;  %v11817_v37 = vld [vmem:[#allocation4] sm:$0xff]  ;;  %vm5030_vm0 = vcmask 1046528  }
 0x669   : > { %4570 = vadd.xlane.f32.xlu2 %v4569_v25  ;;  %4474 = vmax.xlane.f32.xlu1 %v4473_v33  ;;  %v4884_v12 = vmul.f32 %v13705_v5, %v11817_v37  ;;  %v4968_v49 = vmul.f32 %v13702_v58, %v11817_v37  ;;  %v4912_v17 = vmul.f32 %v13706_v43, %v11817_v37 }
 0x66a   : > { %v11846_v48 = vld [vmem:[#allocation4 + $0x18] sm:$0xff]  ;;  %v4856_v39 = vmul.f32 %v13704_v29, %v11817_v37  ;;  %v4996_v63 = vmul.f32 %v13703_v19, %v11817_v37  ;;  %v4940_v42 = vmul.f32 %v13701_v50, %v11817_v37  ;;  %v4595_v5 = vmul.f32 %v11633_v13, %v4526_v9 }
 0x66b   : > { %v4926_v4 = vmul.f32 %v13698_v45, %v11846_v48  ;;  %v5010_v60 = vmul.f32 %v13695_v57, %v11846_v48  ;;  %v4870_v0 = vmul.f32 %v13700_v54, %v11846_v48  ;;  %v4898_v61 = vmul.f32 %v13697_v14, %v11846_v48 }
 0x66c   : > { %v11868_v55 = vpop.xlane.xlu0 %4432  ;;  %v4529_v18 = vpop.xlane.xlu1 %4528 }
 0x66d   : > { %v4596_v50 = vmul.f32 %v11633_v13, %v4529_v18  ;;  %v4688_v3 = vperm.slane %v11868_v55, %v11643_v15  ;;  %v4793_v55 = vperm.slane %v4595_v5, %v11661_v40 }
 0x66f   : > { %v4794_v53 = vperm.slane %v4596_v50, %v11643_v15 }
 0x674   : > { %v4436_v62 = vpop.xlane.xlu2 %4435  ;;  %v4532_v23 = vpop.xlane.xlu0 %4531 }
 0x675   : > { %4888 = vrot.lane.b32.xlu0 %v4884_v12, %s13689_s23  ;;  %s11887_s23 = sld [smem:[#allocation7 + $0x36]]  ;;  %v4597_v58 = vmul.f32 %v11633_v13, %v4532_v23  ;;  %v4690_v22 = vperm.slane %v4436_v62, %v11661_v40  ;;  %v4687_v23 = vperm.slane %v11854_v26, %v11661_v40 }
 0x677   : > { %v4796_v18 = vperm.slane %v4597_v58, %v11661_v40  ;;  %v4689_v20 = vsel %vm4664_vm15, %v4688_v3, %v4687_v23 }
 0x67b   : > { %v13699_v35 = vstv %s11887_s23 }
 0x67c   : > { %v4439_v16 = vpop.xlane.xlu1 %4438  ;;  %v4535_v41 = vpop.xlane.xlu2 %4534  ;;  %v4982_v12 = vmul.f32 %v13699_v35, %v11846_v48 }
 0x67d   : > { %4972 = vrot.lane.b32.xlu0 %v4968_v49, %s13685_s25  ;;  %s13691_s25 = smov 124   ;;  %v4691_v19 = vperm.slane %v4439_v16, %v11643_v15 }
 0x67f   : > { %v4692_v16 = vsel %vm4664_vm15, %v4691_v19, %v4690_v22  ;;  %v4795_v22 = vsel %vm4664_vm15, %v4794_v53, %v4793_v55 }
 0x680   : > { %v4725_v19 = vsel %vm4711_vm5, %v4692_v16, %v4689_v20 }
 0x681   : > { %4916 = vrot.lane.b32.xlu2 %v4912_v17, %s13687_s29 }
 0x682   : > { %4860 = vrot.lane.b32.xlu1 %v4856_v39, %s13712_s30 }
 0x684   : > { %v4442_v33 = vpop.xlane.xlu0 %4441  ;;  %v4538_v49 = vpop.xlane.xlu1 %4537 }
 0x685   : > { %4930 = vrot.lane.b32.xlu0 %v4926_v4, %s13687_s29  ;;  %s11883_s29 = sld [smem:[#allocation7 + $0x35]]  ;;  %v4599_v9 = vmul.f32 %v11633_v13, %v4538_v49  ;;  %v4693_v49 = vperm.slane %v4442_v33, %v11661_v40 }
 0x689   : > { %5000 = vrot.lane.b32.xlu2 %v4996_v63, %s13693_s13 }
 0x68a   : > { %4944 = vrot.lane.b32.xlu1 %v4940_v42, %s13691_s25  ;;  %s13786_s25 = smov 126  }
 0x68b   : > { %v13696_v11 = vstv %s11883_s29 }
 0x68c   : > { %v4954_v25 = vmul.f32 %v13696_v11, %v11846_v48  ;;  %v4445_v17 = vpop.xlane.xlu2 %4444  ;;  %v4541_v39 = vpop.xlane.xlu0 %4540 }
 0x68d   : > { %5014 = vrot.lane.b32.xlu0 %v5010_v60, %s13693_s13  ;;  %s13787_s13 = smov 124  }
 0x691   : > { %4874 = vrot.lane.b32.xlu2 %v4870_v0, %s13712_s30  ;;  %s13792_s30 = smov 125  }
 0x692   : > { %4902 = vrot.lane.b32.xlu1 %v4898_v61, %s13786_s25 }
 0x694   : > { %v4448_v4 = vpop.xlane.xlu1 %4447  ;;  %v4544_v63 = vpop.xlane.xlu2 %4543 }
 0x695   : > { %v4601_v58 = vmul.f32 %v11633_v13, %v4544_v63  ;;  %v4696_v3 = vperm.slane %v4448_v4, %v11661_v40 }
 0x699   : > { %4958 = vrot.lane.b32.xlu2 %v4954_v25, %s13787_s13 }
 0x69a   : > { %4986 = vrot.lane.b32.xlu1 %v4982_v12, %s13788_s0  ;;  %v4598_v12 = vmul.f32 %v11633_v13, %v4535_v41  ;;  %v4600_v41 = vmul.f32 %v11633_v13, %v4541_v39  ;;  %v4694_v39 = vperm.slane %v4445_v17, %v11643_v15  ;;  %v4799_v17 = vperm.slane %v4599_v9, %v11661_v40 }
 0x69c   : > { %v4451_v42 = vpop.xlane.xlu0 %4450  ;;  %v4547_v60 = vpop.xlane.xlu1 %4546  ;;  %v4797_v43 = vperm.slane %v4598_v12, %v11643_v15  ;;  %v4800_v50 = vperm.slane %v4600_v41, %v11643_v15 }
 0x69d   : > { %v4602_v12 = vmul.f32 %v11633_v13, %v4547_v60  ;;  %v4697_v26 = vperm.slane %v4451_v42, %v11643_v15  ;;  %v4695_v42 = vsel %vm4664_vm15, %v4694_v39, %v4693_v49 }
 0x69e   : > { %v4798_v62 = vsel %vm4664_vm15, %v4797_v43, %v4796_v18  ;;  %v4802_v18 = vperm.slane %v4601_v58, %v11661_v40 }
 0x69f   : > { %v4824_v43 = vsel %vm4711_vm5, %v4798_v62, %v4795_v22  ;;  %v4803_v41 = vperm.slane %v4602_v12, %v11643_v15  ;;  %v4698_v23 = vsel %vm4664_vm15, %v4697_v26, %v4696_v3 }
 0x6a4   : > { %v11907_v0 = vpop.xlane.xlu2 %4453  ;;  %v4550_v61 = vpop.xlane.xlu0 %4549 }
 0x6a5   : > { %v4603_v53 = vmul.f32 %v11633_v13, %v4550_v61  ;;  %v4699_v4 = vperm.slane %v11907_v0, %v11661_v40  ;;  %v4726_v61 = vsel %vm4713_vm8, %v4695_v42, %v4725_v19 }
 0x6a6   : > { %v4727_v26 = vsel %vm4715_vm9, %v4698_v23, %v4726_v61 }
 0x6ac   : > { %v4457_v57 = vpop.xlane.xlu1 %4456  ;;  %v4553_v11 = vpop.xlane.xlu2 %4552 }
 0x6ad   : > { %v4604_v5 = vmul.f32 %v11633_v13, %v4553_v11  ;;  %v4700_v20 = vperm.slane %v4457_v57, %v11643_v15  ;;  %v4801_v11 = vsel %vm4664_vm15, %v4800_v50, %v4799_v17  ;;  %v4805_v50 = vperm.slane %v4603_v53, %v11661_v40 }
 0x6af   : > { %v4806_v9 = vperm.slane %v4604_v5, %v11643_v15  ;;  %v4701_v0 = vsel %vm4664_vm15, %v4700_v20, %v4699_v4 }
 0x6b4   : > { %v11909_v14 = vpop.xlane.xlu0 %4459  ;;  %v4556_v45 = vpop.xlane.xlu1 %4555 }
 0x6b5   : > { %v4605_v12 = vmul.f32 %v11633_v13, %v4556_v45  ;;  %v4702_v58 = vperm.slane %v11909_v14, %v11661_v40 }
 0x6b7   : > { %v4808_v19 = vperm.slane %v4605_v12, %v11661_v40 }
 0x6bc   : > { %v11911_v35 = vpop.xlane.xlu2 %4462  ;;  %v4559_v25 = vpop.xlane.xlu0 %4558 }
 0x6bd   : > { %v4606_v33 = vmul.f32 %v11633_v13, %v4559_v25  ;;  %v4703_v57 = vperm.slane %v11911_v35, %v11643_v15  ;;  %v4804_v25 = vsel %vm4664_vm15, %v4803_v41, %v4802_v18  ;;  %v4825_v35 = vsel %vm4713_vm8, %v4801_v11, %v4824_v43 }
 0x6be   : > { %v4826_v14 = vsel %vm4715_vm9, %v4804_v25, %v4825_v35 }
 0x6bf   : > { %v4809_v45 = vperm.slane %v4606_v33, %v11643_v15  ;;  %v4704_v49 = vsel %vm4664_vm15, %v4703_v57, %v4702_v58 }
 0x6c1   : > { %v4810_v41 = vsel %vm4664_vm15, %v4809_v45, %v4808_v19  ;;  %v13795_v45 = vstv %s11820_s19  ;;  %s8052_s19 = sld [smem:[#allocation7 + $0x9]] }
 0x6c4   : > { %v11914_v54 = vpop.xlane.xlu1 %4465  ;;  %v4562_v29 = vpop.xlane.xlu2 %4561 }
 0x6c5   : > { %v4607_v55 = vmul.f32 %v11633_v13, %v4562_v29  ;;  %v4705_v22 = vperm.slane %v11914_v54, %v11661_v40 }
 0x6c7   : > { %v4811_v43 = vperm.slane %v4607_v55, %v11661_v40  ;;  %v13790_v55 = vstv %s11815_s15  ;;  %s13797_s15 = smov 122  }
 0x6cc   : > { %v4469_v31 = vpop.xlane.xlu0 %4468  ;;  %v4565_v60 = vpop.xlane.xlu1 %4564 }
 0x6cd   : > { %v4608_v16 = vmul.f32 %v11633_v13, %v4565_v60  ;;  %v4706_v62 = vperm.slane %v4469_v31, %v11643_v15  ;;  %v4807_v31 = vsel %vm4664_vm15, %v4806_v9, %v4805_v50  ;;  %v4728_v60 = vsel %vm4717_vm10, %v4701_v0, %v4727_v26 }
 0x6ce   : > { %v4827_v33 = vsel %vm4717_vm10, %v4807_v31, %v4826_v14  ;;  %v4729_v11 = vsel %vm4719_vm11, %v4704_v49, %v4728_v60  ;;  %v13794_v0 = vstv %s11837_s24  ;;  %v13796_v26 = vstv %s11841_s26  ;;  %s8056_s24 = sld [smem:[#allocation7 + $0xb]] }
 0x6cf   : > { %v4812_v29 = vperm.slane %v4608_v16, %v11643_v15  ;;  %v4707_v17 = vsel %vm4664_vm15, %v4706_v62, %v4705_v22  ;;  %v13798_v31 = vstv %s11862_s14  ;;  %v13799_v49 = vstv %s11831_s18  ;;  %s8048_s18 = sld [smem:[#allocation7 + $0x7]] }
 0x6d0   : > { %v4730_v23 = vsel %vm4721_vm14, %v4707_v17, %v4729_v11  ;;  %v13800_v14 = vstv %s11866_s28  ;;  %v13801_v17 = vstv %s11883_s29  ;;  %s8049_s26 = sld [smem:[#allocation7 + $0x38]] }
 0x6d1   : > { %v4813_v18 = vsel %vm4664_vm15, %v4812_v29, %v4811_v43  ;;  %s8064_s29 = sld [smem:[#allocation7 + $0xf]] }
 0x6d2   : > { %s8066_s14 = sld [smem:[#allocation7 + $0x10]] }
 0x6d3   : > { %s8068_s28 = sld [smem:[#allocation7 + $0x11]] }
 0x6d4   : > { %v4472_v63 = vpop.xlane.xlu2 %4471  ;;  %v4568_v39 = vpop.xlane.xlu0 %4567 }
 0x6d5   : > { %v4609_v5 = vmul.f32 %v11633_v13, %v4568_v39  ;;  %v4708_v42 = vperm.slane %v4472_v63, %v11661_v40  ;;  %v4828_v63 = vsel %vm4719_vm11, %v4810_v41, %v4827_v33  ;;  %v13791_v39 = vstv %s11828_s17  ;;  %s8054_s17 = sld [smem:[#allocation7 + $0xa]] }
 0x6d6   : > { %v4829_v12 = vsel %vm4721_vm14, %v4813_v18, %v4828_v63 }
 0x6d7   : > { %v4814_v16 = vperm.slane %v4609_v5, %v11661_v40  ;;  %v13789_v40 = vstv %s11825_s20  ;;  %s8050_s20 = sld [smem:[#allocation7 + $0x8]] }
 0x6dc   : > { %v4571_v3 = vpop.xlane.xlu2 %4570  ;;  %v4475_v54 = vpop.xlane.xlu1 %4474 }
 0x6dd   : > { %v4610_v53 = vmul.f32 %v11633_v13, %v4571_v3  ;;  %v4709_v20 = vperm.slane %v4475_v54, %v11643_v15  ;;  %v13802_v54 = vstv %s11852_s27  ;;  %s8060_s27 = sld [smem:[#allocation7 + $0xd]] }
 0x6df   : > { %v4815_v4 = vperm.slane %v4610_v53, %v11643_v15  ;;  %v4710_v13 = vsel %vm4664_vm15, %v4709_v20, %v4708_v42  ;;  %v5058_v42 = vstv %s8050_s20  ;;  %v5100_v53 = vstv %s8052_s19  ;;  %s8070_s20 = sld [smem:[#allocation7 + $0x12]] }
 0x6e0   : > { %v4731_v9 = vsel %vm4723_vm2, %v4710_v13, %v4730_v23  ;;  %v13803_v20 = vstv %s11887_s23  ;;  %s8058_s23 = sld [smem:[#allocation7 + $0xc]] }
 0x6e1   : > { %v4816_v57 = vsel %vm4664_vm15, %v4815_v4, %v4814_v16  ;;  %4736 = vst.msk [vmem:[#allocation4 + $0xb] sm:$0xff] %vm4734_vm3, %v4731_v9  ;;  %v5059_v4 = vmul.f32 %v5058_v42, %v11817_v37  ;;  %s8072_s19 = sld [smem:[#allocation7 + $0x13]] }
 0x6e2   : > { %v4830_v61 = vsel %vm4723_vm2, %v4816_v57, %v4829_v12 }
 0x6e3   : > { %4835 = vst.msk [vmem:[#allocation4 + $0x23] sm:$0xff] %vm4734_vm3, %v4830_v61  ;;  %v5065_v57 = vrot.slane %v5059_v4, 1  ;;  %v5142_v61 = vstv %s8054_s17  ;;  %s8074_s17 = sld [smem:[#allocation7 + $0x14]] }
 0x6e8   : > { %v12001_v15 = vld [vmem:[#allocation4 + $0x8] sm:$0xff]  ;;  %v12041_v43 = vld [vmem:[#allocation4 + $0x10] sm:$0x3f] }
 0x6e9   : > { %v4913_v25 = vmul.f32 %v13789_v40, %v12001_v15  ;;  %v4885_v62 = vmul.f32 %v13790_v55, %v12001_v15  ;;  %v4857_v50 = vmul.f32 %v13791_v39, %v12001_v15  ;;  %v4997_v58 = vmul.f32 %v13794_v0, %v12001_v15 }
 0x6ea   : > { %v4969_v35 = vmul.f32 %v13795_v45, %v12001_v15  ;;  %v4941_v22 = vmul.f32 %v13796_v26, %v12001_v15  ;;  %v12027_v29 = vld [vmem:[#allocation4 + $0x20] sm:$0xff]  ;;  %v5060_v11 = vmul.f32 %v5058_v42, %v12001_v15  ;;  %v5102_v18 = vmul.f32 %v5100_v53, %v12001_v15  ;;  %v12568_v46 = vld [vmem:[#allocation4 + $0x28] sm:$0x3f] }
 0x6eb   : > { %4918 = vrot.lane.b32.xlu1 %v4913_v25, %s13792_s30  ;;  %4890 = vrot.lane.b32.xlu2 %v4885_v62, %s13786_s25  ;;  %v4871_v19 = vmul.f32 %v13798_v31, %v12027_v29  ;;  %v4927_v5 = vmul.f32 %v13799_v49, %v12027_v29  ;;  %v4899_v60 = vmul.f32 %v13800_v14, %v12027_v29  ;;  %v5226_v49 = vstv %s8058_s23  ;;  %s8078_s23 = sld [smem:[#allocation7 + $0x16]] }
 0x6ec   : > { %4862 = vrot.lane.b32.xlu0 %v4857_v50, %s13793_s1  ;;  %v4955_v3 = vmul.f32 %v13801_v17, %v12027_v29  ;;  %v5011_v41 = vmul.f32 %v13802_v54, %v12027_v29  ;;  %v4983_v33 = vmul.f32 %v13803_v20, %v12027_v29  ;;  %v5103_v23 = vmul.f32 %v5100_v53, %v12041_v43 }
 0x6ed   : > { %v5061_v16 = vmul.f32 %v5058_v42, %v12041_v43  ;;  %v5066_v13 = vrot.slane %v5060_v11, 1  ;;  %v5108_v63 = vrot.slane %v5102_v18, 1  ;;  %v5144_v40 = vmul.f32 %v5142_v61, %v12001_v15 }
 0x6ee   : > { %v5110_v9 = vrot.slane %v5103_v23, 1  ;;  %v5145_v25 = vmul.f32 %v5142_v61, %v12041_v43  ;;  %v12067_v50 = vstv %s8048_s18  ;;  %v5143_v0 = vmul.f32 %v5142_v61, %v11817_v37  ;;  %s12159_s18 = sld [smem:[#allocation7]] }
 0x6ef   : > { %v5068_v12 = vrot.slane %v5061_v16, 1  ;;  %v5067_v55 = vsel %vm5030_vm0, %v5065_v57, %v5066_v13  ;;  %v5101_v45 = vmul.f32 %v5100_v53, %v11817_v37  ;;  %v5026_v17 = vmul.f32 %v12067_v50, %v12041_v43 }
 0x6f0   : > { %v5111_v62 = vsel %vm5030_vm0, %v5108_v63, %v5110_v9  ;;  %v5152_v26 = vrot.slane %v5145_v25, 1  ;;  %v5149_v31 = vrot.slane %v5143_v0, 1  ;;  %v5228_v42 = vmul.f32 %v5226_v49, %v12001_v15 }
 0x6f1   : > { %v5069_v39 = vsel %vm5030_vm0, %v5066_v13, %v5068_v12  ;;  %v5229_v53 = vmul.f32 %v5226_v49, %v12041_v43 }
 0x6f2   : > { %v5234_v57 = vrot.slane %v5228_v42, 1 }
 0x6f3   : > { %5002 = vrot.lane.b32.xlu1 %v4997_v58, %s13797_s15  ;;  %4974 = vrot.lane.b32.xlu2 %v4969_v35, %s13788_s0  ;;  %v12073_v58 = vmul.f32 %v12067_v50, %v12001_v15  ;;  %v5150_v35 = vrot.slane %v5144_v40, 1  ;;  %v5236_v61 = vrot.slane %v5229_v53, 1 }
 0x6f4   : > { %4946 = vrot.lane.b32.xlu0 %v4941_v22, %s13787_s13  ;;  %v12076_v22 = vld [vmem:[#allocation4 + $0x28] sm:$0x3f] }
 0x6f5   : > { %v13715_v14 = vrot.slane %v12073_v58, 1  ;;  %v5153_v54 = vsel %vm5030_vm0, %v5150_v35, %v5152_v26  ;;  %v5151_v20 = vsel %vm5030_vm0, %v5149_v31, %v5150_v35  ;;  %v5227_v31 = vmul.f32 %v5226_v49, %v11817_v37 }
 0x6f7   : > { %v5233_v42 = vrot.slane %v5227_v31, 1 }
 0x6f9   : > { %v5235_v49 = vsel %vm5030_vm0, %v5233_v42, %v5234_v57  ;;  %v5471_v42 = vstv %s8070_s20  ;;  %s8092_s20 = sld [smem:[#allocation7 + $0x1d]] }
 0x6fb   : > { %4876 = vrot.lane.b32.xlu1 %v4871_v19, %s13793_s1  ;;  %4932 = vrot.lane.b32.xlu2 %v4927_v5, %s13792_s30  ;;  %v5184_v19 = vstv %s8056_s24  ;;  %v12078_v5 = vstv %s8049_s26  ;;  %s12161_s24 = sld [smem:[#allocation7 + $0x31]] }
 0x6fc   : > { %4904 = vrot.lane.b32.xlu0 %v4899_v60, %s13786_s25  ;;  %v5107_v60 = vrot.slane %v5101_v45, 1  ;;  %v5044_v11 = vmul.f32 %v12078_v5, %v12076_v22  ;;  %v5187_v16 = vmul.f32 %v5184_v19, %v12041_v43  ;;  %v5185_v4 = vmul.f32 %v5184_v19, %v11817_v37  ;;  %s8080_s26 = sld [smem:[#allocation7 + $0x17]] }
 0x6fe   : > { %v5109_v23 = vsel %vm5030_vm0, %v5107_v60, %v5108_v63  ;;  %v5051_v9 = vrot.slane %v5044_v11, 1  ;;  %v5194_v63 = vrot.slane %v5187_v16, 1  ;;  %v5191_v25 = vrot.slane %v5185_v4, 1 }
 0x703   : > { %4960 = vrot.lane.b32.xlu1 %v4955_v3, %s13787_s13  ;;  %5016 = vrot.lane.b32.xlu2 %v5011_v41, %s13797_s15  ;;  %v12085_v3 = vmul.f32 %v12078_v5, %v12027_v29  ;;  %v5186_v41 = vmul.f32 %v5184_v19, %v12001_v15 }
 0x704   : > { %4988 = vrot.lane.b32.xlu0 %v4983_v33, %s13788_s0  ;;  %v5034_v33 = vrot.slane %v5026_v17, 1  ;;  %v12121_v17 = vpop.permute.xlu2 %4916 }
 0x705   : > { %v13714_v18 = vrot.slane %v12085_v3, 1  ;;  %v5192_v12 = vrot.slane %v5186_v41, 1  ;;  %v5345_v41 = vstv %s8064_s29  ;;  %s8084_s29 = sld [smem:[#allocation7 + $0x19]] }
 0x706   : > { %v12104_v13 = vsel %vm5030_vm0, %v13715_v14, %v5034_v33  ;;  %v5347_v53 = vmul.f32 %v5345_v41, %v12001_v15  ;;  %v5348_v4 = vmul.f32 %v5345_v41, %v12041_v43 }
 0x707   : > { %v12109_v40 = vsel %vm5030_vm0, %v13714_v18, %v5051_v9  ;;  %v5195_v35 = vsel %vm5030_vm0, %v5192_v12, %v5194_v63  ;;  %v5346_v9 = vmul.f32 %v5345_v41, %v11817_v37 }
 0x70b   : > { %5070 = vrot.lane.b32.xlu1 %v5067_v55, %s13793_s1  ;;  %5114 = vrot.lane.b32.xlu2 %v5111_v62, %s13786_s25  ;;  %v5268_v55 = vstv %s8060_s27  ;;  %v5193_v62 = vsel %vm5030_vm0, %v5191_v25, %v5192_v12  ;;  %v5353_v12 = vrot.slane %v5347_v53, 2  ;;  %v5355_v25 = vrot.slane %v5348_v4, 2  ;;  %s8082_s27 = sld [smem:[#allocation7 + $0x18]] }
 0x70c   : > { %5072 = vrot.lane.b32.xlu0 %v5069_v39, %s13793_s1  ;;  %v5237_v39 = vsel %vm5030_vm0, %v5234_v57, %v5236_v61  ;;  %v5270_v0 = vmul.f32 %v5268_v55, %v12001_v15  ;;  %v5271_v45 = vmul.f32 %v5268_v55, %v12041_v43  ;;  %v5269_v26 = vmul.f32 %v5268_v55, %v11817_v37 }
 0x70d   : > { %v5352_v55 = vrot.slane %v5346_v9, 2 }
 0x70e   : > { %v5276_v19 = vrot.slane %v5270_v0, 1  ;;  %v5278_v60 = vrot.slane %v5271_v45, 1 }
 0x70f   : > { %v5354_v0 = vsel %vm5317_vm12, %v5352_v55, %v5353_v12 }
 0x710   : > { %v5279_v33 = vsel %vm5030_vm0, %v5276_v19, %v5278_v60 }
 0x713   : > { %5156 = vrot.lane.b32.xlu1 %v5153_v54, %s13792_s30  ;;  %5154 = vrot.lane.b32.xlu2 %v5151_v20, %s13792_s30  ;;  %v5275_v54 = vrot.slane %v5269_v26, 1  ;;  %v5387_v20 = vstv %s8066_s14  ;;  %v5356_v26 = vsel %vm5317_vm12, %v5353_v12, %v5355_v25  ;;  %v5474_v12 = vmul.f32 %v5471_v42, %v12041_v43  ;;  %s8086_s14 = sld [smem:[#allocation7 + $0x1a]] }
 0x714   : > { %5112 = vrot.lane.b32.xlu0 %v5109_v23, %s13786_s25  ;;  %v5389_v23 = vmul.f32 %v5387_v20, %v12001_v15  ;;  %v5390_v16 = vmul.f32 %v5387_v20, %v12041_v43 }
 0x715   : > { %v5277_v11 = vsel %vm5030_vm0, %v5275_v54, %v5276_v19  ;;  %v5388_v19 = vmul.f32 %v5387_v20, %v11817_v37 }
 0x716   : > { %v5395_v61 = vrot.slane %v5389_v23, 2  ;;  %v5397_v63 = vrot.slane %v5390_v16, 2 }
 0x717   : > { %v5394_v53 = vrot.slane %v5388_v19, 2 }
 0x718   : > { %v5398_v57 = vsel %vm5317_vm12, %v5395_v61, %v5397_v63  ;;  %v5472_v63 = vmul.f32 %v5471_v42, %v11817_v37 }
 0x719   : > { %v5396_v20 = vsel %vm5317_vm12, %v5394_v53, %v5395_v61  ;;  %v5555_v61 = vstv %s8074_s17  ;;  %s12237_s17 = sld [smem:[#allocation7 + $0x3b]] }
 0x71a   : > { %v5557_v19 = vmul.f32 %v5555_v61, %v12001_v15 }
 0x71b   : > { %5196 = vrot.lane.b32.xlu1 %v5193_v62, %s13787_s13  ;;  %5240 = vrot.lane.b32.xlu2 %v5237_v39, %s13788_s0  ;;  %v12134_v62 = vpop.permute.xlu2 %5000  ;;  %v5429_v39 = vstv %s8068_s28  ;;  %s8088_s28 = sld [smem:[#allocation7 + $0x1b]] }
 0x71c   : > { %5198 = vrot.lane.b32.xlu0 %v5195_v35, %s13787_s13  ;;  %v5431_v45 = vmul.f32 %v5429_v39, %v12001_v15  ;;  %v5432_v35 = vmul.f32 %v5429_v39, %v12041_v43  ;;  %v5430_v31 = vmul.f32 %v5429_v39, %v11817_v37 }
 0x71e   : > { %v5437_v60 = vrot.slane %v5431_v45, 2  ;;  %v5439_v54 = vrot.slane %v5432_v35, 2  ;;  %v5436_v41 = vrot.slane %v5430_v31, 2  ;;  %v12163_v45 = vpop.permute.xlu0 %4888  ;;  %v5478_v35 = vrot.slane %v5472_v63, 2 }
 0x720   : > { %v5440_v23 = vsel %vm5317_vm12, %v5437_v60, %v5439_v54  ;;  %v5438_v16 = vsel %vm5317_vm12, %v5436_v41, %v5437_v60  ;;  %v5558_v60 = vmul.f32 %v5555_v61, %v12041_v43  ;;  %v5556_v41 = vmul.f32 %v5555_v61, %v11817_v37 }
 0x723   : > { %5282 = vrot.lane.b32.xlu1 %v5279_v33, %s13797_s15  ;;  %5280 = vrot.lane.b32.xlu2 %v5277_v11, %s13797_s15  ;;  %v5473_v33 = vmul.f32 %v5471_v42, %v12001_v15  ;;  %v5513_v11 = vstv %s8072_s19  ;;  %v12151_v9 = vpop.permute.xlu2 %4874  ;;  %s8051_s19 = sld [smem:[#allocation7 + $0x39]] }
 0x724   : > { %5238 = vrot.lane.b32.xlu0 %v5235_v49, %s13788_s0  ;;  %v5515_v49 = vmul.f32 %v5513_v11, %v12001_v15  ;;  %v5516_v4 = vmul.f32 %v5513_v11, %v12041_v43  ;;  %v5514_v53 = vmul.f32 %v5513_v11, %v11817_v37 }
 0x725   : > { %v5479_v25 = vrot.slane %v5473_v33, 2  ;;  %v5563_v33 = vrot.slane %v5557_v19, 2 }
 0x726   : > { %v5521_v55 = vrot.slane %v5515_v49, 2  ;;  %v5523_v39 = vrot.slane %v5516_v4, 2  ;;  %v5562_v49 = vrot.slane %v5556_v41, 2  ;;  %v5632_v4 = vstv %s8078_s23  ;;  %s12239_s23 = sld [smem:[#allocation7 + $0x3a]] }
 0x727   : > { %v5520_v63 = vrot.slane %v5514_v53, 2 }
 0x728   : > { %v5524_v31 = vsel %vm5317_vm12, %v5521_v55, %v5523_v39  ;;  %v5674_v39 = vstv %s8080_s26  ;;  %v5564_v11 = vsel %vm5317_vm12, %v5562_v49, %v5563_v33  ;;  %s12245_s26 = sld [smem:[#allocation7 + $0x23]] }
 0x729   : > { %v5676_v61 = vmul.f32 %v5674_v39, %v12001_v15  ;;  %v5522_v19 = vsel %vm5317_vm12, %v5520_v63, %v5521_v55  ;;  %v5716_v63 = vstv %s8082_s27  ;;  %s12250_s27 = sld [smem:[#allocation7 + $0x54]] }
 0x72a   : > { %v5718_v14 = vmul.f32 %v5716_v63, %v12001_v15 }
 0x72b   : > { %5357 = vrot.lane.b32.xlu1 %v5354_v0, %s13793_s1  ;;  %5401 = vrot.lane.b32.xlu2 %v5398_v57, %s13786_s25  ;;  %v4861_v0 = vpop.permute.xlu1 %4860  ;;  %v5481_v57 = vrot.slane %v5474_v12, 2  ;;  %v12174_v42 = vpop.permute.xlu2 %4958 }
 0x72c   : > { %5359 = vrot.lane.b32.xlu0 %v5356_v26, %s13793_s1  ;;  %v5480_v26 = vsel %vm5317_vm12, %v5478_v35, %v5479_v25  ;;  %v12275_v10 = vstv %s12239_s23  ;;  %s8071_s23 = sld [smem:[#allocation7 + $0x43]] }
 0x72d   : > { %v5482_v54 = vsel %vm5317_vm12, %v5479_v25, %v5481_v57  ;;  %v5634_v25 = vmul.f32 %v5632_v4, %v12001_v15  ;;  %v12182_v57 = vpop.permute.xlu0 %4972 }
 0x733   : > { %5443 = vrot.lane.b32.xlu1 %v5440_v23, %s13792_s30  ;;  %5441 = vrot.lane.b32.xlu2 %v5438_v16, %s13792_s30  ;;  %v5565_v23 = vrot.slane %v5558_v60, 2  ;;  %v13717_v16 = vstv %s12161_s24  ;;  %v12179_v12 = vpop.permute.xlu1 %4944  ;;  %v5635_v60 = vmul.f32 %v5632_v4, %v12041_v43 }
 0x734   : > { %5399 = vrot.lane.b32.xlu0 %v5396_v20, %s13786_s25  ;;  %v13716_v20 = vstv %s12159_s18 }
 0x735   : > { %v5566_v35 = vsel %vm5317_vm12, %v5563_v33, %v5565_v23  ;;  %v4844_v41 = vmul.f32 %v13716_v20, %v11817_v37  ;;  %v5640_v33 = vrot.slane %v5634_v25, 3  ;;  %v5682_v23 = vrot.slane %v5676_v61, 3  ;;  %v4931_v61 = vpop.permute.xlu0 %4930 }
 0x736   : > { %v5719_v20 = vmul.f32 %v5716_v63, %v12041_v43 }
 0x73b   : > { %5483 = vrot.lane.b32.xlu1 %v5480_v26, %s13787_s13  ;;  %5527 = vrot.lane.b32.xlu2 %v5524_v31, %s13788_s0  ;;  %v5677_v26 = vmul.f32 %v5674_v39, %v12041_v43  ;;  %v4850_v31 = vmul.f32 %v13717_v16, %v11846_v48  ;;  %v4903_v16 = vpop.permute.xlu1 %4902 }
 0x73c   : > { %5485 = vrot.lane.b32.xlu0 %v5482_v54, %s13787_s13  ;;  %v5633_v54 = vmul.f32 %v5632_v4, %v11817_v37 }
 0x73d   : > { %v5684_v49 = vrot.slane %v5677_v26, 3  ;;  %v4852_v18 = vadd.f32 %v4850_v31, %v4844_v41  ;;  %v5675_v31 = vmul.f32 %v5674_v39, %v11817_v37 }
 0x73f   : > { %v4866_v55 = vadd.f32 %v4861_v0, %v4852_v18  ;;  %v5685_v4 = vsel %vm5604_vm13, %v5682_v23, %v5684_v49  ;;  %v5717_v18 = vmul.f32 %v5716_v63, %v11817_v37  ;;  %v5758_v49 = vstv %s8084_s29  ;;  %s12254_s29 = sld [smem:[#allocation7 + $0x2a]] }
 0x740   : > { %v5761_v39 = vmul.f32 %v5758_v49, %v12041_v43 }
 0x741   : > { %v4880_v0 = vadd.f32 %v12151_v9, %v4866_v55  ;;  %v5723_v41 = vrot.slane %v5717_v18, 3 }
 0x743   : > { %5569 = vrot.lane.b32.xlu1 %v5566_v35, %s13797_s15  ;;  %5567 = vrot.lane.b32.xlu2 %v5564_v11, %s13797_s15  ;;  %v5642_v35 = vrot.slane %v5635_v60, 3  ;;  %v5639_v11 = vrot.slane %v5633_v54, 3  ;;  %v5724_v60 = vrot.slane %v5718_v14, 3  ;;  %v5726_v54 = vrot.slane %v5719_v20, 3 }
 0x744   : > { %5525 = vrot.lane.b32.xlu0 %v5522_v19, %s13788_s0 }
 0x745   : > { %v12200_v53 = vpop.permute.xlu2 %4890  ;;  %v5641_v19 = vsel %vm5604_vm13, %v5639_v11, %v5640_v33  ;;  %v5643_v25 = vsel %vm5604_vm13, %v5640_v33, %v5642_v35  ;;  %v4894_v11 = vadd.f32 %v12163_v45, %v4880_v0  ;;  %v5760_v33 = vmul.f32 %v5758_v49, %v12001_v15  ;;  %v12233_v0 = vpop.permute.xlu0 %5014 }
 0x746   : > { %v5800_v35 = vstv %s8086_s14  ;;  %v5727_v63 = vsel %vm5604_vm13, %v5724_v60, %v5726_v54  ;;  %v5725_v9 = vsel %vm5604_vm13, %v5723_v41, %v5724_v60  ;;  %s12262_s14 = sld [smem:[#allocation7 + $0x5b]] }
 0x747   : > { %v12220_v55 = vmul.f32 %v5800_v35, %v12001_v15  ;;  %v5803_v14 = vmul.f32 %v5800_v35, %v12041_v43  ;;  %v4908_v20 = vadd.f32 %v4903_v16, %v4894_v11  ;;  %v5766_v16 = vrot.slane %v5760_v33, 3 }
 0x748   : > { %v5842_v11 = vstv %s8088_s28  ;;  %s12385_s28 = sld [smem:[#allocation7 + $0x3d]] }
 0x749   : > { %v5810_v60 = vrot.slane %v5803_v14, 3  ;;  %v4922_v54 = vadd.f32 %v12121_v17, %v4908_v20  ;;  %v5845_v33 = vmul.f32 %v5842_v11, %v12041_v43  ;;  %v5843_v14 = vmul.f32 %v5842_v11, %v11817_v37 }
 0x74b   : > { %5644 = vrot.lane.b32.xlu1 %v5641_v19, %s13793_s1  ;;  %5688 = vrot.lane.b32.xlu2 %v5685_v4, %s13786_s25  ;;  %v5681_v19 = vrot.slane %v5675_v31, 3  ;;  %v5759_v4 = vmul.f32 %v5758_v49, %v11817_v37  ;;  %v5808_v31 = vrot.slane %v12220_v55, 3  ;;  %v4936_v55 = vadd.f32 %v4931_v61, %v4922_v54 }
 0x74c   : > { %5646 = vrot.lane.b32.xlu0 %v5643_v25, %s13793_s1  ;;  %v12229_v25 = vpop.permute.xlu1 %4986  ;;  %v5801_v61 = vmul.f32 %v5800_v35, %v11817_v37  ;;  %v5852_v54 = vrot.slane %v5845_v33, 3 }
 0x74d   : > { %v12212_v26 = vpop.permute.xlu2 %4974  ;;  %v5683_v45 = vsel %vm5604_vm13, %v5681_v19, %v5682_v23  ;;  %v5768_v23 = vrot.slane %v5761_v39, 3  ;;  %v5765_v41 = vrot.slane %v5759_v4, 3  ;;  %v5919_v19 = vstv %s8092_s20  ;;  %s8065_s20 = sld [smem:[#allocation7 + $0x40]] }
 0x74e   : > { %v5920_v39 = vmul.f32 %v5919_v19, %v11817_v37  ;;  %v5079_v4 = vstv %s8051_s19  ;;  %v12271_v37 = vstv %s12237_s17  ;;  %v5922_v47 = vmul.f32 %v5919_v19, %v12041_v43  ;;  %s8069_s19 = sld [smem:[#allocation7 + $0x42]] }
 0x74f   : > { %v5767_v49 = vsel %vm5604_vm13, %v5765_v41, %v5766_v16  ;;  %v5769_v17 = vsel %vm5604_vm13, %v5766_v16, %v5768_v23  ;;  %v4950_v23 = vadd.f32 %v12179_v12, %v4936_v55  ;;  %v5921_v41 = vmul.f32 %v5919_v19, %v12001_v15  ;;  %s8067_s17 = sld [smem:[#allocation7 + $0x41]] }
 0x750   : > { %v12268_v35 = vmul.f32 %v5079_v4, %v12027_v29 }
 0x753   : > { %5730 = vrot.lane.b32.xlu1 %v5727_v63, %s13792_s30  ;;  %5728 = vrot.lane.b32.xlu2 %v5725_v9, %s13792_s30  ;;  %v5811_v63 = vsel %vm5604_vm13, %v5808_v31, %v5810_v60  ;;  %v5844_v9 = vmul.f32 %v5842_v11, %v12001_v15  ;;  %v5849_v11 = vrot.slane %v5843_v14, 3  ;;  %v4964_v14 = vadd.f32 %v12174_v42, %v4950_v23 }
 0x754   : > { %5686 = vrot.lane.b32.xlu0 %v5683_v45, %s13786_s25 }
 0x755   : > { %v12231_v18 = vpop.permute.xlu2 %4932  ;;  %v5850_v60 = vrot.slane %v5844_v9, 3  ;;  %v13804_v9 = vstv %s12161_s24  ;;  %v4978_v42 = vadd.f32 %v12182_v57, %v4964_v14  ;;  %v12337_v14 = vmul.f32 %v12275_v10, %v12027_v29  ;;  %s12381_s24 = sld [smem:[#allocation7 + $0x3e]] }
 0x756   : > { %v4851_v12 = vmul.f32 %v13804_v9, %v12027_v29 }
 0x757   : > { %v5853_v33 = vsel %vm5604_vm13, %v5850_v60, %v5852_v54  ;;  %v5851_v55 = vsel %vm5604_vm13, %v5849_v11, %v5850_v60  ;;  %v13807_v60 = vstv %s12159_s18  ;;  %s12339_s18 = sld [smem:[#allocation7 + $0x3c]]  ;;  %v4992_v56 = vadd.f32 %v12229_v25, %v4978_v42 }
 0x758   : > { %v4845_v54 = vmul.f32 %v13807_v60, %v12001_v15  ;;  %v5129_v44 = vrot.slane %v12337_v14, 1 }
 0x75b   : > { %5770 = vrot.lane.b32.xlu1 %v5767_v49, %s13787_s13  ;;  %5814 = vrot.lane.b32.xlu2 %v5811_v63, %s13788_s0  ;;  %v5080_v49 = vmul.f32 %v5079_v4, %v11846_v48  ;;  %v5807_v63 = vrot.slane %v5801_v61, 3  ;;  %v12283_v48 = vstv %s12245_s26  ;;  %v5927_v61 = vrot.slane %v5921_v41, 4  ;;  %s8075_s26 = sld [smem:[#allocation7 + $0x45]] }
 0x75c   : > { %5772 = vrot.lane.b32.xlu0 %v5769_v17, %s13787_s13  ;;  %v5926_v17 = vrot.slane %v5920_v39, 4  ;;  %13805 = vst [vmem:[#allocation43_spill] sm:$0xff] %v12283_v48  ;;  %v12291_v39 = vmul.f32 %v12283_v48, %v12001_v15  ;;  %v12306_v41 = vstv %s12254_s29  ;;  %v6174_v60 = vmul.f32 %v12283_v48, %v12041_v43  ;;  %s8079_s29 = sld [smem:[#allocation7 + $0x47]] }
 0x75d   : > { %v12256_v20 = vpop.permute.xlu2 %5016  ;;  %v12258_v45 = vpop.permute.xlu1 %4918  ;;  %v5809_v19 = vsel %vm5604_vm13, %v5807_v63, %v5808_v31  ;;  %v5086_v11 = vrot.slane %v5080_v49, 1  ;;  %v12303_v31 = vstv %s12250_s27  ;;  %13809 = vst [vmem:[#allocation46_spill] sm:$0xff] %v12306_v41  ;;  %v12309_v63 = vstv %s12262_s14  ;;  %s8073_s27 = sld [smem:[#allocation7 + $0x44]] }
 0x75e   : > { %v4863_v16 = vpop.permute.xlu0 %4862  ;;  %13806 = vst [vmem:[#allocation44_spill] sm:$0xff] %v12291_v39  ;;  %v12321_v28 = vmul.f32 %v12303_v31, %v12027_v29  ;;  %v6182_v49 = vrot.slane %v6174_v60, 5  ;;  %v6192_v8 = vmul.f32 %v12303_v31, %v12076_v22  ;;  %v12367_v25 = vmul.f32 %v12309_v63, %v12027_v29  ;;  %s8083_s14 = sld [smem:[#allocation7 + $0x49]] }
 0x75f   : > { %13808 = vst [vmem:[#allocation45_spill] sm:$0xff] %v12303_v31 }
 0x760   : > { %13810 = vst [vmem:[#allocation47_spill] sm:$0xff] %v12309_v63  ;;  %v6199_v34 = vrot.slane %v6192_v8, 5  ;;  %v13816_v8 = vrot.slane %v12321_v28, 5 }
 0x761   : > { %13811 = vst [vmem:[#allocation48_spill] sm:$0xff] %v12321_v28 }
 0x762   : > { %13818 = vst [vmem:[#allocation52_spill] sm:$0xff] %v12367_v25 }
 0x763   : > { %5856 = vrot.lane.b32.xlu1 %v5853_v33, %s13797_s15  ;;  %5854 = vrot.lane.b32.xlu2 %v5851_v55, %s13797_s15  ;;  %v5929_v33 = vrot.slane %v5922_v47, 4  ;;  %v4853_v55 = vadd.f32 %v4851_v12, %v4845_v54  ;;  %v5928_v47 = vsel %vm5891_vm1, %v5926_v17, %v5927_v61  ;;  %v13812_v12 = vrot.slane %v12268_v35, 1 }
 0x764   : > { %5812 = vrot.lane.b32.xlu0 %v5809_v19, %s13788_s0  ;;  %v5082_v19 = vmul.f32 %v5079_v4, %v12076_v22  ;;  %v12328_v4 = vmul.f32 %v12271_v37, %v12027_v29  ;;  %v5166_v17 = vmul.f32 %v12271_v37, %v12076_v22 }
 0x765   : > { %v12298_v23 = vpop.permute.xlu2 %5114  ;;  %v12300_v9 = vpop.permute.xlu1 %5002  ;;  %v5088_v54 = vsel %vm5030_vm0, %v5086_v11, %v13812_v12  ;;  %v5930_v57 = vsel %vm5891_vm1, %v5927_v61, %v5929_v33  ;;  %v13813_v12 = vrot.slane %v12291_v39, 5  ;;  %v12349_v61 = vmul.f32 %v12306_v41, %v12001_v15 }
 0x766   : > { %v12311_v30 = vpop.permute.xlu0 %4946  ;;  %v6461_v33 = vmul.f32 %v12306_v41, %v12041_v43  ;;  %v4867_v38 = vadd.f32 %v4863_v16, %v4853_v55  ;;  %v5124_v11 = vmul.f32 %v12275_v10, %v12076_v22  ;;  %v12362_v15 = vsel %vm6178_vm4, %v13816_v8, %v6199_v34 }
 0x767   : > { %v12345_v60 = vsel %vm6178_vm4, %v13813_v12, %v6182_v49  ;;  %13815 = vst [vmem:[#allocation50_spill] sm:$0xff] %v12349_v61  ;;  %v13730_v43 = vrot.slane %v12349_v61, 6  ;;  %v5089_v55 = vrot.slane %v5082_v19, 1  ;;  %v5173_v12 = vrot.slane %v5166_v17, 1  ;;  %v12608_v61 = vld [vmem:[#allocation4 + $0x10] sm:$0x3f] }
 0x768   : > { %13814 = vst [vmem:[#allocation49_spill] sm:$0xff] %v12345_v60  ;;  %v6469_v49 = vrot.slane %v6461_v33, 6  ;;  %v13729_v8 = vrot.slane %v12367_v25, 6  ;;  %v5131_v24 = vrot.slane %v5124_v11, 1 }
 0x769   : > { %13817 = vst [vmem:[#allocation51_spill] sm:$0xff] %v12362_v15 }
 0x76a   : > { %v12377_v33 = vsel %vm6465_vm7, %v13730_v43, %v6469_v49  ;;  %v5205_v49 = vstv %s12339_s18  ;;  %v5247_v43 = vstv %s12385_s28  ;;  %s8081_s18 = sld [smem:[#allocation7 + $0x48]] }
 0x76b   : > { %5931 = vrot.lane.b32.xlu1 %v5928_v47, %s13793_s1  ;;  %5091 = vrot.lane.b32.xlu2 %v5088_v54, %s13793_s1  ;;  %v5171_v47 = vrot.slane %v12328_v4, 1  ;;  %v6479_v54 = vmul.f32 %v12309_v63, %v12076_v22  ;;  %13819 = vst [vmem:[#allocation53_spill] sm:$0xff] %v12377_v33  ;;  %v5006_v4 = vadd.f32 %v12134_v62, %v4992_v56  ;;  %s8089_s28 = sld [smem:[#allocation7 + $0x4c]] }
 0x76c   : > { %5933 = vrot.lane.b32.xlu0 %v5930_v57, %s13793_s1 }
 0x76d   : > { %v12369_v16 = vpop.permute.xlu2 %5154  ;;  %v4877_v42 = vpop.permute.xlu1 %4876  ;;  %v6486_v19 = vrot.slane %v6479_v54, 6  ;;  %v5174_v62 = vsel %vm5030_vm0, %v5171_v47, %v5173_v12  ;;  %v12405_v54 = vld [vmem:[#allocation4 + $0x18] sm:$0xff] }
 0x76e   : > { %v4905_v57 = vpop.permute.xlu0 %4904  ;;  %v4881_v34 = vadd.f32 %v4877_v42, %v4867_v38  ;;  %v12387_v38 = vld [vmem:[#allocation4] sm:$0xff]  ;;  %v13821_v42 = vrot.slane %v12268_v35, 1  ;;  %v5020_v35 = vadd.f32 %v12233_v0, %v5006_v4  ;;  %v13822_v0 = vrot.slane %v12073_v58, 1 }
 0x76f   : > { %v5024_v17 = vmul.f32 %v12387_v38, %v12067_v50  ;;  %v12395_v14 = vsel %vm6465_vm7, %v13729_v8, %v6486_v19  ;;  %v5132_v50 = vsel %vm5030_vm0, %v5129_v44, %v5131_v24 }
 0x770   : > { %v4895_v59 = vadd.f32 %v12200_v53, %v4881_v34  ;;  %13820 = vst [vmem:[#allocation54_spill] sm:$0xff] %v12395_v14  ;;  %v5090_v56 = vsel %vm5030_vm0, %v13821_v42, %v5089_v55  ;;  %v5207_v53 = vmul.f32 %v5205_v49, %v12027_v29  ;;  %v5122_v34 = vmul.f32 %v12405_v54, %v12275_v10 }
 0x771   : > { %v5031_v12 = vrot.slane %v5024_v17, 1  ;;  %v5042_v10 = vmul.f32 %v12405_v54, %v12078_v5 }
 0x772   : > { %v4909_v11 = vadd.f32 %v4905_v57, %v4895_v59  ;;  %v5164_v59 = vmul.f32 %v12405_v54, %v12271_v37  ;;  %v5206_v57 = vmul.f32 %v12405_v54, %v5205_v49  ;;  %v5213_v37 = vrot.slane %v5207_v53, 1 }
 0x773   : > { %5093 = vrot.lane.b32.xlu1 %v5090_v56, %s13793_s1  ;;  %5177 = vrot.lane.b32.xlu2 %v5174_v62, %s13792_s30  ;;  %v5033_v4 = vsel %vm5030_vm0, %v5031_v12, %v13822_v0  ;;  %v5128_v62 = vrot.slane %v5122_v34, 1  ;;  %v5048_v51 = vrot.slane %v5042_v10, 1 }
 0x774   : > { %5135 = vrot.lane.b32.xlu0 %v5132_v50, %s13786_s25  ;;  %v4923_v55 = vadd.f32 %v12258_v45, %v4909_v11  ;;  %v5170_v45 = vrot.slane %v5164_v59, 1  ;;  %v5289_v11 = vstv %s12381_s24  ;;  %v5038_v50 = vadd.f32 %v5033_v4, %v5020_v35  ;;  %s8085_s24 = sld [smem:[#allocation7 + $0x4a]] }
 0x775   : > { %v12415_v24 = vpop.permute.xlu2 %5240  ;;  %v4961_v19 = vpop.permute.xlu1 %4960  ;;  %v5212_v8 = vrot.slane %v5206_v57, 1  ;;  %v5130_v27 = vsel %vm5030_vm0, %v5128_v62, %v5129_v44  ;;  %v5291_v34 = vmul.f32 %v5289_v11, %v12027_v29  ;;  %v5292_v59 = vmul.f32 %v5289_v11, %v12076_v22 }
 0x776   : > { %v4989_v42 = vpop.permute.xlu0 %4988  ;;  %v4937_v56 = vadd.f32 %v12231_v18, %v4923_v55  ;;  %v5172_v5 = vsel %vm5030_vm0, %v5170_v45, %v5171_v47  ;;  %v5208_v18 = vmul.f32 %v5205_v49, %v12076_v22  ;;  %v5249_v47 = vmul.f32 %v5247_v43, %v12027_v29 }
 0x777   : > { %v5214_v58 = vsel %vm5030_vm0, %v5212_v8, %v5213_v37  ;;  %v5250_v49 = vmul.f32 %v5247_v43, %v12076_v22  ;;  %v5366_v62 = vstv %s8065_s20  ;;  %s8087_s20 = sld [smem:[#allocation7 + $0x4b]] }
 0x778   : > { %v4951_v17 = vadd.f32 %v12311_v30, %v4937_v56  ;;  %v13823_v30 = vrot.slane %v12085_v3, 1  ;;  %v5215_v12 = vrot.slane %v5208_v18, 1  ;;  %v5297_v3 = vrot.slane %v5291_v34, 1 }
 0x779   : > { %v5299_v56 = vrot.slane %v5292_v59, 1  ;;  %v5257_v0 = vrot.slane %v5250_v49, 1  ;;  %v5450_v49 = vstv %s8069_s19  ;;  %s8093_s19 = sld [smem:[#allocation7 + $0x4e]] }
 0x77a   : > { %v4965_v53 = vadd.f32 %v4961_v19, %v4951_v17  ;;  %v5050_v44 = vsel %vm5030_vm0, %v5048_v51, %v13823_v30  ;;  %v5255_v51 = vrot.slane %v5249_v47, 1  ;;  %v5216_v45 = vsel %vm5030_vm0, %v5213_v37, %v5215_v12 }
 0x77b   : > { %5133 = vrot.lane.b32.xlu1 %v5130_v27, %s13786_s25  ;;  %5217 = vrot.lane.b32.xlu2 %v5214_v58, %s13787_s13  ;;  %v5055_v8 = vadd.f32 %v5050_v44, %v5038_v50  ;;  %v5300_v50 = vsel %vm5030_vm0, %v5297_v3, %v5299_v56 }
 0x77c   : > { %v4979_v35 = vadd.f32 %v12212_v26, %v4965_v53  ;;  %5175 = vrot.lane.b32.xlu0 %v5172_v5, %s13792_s30  ;;  %v5258_v17 = vsel %vm5030_vm0, %v5255_v51, %v5257_v0  ;;  %v5290_v53 = vmul.f32 %v12405_v54, %v5289_v11  ;;  %v5452_v11 = vmul.f32 %v5450_v49, %v12027_v29 }
 0x77d   : > { %v12441_v55 = vpop.permute.xlu2 %5280  ;;  %v5071_v57 = vpop.permute.xlu1 %5070 }
 0x77e   : > { %v4993_v27 = vadd.f32 %v4989_v42, %v4979_v35  ;;  %v5073_v19 = vpop.permute.xlu0 %5072  ;;  %v12443_v10 = vadd.f32 %v5071_v57, %v5055_v8  ;;  %v5368_v42 = vmul.f32 %v5366_v62, %v12027_v29  ;;  %v5296_v47 = vrot.slane %v5290_v53, 1 }
 0x77f   : > { %v5408_v35 = vstv %s8067_s17  ;;  %s8094_s17 = sld [smem:[#allocation7 + $0x1e]] }
 0x780   : > { %v5007_v4 = vadd.f32 %v12300_v9, %v4993_v27  ;;  %v5248_v9 = vmul.f32 %v12405_v54, %v5247_v43  ;;  %v5374_v59 = vrot.slane %v5368_v42, 2  ;;  %v5369_v43 = vmul.f32 %v5366_v62, %v12076_v22 }
 0x781   : > { %v5298_v12 = vsel %vm5030_vm0, %v5296_v47, %v5297_v3  ;;  %v5410_v27 = vmul.f32 %v5408_v35, %v12027_v29  ;;  %v5492_v42 = vstv %s8071_s23  ;;  %s8096_s23 = sld [smem:[#allocation7 + $0x1f]] }
 0x782   : > { %v5021_v26 = vadd.f32 %v12256_v20, %v5007_v4  ;;  %v5367_v20 = vmul.f32 %v12405_v54, %v5366_v62  ;;  %v5376_v4 = vrot.slane %v5369_v43, 2  ;;  %v5458_v62 = vrot.slane %v5452_v11, 2 }
 0x783   : > { %5219 = vrot.lane.b32.xlu1 %v5216_v45, %s13787_s13  ;;  %5303 = vrot.lane.b32.xlu2 %v5300_v50, %s13797_s15  ;;  %v5416_v45 = vrot.slane %v5410_v27, 2  ;;  %v5493_v53 = vmul.f32 %v12405_v54, %v5492_v42  ;;  %v5495_v11 = vmul.f32 %v5492_v42, %v12076_v22 }
 0x784   : > { %v5039_v5 = vadd.f32 %v12104_v13, %v5021_v26  ;;  %5261 = vrot.lane.b32.xlu0 %v5258_v17, %s13788_s0  ;;  %v5254_v13 = vrot.slane %v5248_v9, 1  ;;  %v5373_v44 = vrot.slane %v5367_v20, 2  ;;  %v5377_v3 = vsel %vm5317_vm12, %v5374_v59, %v5376_v4 }
 0x785   : > { %v12457_v18 = vpop.permute.xlu2 %5401  ;;  %v12459_v37 = vpop.permute.xlu1 %5156  ;;  %v5409_v20 = vmul.f32 %v12405_v54, %v5408_v35  ;;  %v5961_v14 = vstv %s8094_s17  ;;  %s12691_s17 = sld [smem:[#allocation7 + $0x3f]] }
 0x786   : > { %v5056_v58 = vadd.f32 %v12109_v40, %v5039_v5  ;;  %v12463_v34 = vpop.permute.xlu0 %5112  ;;  %v5256_v8 = vsel %vm5030_vm0, %v5254_v13, %v5255_v51  ;;  %v5375_v57 = vsel %vm5317_vm12, %v5373_v44, %v5374_v59  ;;  %v5453_v40 = vmul.f32 %v5450_v49, %v12076_v22 }
 0x787   : > { %v5494_v5 = vmul.f32 %v5492_v42, %v12027_v29  ;;  %v5451_v59 = vmul.f32 %v12405_v54, %v5450_v49  ;;  %v5415_v43 = vrot.slane %v5409_v20, 2  ;;  %v6003_v63 = vstv %s8096_s23  ;;  %s12717_s23 = sld [smem:[#allocation7 + $0x24]] }
 0x788   : > { %v12465_v30 = vadd.f32 %v5073_v19, %v5056_v58  ;;  %v5411_v19 = vmul.f32 %v5408_v35, %v12076_v22  ;;  %v5460_v26 = vrot.slane %v5453_v40, 2  ;;  %v5576_v40 = vstv %s8075_s26  ;;  %s8095_s26 = sld [smem:[#allocation7 + $0x4f]] }
 0x789   : > { %v5500_v47 = vrot.slane %v5494_v5, 2  ;;  %v5417_v35 = vsel %vm5317_vm12, %v5415_v43, %v5416_v45  ;;  %v5579_v4 = vmul.f32 %v5576_v40, %v12076_v22  ;;  %v12519_v43 = vld [vmem:[#allocation4 + $0x20] sm:$0xff] }
 0x78a   : > { %v5418_v50 = vrot.slane %v5411_v19, 2  ;;  %v5461_v17 = vsel %vm5317_vm12, %v5458_v62, %v5460_v26  ;;  %v5578_v19 = vmul.f32 %v5576_v40, %v12027_v29 }
 0x78b   : > { %5259 = vrot.lane.b32.xlu1 %v5256_v8, %s13788_s0  ;;  %5378 = vrot.lane.b32.xlu2 %v5375_v57, %s13793_s1  ;;  %v5499_v8 = vrot.slane %v5493_v53, 2  ;;  %v5457_v57 = vrot.slane %v5451_v59, 2  ;;  %v5653_v59 = vstv %s8079_s29  ;;  %s8098_s29 = sld [smem:[#allocation7 + $0x20]] }
 0x78c   : > { %5301 = vrot.lane.b32.xlu0 %v5298_v12, %s13797_s15  ;;  %v5419_v9 = vsel %vm5317_vm12, %v5416_v45, %v5418_v50  ;;  %v5534_v12 = vstv %s8073_s27  ;;  %v5584_v5 = vrot.slane %v5578_v19, 2  ;;  %v5577_v19 = vmul.f32 %v12405_v54, %v5576_v40  ;;  %s8097_s27 = sld [smem:[#allocation7 + $0x50]] }
 0x78d   : > { %v12478_v56 = vpop.permute.xlu2 %5441  ;;  %v12480_v51 = vpop.permute.xlu1 %5196  ;;  %v5501_v27 = vsel %vm5317_vm12, %v5499_v8, %v5500_v47  ;;  %v5459_v49 = vsel %vm5317_vm12, %v5457_v57, %v5458_v62  ;;  %v5536_v26 = vmul.f32 %v5534_v12, %v12027_v29  ;;  %v5537_v50 = vmul.f32 %v5534_v12, %v12076_v22 }
 0x78e   : > { %v12482_v0 = vpop.permute.xlu0 %5198  ;;  %v5655_v8 = vmul.f32 %v12519_v43, %v5653_v59 }
 0x78f   : > { %v5542_v20 = vrot.slane %v5536_v26, 2  ;;  %v5544_v53 = vrot.slane %v5537_v50, 2 }
 0x791   : > { %v5545_v57 = vsel %vm5317_vm12, %v5542_v20, %v5544_v53  ;;  %v5737_v53 = vstv %s8083_s14  ;;  %s8099_s14 = sld [smem:[#allocation7 + $0x51]] }
 0x792   : > { %v5740_v1 = vmul.f32 %v5737_v53, %v12076_v22 }
 0x793   : > { %5380 = vrot.lane.b32.xlu1 %v5377_v3, %s13793_s1  ;;  %5464 = vrot.lane.b32.xlu2 %v5461_v17, %s13792_s30  ;;  %v5502_v17 = vrot.slane %v5495_v11, 2  ;;  %v5535_v11 = vmul.f32 %v12405_v54, %v5534_v12 }
 0x794   : > { %5422 = vrot.lane.b32.xlu0 %v5419_v9, %s13786_s25  ;;  %v5586_v9 = vrot.slane %v5579_v4, 2 }
 0x795   : > { %v12493_v58 = vpop.permute.xlu2 %5527  ;;  %v12495_v13 = vpop.permute.xlu1 %5282  ;;  %v5503_v29 = vsel %vm5317_vm12, %v5500_v47, %v5502_v17  ;;  %v5541_v26 = vrot.slane %v5535_v11, 2  ;;  %v5583_v17 = vrot.slane %v5577_v19, 2 }
 0x796   : > { %v12498_v44 = vpop.permute.xlu0 %5238  ;;  %v5587_v62 = vsel %vm5317_vm12, %v5584_v5, %v5586_v9  ;;  %v5656_v9 = vmul.f32 %v5653_v59, %v12076_v22 }
 0x797   : > { %v5543_v12 = vsel %vm5317_vm12, %v5541_v26, %v5542_v20  ;;  %v5585_v40 = vsel %vm5317_vm12, %v5583_v17, %v5584_v5  ;;  %v6066_v39 = vstv %s8099_s14  ;;  %s8110_s14 = sld [smem:[#allocation7 + $0x26]] }
 0x798   : > { %v5663_v19 = vrot.slane %v5656_v9, 3 }
 0x79b   : > { %5420 = vrot.lane.b32.xlu1 %v5417_v35, %s13786_s25  ;;  %5504 = vrot.lane.b32.xlu2 %v5501_v27, %s13787_s13  ;;  %v5654_v35 = vmul.f32 %v12405_v54, %v5653_v59 }
 0x79c   : > { %5462 = vrot.lane.b32.xlu0 %v5459_v49, %s13792_s30  ;;  %v5661_v49 = vrot.slane %v5655_v8, 3 }
 0x79d   : > { %v12511_v42 = vpop.permute.xlu2 %5567  ;;  %v12513_v45 = vpop.permute.xlu1 %5357  ;;  %v5660_v50 = vrot.slane %v5654_v35, 3 }
 0x79e   : > { %v12515_v3 = vpop.permute.xlu0 %5359  ;;  %v5664_v5 = vsel %vm5604_vm13, %v5661_v49, %v5663_v19 }
 0x7a3   : > { %5506 = vrot.lane.b32.xlu1 %v5503_v29, %s13787_s13  ;;  %5590 = vrot.lane.b32.xlu2 %v5587_v62, %s13797_s15  ;;  %v5695_v29 = vstv %s8081_s18  ;;  %v5662_v62 = vsel %vm5604_vm13, %v5660_v50, %v5661_v49  ;;  %v5747_v50 = vrot.slane %v5740_v1, 3  ;;  %v5738_v49 = vmul.f32 %v12405_v54, %v5737_v53  ;;  %s8100_s18 = sld [smem:[#allocation7 + $0x21]] }
 0x7a4   : > { %5548 = vrot.lane.b32.xlu0 %v5545_v57, %s13788_s0  ;;  %v5739_v57 = vmul.f32 %v12519_v43, %v5737_v53  ;;  %v5697_v8 = vmul.f32 %v12519_v43, %v5695_v29  ;;  %v5698_v59 = vmul.f32 %v5695_v29, %v12076_v22  ;;  %v5696_v1 = vmul.f32 %v12405_v54, %v5695_v29 }
 0x7a5   : > { %v12528_v27 = vpop.permute.xlu2 %5688  ;;  %v12530_v47 = vpop.permute.xlu1 %5443  ;;  %v5821_v29 = vstv %s8087_s20  ;;  %s8062_s20 = sld [smem:[#allocation7 + $0xe]] }
 0x7a6   : > { %v12533_v4 = vpop.permute.xlu0 %5399  ;;  %v5745_v26 = vrot.slane %v5739_v57, 3  ;;  %v5705_v21 = vrot.slane %v5698_v59, 3 }
 0x7a8   : > { %v5748_v22 = vsel %vm5604_vm13, %v5745_v26, %v5747_v50  ;;  %v5702_v50 = vrot.slane %v5696_v1, 3  ;;  %v5823_v1 = vmul.f32 %v12519_v43, %v5821_v29 }
 0x7ab   : > { %5546 = vrot.lane.b32.xlu1 %v5543_v12, %s13788_s0  ;;  %5665 = vrot.lane.b32.xlu2 %v5662_v62, %s13793_s1  ;;  %v5703_v12 = vrot.slane %v5697_v8, 3  ;;  %v5779_v62 = vstv %s8085_s24  ;;  %s8101_s24 = sld [smem:[#allocation7 + $0x52]] }
 0x7ac   : > { %5588 = vrot.lane.b32.xlu0 %v5585_v40, %s13797_s15  ;;  %v5781_v17 = vmul.f32 %v12519_v43, %v5779_v62  ;;  %v5780_v9 = vmul.f32 %v12405_v54, %v5779_v62 }
 0x7ad   : > { %v12546_v11 = vpop.permute.xlu2 %5728  ;;  %v12548_v20 = vpop.permute.xlu1 %5483  ;;  %v5706_v40 = vsel %vm5604_vm13, %v5703_v12, %v5705_v21  ;;  %v5782_v21 = vmul.f32 %v12568_v46, %v5779_v62  ;;  %v5704_v32 = vsel %vm5604_vm13, %v5702_v50, %v5703_v12  ;;  %v5824_v62 = vmul.f32 %v12568_v46, %v5821_v29 }
 0x7ae   : > { %v12550_v35 = vpop.permute.xlu0 %5485  ;;  %v5787_v19 = vrot.slane %v5781_v17, 3 }
 0x7af   : > { %v5789_v50 = vrot.slane %v5782_v21, 3  ;;  %v5831_v36 = vrot.slane %v5824_v62, 3 }
 0x7b3   : > { %5667 = vrot.lane.b32.xlu1 %v5664_v5, %s13793_s1  ;;  %5751 = vrot.lane.b32.xlu2 %v5748_v22, %s13792_s30  ;;  %v5786_v5 = vrot.slane %v5780_v9, 3  ;;  %v5744_v22 = vrot.slane %v5738_v49, 3 }
 0x7b4   : > { %5709 = vrot.lane.b32.xlu0 %v5706_v40, %s13786_s25  ;;  %v5863_v40 = vstv %s8089_s28  ;;  %s8102_s28 = sld [smem:[#allocation7 + $0x22]] }
 0x7b5   : > { %v12561_v57 = vpop.permute.xlu2 %5814  ;;  %v12563_v8 = vpop.permute.xlu1 %5569  ;;  %v5788_v2 = vsel %vm5604_vm13, %v5786_v5, %v5787_v19  ;;  %v5865_v52 = vmul.f32 %v12519_v43, %v5863_v40  ;;  %v5866_v53 = vmul.f32 %v12568_v46, %v5863_v40  ;;  %v5746_v17 = vsel %vm5604_vm13, %v5744_v22, %v5745_v26 }
 0x7b6   : > { %v12566_v59 = vpop.permute.xlu0 %5525  ;;  %v5790_v26 = vsel %vm5604_vm13, %v5787_v19, %v5789_v50  ;;  %v5864_v19 = vmul.f32 %v12405_v54, %v5863_v40 }
 0x7b7   : > { %v5871_v5 = vrot.slane %v5865_v52, 3  ;;  %v5873_v6 = vrot.slane %v5866_v53, 3  ;;  %v5822_v52 = vmul.f32 %v12405_v54, %v5821_v29 }
 0x7b9   : > { %v5874_v22 = vsel %vm5604_vm13, %v5871_v5, %v5873_v6  ;;  %v5828_v50 = vrot.slane %v5822_v52, 3 }
 0x7bb   : > { %5707 = vrot.lane.b32.xlu1 %v5704_v32, %s13786_s25  ;;  %5791 = vrot.lane.b32.xlu2 %v5788_v2, %s13787_s13  ;;  %v5829_v32 = vrot.slane %v5823_v1, 3  ;;  %v5940_v2 = vstv %s8093_s19  ;;  %s12687_s19 = sld [smem:[#allocation7 + $0x53]] }
 0x7bc   : > { %5749 = vrot.lane.b32.xlu0 %v5746_v17, %s13792_s30  ;;  %v5942_v7 = vmul.f32 %v12519_v43, %v5940_v2  ;;  %v5941_v21 = vmul.f32 %v12405_v54, %v5940_v2 }
 0x7bd   : > { %v12581_v9 = vpop.permute.xlu2 %5854  ;;  %v12583_v12 = vpop.permute.xlu1 %5644  ;;  %v5832_v17 = vsel %vm5604_vm13, %v5829_v32, %v5831_v36  ;;  %v5943_v36 = vmul.f32 %v12568_v46, %v5940_v2  ;;  %v5830_v33 = vsel %vm5604_vm13, %v5828_v50, %v5829_v32 }
 0x7be   : > { %13824 = vst [vmem:[#allocation55_spill] sm:$0xff] %v12581_v9  ;;  %v12585_v49 = vpop.permute.xlu0 %5646  ;;  %v5948_v62 = vrot.slane %v5942_v7, 4  ;;  %v5964_v7 = vmul.f32 %v12608_v61, %v5961_v14 }
 0x7c0   : > { %v5971_v50 = vrot.slane %v5964_v7, 4 }
 0x7c3   : > { %5793 = vrot.lane.b32.xlu1 %v5790_v26, %s13787_s13  ;;  %5877 = vrot.lane.b32.xlu2 %v5874_v22, %s13797_s15  ;;  %v5947_v26 = vrot.slane %v5941_v21, 4  ;;  %v5870_v22 = vrot.slane %v5864_v19, 3 }
 0x7c4   : > { %5835 = vrot.lane.b32.xlu0 %v5832_v17, %s13788_s0  ;;  %v12602_v17 = vld [vmem:[#allocation4 + $0x8] sm:$0xff] }
 0x7c5   : > { %v5092_v53 = vpop.permute.xlu2 %5091  ;;  %v12596_v1 = vpop.permute.xlu1 %5730  ;;  %v5963_v29 = vmul.f32 %v12602_v17, %v5961_v14  ;;  %v5949_v40 = vsel %vm5891_vm1, %v5947_v26, %v5948_v62  ;;  %v5872_v2 = vsel %vm5604_vm13, %v5870_v22, %v5871_v5 }
 0x7c6   : > { %v12599_v6 = vpop.permute.xlu0 %5686  ;;  %v5097_v25 = vadd.f32 %v5092_v53, %v12443_v10  ;;  %v5962_v10 = vmul.f32 %v12387_v38, %v5961_v14  ;;  %v5950_v53 = vrot.slane %v5943_v36, 4  ;;  %v6005_v14 = vmul.f32 %v12602_v17, %v6003_v63 }
 0x7c7   : > { %v5969_v19 = vrot.slane %v5963_v29, 4 }
 0x7c8   : > { %v12623_v26 = vadd.f32 %v12463_v34, %v5097_v25  ;;  %v5951_v5 = vsel %vm5891_vm1, %v5948_v62, %v5950_v53  ;;  %v6004_v62 = vmul.f32 %v12387_v38, %v6003_v63 }
 0x7c9   : > { %v5972_v22 = vsel %vm5891_vm1, %v5969_v19, %v5971_v50  ;;  %v6011_v50 = vrot.slane %v6005_v14, 4 }
 0x7ca   : > { %v6010_v41 = vrot.slane %v6004_v62, 4 }
 0x7cb   : > { %5833 = vrot.lane.b32.xlu1 %v5830_v33, %s13788_s0  ;;  %5952 = vrot.lane.b32.xlu2 %v5949_v40, %s13793_s1  ;;  %v5968_v33 = vrot.slane %v5962_v10, 4  ;;  %v5982_v40 = vstv %s8095_s26  ;;  %s12723_s26 = sld [smem:[#allocation7 + $0x55]] }
 0x7cc   : > { %5875 = vrot.lane.b32.xlu0 %v5872_v2, %s13797_s15  ;;  %v5984_v2 = vmul.f32 %v12519_v43, %v5982_v40  ;;  %v5985_v25 = vmul.f32 %v12568_v46, %v5982_v40  ;;  %v5983_v34 = vmul.f32 %v12405_v54, %v5982_v40 }
 0x7cd   : > { %v12615_v52 = vpop.permute.xlu2 %5177  ;;  %v12617_v21 = vpop.permute.xlu1 %5770  ;;  %v5970_v36 = vsel %vm5891_vm1, %v5968_v33, %v5969_v19  ;;  %v6006_v19 = vmul.f32 %v12608_v61, %v6003_v63  ;;  %v6024_v33 = vstv %s8097_s27  ;;  %s12741_s27 = sld [smem:[#allocation7 + $0x25]] }
 0x7ce   : > { %v12620_v32 = vpop.permute.xlu0 %5772  ;;  %v5990_v53 = vrot.slane %v5984_v2, 4  ;;  %v6026_v15 = vmul.f32 %v12519_v43, %v6024_v33  ;;  %v6027_v28 = vmul.f32 %v12568_v46, %v6024_v33 }
 0x7d0   : > { %v6032_v62 = vrot.slane %v6026_v15, 4 }
 0x7d3   : > { %5954 = vrot.lane.b32.xlu1 %v5951_v5, %s13793_s1  ;;  %5975 = vrot.lane.b32.xlu2 %v5972_v22, %s13786_s25  ;;  %v5992_v5 = vrot.slane %v5985_v25, 4  ;;  %v5989_v22 = vrot.slane %v5983_v34, 4  ;;  %v6025_v25 = vmul.f32 %v12405_v54, %v6024_v33 }
 0x7d4   : > { %5973 = vrot.lane.b32.xlu0 %v5970_v36, %s13786_s25  ;;  %v6012_v36 = vsel %vm5891_vm1, %v6010_v41, %v6011_v50  ;;  %v6013_v41 = vrot.slane %v6006_v19, 4 }
 0x7d5   : > { %v12636_v29 = vpop.permute.xlu2 %5217  ;;  %v12638_v7 = vpop.permute.xlu1 %5856  ;;  %v5991_v40 = vsel %vm5891_vm1, %v5989_v22, %v5990_v53  ;;  %v5993_v2 = vsel %vm5891_vm1, %v5990_v53, %v5992_v5  ;;  %v6034_v22 = vrot.slane %v6027_v28, 4  ;;  %v6031_v60 = vrot.slane %v6025_v25, 4 }
 0x7d6   : > { %v12640_v10 = vpop.permute.xlu0 %5812 }
 0x7d7   : > { %13825 = vst [vmem:[#allocation56_spill] sm:$0xff] %v12640_v10  ;;  %v6035_v53 = vsel %vm5891_vm1, %v6032_v62, %v6034_v22  ;;  %v6033_v19 = vsel %vm5891_vm1, %v6031_v60, %v6032_v62 }
 0x7db   : > { %5994 = vrot.lane.b32.xlu1 %v5991_v40, %s13786_s25  ;;  %6015 = vrot.lane.b32.xlu2 %v6012_v36, %s13792_s30  ;;  %v6045_v40 = vstv %s8098_s29  ;;  %v6014_v36 = vsel %vm5891_vm1, %v6011_v50, %v6013_v41  ;;  %v6067_v50 = vmul.f32 %v12405_v54, %v6066_v39  ;;  %s8109_s29 = sld [smem:[#allocation7 + $0x56]] }
 0x7dc   : > { %5996 = vrot.lane.b32.xlu0 %v5993_v2, %s13786_s25  ;;  %v6047_v5 = vmul.f32 %v12602_v17, %v6045_v40  ;;  %v6068_v2 = vmul.f32 %v12519_v43, %v6066_v39  ;;  %v6048_v28 = vmul.f32 %v12608_v61, %v6045_v40  ;;  %v6046_v15 = vmul.f32 %v12387_v38, %v6045_v40 }
 0x7dd   : > { %v12651_v14 = vpop.permute.xlu2 %5303  ;;  %v12653_v63 = vpop.permute.xlu1 %5931  ;;  %v6073_v48 = vrot.slane %v6067_v50, 4  ;;  %v6069_v40 = vmul.f32 %v12568_v46, %v6066_v39 }
 0x7de   : > { %13826 = vst [vmem:[#allocation57_spill] sm:$0xff] %v12653_v63  ;;  %v12656_v34 = vpop.permute.xlu0 %5933  ;;  %v6074_v31 = vrot.slane %v6068_v2, 4  ;;  %v6052_v62 = vrot.slane %v6046_v15, 4  ;;  %v6087_v63 = vstv %s8100_s18  ;;  %v6108_v15 = vstv %s8101_s24  ;;  %s8076_s18 = sld [smem:[#allocation7 + $0x15]] }
 0x7df   : > { %13827 = vst [vmem:[#allocation58_spill] sm:$0xff] %v12656_v34  ;;  %s12781_s24 = sld [smem:[#allocation7 + $0x57]] }
 0x7e0   : > { %v6075_v10 = vsel %vm5891_vm1, %v6073_v48, %v6074_v31 }
 0x7e3   : > { %6017 = vrot.lane.b32.xlu1 %v6014_v36, %s13792_s30  ;;  %6038 = vrot.lane.b32.xlu2 %v6035_v53, %s13792_s30  ;;  %v6053_v36 = vrot.slane %v6047_v5, 4  ;;  %v6055_v53 = vrot.slane %v6048_v28, 4  ;;  %v6088_v28 = vmul.f32 %v12387_v38, %v6087_v63 }
 0x7e4   : > { %6036 = vrot.lane.b32.xlu0 %v6033_v19, %s13792_s30  ;;  %v6089_v19 = vmul.f32 %v12602_v17, %v6087_v63 }
 0x7e5   : > { %v12669_v33 = vpop.permute.xlu2 %5378  ;;  %v5094_v25 = vpop.permute.xlu1 %5093  ;;  %v6054_v9 = vsel %vm5891_vm1, %v6052_v62, %v6053_v36 }
 0x7e6   : > { %v5136_v41 = vpop.permute.xlu0 %5135  ;;  %v5098_v22 = vadd.f32 %v5094_v25, %v12465_v30  ;;  %v6090_v30 = vmul.f32 %v12608_v61, %v6087_v63  ;;  %v6076_v25 = vrot.slane %v6069_v40, 4  ;;  %v6109_v63 = vmul.f32 %v12405_v54, %v6108_v15 }
 0x7e7   : > { %v6111_v40 = vmul.f32 %v12568_v46, %v6108_v15 }
 0x7e8   : > { %v5119_v60 = vadd.f32 %v12298_v23, %v5098_v22  ;;  %v6056_v23 = vsel %vm5891_vm1, %v6053_v36, %v6055_v53  ;;  %v6094_v22 = vrot.slane %v6088_v28, 4  ;;  %v6110_v36 = vmul.f32 %v12519_v43, %v6108_v15 }
 0x7e9   : > { %v6118_v15 = vrot.slane %v6111_v40, 4 }
 0x7ea   : > { %v5140_v34 = vadd.f32 %v5136_v41, %v5119_v60  ;;  %v6095_v41 = vrot.slane %v6089_v19, 4 }
 0x7eb   : > { %6057 = vrot.lane.b32.xlu1 %v6054_v9, %s13787_s13  ;;  %6078 = vrot.lane.b32.xlu2 %v6075_v10, %s13787_s13  ;;  %v6097_v9 = vrot.slane %v6090_v30, 4 }
 0x7ec   : > { %v5161_v5 = vadd.f32 %v12459_v37, %v5140_v34  ;;  %6059 = vrot.lane.b32.xlu0 %v6056_v23, %s13787_s13  ;;  %v6129_v34 = vstv %s8102_s28  ;;  %s12785_s28 = sld [smem:[#allocation7 + $0x46]] }
 0x7ed   : > { %v12683_v39 = vpop.permute.xlu2 %5464  ;;  %v5134_v2 = vpop.permute.xlu1 %5133  ;;  %v6098_v60 = vsel %vm5891_vm1, %v6095_v41, %v6097_v9  ;;  %v12698_v62 = vmul.f32 %v12602_v17, %v6129_v34 }
 0x7ee   : > { %v5176_v50 = vpop.permute.xlu0 %5175  ;;  %v5139_v48 = vadd.f32 %v5134_v2, %v12623_v26  ;;  %v5182_v37 = vadd.f32 %v12615_v52, %v5161_v5  ;;  %v6077_v26 = vsel %vm5891_vm1, %v6074_v31, %v6076_v25  ;;  %v6130_v52 = vmul.f32 %v12387_v38, %v6129_v34 }
 0x7ef   : > { %v6116_v5 = vrot.slane %v6110_v36, 4  ;;  %v5310_v25 = vstv %s8062_s20  ;;  %s12807_s20 = sld [smem:[#allocation7 + $0x27]] }
 0x7f0   : > { %v5160_v10 = vadd.f32 %v12369_v16, %v5139_v48  ;;  %v6096_v16 = vsel %vm5891_vm1, %v6094_v22, %v6095_v41  ;;  %v5203_v19 = vadd.f32 %v12482_v0, %v5182_v37  ;;  %v6137_v48 = vrot.slane %v12698_v62, 4 }
 0x7f1   : > { %v6136_v41 = vrot.slane %v6130_v52, 4  ;;  %v5312_v9 = vmul.f32 %v12602_v17, %v5310_v25  ;;  %v5313_v0 = vmul.f32 %v12608_v61, %v5310_v25  ;;  %v6150_v37 = vstv %s12687_s19  ;;  %s12817_s19 = sld [smem:[#allocation7 + $0x58]] }
 0x7f2   : > { %v5181_v53 = vadd.f32 %v5176_v50, %v5160_v10  ;;  %v6115_v50 = vrot.slane %v6109_v63, 4  ;;  %v5328_v22 = vstv %s12691_s17  ;;  %v6132_v63 = vmul.f32 %v12608_v61, %v6129_v34  ;;  %s12840_s17 = sld [smem:[#allocation7 + $0x28]] }
 0x7f3   : > { %6080 = vrot.lane.b32.xlu1 %v6077_v26, %s13787_s13  ;;  %6101 = vrot.lane.b32.xlu2 %v6098_v60, %s13788_s0  ;;  %v5331_v26 = vmul.f32 %v12568_v46, %v5328_v22  ;;  %v6138_v62 = vsel %vm5891_vm1, %v6136_v41, %v6137_v48  ;;  %v5311_v34 = vmul.f32 %v12387_v38, %v5310_v25  ;;  %v5319_v52 = vrot.slane %v5312_v9, 2 }
 0x7f4   : > { %6099 = vrot.lane.b32.xlu0 %v6096_v16, %s13788_s0  ;;  %v5202_v31 = vadd.f32 %v12480_v51, %v5181_v53  ;;  %v6117_v36 = vsel %vm5891_vm1, %v6115_v50, %v6116_v5  ;;  %v5330_v53 = vmul.f32 %v12519_v43, %v5328_v22  ;;  %v6119_v16 = vsel %vm5891_vm1, %v6116_v5, %v6118_v15 }
 0x7f5   : > { %v12708_v30 = vpop.permute.xlu2 %5504  ;;  %v5220_v23 = vpop.permute.xlu1 %5219  ;;  %v5321_v40 = vrot.slane %v5313_v0, 2  ;;  %v6139_v50 = vrot.slane %v6132_v63, 4  ;;  %v5318_v0 = vrot.slane %v5311_v34, 2 }
 0x7f6   : > { %v5262_v2 = vpop.permute.xlu0 %5261  ;;  %v5224_v28 = vadd.f32 %v5220_v23, %v5203_v19  ;;  %v5223_v51 = vadd.f32 %v12636_v29, %v5202_v31  ;;  %v6153_v29 = vmul.f32 %v12568_v46, %v6150_v37  ;;  %v6151_v23 = vmul.f32 %v12405_v54, %v6150_v37 }
 0x7f7   : > { %v5336_v41 = vrot.slane %v5330_v53, 2  ;;  %v6206_v53 = vstv %s12717_s23  ;;  %v5320_v34 = vsel %vm5317_vm12, %v5318_v0, %v5319_v52  ;;  %s12860_s23 = sld [smem:[#allocation7 + $0x29]] }
 0x7f8   : > { %v5245_v10 = vadd.f32 %v12415_v24, %v5224_v28  ;;  %v6152_v24 = vmul.f32 %v12519_v43, %v6150_v37  ;;  %v5244_v31 = vadd.f32 %v12498_v44, %v5223_v51  ;;  %v6160_v9 = vrot.slane %v6153_v29, 4 }
 0x7f9   : > { %v5329_v44 = vmul.f32 %v12405_v54, %v5328_v22  ;;  %v6157_v37 = vrot.slane %v6151_v23, 4  ;;  %v6207_v23 = vmul.f32 %v12387_v38, %v6206_v53 }
 0x7fa   : > { %v5266_v60 = vadd.f32 %v5262_v2, %v5245_v10  ;;  %v5338_v10 = vrot.slane %v5331_v26, 2  ;;  %v6158_v15 = vrot.slane %v6152_v24, 4  ;;  %v6140_v26 = vsel %vm5891_vm1, %v6137_v48, %v6139_v50 }
 0x7fb   : > { %6120 = vrot.lane.b32.xlu1 %v6117_v36, %s13788_s0  ;;  %6141 = vrot.lane.b32.xlu2 %v6138_v62, %s13797_s15  ;;  %v5322_v36 = vsel %vm5317_vm12, %v5319_v52, %v5321_v40  ;;  %v6208_v62 = vmul.f32 %v12602_v17, %v6206_v53  ;;  %v6227_v24 = vstv %s12723_s26  ;;  %v6209_v48 = vmul.f32 %v12608_v61, %v6206_v53  ;;  %s8115_s26 = sld [smem:[#allocation7 + $0x59]] }
 0x7fc   : > { %v5287_v19 = vadd.f32 %v12495_v13, %v5266_v60  ;;  %6122 = vrot.lane.b32.xlu0 %v6119_v16, %s13788_s0  ;;  %v5339_v60 = vsel %vm5317_vm12, %v5336_v41, %v5338_v10  ;;  %v6161_v29 = vsel %vm5891_vm1, %v6158_v15, %v6160_v9  ;;  %v6229_v22 = vmul.f32 %v12519_v43, %v6227_v24 }
 0x7fd   : > { %v12736_v2 = vpop.permute.xlu2 %5590  ;;  %v5260_v28 = vpop.permute.xlu1 %5259  ;;  %v5335_v40 = vrot.slane %v5329_v44, 2  ;;  %v6216_v0 = vrot.slane %v6209_v48, 5 }
 0x7fe   : > { %v5302_v5 = vpop.permute.xlu0 %5301  ;;  %v5265_v25 = vadd.f32 %v5260_v28, %v5244_v31  ;;  %v5308_v13 = vadd.f32 %v12651_v14, %v5287_v19  ;;  %v6228_v28 = vmul.f32 %v12405_v54, %v6227_v24  ;;  %v6235_v9 = vrot.slane %v6229_v22, 5 }
 0x7ff   : > { %v5337_v10 = vsel %vm5317_vm12, %v5335_v40, %v5336_v41 }
 0x800   : > { %v5286_v51 = vadd.f32 %v12441_v55, %v5265_v25  ;;  %v5326_v63 = vadd.f32 %v5322_v36, %v5308_v13  ;;  %v6159_v55 = vsel %vm5891_vm1, %v6157_v37, %v6158_v15  ;;  %v6214_v15 = vrot.slane %v6208_v62, 5 }
 0x801   : > { %v6248_v36 = vstv %s12741_s27  ;;  %s8090_s27 = sld [smem:[#allocation7 + $0x1c]] }
 0x802   : > { %v5307_v14 = vadd.f32 %v5302_v5, %v5286_v51  ;;  %v5343_v16 = vadd.f32 %v5339_v60, %v5326_v63  ;;  %v6234_v51 = vrot.slane %v6228_v28, 5  ;;  %v6230_v63 = vmul.f32 %v12568_v46, %v6227_v24 }
 0x803   : > { %6143 = vrot.lane.b32.xlu1 %v6140_v26, %s13797_s15  ;;  %6164 = vrot.lane.b32.xlu2 %v6161_v29, %s13797_s15  ;;  %v6250_v53 = vmul.f32 %v12602_v17, %v6248_v36  ;;  %v6251_v41 = vmul.f32 %v12608_v61, %v6248_v36  ;;  %v6249_v22 = vmul.f32 %v12387_v38, %v6248_v36 }
 0x804   : > { %v5325_v19 = vadd.f32 %v5320_v34, %v5307_v14  ;;  %6162 = vrot.lane.b32.xlu0 %v6159_v55, %s13797_s15  ;;  %v5364_v31 = vadd.f32 %v12515_v3, %v5343_v16  ;;  %v6213_v3 = vrot.slane %v6207_v23, 5  ;;  %v6236_v62 = vsel %vm6178_vm4, %v6234_v51, %v6235_v9 }
 0x805   : > { %v12760_v52 = vpop.permute.xlu2 %5665  ;;  %v5381_v50 = vpop.permute.xlu1 %5380  ;;  %v6269_v34 = vstv %s8109_s29  ;;  %v6237_v48 = vrot.slane %v6230_v63, 5  ;;  %v6256_v40 = vrot.slane %v6250_v53, 5  ;;  %v6290_v23 = vstv %s8110_s14  ;;  %s8117_s29 = sld [smem:[#allocation7 + $0x5a]] }
 0x806   : > { %v5423_v5 = vpop.permute.xlu0 %5422  ;;  %v5385_v25 = vadd.f32 %v5381_v50, %v5364_v31  ;;  %v5342_v13 = vadd.f32 %v5337_v10, %v5325_v19  ;;  %v6215_v60 = vsel %vm6178_vm4, %v6213_v3, %v6214_v15  ;;  %v6258_v19 = vrot.slane %v6251_v41, 5  ;;  %s12887_s14 = sld [smem:[#allocation7 + $0x4d]] }
 0x807   : > { %v6270_v28 = vmul.f32 %v12405_v54, %v6269_v34  ;;  %v6271_v50 = vmul.f32 %v12519_v43, %v6269_v34  ;;  %v6272_v54 = vmul.f32 %v12568_v46, %v6269_v34 }
 0x808   : > { %v5406_v44 = vadd.f32 %v12457_v18, %v5385_v25  ;;  %v5363_v37 = vadd.f32 %v12513_v45, %v5342_v13  ;;  %v6217_v18 = vsel %vm6178_vm4, %v6214_v15, %v6216_v0  ;;  %v6259_v25 = vsel %vm6178_vm4, %v6256_v40, %v6258_v19 }
 0x809   : > { %v12792_v15 = vmul.f32 %v12602_v17, %v6290_v23  ;;  %v6279_v41 = vrot.slane %v6272_v54, 5 }
 0x80a   : > { %v5427_v26 = vadd.f32 %v5423_v5, %v5406_v44  ;;  %v5384_v14 = vadd.f32 %v12669_v33, %v5363_v37  ;;  %v6238_v5 = vsel %vm6178_vm4, %v6235_v9, %v6237_v48  ;;  %v6277_v44 = vrot.slane %v6271_v50, 5 }
 0x80b   : > { %6218 = vrot.lane.b32.xlu1 %v6215_v60, %s13793_s1  ;;  %6239 = vrot.lane.b32.xlu2 %v6236_v62, %s13793_s1  ;;  %v6276_v37 = vrot.slane %v6270_v28, 5  ;;  %v6298_v63 = vrot.slane %v12792_v15, 5  ;;  %v6311_v62 = vstv %s12781_s24  ;;  %s12921_s24 = sld [smem:[#allocation7 + $0x5c]] }
 0x80c   : > { %6220 = vrot.lane.b32.xlu0 %v6217_v18, %s13793_s1  ;;  %v5405_v45 = vadd.f32 %v12533_v4, %v5384_v14  ;;  %v5448_v24 = vadd.f32 %v12530_v47, %v5427_v26  ;;  %v6255_v47 = vrot.slane %v6249_v22, 5  ;;  %v5615_v14 = vstv %s12785_s28  ;;  %s12940_s28 = sld [smem:[#allocation7 + $0x2c]] }
 0x80d   : > { %v12778_v29 = vpop.permute.xlu2 %5751  ;;  %v5421_v16 = vpop.permute.xlu1 %5420  ;;  %v6278_v18 = vsel %vm6178_vm4, %v6276_v37, %v6277_v44 }
 0x80e   : > { %v5463_v55 = vpop.permute.xlu0 %5462  ;;  %v5426_v33 = vadd.f32 %v5421_v16, %v5405_v45  ;;  %v5469_v4 = vadd.f32 %v12683_v39, %v5448_v24  ;;  %v6291_v39 = vmul.f32 %v12387_v38, %v6290_v23  ;;  %v5597_v38 = vstv %s8076_s18  ;;  %s12913_s18 = sld [smem:[#allocation7 + $0x2b]] }
 0x80f   : > { %v5599_v26 = vmul.f32 %v12602_v17, %v5597_v38  ;;  %v6293_v45 = vmul.f32 %v12608_v61, %v6290_v23  ;;  %v5617_v24 = vmul.f32 %v12519_v43, %v5615_v14  ;;  %v5618_v16 = vmul.f32 %v12568_v46, %v5615_v14  ;;  %v12831_v23 = vld [vmem:[#allocation4 + $0x18] sm:$0xff] }
 0x810   : > { %v5447_v31 = vadd.f32 %v12478_v56, %v5426_v33  ;;  %v6257_v56 = vsel %vm6178_vm4, %v6255_v47, %v6256_v40  ;;  %v5490_v13 = vadd.f32 %v12550_v35, %v5469_v4  ;;  %v6297_v53 = vrot.slane %v6291_v39, 5 }
 0x811   : > { %v5600_v35 = vmul.f32 %v12608_v61, %v5597_v38  ;;  %v5606_v33 = vrot.slane %v5599_v26, 3  ;;  %v6312_v47 = vmul.f32 %v12831_v23, %v6311_v62 }
 0x812   : > { %v5468_v10 = vadd.f32 %v5463_v55, %v5447_v31  ;;  %v6299_v34 = vsel %vm6178_vm4, %v6297_v53, %v6298_v63  ;;  %v6313_v55 = vmul.f32 %v12519_v43, %v6311_v62  ;;  %v12828_v31 = vld [vmem:[#allocation4] sm:$0xff] }
 0x813   : > { %6241 = vrot.lane.b32.xlu1 %v6238_v5, %s13793_s1  ;;  %6262 = vrot.lane.b32.xlu2 %v6259_v25, %s13786_s25  ;;  %v5608_v48 = vrot.slane %v5600_v35, 3  ;;  %v5598_v4 = vmul.f32 %v12828_v31, %v5597_v38  ;;  %v5623_v5 = vrot.slane %v5617_v24, 3  ;;  %v5625_v25 = vrot.slane %v5618_v16, 3 }
 0x814   : > { %6260 = vrot.lane.b32.xlu0 %v6257_v56, %s13786_s25  ;;  %v5489_v9 = vadd.f32 %v12548_v20, %v5468_v10  ;;  %v6300_v10 = vrot.slane %v6293_v45, 5  ;;  %v6319_v56 = vrot.slane %v6313_v55, 5 }
 0x815   : > { %v12802_v0 = vpop.permute.xlu2 %5791  ;;  %v5507_v36 = vpop.permute.xlu1 %5506  ;;  %v5609_v54 = vsel %vm5604_vm13, %v5606_v33, %v5608_v48  ;;  %v5626_v38 = vsel %vm5604_vm13, %v5623_v5, %v5625_v25 }
 0x816   : > { %v5549_v3 = vpop.permute.xlu0 %5548  ;;  %v5511_v51 = vadd.f32 %v5507_v36, %v5490_v13  ;;  %v5510_v60 = vadd.f32 %v12708_v30, %v5489_v9  ;;  %v6280_v30 = vsel %vm6178_vm4, %v6277_v44, %v6279_v41  ;;  %v6332_v13 = vstv %s12807_s20  ;;  %s8124_s20 = sld [smem:[#allocation7 + $0x2d]] }
 0x817   : > { %v5616_v9 = vmul.f32 %v12831_v23, %v5615_v14  ;;  %v5605_v36 = vrot.slane %v5598_v4, 3  ;;  %v6301_v37 = vsel %vm6178_vm4, %v6298_v63, %v6300_v10  ;;  %v6334_v53 = vmul.f32 %v12602_v17, %v6332_v13 }
 0x818   : > { %v5532_v20 = vadd.f32 %v12493_v58, %v5511_v51  ;;  %v6314_v58 = vmul.f32 %v12568_v46, %v6311_v62  ;;  %v5531_v19 = vadd.f32 %v12566_v59, %v5510_v60  ;;  %v6353_v41 = vstv %s12817_s19  ;;  %s8123_s19 = sld [smem:[#allocation7 + $0x5d]] }
 0x819   : > { %v5607_v60 = vsel %vm5604_vm13, %v5605_v36, %v5606_v33  ;;  %v6335_v63 = vmul.f32 %v12608_v61, %v6332_v13  ;;  %v5622_v62 = vrot.slane %v5616_v9, 3  ;;  %v6333_v45 = vmul.f32 %v12828_v31, %v6332_v13 }
 0x81a   : > { %v5553_v22 = vadd.f32 %v5549_v3, %v5532_v20  ;;  %v6321_v59 = vrot.slane %v6314_v58, 5  ;;  %v6318_v3 = vrot.slane %v6312_v47, 5  ;;  %v12849_v20 = vmul.f32 %v12519_v43, %v6353_v41 }
 0x81b   : > { %6281 = vrot.lane.b32.xlu1 %v6278_v18, %s13786_s25  ;;  %6302 = vrot.lane.b32.xlu2 %v6299_v34, %s13792_s30  ;;  %v6354_v24 = vmul.f32 %v12831_v23, %v6353_v41  ;;  %v5624_v34 = vsel %vm5604_vm13, %v5622_v62, %v5623_v5  ;;  %v6339_v4 = vrot.slane %v6333_v45, 5  ;;  %v6356_v10 = vmul.f32 %v12568_v46, %v6353_v41 }
 0x81c   : > { %v5574_v40 = vadd.f32 %v12563_v8, %v5553_v22  ;;  %6283 = vrot.lane.b32.xlu0 %v6280_v30, %s13786_s25  ;;  %v6322_v26 = vsel %vm6178_vm4, %v6319_v56, %v6321_v59  ;;  %v6340_v30 = vrot.slane %v6334_v53, 5  ;;  %v6361_v33 = vrot.slane %v12849_v20, 5 }
 0x81d   : > { %v12834_v28 = vpop.permute.xlu2 %5877  ;;  %v5547_v50 = vpop.permute.xlu1 %5546  ;;  %v6360_v47 = vrot.slane %v6354_v24, 5  ;;  %v6395_v36 = vstv %s8115_s26  ;;  %v5884_v45 = vstv %s8090_s27  ;;  %s8128_s26 = sld [smem:[#allocation7 + $0x2f]] }
 0x81e   : > { %v5589_v8 = vpop.permute.xlu0 %5588  ;;  %v5552_v15 = vadd.f32 %v5547_v50, %v5531_v19  ;;  %v5595_v39 = vadd.f32 %v12736_v2, %v5574_v40  ;;  %v6342_v40 = vrot.slane %v6335_v63, 5  ;;  %v6396_v41 = vmul.f32 %v12831_v23, %v6395_v36  ;;  %s8131_s27 = sld [smem:[#allocation7 + $0x61]] }
 0x820   : > { %v5573_v44 = vadd.f32 %v12511_v42, %v5552_v15  ;;  %v5613_v51 = vadd.f32 %v5609_v54, %v5595_v39  ;;  %v6320_v42 = vsel %vm6178_vm4, %v6318_v3, %v6319_v56  ;;  %v6341_v15 = vsel %vm6178_vm4, %v6339_v4, %v6340_v30  ;;  %v12915_v4 = vld [vmem:[#allocation4 + $0x20] sm:$0xff] }
 0x821   : > { %v6362_v56 = vsel %vm6178_vm4, %v6360_v47, %v6361_v33 }
 0x822   : > { %v5594_v2 = vadd.f32 %v5589_v8, %v5573_v44  ;;  %v5630_v35 = vadd.f32 %v5626_v38, %v5613_v51  ;;  %v6416_v44 = vstv %s12860_s23  ;;  %v6363_v51 = vrot.slane %v6356_v10, 5  ;;  %s8127_s23 = sld [smem:[#allocation7 + $0x5f]] }
 0x823   : > { %6304 = vrot.lane.b32.xlu1 %v6301_v37, %s13792_s30  ;;  %6325 = vrot.lane.b32.xlu2 %v6322_v26, %s13792_s30  ;;  %v6417_v26 = vmul.f32 %v12828_v31, %v6416_v44 }
 0x824   : > { %v5612_v14 = vadd.f32 %v5607_v60, %v5594_v2  ;;  %6323 = vrot.lane.b32.xlu0 %v6320_v42, %s13792_s30  ;;  %v5651_v18 = vadd.f32 %v12585_v49, %v5630_v35  ;;  %v6374_v49 = vstv %s12840_s17  ;;  %v6397_v2 = vmul.f32 %v12519_v43, %v6395_v36  ;;  %s8125_s17 = sld [smem:[#allocation7 + $0x5e]] }
 0x825   : > { %v12862_v16 = vpop.permute.xlu2 %5952  ;;  %v5668_v22 = vpop.permute.xlu1 %5667  ;;  %v6376_v25 = vmul.f32 %v12602_v17, %v6374_v49  ;;  %v6377_v5 = vmul.f32 %v12608_v61, %v6374_v49  ;;  %v6375_v9 = vmul.f32 %v12828_v31, %v6374_v49  ;;  %v6364_v20 = vsel %vm6178_vm4, %v6361_v33, %v6363_v51 }
 0x826   : > { %v5710_v55 = vpop.permute.xlu0 %5709  ;;  %v5672_v58 = vadd.f32 %v5668_v22, %v5651_v18  ;;  %v5629_v48 = vadd.f32 %v5624_v34, %v5612_v14  ;;  %v12895_v42 = vmul.f32 %v12602_v17, %v6416_v44  ;;  %v6423_v18 = vrot.slane %v6417_v26, 5 }
 0x827   : > { %v6382_v37 = vrot.slane %v6376_v25, 5  ;;  %v6384_v38 = vrot.slane %v6377_v5, 5  ;;  %v6402_v34 = vrot.slane %v6396_v41, 5  ;;  %v5886_v33 = vmul.f32 %v12602_v17, %v5884_v45  ;;  %v13829_v41 = vld [vmem:[#allocation55_spill] sm:$0xff] }
 0x828   : > { %v5693_v19 = vadd.f32 %v12528_v27, %v5672_v58  ;;  %v5650_v50 = vadd.f32 %v12583_v12, %v5629_v48  ;;  %v6343_v27 = vsel %vm6178_vm4, %v6340_v30, %v6342_v40  ;;  %v6424_v58 = vrot.slane %v12895_v42, 5 }
 0x829   : > { %v6385_v60 = vsel %vm6178_vm4, %v6382_v37, %v6384_v38  ;;  %v6437_v48 = vstv %s8117_s29  ;;  %v6419_v49 = vmul.f32 %v12608_v61, %v6416_v44  ;;  %s7798_s29 = sld [smem:[#allocation5 + $0x6]] }
 0x82a   : > { %v5714_v8 = vadd.f32 %v5710_v55, %v5693_v19  ;;  %v5671_v59 = vadd.f32 %v12760_v52, %v5650_v50  ;;  %v6403_v55 = vrot.slane %v6397_v2, 5  ;;  %v5902_v19 = vstv %s12887_s14  ;;  %s13881_s14 = sshll.u32 %s13883_s22, 7 }
 0x82b   : > { %6344 = vrot.lane.b32.xlu1 %v6341_v15, %s13787_s13  ;;  %6365 = vrot.lane.b32.xlu2 %v6362_v56, %s13787_s13  ;;  %v6439_v47 = vmul.f32 %v12915_v4, %v6437_v48  ;;  %v6440_v50 = vmul.f32 %v12568_v46, %v6437_v48  ;;  %v5904_v10 = vmul.f32 %v12915_v4, %v5902_v19  ;;  %v5893_v56 = vrot.slane %v5886_v33, 4 }
 0x82c   : > { %v5735_v12 = vadd.f32 %v12596_v1, %v5714_v8  ;;  %6346 = vrot.lane.b32.xlu0 %v6343_v27, %s13787_s13  ;;  %v5692_v39 = vadd.f32 %v12599_v6, %v5671_v59  ;;  %v6381_v6 = vrot.slane %v6375_v9, 5  ;;  %v5905_v25 = vmul.f32 %v12568_v46, %v5902_v19 }
 0x82d   : > { %v12881_v54 = vpop.permute.xlu2 %5975  ;;  %v5708_v13 = vpop.permute.xlu1 %5707  ;;  %v6425_v5 = vsel %vm6178_vm4, %v6423_v18, %v6424_v58  ;;  %v5885_v15 = vmul.f32 %v12828_v31, %v5884_v45  ;;  %v6445_v44 = vrot.slane %v6439_v47, 5 }
 0x82e   : > { %v5750_v52 = vpop.permute.xlu0 %5749  ;;  %v5713_v3 = vadd.f32 %v5708_v13, %v5692_v39  ;;  %v5756_v53 = vadd.f32 %v12778_v29, %v5735_v12  ;;  %v6398_v29 = vmul.f32 %v12568_v46, %v6395_v36  ;;  %v13828_v46 = vld [vmem:[#allocation56_spill] sm:$0xff]  ;;  %v6426_v39 = vrot.slane %v6419_v49, 5 }
 0x82f   : > { %v6438_v13 = vmul.f32 %v12831_v23, %v6437_v48  ;;  %v5912_v51 = vrot.slane %v5905_v25, 4  ;;  %v13831_v25 = vld [vmem:[#allocation57_spill] sm:$0xff] }
 0x830   : > { %v5734_v1 = vadd.f32 %v12546_v11, %v5713_v3  ;;  %v6383_v11 = vsel %vm6178_vm4, %v6381_v6, %v6382_v37  ;;  %v5777_v43 = vadd.f32 %v12620_v32, %v5756_v53  ;;  %v6405_v30 = vrot.slane %v6398_v29, 5 }
 0x831   : > { %v5887_v32 = vmul.f32 %v12608_v61, %v5884_v45  ;;  %v5910_v3 = vrot.slane %v5904_v10, 4  ;;  %v5903_v53 = vmul.f32 %v12831_v23, %v5902_v19  ;;  %v6444_v26 = vrot.slane %v6438_v13, 5 }
 0x832   : > { %v5755_v35 = vadd.f32 %v5750_v52, %v5734_v1  ;;  %v6406_v8 = vsel %vm6178_vm4, %v6403_v55, %v6405_v30  ;;  %v6447_v52 = vrot.slane %v6440_v50, 5  ;;  %v5892_v1 = vrot.slane %v5885_v15, 4 }
 0x833   : > { %6367 = vrot.lane.b32.xlu1 %v6364_v20, %s13787_s13  ;;  %6388 = vrot.lane.b32.xlu2 %v6385_v60, %s13788_s0  ;;  %v5895_v59 = vrot.slane %v5887_v32, 4  ;;  %v6493_v20 = vstv %s12913_s18  ;;  %v6427_v60 = vsel %vm6178_vm4, %v6424_v58, %v6426_v39  ;;  %v6514_v29 = vstv %s12921_s24 }
 0x834   : > { %6386 = vrot.lane.b32.xlu0 %v6383_v11, %s13788_s0  ;;  %v5776_v63 = vadd.f32 %v12617_v21, %v5755_v35  ;;  %v6448_v42 = vsel %vm6178_vm4, %v6445_v44, %v6447_v52  ;;  %v5913_v11 = vsel %vm5891_vm1, %v5910_v3, %v5912_v51  ;;  %v5894_v18 = vsel %vm5891_vm1, %v5892_v1, %v5893_v56 }
 0x835   : > { %v12904_v62 = vpop.permute.xlu2 %6015  ;;  %v5794_v14 = vpop.permute.xlu1 %5793  ;;  %v5896_v6 = vsel %vm5891_vm1, %v5893_v56, %v5895_v59  ;;  %v6446_v45 = vsel %vm6178_vm4, %v6444_v26, %v6445_v44  ;;  %v6494_v30 = vmul.f32 %v12828_v31, %v6493_v20  ;;  %v6515_v33 = vmul.f32 %v12831_v23, %v6514_v29 }
 0x836   : > { %v5836_v24 = vpop.permute.xlu0 %5835  ;;  %v5798_v22 = vadd.f32 %v5794_v14, %v5777_v43  ;;  %v5797_v40 = vadd.f32 %v12802_v0, %v5776_v63  ;;  %v6404_v0 = vsel %vm6178_vm4, %v6402_v34, %v6403_v55  ;;  %v6495_v63 = vmul.f32 %v12602_v17, %v6493_v20  ;;  %v13830_v55 = vld [vmem:[#allocation58_spill] sm:$0xff] }
 0x837   : > { %v6516_v14 = vmul.f32 %v12915_v4, %v6514_v29 }
 0x838   : > { %v5819_v21 = vadd.f32 %v12561_v57, %v5798_v22  ;;  %v5818_v12 = vadd.f32 %v13828_v46, %v5797_v40  ;;  %v6496_v22 = vmul.f32 %v12608_v61, %v6493_v20  ;;  %v6501_v47 = vrot.slane %v6495_v63, 6 }
 0x839   : > { %v6522_v50 = vrot.slane %v6516_v14, 6 }
 0x83a   : > { %v5840_v57 = vadd.f32 %v5836_v24, %v5819_v21  ;;  %v5909_v24 = vrot.slane %v5903_v53, 4  ;;  %v6503_v10 = vrot.slane %v6496_v22, 6  ;;  %v6577_v53 = vstv %s8124_s20 }
 0x83b   : > { %6407 = vrot.lane.b32.xlu1 %v6404_v0, %s13788_s0  ;;  %6428 = vrot.lane.b32.xlu2 %v6425_v5, %s13797_s15  ;;  %v6500_v0 = vrot.slane %v6494_v30, 6  ;;  %v6521_v5 = vrot.slane %v6515_v33, 6 }
 0x83c   : > { %v5861_v27 = vadd.f32 %v12638_v7, %v5840_v57  ;;  %6409 = vrot.lane.b32.xlu0 %v6406_v8, %s13788_s0  ;;  %v5911_v32 = vsel %vm5891_vm1, %v5909_v24, %v5910_v3  ;;  %v6535_v8 = vstv %s12940_s28  ;;  %v6504_v13 = vsel %vm6465_vm7, %v6501_v47, %v6503_v10  ;;  %s13644_s28 = scalar_lea.vmem %s13677_s12, %s13881_s14 }
 0x83d   : > { %v12933_v9 = vpop.permute.xlu2 %6038  ;;  %v5834_v36 = vpop.permute.xlu1 %5833  ;;  %v6537_v15 = vmul.f32 %v12602_v17, %v6535_v8  ;;  %v6538_v56 = vmul.f32 %v12608_v61, %v6535_v8  ;;  %v6523_v46 = vsel %vm6465_vm7, %v6521_v5, %v6522_v50  ;;  %v6536_v52 = vmul.f32 %v12828_v31, %v6535_v8 }
 0x83e   : > { %v5876_v37 = vpop.permute.xlu0 %5875  ;;  %v5839_v38 = vadd.f32 %v5834_v36, %v5818_v12  ;;  %v5882_v7 = vadd.f32 %v12834_v28, %v5861_v27  ;;  %v6502_v27 = vsel %vm6465_vm7, %v6500_v0, %v6501_v47  ;;  %v12967_v12 = vld [vmem:[#allocation4 + $0x28] sm:$0x3f] }
 0x83f   : > { %v6517_v39 = vmul.f32 %v12967_v12, %v6514_v29 }
 0x840   : > { %v5860_v2 = vadd.f32 %v13829_v41, %v5839_v38  ;;  %v5900_v35 = vadd.f32 %v5896_v6, %v5882_v7  ;;  %v6545_v38 = vrot.slane %v6538_v56, 6  ;;  %v6542_v6 = vrot.slane %v6536_v52, 6 }
 0x841   : > { %v6524_v7 = vrot.slane %v6517_v39, 6  ;;  %v6579_v41 = vmul.f32 %v12602_v17, %v6577_v53  ;;  %v6640_v56 = vstv %s8127_s23 }
 0x842   : > { %v5881_v28 = vadd.f32 %v5876_v37, %v5860_v2  ;;  %v5917_v43 = vadd.f32 %v5913_v11, %v5900_v35  ;;  %v6543_v37 = vrot.slane %v6537_v15, 6  ;;  %v6556_v2 = vstv %s8123_s19 }
 0x843   : > { %6430 = vrot.lane.b32.xlu1 %v6427_v60, %s13797_s15  ;;  %6451 = vrot.lane.b32.xlu2 %v6448_v42, %s13797_s15  ;;  %v6525_v35 = vsel %vm6465_vm7, %v6522_v50, %v6524_v7  ;;  %v6578_v60 = vmul.f32 %v12828_v31, %v6577_v53  ;;  %v6559_v42 = vmul.f32 %v12967_v12, %v6556_v2 }
 0x844   : > { %v5899_v34 = vadd.f32 %v5894_v18, %v5881_v28  ;;  %6449 = vrot.lane.b32.xlu0 %v6446_v45, %s13797_s15  ;;  %v5938_v58 = vadd.f32 %v13830_v55, %v5917_v43  ;;  %v6546_v26 = vsel %vm6465_vm7, %v6543_v37, %v6545_v38  ;;  %v6544_v20 = vsel %vm6465_vm7, %v6542_v6, %v6543_v37 }
 0x845   : > { %v12957_v48 = vpop.permute.xlu2 %6078  ;;  %v5955_v21 = vpop.permute.xlu1 %5954  ;;  %v6557_v17 = vmul.f32 %v12831_v23, %v6556_v2  ;;  %v6585_v43 = vrot.slane %v6579_v41, 6  ;;  %v6584_v24 = vrot.slane %v6578_v60, 6  ;;  %v6566_v22 = vrot.slane %v6559_v42, 6 }
 0x846   : > { %v5974_v40 = vpop.permute.xlu0 %5973  ;;  %v5916_v49 = vadd.f32 %v5911_v32, %v5899_v34  ;;  %v5959_v19 = vadd.f32 %v5955_v21, %v5938_v58  ;;  %v6598_v58 = vstv %s8125_s17  ;;  %v12996_v32 = vld [vmem:[#allocation4 + $0x10] sm:$0x3f]  ;;  %v6642_v39 = vmul.f32 %v12915_v4, %v6640_v56 }
 0x847   : > { %v6563_v34 = vrot.slane %v6557_v17, 6  ;;  %v6586_v55 = vsel %vm6465_vm7, %v6584_v24, %v6585_v43  ;;  %v6600_v33 = vmul.f32 %v12915_v4, %v6598_v58  ;;  %v6580_v21 = vmul.f32 %v12996_v32, %v6577_v53 }
 0x848   : > { %v5937_v57 = vadd.f32 %v13831_v25, %v5916_v49  ;;  %v6599_v50 = vmul.f32 %v12831_v23, %v6598_v58  ;;  %v6643_v17 = vmul.f32 %v12967_v12, %v6640_v56 }
 0x849   : > { %v6587_v5 = vrot.slane %v6580_v21, 6 }
 0x84a   : > { %v5958_v59 = vadd.f32 %v12862_v16, %v5937_v57  ;;  %v5980_v16 = vadd.f32 %v12881_v54, %v5959_v19  ;;  %v6558_v54 = vmul.f32 %v12915_v4, %v6556_v2  ;;  %v6606_v57 = vrot.slane %v6600_v33, 6 }
 0x84b   : > { %6505 = vrot.lane.b32.xlu1 %v6502_v27, %s13793_s1  ;;  %6526 = vrot.lane.b32.xlu2 %v6523_v46, %s13793_s1  ;;  %v6605_v15 = vrot.slane %v6599_v50, 6  ;;  %v6588_v46 = vsel %vm6465_vm7, %v6585_v43, %v6587_v5  ;;  %v6650_v24 = vrot.slane %v6643_v17, 6 }
 0x84c   : > { %v5979_v36 = vadd.f32 %v5974_v40, %v5958_v59  ;;  %6507 = vrot.lane.b32.xlu0 %v6504_v13, %s13793_s1  ;;  %v6564_v18 = vrot.slane %v6558_v54, 6  ;;  %v6661_v54 = vstv %s8128_s26 }
 0x84d   : > { %v12974_v61 = vpop.permute.xlu2 %6101  ;;  %v5995_v44 = vpop.permute.xlu1 %5994 }
 0x84e   : > { %v5997_v3 = vpop.permute.xlu0 %5996  ;;  %v6000_v51 = vadd.f32 %v5995_v44, %v5979_v36  ;;  %v6565_v30 = vsel %vm6465_vm7, %v6563_v34, %v6564_v18  ;;  %v6567_v40 = vsel %vm6465_vm7, %v6564_v18, %v6566_v22  ;;  %v6607_v36 = vsel %vm6465_vm7, %v6605_v15, %v6606_v57 }
 0x84f   : > { %v6001_v1 = vadd.f32 %v5997_v3, %v5980_v16  ;;  %v6641_v44 = vmul.f32 %v12831_v23, %v6640_v56 }
 0x850   : > { %v6021_v29 = vadd.f32 %v12904_v62, %v6000_v51  ;;  %v6601_v62 = vmul.f32 %v12967_v12, %v6598_v58 }
 0x851   : > { %v6647_v2 = vrot.slane %v6641_v44, 6 }
 0x852   : > { %v6608_v0 = vrot.slane %v6601_v62, 6 }
 0x853   : > { %6549 = vrot.lane.b32.xlu2 %v6546_v26, %s13786_s25  ;;  %6528 = vrot.lane.b32.xlu1 %v6525_v35, %s13793_s1  ;;  %s8126_s1 = sld [smem:[#allocation7 + $0x2e]] }
 0x854   : > { %6547 = vrot.lane.b32.xlu0 %v6544_v20, %s13786_s25  ;;  %v6609_v27 = vsel %vm6465_vm7, %v6606_v57, %v6608_v0  ;;  %v13833_v57 = vld [vmem:[#allocation45_spill] sm:$0xff] }
 0x855   : > { %v12989_v11 = vpop.permute.xlu2 %6141  ;;  %v6018_v28 = vpop.permute.xlu1 %6017  ;;  %v6190_v0 = vmul.f32 %v12831_v23, %v13833_v57 }
 0x856   : > { %v6037_v63 = vpop.permute.xlu0 %6036  ;;  %v6022_v14 = vadd.f32 %v6018_v28, %v6001_v1  ;;  %v6648_v1 = vrot.slane %v6642_v39, 6  ;;  %v6662_v28 = vmul.f32 %v12828_v31, %v6661_v54 }
 0x857   : > { %v6042_v45 = vadd.f32 %v6037_v63, %v6021_v29 }
 0x858   : > { %v6043_v19 = vadd.f32 %v12933_v9, %v6022_v14  ;;  %v8965_v9 = vld [vmem:[#allocation4 + $0x8] sm:$0xff]  ;;  %v6649_v60 = vsel %vm6465_vm7, %v6647_v2, %v6648_v1 }
 0x859   : > { %v6619_v59 = vstv %s8126_s1  ;;  %v6663_v20 = vmul.f32 %v8965_v9, %v6661_v54 }
 0x85a   : > { %v6621_v13 = vmul.f32 %v8965_v9, %v6619_v59  ;;  %v6622_v16 = vmul.f32 %v12996_v32, %v6619_v59  ;;  %v6620_v52 = vmul.f32 %v12828_v31, %v6619_v59 }
 0x85b   : > { %6589 = vrot.lane.b32.xlu2 %v6586_v55, %s13792_s30  ;;  %6568 = vrot.lane.b32.xlu1 %v6565_v30, %s13786_s25  ;;  %v6669_v18 = vrot.slane %v6663_v20, 6  ;;  %v6668_v30 = vrot.slane %v6662_v28, 6 }
 0x85c   : > { %6570 = vrot.lane.b32.xlu0 %v6567_v40, %s13786_s25  ;;  %v6627_v53 = vrot.slane %v6621_v13, 6  ;;  %v6629_v41 = vrot.slane %v6622_v16, 6  ;;  %s8130_s25 = sld [smem:[#allocation7 + $0x30]]  ;;  %v6626_v26 = vrot.slane %v6620_v52, 6  ;;  %v6651_v40 = vsel %vm6465_vm7, %v6648_v1, %v6650_v24  ;;  %v13834_v16 = vld [vmem:[#allocation44_spill] sm:$0xff] }
 0x85d   : > { %v13003_v49 = vpop.permute.xlu2 %6164  ;;  %v6058_v47 = vpop.permute.xlu1 %6057  ;;  %v13835_v44 = vrot.slane %v13834_v16, 5 }
 0x85e   : > { %v6060_v10 = vpop.permute.xlu0 %6059  ;;  %v6063_v25 = vadd.f32 %v6058_v47, %v6042_v45  ;;  %v6628_v42 = vsel %vm6465_vm7, %v6626_v26, %v6627_v53  ;;  %v6630_v29 = vsel %vm6465_vm7, %v6627_v53, %v6629_v41  ;;  %v13836_v41 = vld [vmem:[#allocation49_spill] sm:$0xff]  ;;  %v13837_v26 = vld [vmem:[#allocation48_spill] sm:$0xff] }
 0x85f   : > { %v6064_v8 = vadd.f32 %v6060_v10, %v6043_v19  ;;  %v13832_v19 = vld [vmem:[#allocation43_spill] sm:$0xff]  ;;  %v6670_v10 = vsel %vm6465_vm7, %v6668_v30, %v6669_v18 }
 0x860   : > { %v6084_v51 = vadd.f32 %v12957_v48, %v6063_v25  ;;  %v6664_v48 = vmul.f32 %v12996_v32, %v6661_v54  ;;  %v6172_v47 = vmul.f32 %v12828_v31, %v13832_v19 }
 0x862   : > { %v6671_v45 = vrot.slane %v6664_v48, 6  ;;  %v6703_v34 = vstv %s8130_s25  ;;  %v6179_v56 = vrot.slane %v6172_v47, 5 }
 0x863   : > { %6612 = vrot.lane.b32.xlu2 %v6609_v27, %s13792_s30  ;;  %6591 = vrot.lane.b32.xlu1 %v6588_v46, %s13792_s30  ;;  %v6705_v33 = vmul.f32 %v8965_v9, %v6703_v34  ;;  %v6704_v50 = vmul.f32 %v12828_v31, %v6703_v34 }
 0x864   : > { %6610 = vrot.lane.b32.xlu0 %v6607_v36, %s13792_s30  ;;  %s8129_s30 = sld [smem:[#allocation7 + $0x60]]  ;;  %v6672_v21 = vsel %vm6465_vm7, %v6669_v18, %v6671_v45  ;;  %v6181_v52 = vsel %vm6178_vm4, %v6179_v56, %v13835_v44 }
 0x865   : > { %v13017_v3 = vpop.permute.xlu2 %6239  ;;  %v6081_v37 = vpop.permute.xlu1 %6080  ;;  %v6710_v39 = vrot.slane %v6704_v50, 6 }
 0x866   : > { %v6100_v38 = vpop.permute.xlu0 %6099  ;;  %v6085_v7 = vadd.f32 %v6081_v37, %v6064_v8  ;;  %v6711_v8 = vrot.slane %v6705_v33, 6  ;;  %v6196_v37 = vrot.slane %v6190_v0, 5 }
 0x867   : > { %v6105_v6 = vadd.f32 %v6100_v38, %v6084_v51  ;;  %v6724_v38 = vstv %s8131_s27 }
 0x868   : > { %v6106_v35 = vadd.f32 %v12974_v61, %v6085_v7  ;;  %v6712_v1 = vsel %vm6465_vm7, %v6710_v39, %v6711_v8  ;;  %v6727_v20 = vmul.f32 %v12967_v12, %v6724_v38 }
 0x86a   : > { %v6682_v58 = vstv %s8129_s30 }
 0x86b   : > { %6652 = vrot.lane.b32.xlu2 %v6649_v60, %s13787_s13  ;;  %6631 = vrot.lane.b32.xlu1 %v6628_v42, %s13787_s13  ;;  %v6684_v62 = vmul.f32 %v12915_v4, %v6682_v58  ;;  %v6683_v25 = vmul.f32 %v12831_v23, %v6682_v58  ;;  %v6706_v60 = vmul.f32 %v12996_v32, %v6703_v34 }
 0x86c   : > { %6633 = vrot.lane.b32.xlu0 %v6630_v29, %s13787_s13  ;;  %v6725_v29 = vmul.f32 %v12831_v23, %v6724_v38 }
 0x86d   : > { %v6121_v61 = vpop.permute.xlu1 %6120  ;;  %v13030_v43 = vpop.permute.xlu2 %6262  ;;  %v6690_v15 = vrot.slane %v6684_v62, 6  ;;  %v6689_v13 = vrot.slane %v6683_v25, 6 }
 0x86e   : > { %v6123_v63 = vpop.permute.xlu0 %6122  ;;  %v6126_v14 = vadd.f32 %v6121_v61, %v6105_v6  ;;  %v6726_v6 = vmul.f32 %v12915_v4, %v6724_v38  ;;  %v13839_v4 = vld [vmem:[#allocation51_spill] sm:$0xff]  ;;  %v6731_v45 = vrot.slane %v6725_v29, 6 }
 0x86f   : > { %v6127_v22 = vadd.f32 %v6123_v63, %v6106_v35  ;;  %v6691_v53 = vsel %vm6465_vm7, %v6689_v13, %v6690_v15  ;;  %v13838_v35 = vrot.slane %v13837_v26, 5  ;;  %v13841_v26 = vld [vmem:[#allocation47_spill] sm:$0xff] }
 0x870   : > { %v6147_v55 = vadd.f32 %v12989_v11, %v6126_v14  ;;  %v6685_v11 = vmul.f32 %v12967_v12, %v6682_v58  ;;  %v6732_v63 = vrot.slane %v6726_v6, 6  ;;  %v6734_v12 = vrot.slane %v6727_v20, 6  ;;  %v13840_v6 = vld [vmem:[#allocation46_spill] sm:$0xff] }
 0x871   : > { %v6198_v54 = vsel %vm6178_vm4, %v6196_v37, %v13838_v35  ;;  %v6713_v14 = vrot.slane %v6706_v60, 6  ;;  %v6477_v35 = vmul.f32 %v12831_v23, %v13841_v26 }
 0x872   : > { %v6692_v9 = vrot.slane %v6685_v11, 6 }
 0x873   : > { %6675 = vrot.lane.b32.xlu2 %v6672_v21, %s13788_s0  ;;  %6654 = vrot.lane.b32.xlu1 %v6651_v40, %s13787_s13  ;;  %v6714_v34 = vsel %vm6465_vm7, %v6711_v8, %v6713_v14  ;;  %v13845_v14 = vld [vmem:[#allocation52_spill] sm:$0xff]  ;;  %s7802_s13 = sld [smem:[#allocation5 + $0xa]] }
 0x874   : > { %6673 = vrot.lane.b32.xlu0 %v6670_v10, %s13788_s0 }
 0x875   : > { %v6144_v5 = vpop.permute.xlu1 %6143  ;;  %v6303_v36 = vpop.permute.xlu2 %6302 }
 0x876   : > { %v6163_v59 = vpop.permute.xlu0 %6162  ;;  %v6148_v27 = vadd.f32 %v6144_v5, %v6127_v22  ;;  %v6735_v22 = vsel %vm6465_vm7, %v6732_v63, %v6734_v12 }
 0x877   : > { %v6168_v46 = vadd.f32 %v6163_v59, %v6147_v55  ;;  %v6733_v55 = vsel %vm6465_vm7, %v6731_v45, %v6732_v63  ;;  %v6789_v59 = vld [vmem:[%s9121_s16 + $0x8] sm:$0xff]  ;;  %v13844_v63 = vld [vmem:[#allocation53_spill] sm:$0xff] }
 0x878   : > { %v6169_v51 = vadd.f32 %v13003_v49, %v6148_v27  ;;  %v6693_v49 = vsel %vm6465_vm7, %v6690_v15, %v6692_v9 }
 0x879   : > { %v6186_v7 = vadd.f32 %v6181_v52, %v6168_v46  ;;  %v6791_v52 = vld [vmem:[%s9121_s16 + $0x18] sm:$0xff] }
 0x87a   : > { %v6187_v2 = vadd.f32 %v13836_v41, %v6169_v51  ;;  %v6793_v41 = vld [vmem:[%s9121_s16 + $0x28] sm:$0xff] }
 0x87b   : > { %6715 = vrot.lane.b32.xlu2 %v6712_v1, %s13797_s15  ;;  %6694 = vrot.lane.b32.xlu1 %v6691_v53, %s13788_s0  ;;  %v6203_v42 = vadd.f32 %v6198_v54, %v6186_v7 }
 0x87c   : > { %6696 = vrot.lane.b32.xlu0 %v6693_v49, %s13788_s0  ;;  %v6204_v48 = vadd.f32 %v13839_v4, %v6187_v2  ;;  %s7801_s0 = sld [smem:[#allocation5 + $0x9]] }
 0x87d   : > { %v6219_v17 = vpop.permute.xlu1 %6218  ;;  %v6326_v24 = vpop.permute.xlu2 %6325 }
 0x87e   : > { %v6221_v61 = vpop.permute.xlu0 %6220  ;;  %v6224_v28 = vadd.f32 %v6219_v17, %v6203_v42 }
 0x87f   : > { %v6225_v32 = vadd.f32 %v6221_v61, %v6204_v48  ;;  %v13842_v48 = vld [vmem:[#allocation50_spill] sm:$0xff] }
 0x880   : > { %v6245_v18 = vadd.f32 %v13017_v3, %v6224_v28  ;;  %v13843_v17 = vrot.slane %v13842_v48, 6 }
 0x883   : > { %6738 = vrot.lane.b32.xlu2 %v6735_v22, %s13797_s15  ;;  %6717 = vrot.lane.b32.xlu1 %v6714_v34, %s13797_s15 }
 0x884   : > { %6736 = vrot.lane.b32.xlu0 %v6733_v55, %s13797_s15  ;;  %s7799_s15 = sld [smem:[#allocation5 + $0x7]] }
 0x885   : > { %v6242_v58 = vpop.permute.xlu1 %6241  ;;  %v6366_v21 = vpop.permute.xlu2 %6365 }
 0x886   : > { %v6261_v30 = vpop.permute.xlu0 %6260  ;;  %v6246_v33 = vadd.f32 %v6242_v58, %v6225_v32  ;;  %v13846_v32 = vrot.slane %v13845_v14, 6 }
 0x887   : > { %v6266_v62 = vadd.f32 %v6261_v30, %v6245_v18  ;;  %v6795_v18 = vld [vmem:[%s9121_s16 + $0x38] sm:$0xff] }
 0x888   : > { %v6267_v3 = vadd.f32 %v13030_v43, %v6246_v33  ;;  %v6797_v33 = vld [vmem:[%s9121_s16 + $0x48] sm:$0xff] }
 0x88d   : > { %v6282_v40 = vpop.permute.xlu1 %6281  ;;  %v6389_v10 = vpop.permute.xlu2 %6388 }
 0x88e   : > { %v6284_v19 = vpop.permute.xlu0 %6283  ;;  %v6287_v56 = vadd.f32 %v6282_v40, %v6266_v62 }
 0x88f   : > { %v6288_v47 = vadd.f32 %v6284_v19, %v6267_v3 }
 0x890   : > { %v6308_v27 = vadd.f32 %v6303_v36, %v6287_v56  ;;  %v6459_v36 = vmul.f32 %v12828_v31, %v13840_v6  ;;  %v6483_v31 = vrot.slane %v6477_v35, 6 }
 0x892   : > { %v6466_v60 = vrot.slane %v6459_v36, 6  ;;  %v6485_v23 = vsel %vm6465_vm7, %v6483_v31, %v13846_v32 }
 0x894   : > { %v6468_v29 = vsel %vm6465_vm7, %v6466_v60, %v13843_v17  ;;  %v6744_v60 = vstv %s7801_s0 }
 0x895   : > { %v6305_v50 = vpop.permute.xlu1 %6304  ;;  %v6429_v15 = vpop.permute.xlu2 %6428 }
 0x896   : > { %v6324_v11 = vpop.permute.xlu0 %6323  ;;  %v6309_v25 = vadd.f32 %v6305_v50, %v6288_v47  ;;  %v6799_v47 = vld [vmem:[%s9121_s16 + $0x58] sm:$0xff] }
 0x897   : > { %v6329_v9 = vadd.f32 %v6324_v11, %v6308_v27 }
 0x898   : > { %v6330_v57 = vadd.f32 %v6326_v24, %v6309_v25  ;;  %v13847_v24 = vld [vmem:[#allocation54_spill] sm:$0xff] }
 0x89d   : > { %v6345_v0 = vpop.permute.xlu1 %6344  ;;  %v6452_v44 = vpop.permute.xlu2 %6451 }
 0x89e   : > { %v6347_v5 = vpop.permute.xlu0 %6346  ;;  %v6350_v16 = vadd.f32 %v6345_v0, %v6329_v9 }
 0x89f   : > { %v6351_v8 = vadd.f32 %v6347_v5, %v6330_v57  ;;  %v6801_v57 = vld [vmem:[%s9121_s16 + $0x68] sm:$0xff] }
 0x8a0   : > { %v6371_v51 = vadd.f32 %v6366_v21, %v6350_v16 }
 0x8a5   : > { %v6368_v46 = vpop.permute.xlu1 %6367  ;;  %v6527_v2 = vpop.permute.xlu2 %6526 }
 0x8a6   : > { %6836 = vxpose.xlu0.b32.start [1/8] (short) %v6789_v59, 128  ;;  %v6387_v43 = vpop.permute.xlu0 %6386  ;;  %v6372_v39 = vadd.f32 %v6368_v46, %v6351_v8  ;;  %v6803_v59 = vld [vmem:[%s9121_s16 + $0x78] sm:$0xff] }
 0x8a7   : > { %v6392_v7 = vadd.f32 %v6387_v43, %v6371_v51 }
 0x8a8   : > { %v6393_v13 = vadd.f32 %v6389_v10, %v6372_v39 }
 0x8ad   : > { %v6408_v37 = vpop.permute.xlu1 %6407  ;;  %v6550_v55 = vpop.permute.xlu2 %6549 }
 0x8ae   : > { %6837 = vxpose.xlu0.b32.cont [2/8] (short) %v6791_v52, 128  ;;  %v6410_v38 = vpop.permute.xlu0 %6409  ;;  %v6413_v53 = vadd.f32 %v6408_v37, %v6392_v7 }
 0x8af   : > { %v6414_v1 = vadd.f32 %v6410_v38, %v6393_v13 }
 0x8b0   : > { %v6434_v54 = vadd.f32 %v6429_v15, %v6413_v53 }
 0x8b5   : > { %v6431_v20 = vpop.permute.xlu1 %6430  ;;  %v6590_v40 = vpop.permute.xlu2 %6589 }
 0x8b6   : > { %6838 = vxpose.xlu0.b32.cont [3/8] (short) %v6793_v41, 128  ;;  %v6450_v49 = vpop.permute.xlu0 %6449  ;;  %v6435_v42 = vadd.f32 %v6431_v20, %v6414_v1 }
 0x8b7   : > { %v6455_v4 = vadd.f32 %v6450_v49, %v6434_v54 }
 0x8b8   : > { %v6456_v61 = vadd.f32 %v6452_v44, %v6435_v42 }
 0x8b9   : > { %v6473_v28 = vadd.f32 %v6468_v29, %v6455_v4  ;;  %v6747_v4 = vstv %s7802_s13 }
 0x8ba   : > { %v6474_v12 = vadd.f32 %v13844_v63, %v6456_v61  ;;  %v13848_v63 = vlaneseq }
 0x8bb   : > { %v6490_v45 = vadd.f32 %v6485_v23, %v6473_v28 }
 0x8bc   : > { %v6491_v22 = vadd.f32 %v13847_v24, %v6474_v12  ;;  %v13095_v12 = vshrl.u32 %v13848_v63, 7 }
 0x8bd   : > { %v6506_v34 = vpop.permute.xlu1 %6505  ;;  %v6613_v25 = vpop.permute.xlu2 %6612 }
 0x8be   : > { %6839 = vxpose.xlu0.b32.cont [4/8] (short) %v6795_v18, 128  ;;  %v6508_v58 = vpop.permute.xlu0 %6507  ;;  %v6511_v56 = vadd.f32 %v6506_v34, %v6490_v45  ;;  %8337 = vset.pattern.permute.xlu1 %v13095_v12 }
 0x8bf   : > { %v6512_v30 = vadd.f32 %v6508_v58, %v6491_v22  ;;  %8324 = vset.pattern.permute.xlu2 %v13095_v12 }
 0x8c0   : > { %v6532_v46 = vadd.f32 %v6527_v2, %v6511_v56  ;;  %v6800_v56 = vld [vmem:[%s9121_s16 + $0x60] sm:$0xff] }
 0x8c5   : > { %v6529_v62 = vpop.permute.xlu1 %6528  ;;  %v6653_v27 = vpop.permute.xlu2 %6652 }
 0x8c6   : > { %6840 = vxpose.xlu0.b32.cont [5/8] (short) %v6797_v33, 128  ;;  %v6548_v3 = vpop.permute.xlu0 %6547  ;;  %v6533_v21 = vadd.f32 %v6529_v62, %v6512_v30 }
 0x8c7   : > { %v6553_v9 = vadd.f32 %v6548_v3, %v6532_v46 }
 0x8c8   : > { %v6554_v19 = vadd.f32 %v6550_v55, %v6533_v21 }
 0x8cd   : > { %v6569_v50 = vpop.permute.xlu1 %6568  ;;  %v6676_v51 = vpop.permute.xlu2 %6675 }
 0x8ce   : > { %6841 = vxpose.xlu0.b32.cont [6/8] (short) %v6799_v47, 128  ;;  %v6571_v10 = vpop.permute.xlu0 %6570  ;;  %v6574_v16 = vadd.f32 %v6569_v50, %v6553_v9  ;;  %v13102_v47 = vadd.s32 8, %v13095_v12 }
 0x8cf   : > { %v6575_v11 = vadd.f32 %v6571_v10, %v6554_v19  ;;  %v6788_v10 = vld [vmem:[%s9121_s16] sm:$0xff] }
 0x8d0   : > { %v6595_v44 = vadd.f32 %v6590_v40, %v6574_v16 }
 0x8d5   : > { %v6592_v0 = vpop.permute.xlu1 %6591  ;;  %v6716_v35 = vpop.permute.xlu2 %6715 }
 0x8d6   : > { %6842 = vxpose.xlu0.b32.cont [7/8] (short) %v6801_v57, 128  ;;  %v6611_v5 = vpop.permute.xlu0 %6610  ;;  %v6596_v8 = vadd.f32 %v6592_v0, %v6575_v11  ;;  %v6790_v11 = vld [vmem:[%s9121_s16 + $0x10] sm:$0xff]  ;;  %v6792_v57 = vld [vmem:[%s9121_s16 + $0x20] sm:$0xff] }
 0x8d7   : > { %v6616_v7 = vadd.f32 %v6611_v5, %v6595_v44  ;;  %v6794_v0 = vld [vmem:[%s9121_s16 + $0x30] sm:$0xff]  ;;  %v6796_v5 = vld [vmem:[%s9121_s16 + $0x40] sm:$0xff] }
 0x8d8   : > { %v6617_v15 = vadd.f32 %v6613_v25, %v6596_v8  ;;  %v6798_v8 = vld [vmem:[%s9121_s16 + $0x50] sm:$0xff] }
 0x8dd   : > { %v6632_v43 = vpop.permute.xlu1 %6631  ;;  %v6739_v61 = vpop.permute.xlu2 %6738 }
 0x8de   : > { %6843 = vxpose.xlu0.b32.end [8/8] (short) %v6803_v59, 128  ;;  %v6634_v39 = vpop.permute.xlu0 %6633  ;;  %v6637_v53 = vadd.f32 %v6632_v43, %v6616_v7  ;;  %v6802_v59 = vld [vmem:[%s9121_s16 + $0x70] sm:$0xff]  ;;  %s7800_s16 = sld [smem:[#allocation5 + $0x8]] }
 0x8df   : > { %v6638_v13 = vadd.f32 %v6634_v39, %v6617_v15 }
 0x8e0   : > { %v6658_v6 = vadd.f32 %v6653_v27, %v6637_v53 }
 0x8e5   : > { %v6655_v52 = vpop.permute.xlu1 %6654 }
 0x8e6   : > { %v6674_v37 = vpop.permute.xlu0 %6673  ;;  %v6659_v38 = vadd.f32 %v6655_v52, %v6638_v13 }
 0x8e7   : > { %v6679_v26 = vadd.f32 %v6674_v37, %v6658_v6 }
 0x8e8   : > { %v6680_v1 = vadd.f32 %v6676_v51, %v6659_v38 }
 0x8ed   : > { %v6695_v41 = vpop.permute.xlu1 %6694 }
 0x8ee   : > { %v6697_v36 = vpop.permute.xlu0 %6696  ;;  %v6700_v54 = vadd.f32 %v6695_v41, %v6679_v26 }
 0x8ef   : > { %v6701_v2 = vadd.f32 %v6697_v36, %v6680_v1 }
 0x8f0   : > { %v6721_v20 = vadd.f32 %v6716_v35, %v6700_v54 }
 0x8f5   : > { %v6718_v48 = vpop.permute.xlu1 %6717 }
 0x8f6   : > { %v6737_v49 = vpop.permute.xlu0 %6736  ;;  %v6722_v29 = vadd.f32 %v6718_v48, %v6701_v2 }
 0x8f7   : > { %v6742_v42 = vadd.f32 %v6737_v49, %v6721_v20 }
 0x8f8   : > { %v6743_v28 = vadd.f32 %v6739_v61, %v6722_v29 }
 0x8f9   : > { %v6745_v17 = vmul.f32 %v6744_v60, %v6742_v42 }
 0x8fa   : > { %v6746_v32 = vmul.f32 %v6744_v60, %v6743_v28 }
 0x8fb   : > { %v6748_v31 = vadd.f32 %v6747_v4, %v6745_v17 }
 0x8fc   : > { %v13099_v23 = vadd.f32 %v6747_v4, %v6746_v32  ;;  %v13849_v32 = vld [vmem:[#allocation27_spill] sm:$0xff] }
 0x8fd   : > { %v8132_v14 = vmul.f32 -1.442695, %v6748_v31 }
 0x8fe   : > { %v8133_v43 = vmul.f32 -1.442695, %v13099_v23 }
 0x8ff   : > { %8746 = vpow2.f32 %v8132_v14 }
 0x905   : > { %v8747_v18 = vpop.eup %8746 }
 0x906   : > { %v6756_v45 = vadd.f32 1.0, %v8747_v18 }
 0x908   : > { %8748 = vrcp.f32 %v6756_v45  ;;  %v6769_v55 = vand.u32 2147483648, %v6756_v45  ;;  %v6767_v30 = vand.u32 2147483647, %v6756_v45  ;;  %vm6763_vm15 = vweird.f32 %v6756_v45 }
 0x909   : > { %8750 = vpow2.f32 %v8133_v43 }
 0x90a   : > { %v6770_v62 = vor.u32 1.1754944e-38, %v6769_v55  ;;  %vm6768_vm8 = vcmp.eq.f32.partialorder %v6767_v30, 8.507059e+37 }
 0x90e   : > { %v8749_v24 = vpop.eup %8748 }
 0x90f   : > { %v6759_v22 = vmul.f32 %v8749_v24, %v6756_v45  ;;  %vm6764_vm6 = vweird.f32 %v8749_v24  ;;  %v8751_v9 = vpop.eup %8750 }
 0x910   : > { %vm6765_vm5 = vmor %vm6763_vm15, %vm6764_vm6  ;;  %v6757_v13 = vadd.f32 1.0, %v8751_v9 }
 0x911   : > { %v6760_v34 = vsub.f32 1.0, %v6759_v22 }
 0x912   : > { %8752 = vrcp.f32 %v6757_v13  ;;  %v6784_v38 = vand.u32 2147483648, %v6757_v13  ;;  %vm6778_vm10 = vweird.f32 %v6757_v13  ;;  %v6782_v7 = vand.u32 2147483647, %v6757_v13 }
 0x913   : > { %v6761_v58 = vmul.f32 %v8749_v24, %v6760_v34  ;;  %v13172_v34 = vstv %s7799_s15 }
 0x914   : > { %v6785_v53 = vor.u32 1.1754944e-38, %v6784_v38  ;;  %vm6783_vm14 = vcmp.eq.f32.partialorder %v6782_v7, 8.507059e+37 }
 0x915   : > { %v6762_v33 = vadd.f32 %v8749_v24, %v6761_v58 }
 0x917   : > { %v6766_v3 = vsel %vm6765_vm5, %v8749_v24, %v6762_v33  ;;  %v13169_v24 = vstv %s7800_s16 }
 0x918   : > { %v6771_v21 = vsel %vm6768_vm8, %v6770_v62, %v6766_v3  ;;  %v8753_v16 = vpop.eup %8752 }
 0x919   : > { %v6959_v40 = vperm.slane %v6771_v21, 7  ;;  %v6868_v19 = vperm.slane %v6771_v21, 0  ;;  %v6881_v50 = vperm.slane %v6771_v21, 1  ;;  %v6894_v25 = vperm.slane %v6771_v21, 2 }
 0x91a   : > { %v6907_v15 = vperm.slane %v6771_v21, 3  ;;  %v6933_v27 = vperm.slane %v6771_v21, 5  ;;  %v6920_v46 = vperm.slane %v6771_v21, 4  ;;  %v6946_v39 = vperm.slane %v6771_v21, 6 }
 0x91b   : > { %6964 = vperm.xlu1 %8337, %v6959_v40   ;;  %6873 = vperm.xlu2 %8324, %v6868_v19   ;;  %v6774_v44 = vmul.f32 %v8753_v16, %v6757_v13  ;;  %vm6779_vm9 = vweird.f32 %v8753_v16 }
 0x91c   : > { %vm6780_vm11 = vmor %vm6778_vm10, %vm6779_vm9 }
 0x91d   : > { %v6775_v52 = vsub.f32 1.0, %v6774_v44 }
 0x91f   : > { %v6776_v51 = vmul.f32 %v8753_v16, %v6775_v52 }
 0x921   : > { %v6777_v37 = vadd.f32 %v8753_v16, %v6776_v51 }
 0x923   : > { %8325 = vset.pattern.permute.xlu2 %v13102_v47  ;;  %v6781_v1 = vsel %vm6780_vm11, %v8753_v16, %v6777_v37 }
 0x924   : > { %v13126_v6 = vsel %vm6783_vm14, %v6785_v53, %v6781_v1 }
 0x925   : > { %v6972_v36 = vperm.slane %v13126_v6, 0  ;;  %v6985_v54 = vperm.slane %v13126_v6, 1  ;;  %v6998_v4 = vperm.slane %v13126_v6, 2  ;;  %v7011_v31 = vperm.slane %v13126_v6, 3 }
 0x926   : > { %v7024_v58 = vperm.slane %v13126_v6, 4 }
 0x92b   : > { %6879 = vperm.xlu2 %8325, %v6868_v19  }
 0x933   : > { %8326 = vset.pattern.permute.xlu2 %v13095_v12 }
 0x93b   : > { %6886 = vperm.xlu2 %8326, %v6881_v50  }
 0x943   : > { %8327 = vset.pattern.permute.xlu2 %v13102_v47 }
 0x945   : > { %8335 = vset.pattern.permute.xlu0 %v13102_v47 }
 0x94a   : > { %v6852_v18 = vpop.trf.xlu0 }
 0x94b   : > { %6892 = vperm.xlu2 %8327, %v6881_v50  }
 0x950   : > { %6804 = vxpose.xlu1.b32.start [1/8] (short) %v6788_v10, 128 }
 0x952   : > { %v6853_v33 = vpop.trf.xlu0 }
 0x953   : > { %8328 = vset.pattern.permute.xlu2 %v13095_v12 }
 0x958   : > { %6805 = vxpose.xlu1.b32.cont [2/8] (short) %v6790_v11, 128  ;;  %v13177_v11 = vstv %s7798_s29 }
 0x95b   : > { %6899 = vperm.xlu2 %8328, %v6894_v25  }
 0x960   : > { %6806 = vxpose.xlu1.b32.cont [3/8] (short) %v6792_v57, 128 }
 0x963   : > { %8329 = vset.pattern.permute.xlu2 %v13102_v47 }
 0x968   : > { %6807 = vxpose.xlu1.b32.cont [4/8] (short) %v6794_v0, 128 }
 0x96b   : > { %6905 = vperm.xlu2 %8329, %v6894_v25  }
 0x970   : > { %6808 = vxpose.xlu1.b32.cont [5/8] (short) %v6796_v5, 128  ;;  %v13850_v5 = vld [vmem:[#allocation28_spill] sm:$0xff] }
 0x973   : > { %8330 = vset.pattern.permute.xlu2 %v13095_v12 }
 0x975   : > { %v13129_v41 = vpop.permute.xlu2 %6873 }
 0x978   : > { %6809 = vxpose.xlu1.b32.cont [6/8] (short) %v6798_v8, 128 }
 0x97b   : > { %6912 = vperm.xlu2 %8330, %v6907_v15  }
 0x980   : > { %6810 = vxpose.xlu1.b32.cont [7/8] (short) %v6800_v56, 128 }
 0x983   : > { %8331 = vset.pattern.permute.xlu2 %v13102_v47 }
 0x985   : > { %v13132_v26 = vpop.permute.xlu2 %6879 }
 0x988   : > { %6811 = vxpose.xlu1.b32.end [8/8] (short) %v6802_v59, 128 }
 0x98b   : > { %6918 = vperm.xlu2 %8331, %v6907_v15  }
 0x98c   : > { %6944 = vperm.xlu0 %8335, %v6933_v27  }
 0x98d   : > { %v13188_v51 = vpop.permute.xlu1 %6964 }
 0x993   : > { %8332 = vset.pattern.permute.xlu2 %v13095_v12 }
 0x995   : > { %v13134_v2 = vpop.permute.xlu2 %6886 }
 0x99b   : > { %6925 = vperm.xlu2 %8332, %v6920_v46  }
 0x9a3   : > { %8333 = vset.pattern.permute.xlu2 %v13102_v47 }
 0x9a5   : > { %v13137_v35 = vpop.permute.xlu2 %6892 }
 0x9ab   : > { %6931 = vperm.xlu2 %8333, %v6920_v46  }
 0x9b3   : > { %8334 = vset.pattern.permute.xlu2 %v13095_v12 }
 0x9b5   : > { %v13140_v20 = vpop.permute.xlu2 %6899 }
 0x9bb   : > { %6938 = vperm.xlu2 %8334, %v6933_v27  }
 0x9c3   : > { %6951 = vperm.xlu2 %8334, %v6946_v39  }
 0x9c5   : > { %v13143_v60 = vpop.permute.xlu2 %6905 }
 0x9cb   : > { %8336 = vset.pattern.permute.xlu2 %v13102_v47 }
 0x9d3   : > { %6957 = vperm.xlu2 %8336, %v6946_v39   ;;  %v7037_v39 = vperm.slane %v13126_v6, 5 }
 0x9d5   : > { %v13145_v49 = vpop.permute.xlu2 %6912 }
 0x9db   : > { %6970 = vperm.xlu2 %8336, %v6959_v40   ;;  %v6854_v40 = vpop.trf.xlu0 }
 0x9e3   : > { %8338 = vset.pattern.permute.xlu2 %v13095_v12  ;;  %v6855_v59 = vpop.trf.xlu0 }
 0x9e5   : > { %v13148_v42 = vpop.permute.xlu2 %6918 }
 0x9eb   : > { %6977 = vperm.xlu2 %8338, %v6972_v36   ;;  %v13185_v16 = vpop.trf.xlu0 }
 0x9f3   : > { %8339 = vset.pattern.permute.xlu2 %v13102_v47  ;;  %v13190_v37 = vpop.trf.xlu0 }
 0x9f4   : > { %v6820_v1 = vpop.trf.xlu1 }
 0x9f5   : > { %v13151_v48 = vpop.permute.xlu2 %6925 }
 0x9fb   : > { %6983 = vperm.xlu2 %8339, %v6972_v36  }
 0xa03   : > { %8340 = vset.pattern.permute.xlu2 %v13095_v12 }
 0xa05   : > { %v13154_v17 = vpop.permute.xlu2 %6931 }
 0xa0b   : > { %6990 = vperm.xlu2 %8340, %v6985_v54  }
 0xa13   : > { %8341 = vset.pattern.permute.xlu2 %v13102_v47 }
 0xa15   : > { %v13156_v29 = vpop.permute.xlu2 %6938 }
 0xa1b   : > { %6996 = vperm.xlu2 %8341, %v6985_v54  }
 0xa1d   : > { %v13159_v61 = vpop.permute.xlu2 %6951 }
 0xa23   : > { %8342 = vset.pattern.permute.xlu2 %v13095_v12 }
 0xa2b   : > { %7003 = vperm.xlu2 %8342, %v6998_v4  }
 0xa2d   : > { %v13162_v28 = vpop.permute.xlu2 %6957 }
 0xa33   : > { %8343 = vset.pattern.permute.xlu2 %v13102_v47 }
 0xa35   : > { %v13165_v63 = vpop.permute.xlu2 %6970 }
 0xa3b   : > { %7009 = vperm.xlu2 %8343, %v6998_v4  }
 0xa43   : > { %8344 = vset.pattern.permute.xlu2 %v13095_v12 }
 0xa45   : > { %v6978_v14 = vpop.permute.xlu2 %6977 }
 0xa46   : > { %v7092_v23 = vmul.f32 %v6978_v14, %v13849_v32  ;;  %v13851_v14 = vld [vmem:[#allocation29_spill] sm:$0xff] }
 0xa48   : > { %v7124_v45 = vadd.f32 %v7092_v23, %v6852_v18 }
 0xa4a   : > { %v7157_v22 = vmul.f32 %v13169_v24, %v7124_v45 }
 0xa4b   : > { %7016 = vperm.xlu2 %8344, %v7011_v31  }
 0xa4c   : > { %v7190_v55 = vsub.f32 %v13172_v34, %v7157_v22 }
 0xa4e   : > { %v7302_v30 = vmul.f32 1.442695, %v7190_v55  ;;  %v7254_v50 = vsub.f32 0.0, %v7190_v55  ;;  %vm7222_vm2 = vcmp.gt.f32.partialorder %v7190_v55, 20.0  ;;  %v6821_v55 = vpop.trf.xlu1 }
 0xa50   : > { %8754 = vpow2.f32 %v7302_v30 }
 0xa53   : > { %8345 = vset.pattern.permute.xlu2 %v13102_v47 }
 0xa55   : > { %v6984_v57 = vpop.permute.xlu2 %6983 }
 0xa56   : > { %v8755_v62 = vpop.eup %8754  ;;  %v7093_v8 = vmul.f32 %v6984_v57, %v13850_v5 }
 0xa57   : > { %v7350_v3 = vadd.f32 1.0, %v8755_v62 }
 0xa58   : > { %v7125_v56 = vadd.f32 %v7093_v8, %v6853_v33  ;;  %v7050_v33 = vperm.slane %v13126_v6, 6 }
 0xa59   : > { %8756 = vlog2.f32 %v7350_v3 }
 0xa5a   : > { %v7158_v27 = vmul.f32 %v13169_v24, %v7125_v56 }
 0xa5b   : > { %7022 = vperm.xlu2 %8345, %v7011_v31  }
 0xa5c   : > { %v7191_v46 = vsub.f32 %v13172_v34, %v7158_v27 }
 0xa5e   : > { %v7304_v43 = vmul.f32 1.442695, %v7191_v46  ;;  %v7255_v53 = vsub.f32 0.0, %v7191_v46  ;;  %vm7223_vm3 = vcmp.gt.f32.partialorder %v7191_v46, 20.0 }
 0xa5f   : > { %v8757_v21 = vpop.eup %8756 }
 0xa60   : > { %v7399_v19 = vmul.f32 0.6931472, %v8757_v21 }
 0xa62   : > { %v7446_v10 = vsub.f32 0.0, %v7399_v19  ;;  %v6822_v19 = vpop.trf.xlu1 }
 0xa63   : > { %8346 = vset.pattern.permute.xlu2 %v13095_v12 }
 0xa64   : > { %v7478_v25 = vsel %vm7222_vm2, %v7254_v50, %v7446_v10 }
 0xa65   : > { %v7511_v0 = vmul.f32 %v13177_v11, %v7478_v25  ;;  %v6991_v4 = vpop.permute.xlu2 %6990  ;;  %v13852_v25 = vld [vmem:[#allocation30_spill] sm:$0xff] }
 0xa66   : > { %v7094_v32 = vmul.f32 %v6991_v4, %v13851_v14 }
 0xa67   : > { %v7559_v15 = vmul.f32 1.442695, %v7511_v0  ;;  %v13853_v0 = vld [vmem:[#allocation11_spill] sm:$0xff] }
 0xa68   : > { %v13194_v18 = vadd.f32 %v7094_v32, %v6854_v40  ;;  %v7076_v5 = vmul.f32 %v13129_v41, %v13853_v0 }
 0xa69   : > { %8758 = vpow2.f32 %v7559_v15 }
 0xa6a   : > { %8760 = vpow2.f32 %v7304_v43  ;;  %v7159_v22 = vmul.f32 %v13169_v24, %v13194_v18  ;;  %v13213_v27 = vadd.f32 %v7076_v5, %v6820_v1  ;;  %v6823_v43 = vpop.trf.xlu1  ;;  %v13854_v1 = vld [vmem:[#allocation31_spill] sm:$0xff]  ;;  %v13857_v5 = vld [vmem:[#allocation32_spill] sm:$0xff] }
 0xa6b   : > { %7029 = vperm.xlu2 %8346, %v7024_v58  }
 0xa6c   : > { %v7141_v41 = vmul.f32 %v13169_v24, %v13213_v27 }
 0xa6f   : > { %v8759_v9 = vpop.eup %8758 }
 0xa70   : > { %v7607_v13 = vmul.f32 %v8759_v9, %v7124_v45  ;;  %v8761_v44 = vpop.eup %8760  ;;  %v13196_v45 = vpop.trf.xlu0 }
 0xa71   : > { %v7351_v52 = vadd.f32 1.0, %v8761_v44 }
 0xa72   : > { %7655 = vxpose.xlu1.b32.start [1/16] (narrow) %v7607_v13, 64 }
 0xa73   : > { %8347 = vset.pattern.permute.xlu2 %v13102_v47  ;;  %8762 = vlog2.f32 %v7351_v52 }
 0xa75   : > { %v6997_v10 = vpop.permute.xlu2 %6996 }
 0xa76   : > { %v7095_v57 = vmul.f32 %v6997_v10, %v13852_v25  ;;  %v7063_v10 = vperm.slane %v13126_v6, 7 }
 0xa78   : > { %v13203_v21 = vpop.trf.xlu0  ;;  %v13211_v15 = vadd.f32 %v7095_v57, %v6855_v59 }
 0xa79   : > { %v8763_v38 = vpop.eup %8762 }
 0xa7a   : > { %v7401_v7 = vmul.f32 0.6931472, %v8763_v38  ;;  %v7160_v46 = vmul.f32 %v13169_v24, %v13211_v15 }
 0xa7b   : > { %7035 = vperm.xlu2 %8347, %v7024_v58   ;;  %v7192_v58 = vsub.f32 %v13172_v34, %v7159_v22 }
 0xa7c   : > { %v7447_v36 = vsub.f32 0.0, %v7401_v7  ;;  %v13218_v9 = vsub.f32 %v13172_v34, %v7160_v46  ;;  %v13858_v46 = vld [vmem:[#allocation14_spill] sm:$0xff] }
 0xa7d   : > { %v7306_v30 = vmul.f32 1.442695, %v7192_v58  ;;  %v7256_v13 = vsub.f32 0.0, %v7192_v58  ;;  %vm7224_vm0 = vcmp.gt.f32.partialorder %v7192_v58, 20.0 }
 0xa7e   : > { %v7479_v54 = vsel %vm7223_vm3, %v7255_v53, %v7447_v36  ;;  %v7308_v59 = vmul.f32 1.442695, %v13218_v9  ;;  %v13855_v36 = vld [vmem:[#allocation12_spill] sm:$0xff]  ;;  %vm7225_vm12 = vcmp.gt.f32.partialorder %v13218_v9, 20.0 }
 0xa7f   : > { %v7512_v31 = vmul.f32 %v13177_v11, %v7479_v54  ;;  %v7077_v54 = vmul.f32 %v13132_v26, %v13855_v36 }
 0xa80   : > { %v13209_v8 = vpop.trf.xlu0 }
 0xa81   : > { %v7561_v23 = vmul.f32 1.442695, %v7512_v31  ;;  %v13230_v31 = vsub.f32 %v13172_v34, %v7141_v41  ;;  %v13237_v58 = vadd.f32 %v7077_v54, %v6821_v55 }
 0xa83   : > { %8348 = vset.pattern.permute.xlu2 %v13095_v12  ;;  %8764 = vpow2.f32 %v7561_v23  ;;  %v13856_v23 = vld [vmem:[#allocation13_spill] sm:$0xff]  ;;  %vm7206_vm1 = vcmp.gt.f32.partialorder %v13230_v31, 20.0 }
 0xa84   : > { %8766 = vpow2.f32 %v7306_v30  ;;  %v7078_v22 = vmul.f32 %v13134_v2, %v13856_v23  ;;  %v6824_v30 = vpop.trf.xlu1  ;;  %v7142_v2 = vmul.f32 %v13169_v24, %v13237_v58 }
 0xa85   : > { %v7004_v7 = vpop.permute.xlu2 %7003 }
 0xa86   : > { %v7096_v53 = vmul.f32 %v7004_v7, %v13854_v1  ;;  %v13258_v57 = vsub.f32 %v13172_v34, %v7142_v2 }
 0xa88   : > { %v13227_v4 = vpop.trf.xlu0  ;;  %v13233_v32 = vadd.f32 %v7096_v53, %v13185_v16  ;;  %v7257_v53 = vsub.f32 0.0, %v13218_v9  ;;  %vm7207_vm7 = vcmp.gt.f32.partialorder %v13258_v57, 20.0 }
 0xa89   : > { %v8765_v62 = vpop.eup %8764 }
 0xa8a   : > { %v7608_v3 = vmul.f32 %v8765_v62, %v7125_v56  ;;  %v8767_v40 = vpop.eup %8766  ;;  %v7161_v26 = vmul.f32 %v13169_v24, %v13233_v32  ;;  %v7270_v62 = vmul.f32 1.442695, %v13230_v31 }
 0xa8b   : > { %7042 = vperm.xlu2 %8348, %v7037_v39   ;;  %v7352_v50 = vadd.f32 1.0, %v8767_v40 }
 0xa8c   : > { %7656 = vxpose.xlu1.b32.cont [2/16] (narrow) %v7608_v3, 64  ;;  %v13243_v3 = vadd.f32 %v7078_v22, %v6822_v19  ;;  %v13246_v16 = vsub.f32 %v13172_v34, %v7161_v26 }
 0xa8d   : > { %8768 = vlog2.f32 %v7352_v50 }
 0xa8e   : > { %8770 = vpow2.f32 %v7308_v59  ;;  %v7310_v50 = vmul.f32 1.442695, %v13246_v16  ;;  %v7272_v59 = vmul.f32 1.442695, %v13258_v57  ;;  %vm7226_vm13 = vcmp.gt.f32.partialorder %v13246_v16, 20.0 }
 0xa90   : > { %v13255_v25 = vpop.trf.xlu0 }
 0xa93   : > { %8349 = vset.pattern.permute.xlu2 %v13102_v47  ;;  %v8769_v56 = vpop.eup %8768 }
 0xa95   : > { %v7010_v0 = vpop.permute.xlu2 %7009 }
 0xa98   : > { %v13286_v26 = vpop.trf.xlu0 }
 0xa9b   : > { %7048 = vperm.xlu2 %8349, %v7037_v39   ;;  %v7403_v39 = vmul.f32 0.6931472, %v8769_v56  ;;  %v7097_v56 = vmul.f32 %v7010_v0, %v13857_v5 }
 0xa9d   : > { %v7448_v44 = vsub.f32 0.0, %v7403_v39  ;;  %v7079_v39 = vmul.f32 %v13137_v35, %v13858_v46 }
 0xa9f   : > { %v7480_v52 = vsel %vm7224_vm0, %v7256_v13, %v7448_v44  ;;  %v13266_v44 = vpop.trf.xlu1 }
 0xaa0   : > { %v7513_v38 = vmul.f32 %v13177_v11, %v7480_v52  ;;  %v13272_v52 = vadd.f32 %v7079_v39, %v6823_v43 }
 0xaa2   : > { %v7563_v14 = vmul.f32 1.442695, %v7513_v38  ;;  %v7144_v43 = vmul.f32 %v13169_v24, %v13272_v52 }
 0xaa3   : > { %8350 = vset.pattern.permute.xlu2 %v13095_v12 }
 0xaa4   : > { %8772 = vpow2.f32 %v7563_v14  ;;  %v13292_v2 = vsub.f32 %v13172_v34, %v7144_v43  ;;  %v13861_v43 = vld [vmem:[#allocation16_spill] sm:$0xff] }
 0xaa6   : > { %v7276_v39 = vmul.f32 1.442695, %v13292_v2  ;;  %vm7209_vm5 = vcmp.gt.f32.partialorder %v13292_v2, 20.0 }
 0xaab   : > { %7055 = vperm.xlu2 %8350, %v7050_v33  }
 0xab3   : > { %8351 = vset.pattern.permute.xlu2 %v13102_v47 }
 0xabb   : > { %7061 = vperm.xlu2 %8351, %v7050_v33   ;;  %v8771_v33 = vpop.eup %8770 }
 0xabc   : > { %v7353_v40 = vadd.f32 1.0, %v8771_v33  ;;  %v8773_v55 = vpop.eup %8772 }
 0xabd   : > { %v7609_v19 = vmul.f32 %v8773_v55, %v13194_v18  ;;  %v13269_v18 = vadd.f32 %v7097_v56, %v13190_v37  ;;  %v7017_v55 = vpop.permute.xlu2 %7016 }
 0xabe   : > { %8774 = vlog2.f32 %v7353_v40 }
 0xabf   : > { %8776 = vpow2.f32 %v7270_v62  ;;  %7657 = vxpose.xlu1.b32.cont [3/16] (narrow) %v7609_v19, 64  ;;  %v7162_v7 = vmul.f32 %v13169_v24, %v13269_v18  ;;  %v13859_v62 = vld [vmem:[#allocation15_spill] sm:$0xff] }
 0xac0   : > { %8778 = vpow2.f32 %v7310_v50  ;;  %v7080_v40 = vmul.f32 %v13140_v20, %v13859_v62 }
 0xac1   : > { %v13280_v14 = vsub.f32 %v13172_v34, %v7162_v7  ;;  %8780 = vpow2.f32 %v7272_v59 }
 0xac2   : > { %v13295_v0 = vadd.f32 %v7080_v40, %v6824_v30  ;;  %v7258_v30 = vsub.f32 0.0, %v13246_v16 }
 0xac3   : > { %8352 = vset.pattern.permute.xlu2 %v13095_v12  ;;  %v7143_v12 = vmul.f32 %v13169_v24, %v13243_v3  ;;  %v7312_v33 = vmul.f32 1.442695, %v13280_v14  ;;  %vm7227_vm4 = vcmp.gt.f32.partialorder %v13280_v14, 20.0 }
 0xac4   : > { %v8775_v6 = vpop.eup %8774  ;;  %v7145_v7 = vmul.f32 %v13169_v24, %v13295_v0 }
 0xac5   : > { %v13264_v13 = vsub.f32 %v13172_v34, %v7143_v12  ;;  %v8777_v41 = vpop.eup %8776  ;;  %v7405_v38 = vmul.f32 0.6931472, %v8775_v6  ;;  %v6826_v12 = vpop.trf.xlu1 }
 0xac6   : > { %v8779_v1 = vpop.eup %8778  ;;  %v7334_v54 = vadd.f32 1.0, %v8777_v41  ;;  %v13317_v16 = vsub.f32 %v13172_v34, %v7145_v7 }
 0xac7   : > { %v7274_v35 = vmul.f32 1.442695, %v13264_v13  ;;  %v7449_v36 = vsub.f32 0.0, %v7405_v38  ;;  %v7354_v37 = vadd.f32 1.0, %v8779_v1  ;;  %v8781_v19 = vpop.eup %8780  ;;  %vm7208_vm6 = vcmp.gt.f32.partialorder %v13264_v13, 20.0 }
 0xac8   : > { %v7335_v38 = vadd.f32 1.0, %v8781_v19  ;;  %vm7210_vm9 = vcmp.gt.f32.partialorder %v13317_v16, 20.0 }
 0xac9   : > { %v7481_v23 = vsel %vm7225_vm12, %v7257_v53, %v7449_v36  ;;  %8782 = vlog2.f32 %v7354_v37 }
 0xaca   : > { %v7514_v22 = vmul.f32 %v13177_v11, %v7481_v23  ;;  %8784 = vpow2.f32 %v7274_v35  ;;  %v7081_v23 = vmul.f32 %v13143_v60, %v13861_v43  ;;  %v7023_v60 = vpop.permute.xlu2 %7022 }
 0xacb   : > { %7068 = vperm.xlu2 %8352, %v7063_v10   ;;  %8786 = vlog2.f32 %v7334_v54 }
 0xacc   : > { %v7565_v9 = vmul.f32 1.442695, %v7514_v22  ;;  %8788 = vpow2.f32 %v7312_v33  ;;  %v13321_v62 = vadd.f32 %v7081_v23, %v13266_v44 }
 0xace   : > { %8790 = vpow2.f32 %v7565_v9 }
 0xacf   : > { %v8783_v5 = vpop.eup %8782  ;;  %8792 = vpow2.f32 %v7276_v39  ;;  %v7238_v39 = vsub.f32 0.0, %v13230_v31 }
 0xad0   : > { %v8785_v46 = vpop.eup %8784  ;;  %v7407_v20 = vmul.f32 0.6931472, %v8783_v5  ;;  %v7278_v5 = vmul.f32 1.442695, %v13317_v16 }
 0xad1   : > { %v8787_v6 = vpop.eup %8786 }
 0xad2   : > { %v8789_v59 = vpop.eup %8788  ;;  %v7450_v1 = vsub.f32 0.0, %v7407_v20  ;;  %v7367_v22 = vmul.f32 0.6931472, %v8787_v6  ;;  %v7146_v20 = vmul.f32 %v13169_v24, %v13321_v62 }
 0xad3   : > { %8353 = vset.pattern.permute.xlu2 %v13102_v47  ;;  %v13860_v47 = vld [vmem:[#allocation33_spill] sm:$0xff]  ;;  %v7355_v53 = vadd.f32 1.0, %v8789_v59 }
 0xad4   : > { %v7098_v50 = vmul.f32 %v7017_v55, %v13860_v47  ;;  %v8791_v35 = vpop.eup %8790  ;;  %v7482_v37 = vsel %vm7226_vm13, %v7258_v30, %v7450_v1  ;;  %v7430_v55 = vsub.f32 0.0, %v7367_v22  ;;  %v13862_v47 = vld [vmem:[#allocation34_spill] sm:$0xff] }
 0xad5   : > { %v7610_v54 = vmul.f32 %v8791_v35, %v13211_v15  ;;  %v7515_v33 = vmul.f32 %v13177_v11, %v7482_v37  ;;  %8794 = vlog2.f32 %v7355_v53  ;;  %v13323_v15 = vpop.trf.xlu1  ;;  %v8793_v19 = vpop.eup %8792 }
 0xad6   : > { %v13298_v56 = vadd.f32 %v7098_v50, %v13196_v45  ;;  %v7336_v45 = vadd.f32 1.0, %v8785_v46  ;;  %8796 = vlog2.f32 %v7335_v38  ;;  %v7099_v50 = vmul.f32 %v7023_v60, %v13862_v47 }
 0xad7   : > { %7658 = vxpose.xlu1.b32.cont [4/16] (narrow) %v7610_v54, 64  ;;  %v7567_v40 = vmul.f32 1.442695, %v7515_v33  ;;  %v7462_v30 = vsel %vm7206_vm1, %v7238_v39, %v7430_v55  ;;  %v7337_v1 = vadd.f32 1.0, %v8793_v19 }
 0xad8   : > { %v7163_v41 = vmul.f32 %v13169_v24, %v13298_v56  ;;  %8798 = vlog2.f32 %v7336_v45  ;;  %v13331_v44 = vadd.f32 %v7099_v50, %v13203_v21  ;;  %v7259_v21 = vsub.f32 0.0, %v13280_v14 }
 0xada   : > { %v13308_v36 = vsub.f32 %v13172_v34, %v7163_v41  ;;  %v13863_v41 = vld [vmem:[#allocation17_spill] sm:$0xff]  ;;  %v7164_v35 = vmul.f32 %v13169_v24, %v13331_v44 }
 0xadb   : > { %7074 = vperm.xlu2 %8353, %v7063_v10   ;;  %v13310_v10 = vpop.trf.xlu0  ;;  %v8795_v46 = vpop.eup %8794  ;;  %v7082_v59 = vmul.f32 %v13145_v49, %v13863_v41  ;;  %v13344_v49 = vsub.f32 %v13172_v34, %v7146_v20 }
 0xadc   : > { %v7314_v9 = vmul.f32 1.442695, %v13308_v36  ;;  %v8797_v6 = vpop.eup %8796  ;;  %v7409_v38 = vmul.f32 0.6931472, %v8795_v46  ;;  %v13348_v23 = vsub.f32 %v13172_v34, %v7164_v35  ;;  %v7030_v46 = vpop.permute.xlu2 %7029  ;;  %v7240_v35 = vsub.f32 0.0, %v13264_v13 }
 0xadd   : > { %v13340_v54 = vadd.f32 %v7082_v59, %v6826_v12  ;;  %v7369_v22 = vmul.f32 0.6931472, %v8797_v6  ;;  %v7495_v12 = vmul.f32 %v13177_v11, %v7462_v30  ;;  %v6828_v60 = vpop.trf.xlu1  ;;  %v7280_v50 = vmul.f32 1.442695, %v13344_v49  ;;  %v13864_v6 = vld [vmem:[#allocation35_spill] sm:$0xff]  ;;  %v13865_v59 = vld [vmem:[#allocation18_spill] sm:$0xff] }
 0xade   : > { %8800 = vpow2.f32 %v7314_v9  ;;  %v8799_v7 = vpop.eup %8798  ;;  %v7451_v37 = vsub.f32 0.0, %v7409_v38  ;;  %v7316_v14 = vmul.f32 1.442695, %v13348_v23  ;;  %v7100_v41 = vmul.f32 %v7030_v46, %v13864_v6 }
 0xadf   : > { %8802 = vpow2.f32 %v7567_v40  ;;  %v7371_v40 = vmul.f32 0.6931472, %v8799_v7  ;;  %v7147_v47 = vmul.f32 %v13169_v24, %v13340_v54  ;;  %v7527_v39 = vmul.f32 1.442695, %v7495_v12 }
 0xae0   : > { %8804 = vpow2.f32 %v7278_v5  ;;  %v7483_v9 = vsel %vm7227_vm4, %v7259_v21, %v7451_v37  ;;  %v7083_v38 = vmul.f32 %v13148_v42, %v13865_v59  ;;  %v7239_v7 = vsub.f32 0.0, %v13258_v57 }
 0xae1   : > { %v7516_v55 = vmul.f32 %v13177_v11, %v7483_v9  ;;  %v7432_v20 = vsub.f32 0.0, %v7371_v40  ;;  %v13362_v30 = vsub.f32 %v13172_v34, %v7147_v47  ;;  %vm7228_vm15 = vcmp.gt.f32.partialorder %v13308_v36, 20.0 }
 0xae2   : > { %v13376_v12 = vadd.f32 %v7083_v38, %v13323_v15  ;;  %v13866_v15 = vld [vmem:[#allocation19_spill] sm:$0xff]  ;;  %vm7229_vm8 = vcmp.gt.f32.partialorder %v13348_v23, 20.0  ;;  %vm7211_vm10 = vcmp.gt.f32.partialorder %v13344_v49, 20.0 }
 0xae3   : > { %v13338_v53 = vpop.trf.xlu0  ;;  %v7569_v19 = vmul.f32 1.442695, %v7516_v55  ;;  %v7282_v9 = vmul.f32 1.442695, %v13362_v30  ;;  %v7084_v46 = vmul.f32 %v13151_v48, %v13866_v15  ;;  %vm7212_vm14 = vcmp.gt.f32.partialorder %v13362_v30, 20.0 }
 0xae4   : > { %v8801_v45 = vpop.eup %8800  ;;  %v7036_v48 = vpop.permute.xlu2 %7035 }
 0xae5   : > { %v8803_v43 = vpop.eup %8802  ;;  %v7356_v31 = vadd.f32 1.0, %v8801_v45  ;;  %v13367_v45 = vadd.f32 %v7100_v41, %v13209_v8  ;;  %v7260_v8 = vsub.f32 0.0, %v13308_v36  ;;  %v6829_v47 = vpop.trf.xlu1  ;;  %v7148_v36 = vmul.f32 %v13169_v24, %v13376_v12 }
 0xae6   : > { %v7611_v33 = vmul.f32 %v8803_v43, %v13233_v32  ;;  %v8805_v5 = vpop.eup %8804  ;;  %v7431_v32 = vsub.f32 0.0, %v7369_v22  ;;  %v7464_v22 = vsel %vm7208_vm6, %v7240_v35, %v7432_v20 }
 0xae7   : > { %8806 = vlog2.f32 %v7356_v31  ;;  %v7338_v42 = vadd.f32 1.0, %v8805_v5 }
 0xae8   : > { %7659 = vxpose.xlu1.b32.cont [5/16] (narrow) %v7611_v33, 64  ;;  %8808 = vlog2.f32 %v7337_v1  ;;  %v7463_v37 = vsel %vm7207_vm7, %v7239_v7, %v7431_v32  ;;  %v7165_v33 = vmul.f32 %v13169_v24, %v13367_v45 }
 0xae9   : > { %8810 = vpow2.f32 %v7316_v14  ;;  %v7496_v13 = vmul.f32 %v13177_v11, %v7463_v37  ;;  %v13867_v37 = vld [vmem:[#allocation36_spill] sm:$0xff] }
 0xaea   : > { %8812 = vpow2.f32 %v7569_v19 }
 0xaeb   : > { %8814 = vpow2.f32 %v7280_v50  ;;  %v13369_v21 = vpop.trf.xlu0  ;;  %v13382_v50 = vsub.f32 %v13172_v34, %v7165_v33 }
 0xaec   : > { %8816 = vpow2.f32 %v7527_v39  ;;  %v7497_v39 = vmul.f32 %v13177_v11, %v7464_v22  ;;  %v13868_v22 = vld [vmem:[#allocation20_spill] sm:$0xff] }
 0xaed   : > { %v8807_v1 = vpop.eup %8806  ;;  %8818 = vlog2.f32 %v7338_v42  ;;  %v7318_v41 = vmul.f32 1.442695, %v13382_v50  ;;  %v7101_v42 = vmul.f32 %v7036_v48, %v13867_v37  ;;  %v7085_v33 = vmul.f32 %v13154_v17, %v13868_v22 }
 0xaee   : > { %v7411_v43 = vmul.f32 0.6931472, %v8807_v1  ;;  %v8809_v31 = vpop.eup %8808  ;;  %v13392_v1 = vadd.f32 %v7084_v46, %v6828_v60  ;;  %v7531_v35 = vmul.f32 1.442695, %v7497_v39  ;;  %v7261_v39 = vsub.f32 0.0, %v13348_v23 }
 0xaef   : > { %v8811_v57 = vpop.eup %8810  ;;  %v7373_v6 = vmul.f32 0.6931472, %v8809_v31  ;;  %v7242_v37 = vsub.f32 0.0, %v13317_v16  ;;  %v7243_v16 = vsub.f32 0.0, %v13344_v49  ;;  %vm7230_vm11 = vcmp.gt.f32.partialorder %v13382_v50, 20.0 }
 0xaf0   : > { %v7452_v40 = vsub.f32 0.0, %v7411_v43  ;;  %v8813_v55 = vpop.eup %8812  ;;  %v7357_v14 = vadd.f32 1.0, %v8811_v57 }
 0xaf1   : > { %v7612_v19 = vmul.f32 %v8813_v55, %v13269_v18  ;;  %v8815_v32 = vpop.eup %8814  ;;  %v7529_v18 = vmul.f32 1.442695, %v7496_v13  ;;  %v7433_v57 = vsub.f32 0.0, %v7373_v6  ;;  %v13405_v55 = vadd.f32 %v7101_v42, %v13227_v4 }
 0xaf2   : > { %v7484_v5 = vsel %vm7228_vm15, %v7260_v8, %v7452_v40  ;;  %8820 = vlog2.f32 %v7357_v14  ;;  %v8817_v59 = vpop.eup %8816  ;;  %v7339_v7 = vadd.f32 1.0, %v8815_v32  ;;  %v7241_v40 = vsub.f32 0.0, %v13292_v2  ;;  %v6830_v32 = vpop.trf.xlu1 }
 0xaf3   : > { %v7517_v20 = vmul.f32 %v13177_v11, %v7484_v5  ;;  %8822 = vpow2.f32 %v7282_v9  ;;  %7660 = vxpose.xlu1.b32.cont [6/16] (narrow) %v7612_v19, 64  ;;  %v8819_v43 = vpop.eup %8818  ;;  %v13395_v31 = vpop.trf.xlu0  ;;  %v13400_v9 = vsub.f32 %v13172_v34, %v7148_v36  ;;  %v7591_v60 = vmul.f32 %v8817_v59, %v13213_v27 }
 0xaf4   : > { %8824 = vpow2.f32 %v7318_v41  ;;  %v7149_v14 = vmul.f32 %v13169_v24, %v13392_v1  ;;  %v13409_v19 = vadd.f32 %v7085_v33, %v6829_v47  ;;  %v7375_v5 = vmul.f32 0.6931472, %v8819_v43  ;;  %v13869_v33 = vld [vmem:[#allocation21_spill] sm:$0xff] }
 0xaf5   : > { %v7571_v38 = vmul.f32 1.442695, %v7517_v20  ;;  %v7166_v27 = vmul.f32 %v13169_v24, %v13405_v55  ;;  %v7465_v46 = vsel %vm7209_vm5, %v7241_v40, %v7433_v57  ;;  %v7284_v4 = vmul.f32 1.442695, %v13400_v9 }
 0xaf6   : > { %v13421_v41 = vsub.f32 %v13172_v34, %v7149_v14  ;;  %v7150_v59 = vmul.f32 %v13169_v24, %v13409_v19  ;;  %v7498_v48 = vmul.f32 %v13177_v11, %v7465_v46  ;;  %v7434_v22 = vsub.f32 0.0, %v7375_v5  ;;  %v7043_v14 = vpop.permute.xlu2 %7042 }
 0xaf7   : > { %8826 = vpow2.f32 %v7571_v38  ;;  %v13418_v2 = vsub.f32 %v13172_v34, %v7166_v27  ;;  %v7086_v57 = vmul.f32 %v13156_v29, %v13869_v33  ;;  %vm7213_vm3 = vcmp.gt.f32.partialorder %v13400_v9, 20.0 }
 0xaf8   : > { %v8821_v8 = vpop.eup %8820  ;;  %8828 = vpow2.f32 %v7529_v18  ;;  %v7286_v40 = vmul.f32 1.442695, %v13421_v41  ;;  %vm7214_vm12 = vcmp.gt.f32.partialorder %v13421_v41, 20.0 }
 0xaf9   : > { %v8823_v13 = vpop.eup %8822  ;;  %8830 = vlog2.f32 %v7339_v7  ;;  %v7413_v17 = vmul.f32 0.6931472, %v8821_v8  ;;  %v7320_v42 = vmul.f32 1.442695, %v13418_v2  ;;  %v13439_v29 = vadd.f32 %v7086_v57, %v6830_v32 }
 0xafa   : > { %8832 = vpow2.f32 %v7531_v35  ;;  %v8825_v15 = vpop.eup %8824  ;;  %v7340_v47 = vadd.f32 1.0, %v8823_v13  ;;  %v13435_v13 = vsub.f32 %v13172_v34, %v7150_v59  ;;  %vm7231_vm2 = vcmp.gt.f32.partialorder %v13418_v2, 20.0 }
 0xafb   : > { %v7453_v20 = vsub.f32 0.0, %v7413_v17  ;;  %v7358_v36 = vadd.f32 1.0, %v8825_v15  ;;  %v7533_v17 = vmul.f32 1.442695, %v7498_v48  ;;  %v13870_v15 = vld [vmem:[#allocation37_spill] sm:$0xff] }
 0xafc   : > { %v7102_v5 = vmul.f32 %v7043_v14, %v13870_v15  ;;  %vm7215_vm13 = vcmp.gt.f32.partialorder %v13435_v13, 20.0 }
 0xafd   : > { %v8827_v6 = vpop.eup %8826  ;;  %v7485_v38 = vsel %vm7229_vm8, %v7261_v39, %v7453_v20  ;;  %8834 = vlog2.f32 %v7358_v36  ;;  %v7466_v39 = vsel %vm7210_vm9, %v7242_v37, %v7434_v22  ;;  %v6831_v20 = vpop.trf.xlu1  ;;  %v7288_v36 = vmul.f32 1.442695, %v13435_v13 }
 0xafe   : > { %v7613_v18 = vmul.f32 %v8827_v6, %v13298_v56  ;;  %v8829_v7 = vpop.eup %8828  ;;  %v7518_v35 = vmul.f32 %v13177_v11, %v7485_v38  ;;  %8836 = vpow2.f32 %v7284_v4  ;;  %v13443_v6 = vadd.f32 %v7102_v5, %v13255_v25  ;;  %v7049_v5 = vpop.permute.xlu2 %7048 }
 0xaff   : > { %v8831_v23 = vpop.eup %8830  ;;  %8838 = vlog2.f32 %v7340_v47  ;;  %v7592_v8 = vmul.f32 %v8829_v7, %v13237_v58  ;;  %v13871_v58 = vld [vmem:[#allocation22_spill] sm:$0xff]  ;;  %v7499_v48 = vmul.f32 %v13177_v11, %v7466_v39  ;;  %v7151_v25 = vmul.f32 %v13169_v24, %v13439_v29 }
 0xb00   : > { %7661 = vxpose.xlu1.b32.cont [7/16] (narrow) %v7613_v18, 64  ;;  %v8833_v43 = vpop.eup %8832  ;;  %v7573_v56 = vmul.f32 1.442695, %v7518_v35  ;;  %8840 = vpow2.f32 %v7320_v42  ;;  %v7377_v27 = vmul.f32 0.6931472, %v8831_v23  ;;  %v7167_v38 = vmul.f32 %v13169_v24, %v13443_v6 }
 0xb01   : > { %7623 = vxpose.xlu2.b32.start [1/16] (narrow) %v7591_v60, 64  ;;  %v6945_v60 = vpop.permute.xlu0 %6944  ;;  %v7262_v35 = vsub.f32 0.0, %v13382_v50  ;;  %v7593_v57 = vmul.f32 %v8833_v43, %v13243_v3  ;;  %v13464_v50 = vsub.f32 %v13172_v34, %v7151_v25  ;;  %v7535_v43 = vmul.f32 1.442695, %v7499_v48 }
 0xb02   : > { %8842 = vpow2.f32 %v7573_v56  ;;  %v7087_v4 = vmul.f32 %v6945_v60, %v13871_v58  ;;  %v7435_v32 = vsub.f32 0.0, %v7377_v27  ;;  %v13456_v33 = vsub.f32 %v13172_v34, %v7167_v38 }
 0xb03   : > { %v8835_v46 = vpop.eup %8834  ;;  %8844 = vpow2.f32 %v7286_v40  ;;  %vm7216_vm4 = vcmp.gt.f32.partialorder %v13464_v50, 20.0 }
 0xb04   : > { %v8837_v47 = vpop.eup %8836  ;;  %v7415_v59 = vmul.f32 0.6931472, %v8835_v46  ;;  %8846 = vpow2.f32 %v7533_v17  ;;  %v7467_v60 = vsel %vm7211_vm10, %v7243_v16, %v7435_v32  ;;  %v7322_v27 = vmul.f32 1.442695, %v13456_v33 }
 0xb05   : > { %v8839_v18 = vpop.eup %8838  ;;  %v7341_v42 = vadd.f32 1.0, %v8837_v47  ;;  %8848 = vpow2.f32 %v7288_v36  ;;  %v7500_v49 = vmul.f32 %v13177_v11, %v7467_v60  ;;  %v6832_v39 = vpop.trf.xlu1  ;;  %v13872_v47 = vld [vmem:[#allocation38_spill] sm:$0xff]  ;;  %v7244_v32 = vsub.f32 0.0, %v13362_v30 }
 0xb06   : > { %v8841_v7 = vpop.eup %8840  ;;  %v7454_v23 = vsub.f32 0.0, %v7415_v59  ;;  %v7379_v40 = vmul.f32 0.6931472, %v8839_v18  ;;  %v7103_v36 = vmul.f32 %v7049_v5, %v13872_v47  ;;  %v7290_v18 = vmul.f32 1.442695, %v13464_v50 }
 0xb07   : > { %v7359_v22 = vadd.f32 1.0, %v8841_v7  ;;  %v7537_v7 = vmul.f32 1.442695, %v7500_v49  ;;  %vm7232_vm0 = vcmp.gt.f32.partialorder %v13456_v33, 20.0 }
 0xb08   : > { %v8843_v37 = vpop.eup %8842  ;;  %v7436_v46 = vsub.f32 0.0, %v7379_v40 }
 0xb09   : > { %7624 = vxpose.xlu2.b32.cont [2/16] (narrow) %v7592_v8, 64  ;;  %v7614_v56 = vmul.f32 %v8843_v37, %v13331_v44  ;;  %v7486_v8 = vsel %vm7230_vm11, %v7262_v35, %v7454_v23  ;;  %8850 = vlog2.f32 %v7359_v22  ;;  %v8845_v17 = vpop.eup %8844  ;;  %v13467_v44 = vadd.f32 %v7087_v4, %v6831_v20  ;;  %v13873_v35 = vld [vmem:[#allocation23_spill] sm:$0xff] }
 0xb0a   : > { %v7519_v14 = vmul.f32 %v13177_v11, %v7486_v8  ;;  %v8847_v3 = vpop.eup %8846  ;;  %8852 = vlog2.f32 %v7341_v42  ;;  %v7342_v58 = vadd.f32 1.0, %v8845_v17  ;;  %v13476_v20 = vadd.f32 %v7103_v36, %v13286_v26  ;;  %v7056_v36 = vpop.permute.xlu2 %7055 }
 0xb0b   : > { %7662 = vxpose.xlu1.b32.cont [8/16] (narrow) %v7614_v56, 64  ;;  %8854 = vpow2.f32 %v7322_v27  ;;  %v8849_v59 = vpop.eup %8848  ;;  %v7152_v4 = vmul.f32 %v13169_v24, %v13467_v44  ;;  %v7594_v38 = vmul.f32 %v8847_v3, %v13272_v52  ;;  %v7088_v23 = vmul.f32 %v13159_v61, %v13873_v35 }
 0xb0c   : > { %v7575_v15 = vmul.f32 1.442695, %v7519_v14  ;;  %v7468_v37 = vsel %vm7212_vm14, %v7244_v32, %v7436_v46  ;;  %v7168_v42 = vmul.f32 %v13169_v24, %v13476_v20  ;;  %v7263_v26 = vsub.f32 0.0, %v13418_v2 }
 0xb0d   : > { %v13486_v30 = vsub.f32 %v13172_v34, %v7152_v4  ;;  %v7501_v27 = vmul.f32 %v13177_v11, %v7468_v37  ;;  %v6833_v5 = vpop.trf.xlu1  ;;  %v7245_v32 = vsub.f32 0.0, %v13400_v9 }
 0xb0e   : > { %8856 = vpow2.f32 %v7575_v15  ;;  %v13490_v61 = vsub.f32 %v13172_v34, %v7168_v42 }
 0xb0f   : > { %v8851_v16 = vpop.eup %8850  ;;  %8858 = vpow2.f32 %v7535_v43  ;;  %v13495_v43 = vadd.f32 %v7088_v23, %v6832_v39  ;;  %v7292_v49 = vmul.f32 1.442695, %v13486_v30  ;;  %vm7217_vm6 = vcmp.gt.f32.partialorder %v13486_v30, 20.0 }
 0xb10   : > { %v7417_v48 = vmul.f32 0.6931472, %v8851_v16  ;;  %v8853_v25 = vpop.eup %8852  ;;  %8860 = vlog2.f32 %v7342_v58  ;;  %v7324_v2 = vmul.f32 1.442695, %v13490_v61  ;;  %vm7233_vm1 = vcmp.gt.f32.partialorder %v13490_v61, 20.0 }
 0xb11   : > { %7625 = vxpose.xlu2.b32.cont [3/16] (narrow) %v7593_v57, 64  ;;  %v8855_v22 = vpop.eup %8854  ;;  %v7343_v57 = vadd.f32 1.0, %v8849_v59  ;;  %8862 = vpow2.f32 %v7290_v18  ;;  %v7381_v60 = vmul.f32 0.6931472, %v8853_v25  ;;  %v7539_v59 = vmul.f32 1.442695, %v7501_v27 }
 0xb12   : > { %v7455_v56 = vsub.f32 0.0, %v7417_v48  ;;  %v7360_v8 = vadd.f32 1.0, %v8855_v22  ;;  %8864 = vpow2.f32 %v7537_v7  ;;  %v13874_v18 = vld [vmem:[#allocation39_spill] sm:$0xff]  ;;  %v7153_v4 = vmul.f32 %v13169_v24, %v13495_v43  ;;  %v13875_v7 = vld [vmem:[#allocation24_spill] sm:$0xff] }
 0xb13   : > { %v7437_v47 = vsub.f32 0.0, %v7381_v60  ;;  %v7104_v39 = vmul.f32 %v7056_v36, %v13874_v18 }
 0xb14   : > { %v8857_v52 = vpop.eup %8856  ;;  %v7487_v14 = vsel %vm7231_vm2, %v7263_v26, %v7455_v56  ;;  %8866 = vlog2.f32 %v7360_v8  ;;  %v13514_v9 = vsub.f32 %v13172_v34, %v7153_v4 }
 0xb15   : > { %v7615_v40 = vmul.f32 %v8857_v52, %v13367_v45  ;;  %v8859_v17 = vpop.eup %8858  ;;  %v7520_v3 = vmul.f32 %v13177_v11, %v7487_v14  ;;  %8868 = vlog2.f32 %v7343_v57  ;;  %v13508_v48 = vadd.f32 %v7104_v39, %v13310_v10  ;;  %v7062_v39 = vpop.permute.xlu2 %7061 }
 0xb16   : > { %v8861_v15 = vpop.eup %8860  ;;  %v7595_v45 = vmul.f32 %v8859_v17, %v13295_v0  ;;  %8870 = vpow2.f32 %v7324_v2  ;;  %v7089_v0 = vmul.f32 %v13162_v28, %v13875_v7  ;;  %v7469_v25 = vsel %vm7213_vm3, %v7245_v32, %v7437_v47  ;;  %v13876_v47 = vld [vmem:[#allocation25_spill] sm:$0xff]  ;;  %v13877_v32 = vld [vmem:[#allocation40_spill] sm:$0xff] }
 0xb17   : > { %7663 = vxpose.xlu1.b32.cont [9/16] (narrow) %v7615_v40, 64  ;;  %v7577_v46 = vmul.f32 1.442695, %v7520_v3  ;;  %v8863_v58 = vpop.eup %8862  ;;  %v7383_v35 = vmul.f32 0.6931472, %v8861_v15  ;;  %v7169_v57 = vmul.f32 %v13169_v24, %v13508_v48  ;;  %v7264_v10 = vsub.f32 0.0, %v13456_v33  ;;  %v6834_v15 = vpop.trf.xlu1 }
 0xb18   : > { %v8865_v16 = vpop.eup %8864  ;;  %v7344_v23 = vadd.f32 1.0, %v8863_v58  ;;  %v13516_v28 = vadd.f32 %v7089_v0, %v6833_v5  ;;  %v7502_v8 = vmul.f32 %v13177_v11, %v7469_v25  ;;  %v7246_v3 = vsub.f32 0.0, %v13421_v41 }
 0xb19   : > { %7626 = vxpose.xlu2.b32.cont [4/16] (narrow) %v7594_v38, 64  ;;  %8872 = vpow2.f32 %v7577_v46  ;;  %v7596_v22 = vmul.f32 %v8865_v16, %v13321_v62  ;;  %v13522_v62 = vsub.f32 %v13172_v34, %v7169_v57  ;;  %v7438_v40 = vsub.f32 0.0, %v7383_v35 }
 0xb1a   : > { %v8867_v38 = vpop.eup %8866  ;;  %8874 = vpow2.f32 %v7292_v49  ;;  %v7294_v5 = vmul.f32 1.442695, %v13514_v9  ;;  %v7154_v33 = vmul.f32 %v13169_v24, %v13516_v28  ;;  %v7090_v36 = vmul.f32 %v13188_v51, %v13876_v47 }
 0xb1b   : > { %v7419_v37 = vmul.f32 0.6931472, %v8867_v38  ;;  %v8869_v42 = vpop.eup %8868  ;;  %8876 = vpow2.f32 %v7539_v59  ;;  %v7326_v46 = vmul.f32 1.442695, %v13522_v62  ;;  %v7470_v59 = vsel %vm7214_vm12, %v7246_v3, %v7438_v40 }
 0xb1c   : > { %v8871_v26 = vpop.eup %8870  ;;  %8878 = vlog2.f32 %v7344_v23  ;;  %v7385_v2 = vmul.f32 0.6931472, %v8869_v42  ;;  %v7105_v4 = vmul.f32 %v7062_v39, %v13877_v32  ;;  %v13536_v7 = vsub.f32 %v13172_v34, %v7154_v33  ;;  %v13879_v39 = vld [vmem:[#allocation41_spill] sm:$0xff] }
 0xb1d   : > { %v7456_v56 = vsub.f32 0.0, %v7419_v37  ;;  %v7361_v60 = vadd.f32 1.0, %v8871_v26  ;;  %v13538_v0 = vadd.f32 %v7090_v36, %v6834_v15  ;;  %v7503_v25 = vmul.f32 %v13177_v11, %v7470_v59 }
 0xb1e   : > { %v7439_v16 = vsub.f32 0.0, %v7385_v2  ;;  %v7247_v51 = vsub.f32 0.0, %v13435_v13  ;;  %v13543_v35 = vadd.f32 %v7105_v4, %v13338_v53  ;;  %v7265_v53 = vsub.f32 0.0, %v13490_v61 }
 0xb1f   : > { %v8873_v52 = vpop.eup %8872  ;;  %v7488_v17 = vsel %vm7232_vm0, %v7264_v10, %v7456_v56  ;;  %8880 = vlog2.f32 %v7361_v60  ;;  %v7296_v10 = vmul.f32 1.442695, %v13536_v7  ;;  %v7155_v56 = vmul.f32 %v13169_v24, %v13538_v0  ;;  %v6835_v13 = vpop.trf.xlu1 }
 0xb20   : > { %v7616_v14 = vmul.f32 %v8873_v52, %v13405_v55  ;;  %v8875_v27 = vpop.eup %8874  ;;  %v7521_v49 = vmul.f32 %v13177_v11, %v7488_v17  ;;  %v7541_v55 = vmul.f32 1.442695, %v7502_v8  ;;  %8882 = vpow2.f32 %v7326_v46  ;;  %v13878_v17 = vld [vmem:[#allocation26_spill] sm:$0xff] }
 0xb21   : > { %7627 = vxpose.xlu2.b32.cont [5/16] (narrow) %v7595_v45, 64  ;;  %v8877_v58 = vpop.eup %8876  ;;  %v7345_v18 = vadd.f32 1.0, %v8875_v27  ;;  %v7471_v42 = vsel %vm7215_vm13, %v7247_v51, %v7439_v16  ;;  %v7170_v57 = vmul.f32 %v13169_v24, %v13543_v35  ;;  %v7543_v8 = vmul.f32 1.442695, %v7503_v25 }
 0xb22   : > { %7664 = vxpose.xlu1.b32.cont [10/16] (narrow) %v7616_v14, 64  ;;  %v7579_v45 = vmul.f32 1.442695, %v7521_v49  ;;  %v8879_v38 = vpop.eup %8878  ;;  %v7597_v23 = vmul.f32 %v8877_v58, %v13340_v54  ;;  %v7091_v27 = vmul.f32 %v13165_v63, %v13878_v17  ;;  %v7504_v49 = vmul.f32 %v13177_v11, %v7471_v42 }
 0xb23   : > { %v13555_v40 = vsub.f32 %v13172_v34, %v7170_v57  ;;  %v13563_v61 = vsub.f32 %v13172_v34, %v7155_v56  ;;  %v7248_v47 = vsub.f32 0.0, %v13464_v50  ;;  %vm7234_vm7 = vcmp.gt.f32.partialorder %v13522_v62, 20.0 }
 0xb24   : > { %8884 = vpow2.f32 %v7579_v45  ;;  %v13565_v58 = vadd.f32 %v7091_v27, %v6835_v13  ;;  %v7545_v59 = vmul.f32 1.442695, %v7504_v49  ;;  %vm7218_vm15 = vcmp.gt.f32.partialorder %v13514_v9, 20.0 }
 0xb25   : > { %8886 = vpow2.f32 %v7294_v5  ;;  %v8881_v41 = vpop.eup %8880  ;;  %v7328_v63 = vmul.f32 1.442695, %v13555_v40  ;;  %v7069_v36 = vpop.permute.xlu2 %7068  ;;  %v7298_v4 = vmul.f32 1.442695, %v13563_v61  ;;  %vm7235_vm5 = vcmp.gt.f32.partialorder %v13555_v40, 20.0 }
 0xb26   : > { %8888 = vpow2.f32 %v7541_v55  ;;  %v7421_v37 = vmul.f32 0.6931472, %v8881_v41  ;;  %v8883_v26 = vpop.eup %8882  ;;  %v7106_v16 = vmul.f32 %v7069_v36, %v13879_v39  ;;  %vm7219_vm8 = vcmp.gt.f32.partialorder %v13536_v7, 20.0 }
 0xb27   : > { %8890 = vlog2.f32 %v7345_v18  ;;  %v7362_v60 = vadd.f32 1.0, %v8883_v26  ;;  %v7266_v26 = vsub.f32 0.0, %v13522_v62  ;;  %vm7220_vm10 = vcmp.gt.f32.partialorder %v13563_v61, 20.0 }
 0xb28   : > { %v7457_v52 = vsub.f32 0.0, %v7421_v37 }
 0xb29   : > { %7628 = vxpose.xlu2.b32.cont [6/16] (narrow) %v7596_v22, 64  ;;  %v7387_v22 = vmul.f32 0.6931472, %v8879_v38  ;;  %8892 = vlog2.f32 %v7362_v60  ;;  %v7156_v38 = vmul.f32 %v13169_v24, %v13565_v58 }
 0xb2a   : > { %v8885_v54 = vpop.eup %8884  ;;  %v7489_v2 = vsel %vm7233_vm1, %v7265_v53, %v7457_v52  ;;  %8894 = vpow2.f32 %v7296_v10 }
 0xb2b   : > { %v8887_v14 = vpop.eup %8886  ;;  %v7617_v3 = vmul.f32 %v8885_v54, %v13443_v6  ;;  %v7440_v5 = vsub.f32 0.0, %v7387_v22  ;;  %v7522_v33 = vmul.f32 %v13177_v11, %v7489_v2  ;;  %8896 = vpow2.f32 %v7543_v8 }
 0xb2c   : > { %v8889_v15 = vpop.eup %8888  ;;  %v7346_v6 = vadd.f32 1.0, %v8887_v14  ;;  %8898 = vpow2.f32 %v7328_v63  ;;  %v13582_v57 = vsub.f32 %v13172_v34, %v7156_v38  ;;  %v7249_v14 = vsub.f32 0.0, %v13486_v30  ;;  %v13880_v30 = vld [vmem:[#allocation42_spill] sm:$0xff] }
 0xb2d   : > { %v8891_v46 = vpop.eup %8890  ;;  %7665 = vxpose.xlu1.b32.cont [11/16] (narrow) %v7617_v3, 64  ;;  %v7581_v55 = vmul.f32 1.442695, %v7522_v33  ;;  %v7598_v45 = vmul.f32 %v8889_v15, %v13376_v12  ;;  %v7472_v32 = vsel %vm7216_vm4, %v7248_v47, %v7440_v5  ;;  %v13576_v12 = vadd.f32 %v7106_v16, %v13369_v21 }
 0xb2e   : > { %v7389_v18 = vmul.f32 0.6931472, %v8891_v46  ;;  %v7300_v27 = vmul.f32 1.442695, %v13582_v57  ;;  %vm7221_vm11 = vcmp.gt.f32.partialorder %v13582_v57, 20.0 }
 0xb2f   : > { %8900 = vpow2.f32 %v7581_v55  ;;  %v8893_v41 = vpop.eup %8892  ;;  %v7171_v42 = vmul.f32 %v13169_v24, %v13576_v12 }
 0xb30   : > { %8902 = vlog2.f32 %v7346_v6  ;;  %v8895_v50 = vpop.eup %8894  ;;  %v7423_v25 = vmul.f32 0.6931472, %v8893_v41  ;;  %v7441_v37 = vsub.f32 0.0, %v7389_v18 }
 0xb31   : > { %7629 = vxpose.xlu2.b32.cont [7/16] (narrow) %v7597_v23, 64  ;;  %v8897_v51 = vpop.eup %8896  ;;  %8904 = vpow2.f32 %v7545_v59  ;;  %v7505_v23 = vmul.f32 %v13177_v11, %v7472_v32  ;;  %v7347_v56 = vadd.f32 1.0, %v8895_v50  ;;  %v13587_v52 = vsub.f32 %v13172_v34, %v7171_v42 }
 0xb32   : > { %v8899_v22 = vpop.eup %8898  ;;  %8906 = vpow2.f32 %v7298_v4  ;;  %v7458_v10 = vsub.f32 0.0, %v7423_v25  ;;  %v7599_v54 = vmul.f32 %v8897_v51, %v13392_v1  ;;  %v7473_v1 = vsel %vm7217_vm6, %v7249_v14, %v7441_v37 }
 0xb33   : > { %v7363_v53 = vadd.f32 1.0, %v8899_v22  ;;  %v7330_v62 = vmul.f32 1.442695, %v13587_v52  ;;  %v7547_v2 = vmul.f32 1.442695, %v7505_v23  ;;  %v7506_v46 = vmul.f32 %v13177_v11, %v7473_v1 }
 0xb34   : > { %v7490_v13 = vsel %vm7234_vm7, %v7266_v26, %v7458_v10  ;;  %v7250_v32 = vsub.f32 0.0, %v13514_v9  ;;  %v7267_v4 = vsub.f32 0.0, %v13555_v40  ;;  %vm7236_vm9 = vcmp.gt.f32.partialorder %v13587_v52, 20.0 }
 0xb35   : > { %v8901_v21 = vpop.eup %8900  ;;  %v7523_v17 = vmul.f32 %v13177_v11, %v7490_v13  ;;  %8908 = vlog2.f32 %v7363_v53  ;;  %v7075_v5 = vpop.permute.xlu2 %7074  ;;  %v7549_v16 = vmul.f32 1.442695, %v7506_v46 }
 0xb36   : > { %v7618_v8 = vmul.f32 %v8901_v21, %v13476_v20  ;;  %v8903_v60 = vpop.eup %8902  ;;  %8910 = vlog2.f32 %v7347_v56  ;;  %v7107_v33 = vmul.f32 %v7075_v5, %v13880_v30  ;;  %v7252_v5 = vsub.f32 0.0, %v13563_v61 }
 0xb37   : > { %v8905_v3 = vpop.eup %8904  ;;  %v7583_v20 = vmul.f32 1.442695, %v7523_v17  ;;  %v7391_v49 = vmul.f32 0.6931472, %v8903_v60  ;;  %8912 = vpow2.f32 %v7330_v62  ;;  %v7268_v17 = vsub.f32 0.0, %v13587_v52 }
 0xb38   : > { %7666 = vxpose.xlu1.b32.cont [12/16] (narrow) %v7618_v8, 64  ;;  %v8907_v15 = vpop.eup %8906  ;;  %v13599_v55 = vadd.f32 %v7107_v33, %v13395_v31 }
 0xb39   : > { %7630 = vxpose.xlu2.b32.cont [8/16] (narrow) %v7598_v45, 64  ;;  %8914 = vpow2.f32 %v7583_v20  ;;  %v7348_v6 = vadd.f32 1.0, %v8907_v15  ;;  %v7600_v45 = vmul.f32 %v8905_v3, %v13409_v19  ;;  %v7442_v47 = vsub.f32 0.0, %v7391_v49 }
 0xb3a   : > { %8916 = vpow2.f32 %v7300_v27  ;;  %v7172_v18 = vmul.f32 %v13169_v24, %v13599_v55 }
 0xb3b   : > { %v8909_v63 = vpop.eup %8908  ;;  %8918 = vpow2.f32 %v7547_v2  ;;  %v7474_v25 = vsel %vm7218_vm15, %v7250_v32, %v7442_v47 }
 0xb3c   : > { %v7425_v36 = vmul.f32 0.6931472, %v8909_v63  ;;  %v8911_v59 = vpop.eup %8910  ;;  %8920 = vlog2.f32 %v7348_v6  ;;  %v13609_v41 = vsub.f32 %v13172_v34, %v7172_v18  ;;  %v7507_v40 = vmul.f32 %v13177_v11, %v7474_v25 }
 0xb3d   : > { %v8913_v39 = vpop.eup %8912  ;;  %v7393_v51 = vmul.f32 0.6931472, %v8911_v59 }
 0xb3e   : > { %v7459_v38 = vsub.f32 0.0, %v7425_v36  ;;  %v7364_v19 = vadd.f32 1.0, %v8913_v39  ;;  %v7332_v42 = vmul.f32 1.442695, %v13609_v41  ;;  %v7551_v53 = vmul.f32 1.442695, %v7507_v40 }
 0xb3f   : > { %v8915_v31 = vpop.eup %8914  ;;  %v7443_v10 = vsub.f32 0.0, %v7393_v51  ;;  %v7253_v36 = vsub.f32 0.0, %v13582_v57  ;;  %v7269_v59 = vsub.f32 0.0, %v13609_v41  ;;  %vm7237_vm14 = vcmp.gt.f32.partialorder %v13609_v41, 20.0 }
 0xb40   : > { %v8917_v50 = vpop.eup %8916  ;;  %v7619_v24 = vmul.f32 %v8915_v31, %v13508_v48  ;;  %v7491_v23 = vsel %vm7235_vm5, %v7267_v4, %v7459_v38  ;;  %8922 = vlog2.f32 %v7364_v19  ;;  %v7251_v48 = vsub.f32 0.0, %v13536_v7 }
 0xb41   : > { %7631 = vxpose.xlu2.b32.cont [9/16] (narrow) %v7599_v54, 64  ;;  %v8919_v37 = vpop.eup %8918  ;;  %v7524_v9 = vmul.f32 %v13177_v11, %v7491_v23  ;;  %8924 = vpow2.f32 %v7549_v16  ;;  %v7349_v22 = vadd.f32 1.0, %v8917_v50 }
 0xb42   : > { %7667 = vxpose.xlu1.b32.cont [13/16] (narrow) %v7619_v24, 64  ;;  %v7601_v34 = vmul.f32 %v8919_v37, %v13439_v29  ;;  %8926 = vpow2.f32 %v7332_v42  ;;  %v8921_v21 = vpop.eup %8920  ;;  %v7475_v54 = vsel %vm7219_vm8, %v7251_v48, %v7443_v10 }
 0xb43   : > { %v7585_v26 = vmul.f32 1.442695, %v7524_v9  ;;  %v7395_v8 = vmul.f32 0.6931472, %v8921_v21  ;;  %v7508_v62 = vmul.f32 %v13177_v11, %v7475_v54 }
 0xb45   : > { %8928 = vpow2.f32 %v7585_v26  ;;  %v7444_v1 = vsub.f32 0.0, %v7395_v8  ;;  %v7553_v30 = vmul.f32 1.442695, %v7508_v62 }
 0xb46   : > { %v8923_v56 = vpop.eup %8922  ;;  %8930 = vlog2.f32 %v7349_v22 }
 0xb47   : > { %v7427_v13 = vmul.f32 0.6931472, %v8923_v56  ;;  %v8925_v60 = vpop.eup %8924  ;;  %8932 = vpow2.f32 %v7551_v53  ;;  %v7476_v52 = vsel %vm7220_vm10, %v7252_v5, %v7444_v1 }
 0xb48   : > { %v8927_v14 = vpop.eup %8926  ;;  %v7602_v2 = vmul.f32 %v8925_v60, %v13467_v44 }
 0xb49   : > { %7632 = vxpose.xlu2.b32.cont [10/16] (narrow) %v7600_v45, 64  ;;  %v7460_v29 = vsub.f32 0.0, %v7427_v13  ;;  %v7365_v3 = vadd.f32 1.0, %v8927_v14 }
 0xb4b   : > { %v8929_v27 = vpop.eup %8928  ;;  %v7492_v20 = vsel %vm7236_vm9, %v7268_v17, %v7460_v29  ;;  %8934 = vlog2.f32 %v7365_v3 }
 0xb4c   : > { %v7620_v7 = vmul.f32 %v8929_v27, %v13543_v35  ;;  %v8931_v15 = vpop.eup %8930  ;;  %v7525_v49 = vmul.f32 %v13177_v11, %v7492_v20  ;;  %v7509_v35 = vmul.f32 %v13177_v11, %v7476_v52 }
 0xb4d   : > { %v7397_v46 = vmul.f32 0.6931472, %v8931_v15  ;;  %v8933_v63 = vpop.eup %8932 }
 0xb4e   : > { %7668 = vxpose.xlu1.b32.cont [14/16] (narrow) %v7620_v7, 64  ;;  %v7587_v33 = vmul.f32 1.442695, %v7525_v49  ;;  %v7603_v6 = vmul.f32 %v8933_v63, %v13495_v43  ;;  %v7555_v39 = vmul.f32 1.442695, %v7509_v35 }
 0xb4f   : > { %v7445_v45 = vsub.f32 0.0, %v7397_v46 }
 0xb50   : > { %8936 = vpow2.f32 %v7587_v33 }
 0xb51   : > { %7633 = vxpose.xlu2.b32.cont [11/16] (narrow) %v7601_v34, 64  ;;  %v8935_v44 = vpop.eup %8934  ;;  %8938 = vpow2.f32 %v7553_v30  ;;  %v7477_v16 = vsel %vm7221_vm11, %v7253_v36, %v7445_v45 }
 0xb52   : > { %v7429_v47 = vmul.f32 0.6931472, %v8935_v44  ;;  %8940 = vpow2.f32 %v7555_v39  ;;  %v7510_v31 = vmul.f32 %v13177_v11, %v7477_v16 }
 0xb54   : > { %v7461_v18 = vsub.f32 0.0, %v7429_v47  ;;  %v7557_v57 = vmul.f32 1.442695, %v7510_v31 }
 0xb56   : > { %v8937_v61 = vpop.eup %8936  ;;  %v7493_v4 = vsel %vm7237_vm14, %v7269_v59, %v7461_v18 }
 0xb57   : > { %v7621_v32 = vmul.f32 %v8937_v61, %v13576_v12  ;;  %v8939_v38 = vpop.eup %8938  ;;  %v7526_v43 = vmul.f32 %v13177_v11, %v7493_v4 }
 0xb58   : > { %v7604_v50 = vmul.f32 %v8939_v38, %v13516_v28  ;;  %v8941_v25 = vpop.eup %8940 }
 0xb59   : > { %7634 = vxpose.xlu2.b32.cont [12/16] (narrow) %v7602_v2, 64  ;;  %7669 = vxpose.xlu1.b32.cont [15/16] (narrow) %v7621_v32, 64  ;;  %v7589_v19 = vmul.f32 1.442695, %v7526_v43  ;;  %v7605_v12 = vmul.f32 %v8941_v25, %v13538_v0 }
 0xb5b   : > { %8942 = vpow2.f32 %v7589_v19 }
 0xb5c   : > { %8944 = vpow2.f32 %v7557_v57 }
 0xb61   : > { %7635 = vxpose.xlu2.b32.cont [13/16] (narrow) %v7603_v6, 64  ;;  %v8943_v41 = vpop.eup %8942 }
 0xb62   : > { %v7622_v51 = vmul.f32 %v8943_v41, %v13599_v55  ;;  %v8945_v24 = vpop.eup %8944 }
 0xb63   : > { %v7606_v23 = vmul.f32 %v8945_v24, %v13565_v58 }
 0xb64   : > { %7670 = vxpose.xlu1.b32.end [16/16] (narrow) %v7622_v51, 64 }
 0xb69   : > { %7636 = vxpose.xlu2.b32.cont [14/16] (narrow) %v7604_v50, 64 }
 0xb71   : > { %7637 = vxpose.xlu2.b32.cont [15/16] (narrow) %v7605_v12, 64 }
 0xb79   : > { %7638 = vxpose.xlu2.b32.end [16/16] (narrow) %v7606_v23, 64 }
 0xb90   : > { %v7671_v28 = vpop.trf.xlu1 }
 0xb91   : > { %7688 = vst [vmem:[%s13644_s28 + $0x8] sm:$0xff] %v7671_v28 }
 0xb98   : > { %v7672_v58 = vpop.trf.xlu1 }
 0xb99   : > { %7690 = vst [vmem:[%s13644_s28 + $0x18] sm:$0xff] %v7672_v58 }
 0xb9a   : > { %v7639_v11 = vpop.trf.xlu2 }
 0xb9b   : > { %7687 = vst [vmem:[%s13644_s28] sm:$0xff] %v7639_v11 }
 0xba0   : > { %v7673_v37 = vpop.trf.xlu1 }
 0xba1   : > { %7692 = vst [vmem:[%s13644_s28 + $0x28] sm:$0xff] %v7673_v37 }
 0xba2   : > { %v7640_v0 = vpop.trf.xlu2 }
 0xba3   : > { %7689 = vst [vmem:[%s13644_s28 + $0x10] sm:$0xff] %v7640_v0 }
 0xba8   : > { %v7674_v42 = vpop.trf.xlu1 }
 0xba9   : > { %7694 = vst [vmem:[%s13644_s28 + $0x38] sm:$0xff] %v7674_v42 }
 0xbaa   : > { %v7641_v55 = vpop.trf.xlu2 }
 0xbab   : > { %7691 = vst [vmem:[%s13644_s28 + $0x20] sm:$0xff] %v7641_v55 }
 0xbb0   : > { %v7675_v22 = vpop.trf.xlu1 }
 0xbb1   : > { %7696 = vst [vmem:[%s13644_s28 + $0x48] sm:$0xff] %v7675_v22 }
 0xbb2   : > { %v7642_v9 = vpop.trf.xlu2 }
 0xbb3   : > { %7693 = vst [vmem:[%s13644_s28 + $0x30] sm:$0xff] %v7642_v9 }
 0xbb8   : > { %v7676_v34 = vpop.trf.xlu1 }
 0xbb9   : > { %7698 = vst [vmem:[%s13644_s28 + $0x58] sm:$0xff] %v7676_v34 }
 0xbba   : > { %v7643_v40 = vpop.trf.xlu2 }
 0xbbb   : > { %7695 = vst [vmem:[%s13644_s28 + $0x40] sm:$0xff] %v7643_v40 }
 0xbc0   : > { %v7677_v21 = vpop.trf.xlu1 }
 0xbc1   : > { %7700 = vst [vmem:[%s13644_s28 + $0x68] sm:$0xff] %v7677_v21 }
 0xbc2   : > { %v7644_v26 = vpop.trf.xlu2 }
 0xbc3   : > { %7697 = vst [vmem:[%s13644_s28 + $0x50] sm:$0xff] %v7644_v26 }
 0xbc8   : > { %v7678_v56 = vpop.trf.xlu1 }
 0xbc9   : > { %7702 = vst [vmem:[%s13644_s28 + $0x78] sm:$0xff] %v7678_v56 }
 0xbca   : > { %v7645_v10 = vpop.trf.xlu2 }
 0xbcb   : > { %7699 = vst [vmem:[%s13644_s28 + $0x60] sm:$0xff] %v7645_v10 }
 0xbd2   : > { %v7646_v48 = vpop.trf.xlu2 }
 0xbd3   : > { %7701 = vst [vmem:[%s13644_s28 + $0x70] sm:$0xff] %v7646_v48 }
 0xbd4 PF: > { %s24_s21 = sadd.s32 1, %s9010_s21  }
 0xbd5   : > { %p21_p7 = scmp.ge.s32.totalorder %s24_s21, 4  }
 0xbd7   :  { %23 = sbr.rel (!%p21_p7) target bundleno = 5 (0x5), region = 111 }
 0xbdc   :  { %7724 = vsyncpa [#allocation6], 1 }
 0xbdd   :  { %7726 = vsyncpa [#allocation6 + $0x1], 1 }
 0xbde   :  { %7727 = vsyncpa [#allocation8], 1 }

</bundles_post_ra>
